<compile_context>
chip_gen: v6e
topology: v6e:2x2x1
jax: 0.10.0
libtpu: 0.0.40
codegen_flags: <defaults>
</compile_context>

<pallas_src>
import math

import jax
import jax.numpy as jnp
from jax import lax
from jax.experimental import pallas as pl
from jax.experimental.pallas import tpu as pltpu

OFF_SLOPE = 0.001

EMBED = 200       # bplstm input size (embedding dim)
HIDDEN = 128      # PLSTM hidden size
SEQ = 200         # hidden1 = Linear(127 * 200, 128) hard-codes seq = 200
BATCH = 2
VOCAB = 50


# --------------------------------------------------------------------------------------
# Pallas kernel 1: hoisted input projection  x_flat @ [W_fwd | W_bwd] + [b_fwd | b_bwd]
# --------------------------------------------------------------------------------------
def input_proj_kernel(x_ref, w_ref, b_ref, out_ref):
    out_ref[...] = (jnp.dot(x_ref[...], w_ref[...], preferred_element_type=jnp.float32)
                    + b_ref[...])


def input_proj(x_flat, w_both, b_both):
    M = x_flat.shape[0]
    N = w_both.shape[1]
    return pl.pallas_call(
        input_proj_kernel,
        out_shape=jax.ShapeDtypeStruct((M, N), jnp.float32),
    )(x_flat, w_both, b_both)


# --------------------------------------------------------------------------------------
# Pallas kernel 2: fused bidirectional Phased-LSTM scan, sublane-packed (4, .) layout
#   gin:  (S, 4, 4H)  rows [fwd b0, fwd b1, bwd b0, bwd b1]; bwd rows pre-reversed in
#                     time so scan index t holds x[S-1-t] @ W_bwd + b_bwd.
#   mask: (S, 4, H)   phased time gates, same row packing / time convention.
#   u:    (2H, 4H)    [U_fwd ; U_bwd] stacked along K.
#   out:  (S, 4, H)   row t = packed hidden state after scan step t
#                     (fwd state at time t, bwd state at backward-scan index t,
#                      matching the torch zip(forward, backward) concat).
# --------------------------------------------------------------------------------------
def bi_plstm_scan_kernel(gin_ref, mask_ref, u_ref, out_ref):
    S = gin_ref.shape[0]
    H = mask_ref.shape[2]
    H2 = 2 * H

    u = u_ref[...]                                     # (2H, 4H) loop-invariant (VMEM)

    # Block-diagonal selector: one (4,2H)@(2H,4H) dot gives rows 0:2 -> h_f @ U_f and
    # rows 2:4 -> h_b @ U_b.  Built once, hoisted out of the loop.
    row = lax.broadcasted_iota(jnp.int32, (4, H2), 0)
    col = lax.broadcasted_iota(jnp.int32, (4, H2), 1)
    bmask = jnp.where((row < 2) == (col < H), 1.0, 0.0).astype(jnp.float32)

    def one_step(t, h, c):
        lhs = jnp.concatenate([h, h], axis=1) * bmask                      # (4, 2H)
        gates = gin_ref[t] + jnp.dot(lhs, u,
                                     preferred_element_type=jnp.float32)   # (4, 4H)
        i_t = jax.nn.sigmoid(gates[:, 0 * H:1 * H])
        f_t = jax.nn.sigmoid(gates[:, 1 * H:2 * H])
        g_t = jnp.tanh(gates[:, 2 * H:3 * H])
        o_t = jax.nn.sigmoid(gates[:, 3 * H:4 * H])
        c_new = f_t * c + i_t * g_t
        h_new = o_t * jnp.tanh(c_new)
        m = mask_ref[t]                                                    # (4, H)
        one_m = 1.0 - m
        c_out = m * c_new + one_m * c
        h_out = m * h_new + one_m * h
        out_ref[t] = h_out                                                 # single store
        return h_out, c_out

    # Manual 2x unroll: gives the scheduler two dependent steps of visibility so the
    # loads / mask math / stores of one step overlap the matmul+EUP chain of the other.
    def step2(k, carry):
        h, c = carry
        h, c = one_step(2 * k, h, c)
        h, c = one_step(2 * k + 1, h, c)
        return (h, c)

    z = jnp.zeros((4, H), jnp.float32)
    lax.fori_loop(0, S // 2, step2, (z, z))


def bi_plstm_scan(gin_packed, mask_packed, u_stack):
    S = gin_packed.shape[0]
    H = mask_packed.shape[2]
    assert S % 2 == 0
    return pl.pallas_call(
        bi_plstm_scan_kernel,
        out_shape=jax.ShapeDtypeStruct((S, 4, H), jnp.float32),
        compiler_params=pltpu.CompilerParams(vmem_limit_bytes=32 * 1024 * 1024),
    )(gin_packed, mask_packed, u_stack)


# --------------------------------------------------------------------------------------
# Pallas kernel 3: MLP head, K-tiled over w1 (hidden1 -> relu -> hidden2 -> hidden3)
# --------------------------------------------------------------------------------------
def head_kernel(xf_ref, w1_ref, b1_ref, w2_ref, b2_ref, w3_ref, b3_ref, out_ref, acc_ref):
    k = pl.program_id(0)

    @pl.when(k == 0)
    def _():
        acc_ref[...] = jnp.zeros_like(acc_ref)

    acc_ref[...] += jnp.dot(xf_ref[0], w1_ref[0], preferred_element_type=jnp.float32)

    @pl.when(k == pl.num_programs(0) - 1)
    def _():
        h1 = jnp.maximum(acc_ref[...] + b1_ref[...], 0.0)                              # ReLU
        h2 = jnp.dot(h1, w2_ref[...], preferred_element_type=jnp.float32) + b2_ref[...]
        h3 = jnp.dot(h2, w3_ref[...], preferred_element_type=jnp.float32) + b3_ref[...]
        out_ref[...] = h3


def head_forward(pooled, w1, b1, w2, b2, w3, b3, *, num_k_blocks=5):
    B, S, L = pooled.shape
    K = S * L                          # 25400
    NK = num_k_blocks
    assert K % NK == 0
    TK = K // NK                       # 5080  (multiple of 8)
    N1 = w1.shape[1]

    xf3 = pooled.reshape(B, NK, TK).transpose(1, 0, 2)   # (NK, B, TK)
    w13 = w1.reshape(NK, TK, N1)                         # (NK, TK, N1)

    return pl.pallas_call(
        head_kernel,
        out_shape=jax.ShapeDtypeStruct((B, 1), jnp.float32),
        grid=(NK,),
        in_specs=[
            pl.BlockSpec((1, B, TK), lambda k: (k, 0, 0)),    # xf chunk
            pl.BlockSpec((1, TK, N1), lambda k: (k, 0, 0)),   # w1 chunk (~2.6 MB)
            pl.BlockSpec((1, N1), lambda k: (0, 0)),          # b1
            pl.BlockSpec(w2.shape, lambda k: (0, 0)),         # w2
            pl.BlockSpec(b2.shape, lambda k: (0, 0)),         # b2
            pl.BlockSpec(w3.shape, lambda k: (0, 0)),         # w3
            pl.BlockSpec(b3.shape, lambda k: (0, 0)),         # b3
        ],
        out_specs=pl.BlockSpec((B, 1), lambda k: (0, 0)),
        scratch_shapes=[pltpu.VMEM((B, N1), jnp.float32)],
        compiler_params=pltpu.CompilerParams(dimension_semantics=("arbitrary",)),
    )(xf3, w13, b1, w2, b2, w3, b3)


# --------------------------------------------------------------------------------------
# Phased time-gate mask precompute, packed layout (pure elementwise, off the serial path)
# --------------------------------------------------------------------------------------
def time_gate_mask_packed(ts_pk, shifts_pk, periods_pk, on_end_pk):
    """ts_pk: (S, 4) timestamps (rows [fwd b0, fwd b1, bwd b0(rev), bwd b1(rev)]);
    shifts/periods/on_end: (4, H) per-row parameters. Returns (S, 4, H)."""
    period = jnp.abs(periods_pk)[None]                 # (1, 4, H)
    shift = shifts_pk[None]                            # (1, 4, H)
    on_mid = jnp.abs(on_end_pk)[None] * 0.5 * period
    on_end_b = jnp.abs(on_end_pk)[None] * period
    phase = ts_pk[:, :, None] + shift                  # (S, 4, H)
    # torch.fmod with strictly positive operands == a - floor(a/b) * b
    in_cycle = phase - jnp.floor(phase / period) * period
    is_up = in_cycle <= on_mid
    is_down = jnp.logical_and(in_cycle > on_mid, in_cycle <= on_end_b)
    return jnp.where(is_up, in_cycle / on_mid,
                     jnp.where(is_down, (on_end_b - in_cycle) / on_mid,
                               OFF_SLOPE * (in_cycle / period)))


# --------------------------------------------------------------------------------------
# Parameter init (deterministic, mirrors the PyTorch __init__ shapes/distributions)
# --------------------------------------------------------------------------------------
def init_cell(key, input_sz, hidden_sz):
    stdv = 1.0 / math.sqrt(hidden_sz)
    ks = jax.random.split(key, 5)
    return dict(
        W=jax.random.uniform(ks[0], (input_sz, 4 * hidden_sz), jnp.float32, -stdv, stdv),
        U=jax.random.uniform(ks[1], (hidden_sz, 4 * hidden_sz), jnp.float32, -stdv, stdv),
        b=jax.random.uniform(ks[2], (1, 4 * hidden_sz), jnp.float32, -stdv, stdv),
        shifts=jax.random.uniform(ks[3], (1, hidden_sz), jnp.float32, 0.0, 100.0),
        periods=jnp.exp(2.0 * jax.random.uniform(ks[4], (1, hidden_sz), jnp.float32) + 1.0),
        on_end=jnp.full((1, hidden_sz), 0.05, jnp.float32),
    )


def init_params(key):
    ks = jax.random.split(key, 9)
    L = (2 * HIDDEN - 3) // 2 + 1           # MaxPool1d(3, stride=2) over 2H=256 -> 127
    d1 = L * SEQ                            # 127 * 200 = 25400
    k1 = 1.0 / math.sqrt(d1)
    k2 = 1.0 / math.sqrt(128)
    k3 = 1.0 / math.sqrt(32)
    return dict(
        embedding=jax.random.normal(ks[0], (VOCAB, EMBED), jnp.float32),
        cell_fwd=init_cell(ks[1], EMBED, HIDDEN),
        cell_bwd=init_cell(ks[2], EMBED, HIDDEN),
        w1=jax.random.uniform(ks[3], (d1, 128), jnp.float32, -k1, k1),
        b1=jax.random.uniform(ks[4], (1, 128), jnp.float32, -k1, k1),
        w2=jax.random.uniform(ks[5], (128, 32), jnp.float32, -k2, k2),
        b2=jax.random.uniform(ks[6], (1, 32), jnp.float32, -k2, k2),
        w3=jax.random.uniform(ks[7], (32, 1), jnp.float32, -k3, k3),
        b3=jax.random.uniform(ks[8], (1, 1), jnp.float32, -k3, k3),
    )


# --------------------------------------------------------------------------------------
# Full forward pass (glue in plain JAX, hot paths in the Pallas kernels above)
# --------------------------------------------------------------------------------------
def dlstm_forward(token_ids, params):
    B, S = token_ids.shape
    H = HIDDEN
    H4 = 4 * H

    # embedding lookup (gather) — glue
    emb = params["embedding"][token_ids].astype(jnp.float32)        # (B, S, E)
    ts_tm = jnp.transpose(token_ids.astype(jnp.float32), (1, 0))    # (S, B)

    x_tm = jnp.transpose(emb, (1, 0, 2))                            # (S, B, E)
    x_flat = x_tm.reshape(S * B, EMBED)                             # (S*B, E)

    cf, cb = params["cell_fwd"], params["cell_bwd"]
    w_both = jnp.concatenate([cf["W"], cb["W"]], axis=1)            # (E, 8H)
    b_both = jnp.concatenate([cf["b"], cb["b"]], axis=1)            # (1, 8H)

    # hoisted input projection: one big MXU matmul for both directions
    proj = input_proj(x_flat, w_both, b_both).reshape(S, B, 8 * H)  # (S, B, 8H)

    # pack to the sublane layout the scan wants: rows [fwd b0, fwd b1, bwd b0, bwd b1],
    # backward half pre-reversed in time (scan index t holds original time S-1-t)
    gin_pk = jnp.concatenate([proj[:, :, :H4], proj[::-1, :, H4:]], axis=1)   # (S, 4, 4H)

    # phased time gates precomputed off the serial path, same packed layout
    ts_pk = jnp.concatenate([ts_tm, ts_tm[::-1]], axis=1)                     # (S, 4)
    shifts_pk = jnp.concatenate([cf["shifts"], cf["shifts"],
                                 cb["shifts"], cb["shifts"]], axis=0)         # (4, H)
    periods_pk = jnp.concatenate([cf["periods"], cf["periods"],
                                  cb["periods"], cb["periods"]], axis=0)      # (4, H)
    on_end_pk = jnp.concatenate([cf["on_end"], cf["on_end"],
                                 cb["on_end"], cb["on_end"]], axis=0)         # (4, H)
    mask_pk = time_gate_mask_packed(ts_pk, shifts_pk, periods_pk, on_end_pk)  # (S, 4, H)

    # stacked recurrent weights for the single fused per-step dot
    u_stack = jnp.concatenate([cf["U"], cb["U"]], axis=0)                     # (2H, 4H)

    # single fused bidirectional scan kernel (packed sublane layout)
    hseq_pk = bi_plstm_scan(gin_pk, mask_pk, u_stack)                         # (S, 4, H)

    # unpack to the PyTorch (B, S, 2H) convention (scan-order fwd/bwd concat) — glue
    hidden_seq = jnp.concatenate([hseq_pk[:, 0:2, :], hseq_pk[:, 2:4, :]], axis=-1)
    hidden_seq = jnp.transpose(hidden_seq, (1, 0, 2))                         # (B, S, 2H)

    # TODO(synk): nn.Dropout reproduced as inference-mode identity (no RNG masking).
    # MaxPool1d(kernel=3, stride=2) over the channel axis (2H=256 -> 127) — tiny window
    # select done as strided JAX slices (glue), elementwise max.
    C2 = hidden_seq.shape[-1]
    L = (C2 - 3) // 2 + 1
    a0 = hidden_seq[:, :, 0:2 * (L - 1) + 1:2]
    a1 = hidden_seq[:, :, 1:2 * (L - 1) + 2:2]
    a2 = hidden_seq[:, :, 2:2 * (L - 1) + 3:2]
    pooled = jnp.maximum(jnp.maximum(a0, a1), a2)                   # (B, S, L)

    out = head_forward(pooled, params["w1"], params["b1"],
                       params["w2"], params["b2"],
                       params["w3"], params["b3"])                  # (B, 1)
    return out


if __name__ == "__main__":
    key = jax.random.PRNGKey(0)
    pkey, dkey = jax.random.split(key)
    params = init_params(pkey)

    # integer token ids, shape (B, S); also serve as the PLSTM timestamps
    tokens = jax.random.randint(dkey, (BATCH, SEQ), 0, VOCAB, dtype=jnp.int32)

    out = jax.jit(dlstm_forward)(tokens, params)
    out = jax.block_until_ready(out)
    assert out.shape == (BATCH, 1) and out.dtype == jnp.float32
    print("KERNEL_OK")
</pallas_src>

<mosaic_0001>
module attributes {stable_mosaic.version = 11 : i64} {
  func.func @input_proj_kernel(%arg0: memref<400x200xf32, #tpu.memory_space<vmem>>, %arg1: memref<200x1024xf32, #tpu.memory_space<vmem>>, %arg2: memref<1x1024xf32, #tpu.memory_space<vmem>>, %arg3: memref<400x1024xf32, #tpu.memory_space<vmem>>) attributes {dimension_semantics = [], scalar_prefetch = 0 : i64, scratch_operands = 0 : i64, tpu.core_type = #tpu.core_type<tc>} {
    %c0 = arith.constant 0 : index
    %c0_0 = arith.constant 0 : index
    %0 = vector.load %arg0[%c0, %c0_0] : memref<400x200xf32, #tpu.memory_space<vmem>>, vector<400x200xf32>
    %c0_1 = arith.constant 0 : index
    %c0_2 = arith.constant 0 : index
    %1 = vector.load %arg1[%c0_1, %c0_2] : memref<200x1024xf32, #tpu.memory_space<vmem>>, vector<200x1024xf32>
    %cst = arith.constant dense<0.000000e+00> : vector<400x1024xf32>
    %2 = tpu.matmul %0, %1, %cst {dimension_numbers = #tpu.dot_dimension_numbers<[1], [0], [0], [1], [0, 0, 1, 1], [], []>} : vector<400x200xf32>, vector<200x1024xf32>, vector<400x1024xf32> -> vector<400x1024xf32>
    %c0_3 = arith.constant 0 : index
    %c0_4 = arith.constant 0 : index
    %3 = vector.load %arg2[%c0_3, %c0_4] : memref<1x1024xf32, #tpu.memory_space<vmem>>, vector<1x1024xf32>
    %4 = vector.broadcast %3 : vector<1x1024xf32> to vector<400x1024xf32>
    %5 = arith.addf %2, %4 : vector<400x1024xf32>
    %c0_5 = arith.constant 0 : index
    %c0_6 = arith.constant 0 : index
    %6 = vector.load %arg3[%c0_5, %c0_6] : memref<400x1024xf32, #tpu.memory_space<vmem>>, vector<400x1024xf32>
    tpu.vector_store %arg3[%c0_5, %c0_6], %5 {strides = array<i32>} : memref<400x1024xf32, #tpu.memory_space<vmem>>, vector<400x1024xf32>,
    return
  }
}

module attributes {stable_mosaic.version = 11 : i64} {
  func.func @bi_plstm_scan_kernel(%arg0: memref<200x4x512xf32, #tpu.memory_space<vmem>>, %arg1: memref<200x4x128xf32, #tpu.memory_space<vmem>>, %arg2: memref<256x512xf32, #tpu.memory_space<vmem>>, %arg3: memref<200x4x128xf32, #tpu.memory_space<vmem>>) attributes {dimension_semantics = [], scalar_prefetch = 0 : i64, scratch_operands = 0 : i64, tpu.core_type = #tpu.core_type<tc>} {
    %c0 = arith.constant 0 : index
    %c0_0 = arith.constant 0 : index
    %0 = vector.load %arg2[%c0, %c0_0] : memref<256x512xf32, #tpu.memory_space<vmem>>, vector<256x512xf32>
    %1 = tpu.iota {dimensions = array<i32: 0>} : vector<4x256xi32>
    %2 = tpu.iota {dimensions = array<i32: 1>} : vector<4x256xi32>
    %c2_i32 = arith.constant 2 : i32
    %3 = vector.broadcast %c2_i32 : i32 to vector<4x256xi32>
    %4 = arith.cmpi slt, %1, %3 : vector<4x256xi32>
    %c128_i32 = arith.constant 128 : i32
    %5 = vector.broadcast %c128_i32 : i32 to vector<4x256xi32>
    %6 = arith.cmpi slt, %2, %5 : vector<4x256xi32>
    %7 = arith.xori %4, %6 : vector<4x256xi1>
    %cst = arith.constant dense<true> : vector<4x256xi1>
    %8 = arith.xori %7, %cst : vector<4x256xi1>
    %cst_1 = arith.constant 1.000000e+00 : f32
    %cst_2 = arith.constant 0.000000e+00 : f32
    %9 = vector.broadcast %cst_1 : f32 to vector<4x256xf32>
    %10 = vector.broadcast %cst_2 : f32 to vector<4x256xf32>
    %11 = arith.select %8, %9, %10 : vector<4x256xi1>, vector<4x256xf32>
    %cst_3 = arith.constant 0.000000e+00 : f32
    %12 = vector.broadcast %cst_3 : f32 to vector<4x128xf32>
    %c0_i32 = arith.constant 0 : i32
    %c100_i32 = arith.constant 100 : i32
    %13 = arith.addi %c0_i32, %c100_i32 : i32
    %c1_i32 = arith.constant 1 : i32
    %14:2 = scf.for %arg4 = %c0_i32 to %13 step %c1_i32 iter_args(%arg5 = %12, %arg6 = %12) -> (vector<4x128xf32>, vector<4x128xf32>)  : i32 {
      %c2_i32_5 = arith.constant 2 : i32
      %15 = arith.muli %c2_i32_5, %arg4 : i32
      %16 = tpu.concatenate %arg5, %arg5 in 1 : vector<4x128xf32>, vector<4x128xf32> -> vector<4x256xf32>
      %17 = arith.mulf %16, %11 : vector<4x256xf32>
      %18 = arith.index_cast %15 : i32 to index
      %c0_6 = arith.constant 0 : index
      %c0_7 = arith.constant 0 : index
      %19 = vector.load %arg0[%18, %c0_6, %c0_7] : memref<200x4x512xf32, #tpu.memory_space<vmem>>, vector<1x4x512xf32>
      %20 = vector.shape_cast %19 : vector<1x4x512xf32> to vector<4x512xf32>
      %cst_8 = arith.constant dense<0.000000e+00> : vector<4x512xf32>
      %21 = tpu.matmul %17, %0, %cst_8 {dimension_numbers = #tpu.dot_dimension_numbers<[1], [0], [0], [1], [0, 0, 1, 1], [], []>} : vector<4x256xf32>, vector<256x512xf32>, vector<4x512xf32> -> vector<4x512xf32>
      %22 = arith.addf %20, %21 : vector<4x512xf32>
      %23 = vector.extract_strided_slice %22 {offsets = [0, 0], sizes = [4, 128], strides = [1, 1]} : vector<4x512xf32> to vector<4x128xf32>
      %24 = arith.negf %23 : vector<4x128xf32>
      %25 = math.exp %24 : vector<4x128xf32>
      %cst_9 = arith.constant 1.000000e+00 : f32
      %26 = vector.broadcast %cst_9 : f32 to vector<4x128xf32>
      %27 = arith.addf %26, %25 : vector<4x128xf32>
      %28 = arith.divf %26, %27 : vector<4x128xf32>
      %29 = vector.extract_strided_slice %22 {offsets = [0, 128], sizes = [4, 128], strides = [1, 1]} : vector<4x512xf32> to vector<4x128xf32>
      %30 = arith.negf %29 : vector<4x128xf32>
      %31 = math.exp %30 : vector<4x128xf32>
      %cst_10 = arith.constant 1.000000e+00 : f32
      %32 = vector.broadcast %cst_10 : f32 to vector<4x128xf32>
      %33 = arith.addf %32, %31 : vector<4x128xf32>
      %34 = arith.divf %32, %33 : vector<4x128xf32>
      %35 = vector.extract_strided_slice %22 {offsets = [0, 256], sizes = [4, 128], strides = [1, 1]} : vector<4x512xf32> to vector<4x128xf32>
      %36 = math.tanh %35 : vector<4x128xf32>
      %37 = vector.extract_strided_slice %22 {offsets = [0, 384], sizes = [4, 128], strides = [1, 1]} : vector<4x512xf32> to vector<4x128xf32>
      %38 = arith.negf %37 : vector<4x128xf32>
      %39 = math.exp %38 : vector<4x128xf32>
      %cst_11 = arith.constant 1.000000e+00 : f32
      %40 = vector.broadcast %cst_11 : f32 to vector<4x128xf32>
      %41 = arith.addf %40, %39 : vector<4x128xf32>
      %42 = arith.divf %40, %41 : vector<4x128xf32>
      %43 = arith.mulf %34, %arg6 : vector<4x128xf32>
      %44 = arith.mulf %28, %36 : vector<4x128xf32>
      %45 = arith.addf %43, %44 : vector<4x128xf32>
      %46 = math.tanh %45 : vector<4x128xf32>
      %47 = arith.mulf %42, %46 : vector<4x128xf32>
      %48 = arith.index_cast %15 : i32 to index
      %c0_12 = arith.constant 0 : index
      %c0_13 = arith.constant 0 : index
      %49 = vector.load %arg1[%48, %c0_12, %c0_13] : memref<200x4x128xf32, #tpu.memory_space<vmem>>, vector<1x4x128xf32>
      %50 = vector.shape_cast %49 : vector<1x4x128xf32> to vector<4x128xf32>
      %cst_14 = arith.constant 1.000000e+00 : f32
      %51 = vector.broadcast %cst_14 : f32 to vector<4x128xf32>
      %52 = arith.subf %51, %50 : vector<4x128xf32>
      %53 = arith.mulf %50, %45 : vector<4x128xf32>
      %54 = arith.mulf %52, %arg6 : vector<4x128xf32>
      %55 = arith.addf %53, %54 : vector<4x128xf32>
      %56 = arith.mulf %50, %47 : vector<4x128xf32>
      %57 = arith.mulf %52, %arg5 : vector<4x128xf32>
      %58 = arith.addf %56, %57 : vector<4x128xf32>
      %59 = arith.index_cast %15 : i32 to index
      %c0_15 = arith.constant 0 : index
      %c0_16 = arith.constant 0 : index
      %60 = vector.load %arg3[%59, %c0_15, %c0_16] : memref<200x4x128xf32, #tpu.memory_space<vmem>>, vector<1x4x128xf32>
      %61 = vector.shape_cast %60 : vector<1x4x128xf32> to vector<4x128xf32>
      %62 = vector.shape_cast %58 : vector<4x128xf32> to vector<1x4x128xf32>
      tpu.vector_store %arg3[%59, %c0_15, %c0_16], %62 {strides = array<i32>} : memref<200x4x128xf32, #tpu.memory_space<vmem>>, vector<1x4x128xf32>,
      %c2_i32_17 = arith.constant 2 : i32
      %63 = arith.muli %c2_i32_17, %arg4 : i32
      %c1_i32_18 = arith.constant 1 : i32
      %64 = arith.addi %63, %c1_i32_18 : i32
      %65 = tpu.concatenate %58, %58 in 1 : vector<4x128xf32>, vector<4x128xf32> -> vector<4x256xf32>
      %66 = arith.mulf %65, %11 : vector<4x256xf32>
      %67 = arith.index_cast %64 : i32 to index
      %c0_19 = arith.constant 0 : index
      %c0_20 = arith.constant 0 : index
      %68 = vector.load %arg0[%67, %c0_19, %c0_20] : memref<200x4x512xf32, #tpu.memory_space<vmem>>, vector<1x4x512xf32>
      %69 = vector.shape_cast %68 : vector<1x4x512xf32> to vector<4x512xf32>
      %cst_21 = arith.constant dense<0.000000e+00> : vector<4x512xf32>
      %70 = tpu.matmul %66, %0, %cst_21 {dimension_numbers = #tpu.dot_dimension_numbers<[1], [0], [0], [1], [0, 0, 1, 1], [], []>} : vector<4x256xf32>, vector<256x512xf32>, vector<4x512xf32> -> vector<4x512xf32>
      %71 = arith.addf %69, %70 : vector<4x512xf32>
      %72 = vector.extract_strided_slice %71 {offsets = [0, 0], sizes = [4, 128], strides = [1, 1]} : vector<4x512xf32> to vector<4x128xf32>
      %73 = arith.negf %72 : vector<4x128xf32>
      %74 = math.exp %73 : vector<4x128xf32>
      %cst_22 = arith.constant 1.000000e+00 : f32
      %75 = vector.broadcast %cst_22 : f32 to vector<4x128xf32>
      %76 = arith.addf %75, %74 : vector<4x128xf32>
      %77 = arith.divf %75, %76 : vector<4x128xf32>
      %78 = vector.extract_strided_slice %71 {offsets = [0, 128], sizes = [4, 128], strides = [1, 1]} : vector<4x512xf32> to vector<4x128xf32>
      %79 = arith.negf %78 : vector<4x128xf32>
      %80 = math.exp %79 : vector<4x128xf32>
      %cst_23 = arith.constant 1.000000e+00 : f32
      %81 = vector.broadcast %cst_23 : f32 to vector<4x128xf32>
      %82 = arith.addf %81, %80 : vector<4x128xf32>
      %83 = arith.divf %81, %82 : vector<4x128xf32>
      %84 = vector.extract_strided_slice %71 {offsets = [0, 256], sizes = [4, 128], strides = [1, 1]} : vector<4x512xf32> to vector<4x128xf32>
      %85 = math.tanh %84 : vector<4x128xf32>
      %86 = vector.extract_strided_slice %71 {offsets = [0, 384], sizes = [4, 128], strides = [1, 1]} : vector<4x512xf32> to vector<4x128xf32>
      %87 = arith.negf %86 : vector<4x128xf32>
      %88 = math.exp %87 : vector<4x128xf32>
      %cst_24 = arith.constant 1.000000e+00 : f32
      %89 = vector.broadcast %cst_24 : f32 to vector<4x128xf32>
      %90 = arith.addf %89, %88 : vector<4x128xf32>
      %91 = arith.divf %89, %90 : vector<4x128xf32>
      %92 = arith.mulf %83, %55 : vector<4x128xf32>
      %93 = arith.mulf %77, %85 : vector<4x128xf32>
      %94 = arith.addf %92, %93 : vector<4x128xf32>
      %95 = math.tanh %94 : vector<4x128xf32>
      %96 = arith.mulf %91, %95 : vector<4x128xf32>
      %97 = arith.index_cast %64 : i32 to index
      %c0_25 = arith.constant 0 : index
      %c0_26 = arith.constant 0 : index
      %98 = vector.load %arg1[%97, %c0_25, %c0_26] : memref<200x4x128xf32, #tpu.memory_space<vmem>>, vector<1x4x128xf32>
      %99 = vector.shape_cast %98 : vector<1x4x128xf32> to vector<4x128xf32>
      %cst_27 = arith.constant 1.000000e+00 : f32
      %100 = vector.broadcast %cst_27 : f32 to vector<4x128xf32>
      %101 = arith.subf %100, %99 : vector<4x128xf32>
      %102 = arith.mulf %99, %94 : vector<4x128xf32>
      %103 = arith.mulf %101, %55 : vector<4x128xf32>
      %104 = arith.addf %102, %103 : vector<4x128xf32>
      %105 = arith.mulf %99, %96 : vector<4x128xf32>
      %106 = arith.mulf %101, %58 : vector<4x128xf32>
      %107 = arith.addf %105, %106 : vector<4x128xf32>
      %108 = arith.index_cast %64 : i32 to index
      %c0_28 = arith.constant 0 : index
      %c0_29 = arith.constant 0 : index
      %109 = vector.load %arg3[%108, %c0_28, %c0_29] : memref<200x4x128xf32, #tpu.memory_space<vmem>>, vector<1x4x128xf32>
      %110 = vector.shape_cast %109 : vector<1x4x128xf32> to vector<4x128xf32>
      %111 = vector.shape_cast %107 : vector<4x128xf32> to vector<1x4x128xf32>
      tpu.vector_store %arg3[%108, %c0_28, %c0_29], %111 {strides = array<i32>} : memref<200x4x128xf32, #tpu.memory_space<vmem>>, vector<1x4x128xf32>,
      scf.yield %107, %104 : vector<4x128xf32>, vector<4x128xf32>
    }
    %c100_i32_4 = arith.constant 100 : i32
    return
  }
}

module attributes {stable_mosaic.version = 11 : i64} {
  func.func @head_kernel(%arg0: i32, %arg1: memref<1x2x5080xf32, #tpu.memory_space<vmem>>, %arg2: memref<1x5080x128xf32, #tpu.memory_space<vmem>>, %arg3: memref<1x128xf32, #tpu.memory_space<vmem>>, %arg4: memref<128x32xf32, #tpu.memory_space<vmem>>, %arg5: memref<1x32xf32, #tpu.memory_space<vmem>>, %arg6: memref<32x1xf32, #tpu.memory_space<vmem>>, %arg7: memref<1x1xf32, #tpu.memory_space<vmem>>, %arg8: memref<2x1xf32, #tpu.memory_space<vmem>>, %arg9: memref<2x128xf32, #tpu.memory_space<vmem>>) attributes {dimension_semantics = [#tpu.dimension_semantics<arbitrary>], iteration_bounds = array<i64: 5>, scalar_prefetch = 0 : i64, scratch_operands = 1 : i64, tpu.core_type = #tpu.core_type<tc>, window_params = [{transform_indices = @transform_0, window_bounds = array<i64: 1, 2, 5080>}, {transform_indices = @transform_1, window_bounds = array<i64: 1, 5080, 128>}, {pipeline_mode = #tpu.pipeline_mode<synchronous>, transform_indices = @transform_2, window_bounds = array<i64: 1, 128>}, {pipeline_mode = #tpu.pipeline_mode<synchronous>, transform_indices = @transform_3, window_bounds = array<i64: 128, 32>}, {pipeline_mode = #tpu.pipeline_mode<synchronous>, transform_indices = @transform_4, window_bounds = array<i64: 1, 32>}, {pipeline_mode = #tpu.pipeline_mode<synchronous>, transform_indices = @transform_5, window_bounds = array<i64: 32, 1>}, {pipeline_mode = #tpu.pipeline_mode<synchronous>, transform_indices = @transform_6, window_bounds = array<i64: 1, 1>}, {pipeline_mode = #tpu.pipeline_mode<synchronous>, transform_indices = @transform_7, window_bounds = array<i64: 2, 1>}]} {
    %c0_i32 = arith.constant 0 : i32
    %0 = arith.cmpi eq, %arg0, %c0_i32 : i32
    %1 = arith.extui %0 : i1 to i32
    %c0_i32_0 = arith.constant 0 : i32
    %2 = arith.cmpi ne, %1, %c0_i32_0 : i32
    scf.if %2 {
      %cst_11 = arith.constant 0.000000e+00 : f32
      %14 = vector.broadcast %cst_11 : f32 to vector<2x128xf32>
      %c0_12 = arith.constant 0 : index
      %c0_13 = arith.constant 0 : index
      %15 = vector.load %arg9[%c0_12, %c0_13] : memref<2x128xf32, #tpu.memory_space<vmem>>, vector<2x128xf32>
      tpu.vector_store %arg9[%c0_12, %c0_13], %14 {strides = array<i32>} : memref<2x128xf32, #tpu.memory_space<vmem>>, vector<2x128xf32>,
    } else {
    }
    %c0 = arith.constant 0 : index
    %c0_1 = arith.constant 0 : index
    %3 = vector.load %arg9[%c0, %c0_1] : memref<2x128xf32, #tpu.memory_space<vmem>>, vector<2x128xf32>
    %c0_2 = arith.constant 0 : index
    %c0_3 = arith.constant 0 : index
    %c0_4 = arith.constant 0 : index
    %4 = vector.load %arg1[%c0_2, %c0_3, %c0_4] : memref<1x2x5080xf32, #tpu.memory_space<vmem>>, vector<1x2x5080xf32>
    %5 = vector.shape_cast %4 : vector<1x2x5080xf32> to vector<2x5080xf32>
    %c0_5 = arith.constant 0 : index
    %c0_6 = arith.constant 0 : index
    %c0_7 = arith.constant 0 : index
    %6 = vector.load %arg2[%c0_5, %c0_6, %c0_7] : memref<1x5080x128xf32, #tpu.memory_space<vmem>>, vector<1x5080x128xf32>
    %7 = vector.shape_cast %6 : vector<1x5080x128xf32> to vector<5080x128xf32>
    %cst = arith.constant dense<0.000000e+00> : vector<2x128xf32>
    %8 = tpu.matmul %5, %7, %cst {dimension_numbers = #tpu.dot_dimension_numbers<[1], [0], [0], [1], [0, 0, 1, 1], [], []>} : vector<2x5080xf32>, vector<5080x128xf32>, vector<2x128xf32> -> vector<2x128xf32>
    %9 = arith.addf %3, %8 : vector<2x128xf32>
    %c0_8 = arith.constant 0 : index
    %c0_9 = arith.constant 0 : index
    %10 = vector.load %arg9[%c0_8, %c0_9] : memref<2x128xf32, #tpu.memory_space<vmem>>, vector<2x128xf32>
    tpu.vector_store %arg9[%c0_8, %c0_9], %9 {strides = array<i32>} : memref<2x128xf32, #tpu.memory_space<vmem>>, vector<2x128xf32>,
    %c4_i32 = arith.constant 4 : i32
    %11 = arith.cmpi eq, %arg0, %c4_i32 : i32
    %12 = arith.extui %11 : i1 to i32
    %c0_i32_10 = arith.constant 0 : i32
    %13 = arith.cmpi ne, %12, %c0_i32_10 : i32
    scf.if %13 {
      %c0_11 = arith.constant 0 : index
      %c0_12 = arith.constant 0 : index
      %14 = vector.load %arg9[%c0_11, %c0_12] : memref<2x128xf32, #tpu.memory_space<vmem>>, vector<2x128xf32>
      %c0_13 = arith.constant 0 : index
      %c0_14 = arith.constant 0 : index
      %15 = vector.load %arg3[%c0_13, %c0_14] : memref<1x128xf32, #tpu.memory_space<vmem>>, vector<1x128xf32>
      %16 = vector.broadcast %15 : vector<1x128xf32> to vector<2x128xf32>
      %17 = arith.addf %14, %16 : vector<2x128xf32>
      %cst_15 = arith.constant 0.000000e+00 : f32
      %18 = vector.broadcast %cst_15 : f32 to vector<2x128xf32>
      %19 = arith.maximumf %17, %18 : vector<2x128xf32>
      %c0_16 = arith.constant 0 : index
      %c0_17 = arith.constant 0 : index
      %20 = vector.load %arg4[%c0_16, %c0_17] : memref<128x32xf32, #tpu.memory_space<vmem>>, vector<128x32xf32>
      %cst_18 = arith.constant dense<0.000000e+00> : vector<2x32xf32>
      %21 = tpu.matmul %19, %20, %cst_18 {dimension_numbers = #tpu.dot_dimension_numbers<[1], [0], [0], [1], [0, 0, 1, 1], [], []>} : vector<2x128xf32>, vector<128x32xf32>, vector<2x32xf32> -> vector<2x32xf32>
      %c0_19 = arith.constant 0 : index
      %c0_20 = arith.constant 0 : index
      %22 = vector.load %arg5[%c0_19, %c0_20] : memref<1x32xf32, #tpu.memory_space<vmem>>, vector<1x32xf32>
      %23 = vector.broadcast %22 : vector<1x32xf32> to vector<2x32xf32>
      %24 = arith.addf %21, %23 : vector<2x32xf32>
      %c0_21 = arith.constant 0 : index
      %c0_22 = arith.constant 0 : index
      %25 = vector.load %arg6[%c0_21, %c0_22] : memref<32x1xf32, #tpu.memory_space<vmem>>, vector<32x1xf32>
      %cst_23 = arith.constant dense<0.000000e+00> : vector<2x1xf32>
      %26 = tpu.matmul %24, %25, %cst_23 {dimension_numbers = #tpu.dot_dimension_numbers<[1], [0], [0], [1], [0, 0, 1, 1], [], []>} : vector<2x32xf32>, vector<32x1xf32>, vector<2x1xf32> -> vector<2x1xf32>
      %c0_24 = arith.constant 0 : index
      %c0_25 = arith.constant 0 : index
      %27 = vector.load %arg7[%c0_24, %c0_25] : memref<1x1xf32, #tpu.memory_space<vmem>>, vector<1x1xf32>
      %28 = vector.broadcast %27 : vector<1x1xf32> to vector<2x1xf32>
      %29 = arith.addf %26, %28 : vector<2x1xf32>
      %c0_26 = arith.constant 0 : index
      %c0_27 = arith.constant 0 : index
      %30 = vector.load %arg8[%c0_26, %c0_27] : memref<2x1xf32, #tpu.memory_space<vmem>>, vector<2x1xf32>
      tpu.vector_store %arg8[%c0_26, %c0_27], %29 {strides = array<i32>} : memref<2x1xf32, #tpu.memory_space<vmem>>, vector<2x1xf32>,
    } else {
    }
    return
  }
  func.func @transform_0(%arg0: i32) -> (i32, i32, i32) {
    %c0_i32 = arith.constant 0 : i32
    %c0_i32_0 = arith.constant 0 : i32
    %c0_i32_1 = arith.constant 0 : i32
    return %arg0, %c0_i32, %c0_i32_0 : i32, i32, i32
  }
  func.func @transform_1(%arg0: i32) -> (i32, i32, i32) {
    %c0_i32 = arith.constant 0 : i32
    %c0_i32_0 = arith.constant 0 : i32
    %c0_i32_1 = arith.constant 0 : i32
    return %arg0, %c0_i32, %c0_i32_0 : i32, i32, i32
  }
  func.func @transform_2(%arg0: i32) -> (i32, i32) {
    %c0_i32 = arith.constant 0 : i32
    %c0_i32_0 = arith.constant 0 : i32
    %c0_i32_1 = arith.constant 0 : i32
    return %c0_i32, %c0_i32_0 : i32, i32
  }
  func.func @transform_3(%arg0: i32) -> (i32, i32) {
    %c0_i32 = arith.constant 0 : i32
    %c0_i32_0 = arith.constant 0 : i32
    %c0_i32_1 = arith.constant 0 : i32
    return %c0_i32, %c0_i32_0 : i32, i32
  }
  func.func @transform_4(%arg0: i32) -> (i32, i32) {
    %c0_i32 = arith.constant 0 : i32
    %c0_i32_0 = arith.constant 0 : i32
    %c0_i32_1 = arith.constant 0 : i32
    return %c0_i32, %c0_i32_0 : i32, i32
  }
  func.func @transform_5(%arg0: i32) -> (i32, i32) {
    %c0_i32 = arith.constant 0 : i32
    %c0_i32_0 = arith.constant 0 : i32
    %c0_i32_1 = arith.constant 0 : i32
    return %c0_i32, %c0_i32_0 : i32, i32
  }
  func.func @transform_6(%arg0: i32) -> (i32, i32) {
    %c0_i32 = arith.constant 0 : i32
    %c0_i32_0 = arith.constant 0 : i32
    %c0_i32_1 = arith.constant 0 : i32
    return %c0_i32, %c0_i32_0 : i32, i32
  }
  func.func @transform_7(%arg0: i32) -> (i32, i32) {
    %c0_i32 = arith.constant 0 : i32
    %c0_i32_0 = arith.constant 0 : i32
    %c0_i32_1 = arith.constant 0 : i32
    return %c0_i32, %c0_i32_0 : i32, i32
  }
}

</mosaic_0001>

<bundles_post_ra>
// kernel: dlstm_forward.3
= control target key start
LH: loop header
LB: loop body
LE: loop exit
PB: predicated region body
PF: predicated region fallthrough
CT: control target
= control target key end

     0   :  { %vm356_vm0 = vcmask 588800   ;;  %s5724_s1 = inlined_call_operand.vmem [shape: f32[200,1024], index: 1, kind: input, shape index: {}]   ;;  %s5725_s0 = inlined_call_operand.vmem [shape: f32[400,200], index: 0, kind: input, shape index: {}]   ;;  %s5726_s2 = inlined_call_operand.vmem [shape: f32[1,1024], index: 2, kind: input, shape index: {}]   ;;  %s5727_s3 = inlined_call_operand.vmem [shape: f32[400,1024], index: 3, kind: output, shape index: {}]  }
   0x1   :  { %v235_v0 = vld [vmem:[%s5724_s1 + $0x3c8] sm:$0xff]  ;;  %v237_v1 = vld [vmem:[%s5724_s1 + $0x3d8] sm:$0xff]  ;;  %v234_v2 = vld [vmem:[%s5724_s1 + $0x3c0] sm:$0xff] }
   0x2   :  { %507 = vmatprep.subr.mxu0 %v235_v0  ;;  %872 = vmatprep.subr.mxu1 %v237_v1  ;;  %v236_v3 = vld [vmem:[%s5724_s1 + $0x3d0] sm:$0xff]  ;;  %v227_v4 = vld [vmem:[%s5724_s1 + $0x388] sm:$0xff]  ;;  %v229_v5 = vld [vmem:[%s5724_s1 + $0x398] sm:$0xff] }
   0x3   :  { %508 = vmatpush1.msra.mxu0 %v234_v2  ;;  %873 = vmatpush1.msra.mxu1 %v236_v3  ;;  %v226_v6 = vld [vmem:[%s5724_s1 + $0x380] sm:$0xff]  ;;  %v228_v7 = vld [vmem:[%s5724_s1 + $0x390] sm:$0xff]  ;;  %v219_v8 = vld [vmem:[%s5724_s1 + $0x348] sm:$0xff] }
   0x4   :  { %509 = vmatprep.subr.mxu0 %v227_v4  ;;  %874 = vmatprep.subr.mxu1 %v229_v5  ;;  %v221_v9 = vld [vmem:[%s5724_s1 + $0x358] sm:$0xff]  ;;  %v218_v10 = vld [vmem:[%s5724_s1 + $0x340] sm:$0xff]  ;;  %v220_v11 = vld [vmem:[%s5724_s1 + $0x350] sm:$0xff] }
   0x5   :  { %510 = vmatpush1.msra.mxu0 %v226_v6  ;;  %875 = vmatpush1.msra.mxu1 %v228_v7  ;;  %v211_v12 = vld [vmem:[%s5724_s1 + $0x308] sm:$0xff]  ;;  %v213_v13 = vld [vmem:[%s5724_s1 + $0x318] sm:$0xff]  ;;  %v210_v14 = vld [vmem:[%s5724_s1 + $0x300] sm:$0xff] }
   0x6   :  { %511 = vmatprep.subr.mxu0 %v219_v8  ;;  %876 = vmatprep.subr.mxu1 %v221_v9  ;;  %v212_v15 = vld [vmem:[%s5724_s1 + $0x310] sm:$0xff]  ;;  %v203_v16 = vld [vmem:[%s5724_s1 + $0x2c8] sm:$0xff]  ;;  %v205_v17 = vld [vmem:[%s5724_s1 + $0x2d8] sm:$0xff] }
   0x7   :  { %512 = vmatpush1.msra.mxu0 %v218_v10  ;;  %877 = vmatpush1.msra.mxu1 %v220_v11  ;;  %v202_v18 = vld [vmem:[%s5724_s1 + $0x2c0] sm:$0xff]  ;;  %v204_v19 = vld [vmem:[%s5724_s1 + $0x2d0] sm:$0xff]  ;;  %v195_v20 = vld [vmem:[%s5724_s1 + $0x288] sm:$0xff] }
   0x8   :  { %513 = vmatprep.subr.mxu0 %v211_v12  ;;  %878 = vmatprep.subr.mxu1 %v213_v13  ;;  %v197_v21 = vld [vmem:[%s5724_s1 + $0x298] sm:$0xff]  ;;  %v194_v22 = vld [vmem:[%s5724_s1 + $0x280] sm:$0xff]  ;;  %v196_v23 = vld [vmem:[%s5724_s1 + $0x290] sm:$0xff] }
   0x9   :  { %514 = vmatpush1.msra.mxu0 %v210_v14  ;;  %879 = vmatpush1.msra.mxu1 %v212_v15  ;;  %v187_v24 = vld [vmem:[%s5724_s1 + $0x248] sm:$0xff]  ;;  %v189_v25 = vld [vmem:[%s5724_s1 + $0x258] sm:$0xff]  ;;  %v186_v26 = vld [vmem:[%s5724_s1 + $0x240] sm:$0xff] }
   0xa   :  { %515 = vmatprep.subr.mxu0 %v203_v16  ;;  %880 = vmatprep.subr.mxu1 %v205_v17  ;;  %v188_v27 = vld [vmem:[%s5724_s1 + $0x250] sm:$0xff]  ;;  %v179_v28 = vld [vmem:[%s5724_s1 + $0x208] sm:$0xff]  ;;  %v181_v29 = vld [vmem:[%s5724_s1 + $0x218] sm:$0xff] }
   0xb   :  { %516 = vmatpush1.msra.mxu0 %v202_v18  ;;  %881 = vmatpush1.msra.mxu1 %v204_v19  ;;  %v178_v30 = vld [vmem:[%s5724_s1 + $0x200] sm:$0xff]  ;;  %v180_v31 = vld [vmem:[%s5724_s1 + $0x210] sm:$0xff]  ;;  %v171_v32 = vld [vmem:[%s5724_s1 + $0x1c8] sm:$0xff] }
   0xc   :  { %517 = vmatprep.subr.mxu0 %v195_v20  ;;  %882 = vmatprep.subr.mxu1 %v197_v21  ;;  %v173_v33 = vld [vmem:[%s5724_s1 + $0x1d8] sm:$0xff]  ;;  %v170_v34 = vld [vmem:[%s5724_s1 + $0x1c0] sm:$0xff]  ;;  %v172_v35 = vld [vmem:[%s5724_s1 + $0x1d0] sm:$0xff] }
   0xd   :  { %518 = vmatpush1.msra.mxu0 %v194_v22  ;;  %883 = vmatpush1.msra.mxu1 %v196_v23  ;;  %v163_v36 = vld [vmem:[%s5724_s1 + $0x188] sm:$0xff]  ;;  %v165_v37 = vld [vmem:[%s5724_s1 + $0x198] sm:$0xff]  ;;  %v162_v38 = vld [vmem:[%s5724_s1 + $0x180] sm:$0xff] }
   0xe   :  { %519 = vmatprep.subr.mxu0 %v187_v24  ;;  %884 = vmatprep.subr.mxu1 %v189_v25  ;;  %v164_v39 = vld [vmem:[%s5724_s1 + $0x190] sm:$0xff]  ;;  %v155_v40 = vld [vmem:[%s5724_s1 + $0x148] sm:$0xff]  ;;  %v157_v41 = vld [vmem:[%s5724_s1 + $0x158] sm:$0xff] }
   0xf   :  { %520 = vmatpush1.msra.mxu0 %v186_v26  ;;  %885 = vmatpush1.msra.mxu1 %v188_v27  ;;  %v154_v42 = vld [vmem:[%s5724_s1 + $0x140] sm:$0xff]  ;;  %v156_v43 = vld [vmem:[%s5724_s1 + $0x150] sm:$0xff]  ;;  %v147_v44 = vld [vmem:[%s5724_s1 + $0x108] sm:$0xff] }
  0x10   :  { %521 = vmatprep.subr.mxu0 %v179_v28  ;;  %886 = vmatprep.subr.mxu1 %v181_v29  ;;  %v149_v45 = vld [vmem:[%s5724_s1 + $0x118] sm:$0xff]  ;;  %v146_v46 = vld [vmem:[%s5724_s1 + $0x100] sm:$0xff]  ;;  %v148_v47 = vld [vmem:[%s5724_s1 + $0x110] sm:$0xff] }
  0x11   :  { %522 = vmatpush1.msra.mxu0 %v178_v30  ;;  %887 = vmatpush1.msra.mxu1 %v180_v31  ;;  %v139_v48 = vld [vmem:[%s5724_s1 + $0xc8] sm:$0xff]  ;;  %v141_v49 = vld [vmem:[%s5724_s1 + $0xd8] sm:$0xff]  ;;  %v138_v50 = vld [vmem:[%s5724_s1 + $0xc0] sm:$0xff] }
  0x12   :  { %523 = vmatprep.subr.mxu0 %v171_v32  ;;  %888 = vmatprep.subr.mxu1 %v173_v33  ;;  %v140_v51 = vld [vmem:[%s5724_s1 + $0xd0] sm:$0xff]  ;;  %v131_v52 = vld [vmem:[%s5724_s1 + $0x88] sm:$0xff]  ;;  %v133_v53 = vld [vmem:[%s5724_s1 + $0x98] sm:$0xff] }
  0x13   :  { %524 = vmatpush1.msra.mxu0 %v170_v34  ;;  %889 = vmatpush1.msra.mxu1 %v172_v35  ;;  %v130_v54 = vld [vmem:[%s5724_s1 + $0x80] sm:$0xff]  ;;  %v132_v55 = vld [vmem:[%s5724_s1 + $0x90] sm:$0xff]  ;;  %v123_v56 = vld [vmem:[%s5724_s1 + $0x48] sm:$0xff] }
  0x14   :  { %525 = vmatprep.subr.mxu0 %v163_v36  ;;  %890 = vmatprep.subr.mxu1 %v165_v37  ;;  %v125_v57 = vld [vmem:[%s5724_s1 + $0x58] sm:$0xff]  ;;  %v122_v58 = vld [vmem:[%s5724_s1 + $0x40] sm:$0xff]  ;;  %v124_v59 = vld [vmem:[%s5724_s1 + $0x50] sm:$0xff] }
  0x15   :  { %526 = vmatpush1.msra.mxu0 %v162_v38  ;;  %891 = vmatpush1.msra.mxu1 %v164_v39  ;;  %v115_v60 = vld [vmem:[%s5724_s1 + $0x8] sm:$0xff]  ;;  %v117_v61 = vld [vmem:[%s5724_s1 + $0x18] sm:$0xff]  ;;  %v114_v62 = vld [vmem:[%s5724_s1] sm:$0xff] }
  0x16   :  { %527 = vmatprep.subr.mxu0 %v155_v40  ;;  %892 = vmatprep.subr.mxu1 %v157_v41  ;;  %v116_v63 = vld [vmem:[%s5724_s1 + $0x10] sm:$0xff]  ;;  %v307_v0 = vld [vmem:[%s5724_s1 + $0x608] sm:$0xff]  ;;  %v309_v1 = vld [vmem:[%s5724_s1 + $0x618] sm:$0xff] }
  0x17   :  { %528 = vmatpush1.msra.mxu0 %v154_v42  ;;  %893 = vmatpush1.msra.mxu1 %v156_v43  ;;  %v306_v2 = vld [vmem:[%s5724_s1 + $0x600] sm:$0xff]  ;;  %v308_v3 = vld [vmem:[%s5724_s1 + $0x610] sm:$0xff]  ;;  %v299_v4 = vld [vmem:[%s5724_s1 + $0x5c8] sm:$0xff] }
  0x18   :  { %529 = vmatprep.subr.mxu0 %v147_v44  ;;  %894 = vmatprep.subr.mxu1 %v149_v45  ;;  %v301_v5 = vld [vmem:[%s5724_s1 + $0x5d8] sm:$0xff]  ;;  %v298_v6 = vld [vmem:[%s5724_s1 + $0x5c0] sm:$0xff]  ;;  %v300_v7 = vld [vmem:[%s5724_s1 + $0x5d0] sm:$0xff] }
  0x19   :  { %530 = vmatpush1.msra.mxu0 %v146_v46  ;;  %895 = vmatpush1.msra.mxu1 %v148_v47  ;;  %v291_v8 = vld [vmem:[%s5724_s1 + $0x588] sm:$0xff]  ;;  %v293_v9 = vld [vmem:[%s5724_s1 + $0x598] sm:$0xff]  ;;  %v290_v10 = vld [vmem:[%s5724_s1 + $0x580] sm:$0xff] }
  0x1a   :  { %531 = vmatprep.subr.mxu0 %v139_v48  ;;  %896 = vmatprep.subr.mxu1 %v141_v49  ;;  %v292_v11 = vld [vmem:[%s5724_s1 + $0x590] sm:$0xff]  ;;  %v283_v12 = vld [vmem:[%s5724_s1 + $0x548] sm:$0xff]  ;;  %v285_v13 = vld [vmem:[%s5724_s1 + $0x558] sm:$0xff] }
  0x1b   :  { %532 = vmatpush1.msra.mxu0 %v138_v50  ;;  %897 = vmatpush1.msra.mxu1 %v140_v51  ;;  %v282_v14 = vld [vmem:[%s5724_s1 + $0x540] sm:$0xff]  ;;  %v284_v15 = vld [vmem:[%s5724_s1 + $0x550] sm:$0xff]  ;;  %v275_v16 = vld [vmem:[%s5724_s1 + $0x508] sm:$0xff] }
  0x1c   :  { %533 = vmatprep.subr.mxu0 %v131_v52  ;;  %898 = vmatprep.subr.mxu1 %v133_v53  ;;  %v277_v17 = vld [vmem:[%s5724_s1 + $0x518] sm:$0xff]  ;;  %v274_v18 = vld [vmem:[%s5724_s1 + $0x500] sm:$0xff]  ;;  %v276_v19 = vld [vmem:[%s5724_s1 + $0x510] sm:$0xff] }
  0x1d   :  { %534 = vmatpush1.msra.mxu0 %v130_v54  ;;  %899 = vmatpush1.msra.mxu1 %v132_v55  ;;  %v267_v20 = vld [vmem:[%s5724_s1 + $0x4c8] sm:$0xff]  ;;  %v269_v21 = vld [vmem:[%s5724_s1 + $0x4d8] sm:$0xff]  ;;  %v266_v22 = vld [vmem:[%s5724_s1 + $0x4c0] sm:$0xff] }
  0x1e   :  { %535 = vmatprep.subr.mxu0 %v123_v56  ;;  %900 = vmatprep.subr.mxu1 %v125_v57  ;;  %v268_v23 = vld [vmem:[%s5724_s1 + $0x4d0] sm:$0xff]  ;;  %v259_v24 = vld [vmem:[%s5724_s1 + $0x488] sm:$0xff]  ;;  %v261_v25 = vld [vmem:[%s5724_s1 + $0x498] sm:$0xff] }
  0x1f   :  { %536 = vmatpush1.msra.mxu0 %v122_v58  ;;  %901 = vmatpush1.msra.mxu1 %v124_v59  ;;  %v258_v26 = vld [vmem:[%s5724_s1 + $0x480] sm:$0xff]  ;;  %v260_v27 = vld [vmem:[%s5724_s1 + $0x490] sm:$0xff]  ;;  %v251_v28 = vld [vmem:[%s5724_s1 + $0x448] sm:$0xff] }
  0x20   :  { %537 = vmatprep.subr.mxu0 %v115_v60  ;;  %902 = vmatprep.subr.mxu1 %v117_v61  ;;  %v253_v29 = vld [vmem:[%s5724_s1 + $0x458] sm:$0xff]  ;;  %v250_v30 = vld [vmem:[%s5724_s1 + $0x440] sm:$0xff]  ;;  %v252_v31 = vld [vmem:[%s5724_s1 + $0x450] sm:$0xff] }
  0x21   :  { %538 = vmatpush1.msra.mxu0 %v114_v62  ;;  %903 = vmatpush1.msra.mxu1 %v116_v63  ;;  %v243_v32 = vld [vmem:[%s5724_s1 + $0x408] sm:$0xff]  ;;  %v245_v33 = vld [vmem:[%s5724_s1 + $0x418] sm:$0xff]  ;;  %v242_v34 = vld [vmem:[%s5724_s1 + $0x400] sm:$0xff] }
  0x22   :  { %553 = vmatprep.subr.mxu0 %v307_v0  ;;  %918 = vmatprep.subr.mxu1 %v309_v1  ;;  %v15_v35 = vld [vmem:[%s5725_s0 + $0x8] sm:$0xff]  ;;  %v244_v36 = vld [vmem:[%s5724_s1 + $0x410] sm:$0xff]  ;;  %v14_v37 = vld [vmem:[%s5725_s0] sm:$0xff] }
  0x23   :  { %554 = vmatpush2.msra.mxu0 %v306_v2  ;;  %919 = vmatpush2.msra.mxu1 %v308_v3  ;;  %v239_v38 = vld [vmem:[%s5724_s1 + $0x3e8] sm:$0xff]  ;;  %v241_v39 = vld [vmem:[%s5724_s1 + $0x3f8] sm:$0xff]  ;;  %v238_v40 = vld [vmem:[%s5724_s1 + $0x3e0] sm:$0xff] }
  0x24   :  { %555 = vmatprep.subr.mxu0 %v299_v4  ;;  %920 = vmatprep.subr.mxu1 %v301_v5  ;;  %v240_v41 = vld [vmem:[%s5724_s1 + $0x3f0] sm:$0xff]  ;;  %v17_v42 = vld [vmem:[%s5725_s0 + $0x18] sm:$0xff]  ;;  %v19_v44 = vld [vmem:[%s5725_s0 + $0x28] sm:$0xff] }
  0x25   :  { %556 = vmatpush2.msra.mxu0 %v298_v6  ;;  %921 = vmatpush2.msra.mxu1 %v300_v7  ;;  %v16_v43 = vld [vmem:[%s5725_s0 + $0x10] sm:$0xff]  ;;  %v231_v45 = vld [vmem:[%s5724_s1 + $0x3a8] sm:$0xff]  ;;  %v233_v46 = vld [vmem:[%s5724_s1 + $0x3b8] sm:$0xff] }
  0x26   :  { %557 = vmatprep.subr.mxu0 %v291_v8  ;;  %922 = vmatprep.subr.mxu1 %v293_v9  ;;  %v230_v47 = vld [vmem:[%s5724_s1 + $0x3a0] sm:$0xff]  ;;  %v232_v48 = vld [vmem:[%s5724_s1 + $0x3b0] sm:$0xff]  ;;  %v21_v50 = vld [vmem:[%s5725_s0 + $0x38] sm:$0xff] }
  0x27   :  { %558 = vmatpush2.msra.mxu0 %v290_v10  ;;  %923 = vmatpush2.msra.mxu1 %v292_v11  ;;  %v18_v49 = vld [vmem:[%s5725_s0 + $0x20] sm:$0xff]  ;;  %v223_v51 = vld [vmem:[%s5724_s1 + $0x368] sm:$0xff]  ;;  %v225_v52 = vld [vmem:[%s5724_s1 + $0x378] sm:$0xff] }
  0x28   :  { %559 = vmatprep.subr.mxu0 %v283_v12  ;;  %924 = vmatprep.subr.mxu1 %v285_v13  ;;  %v222_v53 = vld [vmem:[%s5724_s1 + $0x360] sm:$0xff]  ;;  %v224_v54 = vld [vmem:[%s5724_s1 + $0x370] sm:$0xff]  ;;  %v23_v56 = vld [vmem:[%s5725_s0 + $0x48] sm:$0xff] }
  0x29   :  { %560 = vmatpush2.msra.mxu0 %v282_v14  ;;  %925 = vmatpush2.msra.mxu1 %v284_v15  ;;  %v20_v55 = vld [vmem:[%s5725_s0 + $0x30] sm:$0xff]  ;;  %v215_v57 = vld [vmem:[%s5724_s1 + $0x328] sm:$0xff]  ;;  %v217_v58 = vld [vmem:[%s5724_s1 + $0x338] sm:$0xff] }
  0x2a   :  { %561 = vmatprep.subr.mxu0 %v275_v16  ;;  %926 = vmatprep.subr.mxu1 %v277_v17  ;;  %v214_v59 = vld [vmem:[%s5724_s1 + $0x320] sm:$0xff]  ;;  %v216_v60 = vld [vmem:[%s5724_s1 + $0x330] sm:$0xff]  ;;  %v25_v62 = vld [vmem:[%s5725_s0 + $0x58] sm:$0xff] }
  0x2b   :  { %562 = vmatpush2.msra.mxu0 %v274_v18  ;;  %927 = vmatpush2.msra.mxu1 %v276_v19  ;;  %v22_v61 = vld [vmem:[%s5725_s0 + $0x40] sm:$0xff]  ;;  %v207_v63 = vld [vmem:[%s5724_s1 + $0x2e8] sm:$0xff]  ;;  %v209_v0 = vld [vmem:[%s5724_s1 + $0x2f8] sm:$0xff] }
  0x2c   :  { %563 = vmatprep.subr.mxu0 %v267_v20  ;;  %928 = vmatprep.subr.mxu1 %v269_v21  ;;  %v206_v1 = vld [vmem:[%s5724_s1 + $0x2e0] sm:$0xff]  ;;  %v208_v2 = vld [vmem:[%s5724_s1 + $0x2f0] sm:$0xff]  ;;  %v27_v4 = vld [vmem:[%s5725_s0 + $0x68] sm:$0xff] }
  0x2d   :  { %564 = vmatpush2.msra.mxu0 %v266_v22  ;;  %929 = vmatpush2.msra.mxu1 %v268_v23  ;;  %v24_v3 = vld [vmem:[%s5725_s0 + $0x50] sm:$0xff]  ;;  %v199_v5 = vld [vmem:[%s5724_s1 + $0x2a8] sm:$0xff]  ;;  %v201_v6 = vld [vmem:[%s5724_s1 + $0x2b8] sm:$0xff] }
  0x2e   :  { %565 = vmatprep.subr.mxu0 %v259_v24  ;;  %930 = vmatprep.subr.mxu1 %v261_v25  ;;  %v198_v7 = vld [vmem:[%s5724_s1 + $0x2a0] sm:$0xff]  ;;  %v200_v8 = vld [vmem:[%s5724_s1 + $0x2b0] sm:$0xff]  ;;  %v29_v10 = vld [vmem:[%s5725_s0 + $0x78] sm:$0xff] }
  0x2f   :  { %566 = vmatpush2.msra.mxu0 %v258_v26  ;;  %931 = vmatpush2.msra.mxu1 %v260_v27  ;;  %v26_v9 = vld [vmem:[%s5725_s0 + $0x60] sm:$0xff]  ;;  %v191_v11 = vld [vmem:[%s5724_s1 + $0x268] sm:$0xff]  ;;  %v193_v12 = vld [vmem:[%s5724_s1 + $0x278] sm:$0xff] }
  0x30   :  { %567 = vmatprep.subr.mxu0 %v251_v28  ;;  %932 = vmatprep.subr.mxu1 %v253_v29  ;;  %v190_v13 = vld [vmem:[%s5724_s1 + $0x260] sm:$0xff]  ;;  %v192_v14 = vld [vmem:[%s5724_s1 + $0x270] sm:$0xff]  ;;  %v31_v16 = vld [vmem:[%s5725_s0 + $0x88] sm:$0xff] }
  0x31   :  { %568 = vmatpush2.msra.mxu0 %v250_v30  ;;  %933 = vmatpush2.msra.mxu1 %v252_v31  ;;  %v28_v15 = vld [vmem:[%s5725_s0 + $0x70] sm:$0xff]  ;;  %v183_v17 = vld [vmem:[%s5724_s1 + $0x228] sm:$0xff]  ;;  %v185_v18 = vld [vmem:[%s5724_s1 + $0x238] sm:$0xff] }
  0x32   :  { %569 = vmatprep.subr.mxu0 %v243_v32  ;;  %934 = vmatprep.subr.mxu1 %v245_v33  ;;  %v182_v19 = vld [vmem:[%s5724_s1 + $0x220] sm:$0xff]  ;;  %v184_v20 = vld [vmem:[%s5724_s1 + $0x230] sm:$0xff]  ;;  %v33_v22 = vld [vmem:[%s5725_s0 + $0x98] sm:$0xff] }
  0x33   :  { %570 = vmatpush2.msra.mxu0 %v242_v34  ;;  %2371 = vmatprep.mubr.msk.f32.mxu0 %vm356_vm0, %v15_v35  ;;  %v30_v21 = vld [vmem:[%s5725_s0 + $0x80] sm:$0xff]  ;;  %v175_v23 = vld [vmem:[%s5724_s1 + $0x1e8] sm:$0xff]  ;;  %v177_v24 = vld [vmem:[%s5724_s1 + $0x1f8] sm:$0xff] }
  0x34   :  { %935 = vmatpush2.msra.mxu1 %v244_v36  ;;  %2421 = vmatprep.mubr.msk.f32.mxu1 %vm356_vm0, %v15_v35  ;;  %v174_v25 = vld [vmem:[%s5724_s1 + $0x1e0] sm:$0xff]  ;;  %v176_v26 = vld [vmem:[%s5724_s1 + $0x1f0] sm:$0xff]  ;;  %v35_v28 = vld [vmem:[%s5725_s0 + $0xa8] sm:$0xff] }
  0x35   :  { %572 = vmatmul.mubr.f32.vlgmr.msra.gmra.mxu0 %v14_v37  ;;  %937 = vmatmul.mubr.f32.vlgmr.msra.gmra.mxu1 %v14_v37  ;;  %v32_v27 = vld [vmem:[%s5725_s0 + $0x90] sm:$0xff]  ;;  %v167_v29 = vld [vmem:[%s5724_s1 + $0x1a8] sm:$0xff]  ;;  %v169_v30 = vld [vmem:[%s5724_s1 + $0x1b8] sm:$0xff] }
  0x36   :  { %1237 = vmatprep.subr.mxu0 %v239_v38  ;;  %1602 = vmatprep.subr.mxu1 %v241_v39  ;;  %v166_v31 = vld [vmem:[%s5724_s1 + $0x1a0] sm:$0xff]  ;;  %v168_v32 = vld [vmem:[%s5724_s1 + $0x1b0] sm:$0xff]  ;;  %v37_v34 = vld [vmem:[%s5725_s0 + $0xb8] sm:$0xff] }
  0x37   :  { %1238 = vmatpush1.msra.mxu0 %v238_v40  ;;  %1603 = vmatpush1.msra.mxu1 %v240_v41  ;;  %v34_v33 = vld [vmem:[%s5725_s0 + $0xa0] sm:$0xff]  ;;  %v159_v35 = vld [vmem:[%s5724_s1 + $0x168] sm:$0xff]  ;;  %v161_v36 = vld [vmem:[%s5724_s1 + $0x178] sm:$0xff] }
  0x38   :  { %2372 = vmatprep.mubr.msk.f32.mxu0 %vm356_vm0, %v17_v42  ;;  %2422 = vmatprep.mubr.msk.f32.mxu1 %vm356_vm0, %v17_v42  ;;  %v158_v37 = vld [vmem:[%s5724_s1 + $0x160] sm:$0xff]  ;;  %v160_v38 = vld [vmem:[%s5724_s1 + $0x170] sm:$0xff]  ;;  %v39_v40 = vld [vmem:[%s5725_s0 + $0xc8] sm:$0xff] }
  0x39   :  { %578 = vmatmul.mubr.f32.gmra.mxu0 %v16_v43  ;;  %943 = vmatmul.mubr.f32.gmra.mxu1 %v16_v43  ;;  %v36_v39 = vld [vmem:[%s5725_s0 + $0xb0] sm:$0xff]  ;;  %v151_v41 = vld [vmem:[%s5724_s1 + $0x128] sm:$0xff]  ;;  %v153_v42 = vld [vmem:[%s5724_s1 + $0x138] sm:$0xff] }
  0x3a   :  { %2373 = vmatprep.mubr.msk.f32.mxu0 %vm356_vm0, %v19_v44  ;;  %2423 = vmatprep.mubr.msk.f32.mxu1 %vm356_vm0, %v19_v44  ;;  %v150_v43 = vld [vmem:[%s5724_s1 + $0x120] sm:$0xff]  ;;  %v152_v44 = vld [vmem:[%s5724_s1 + $0x130] sm:$0xff] }
  0x3b   :  { %1239 = vmatprep.subr.mxu0 %v231_v45  ;;  %1604 = vmatprep.subr.mxu1 %v233_v46  ;;  %v38_v45 = vld [vmem:[%s5725_s0 + $0xc0] sm:$0xff]  ;;  %v41_v46 = vld [vmem:[%s5725_s0 + $0xd8] sm:$0xff] }
  0x3c   :  { %1240 = vmatpush1.msra.mxu0 %v230_v47  ;;  %1605 = vmatpush1.msra.mxu1 %v232_v48  ;;  %v143_v47 = vld [vmem:[%s5724_s1 + $0xe8] sm:$0xff]  ;;  %v145_v48 = vld [vmem:[%s5724_s1 + $0xf8] sm:$0xff] }
  0x3d   :  { %584 = vmatmul.mubr.f32.gmra.mxu0 %v18_v49  ;;  %949 = vmatmul.mubr.f32.gmra.mxu1 %v18_v49  ;;  %v142_v49 = vld [vmem:[%s5724_s1 + $0xe0] sm:$0xff] }
  0x3e   :  { %2374 = vmatprep.mubr.msk.f32.mxu0 %vm356_vm0, %v21_v50  ;;  %2424 = vmatprep.mubr.msk.f32.mxu1 %vm356_vm0, %v21_v50  ;;  %v144_v50 = vld [vmem:[%s5724_s1 + $0xf0] sm:$0xff] }
  0x3f   :  { %1241 = vmatprep.subr.mxu0 %v223_v51  ;;  %1606 = vmatprep.subr.mxu1 %v225_v52  ;;  %v40_v51 = vld [vmem:[%s5725_s0 + $0xd0] sm:$0xff]  ;;  %v43_v52 = vld [vmem:[%s5725_s0 + $0xe8] sm:$0xff] }
  0x40   :  { %1242 = vmatpush1.msra.mxu0 %v222_v53  ;;  %1607 = vmatpush1.msra.mxu1 %v224_v54  ;;  %v135_v53 = vld [vmem:[%s5724_s1 + $0xa8] sm:$0xff]  ;;  %v137_v54 = vld [vmem:[%s5724_s1 + $0xb8] sm:$0xff] }
  0x41   :  { %590 = vmatmul.mubr.f32.gmra.mxu0 %v20_v55  ;;  %955 = vmatmul.mubr.f32.gmra.mxu1 %v20_v55  ;;  %v134_v55 = vld [vmem:[%s5724_s1 + $0xa0] sm:$0xff] }
  0x42   :  { %2375 = vmatprep.mubr.msk.f32.mxu0 %vm356_vm0, %v23_v56  ;;  %2425 = vmatprep.mubr.msk.f32.mxu1 %vm356_vm0, %v23_v56  ;;  %v136_v56 = vld [vmem:[%s5724_s1 + $0xb0] sm:$0xff] }
  0x43   :  { %1243 = vmatprep.subr.mxu0 %v215_v57  ;;  %1608 = vmatprep.subr.mxu1 %v217_v58  ;;  %v42_v57 = vld [vmem:[%s5725_s0 + $0xe0] sm:$0xff]  ;;  %v45_v58 = vld [vmem:[%s5725_s0 + $0xf8] sm:$0xff] }
  0x44   :  { %1244 = vmatpush1.msra.mxu0 %v214_v59  ;;  %1609 = vmatpush1.msra.mxu1 %v216_v60  ;;  %v127_v59 = vld [vmem:[%s5724_s1 + $0x68] sm:$0xff]  ;;  %v129_v60 = vld [vmem:[%s5724_s1 + $0x78] sm:$0xff] }
  0x45   :  { %596 = vmatmul.mubr.f32.gmra.mxu0 %v22_v61  ;;  %961 = vmatmul.mubr.f32.gmra.mxu1 %v22_v61  ;;  %v126_v61 = vld [vmem:[%s5724_s1 + $0x60] sm:$0xff] }
  0x46   :  { %2376 = vmatprep.mubr.msk.f32.mxu0 %vm356_vm0, %v25_v62  ;;  %2426 = vmatprep.mubr.msk.f32.mxu1 %vm356_vm0, %v25_v62  ;;  %v128_v62 = vld [vmem:[%s5724_s1 + $0x70] sm:$0xff] }
  0x47   :  { %1245 = vmatprep.subr.mxu0 %v207_v63  ;;  %1610 = vmatprep.subr.mxu1 %v209_v0  ;;  %v44_v63 = vld [vmem:[%s5725_s0 + $0xf0] sm:$0xff]  ;;  %v47_v0 = vld [vmem:[%s5725_s0 + $0x108] sm:$0xff] }
  0x48   :  { %1246 = vmatpush1.msra.mxu0 %v206_v1  ;;  %1611 = vmatpush1.msra.mxu1 %v208_v2  ;;  %v119_v1 = vld [vmem:[%s5724_s1 + $0x28] sm:$0xff]  ;;  %v121_v2 = vld [vmem:[%s5724_s1 + $0x38] sm:$0xff] }
  0x49   :  { %602 = vmatmul.mubr.f32.gmra.mxu0 %v24_v3  ;;  %967 = vmatmul.mubr.f32.gmra.mxu1 %v24_v3  ;;  %v118_v3 = vld [vmem:[%s5724_s1 + $0x20] sm:$0xff] }
  0x4a   :  { %2377 = vmatprep.mubr.msk.f32.mxu0 %vm356_vm0, %v27_v4  ;;  %2427 = vmatprep.mubr.msk.f32.mxu1 %vm356_vm0, %v27_v4  ;;  %v120_v4 = vld [vmem:[%s5724_s1 + $0x30] sm:$0xff] }
  0x4b   :  { %1247 = vmatprep.subr.mxu0 %v199_v5  ;;  %1612 = vmatprep.subr.mxu1 %v201_v6  ;;  %v46_v5 = vld [vmem:[%s5725_s0 + $0x100] sm:$0xff]  ;;  %v49_v6 = vld [vmem:[%s5725_s0 + $0x118] sm:$0xff] }
  0x4c   :  { %1248 = vmatpush1.msra.mxu0 %v198_v7  ;;  %1613 = vmatpush1.msra.mxu1 %v200_v8  ;;  %v311_v7 = vld [vmem:[%s5724_s1 + $0x628] sm:$0xff]  ;;  %v313_v8 = vld [vmem:[%s5724_s1 + $0x638] sm:$0xff] }
  0x4d   :  { %608 = vmatmul.mubr.f32.gmra.mxu0 %v26_v9  ;;  %973 = vmatmul.mubr.f32.gmra.mxu1 %v26_v9  ;;  %v310_v9 = vld [vmem:[%s5724_s1 + $0x620] sm:$0xff] }
  0x4e   :  { %2378 = vmatprep.mubr.msk.f32.mxu0 %vm356_vm0, %v29_v10  ;;  %2428 = vmatprep.mubr.msk.f32.mxu1 %vm356_vm0, %v29_v10  ;;  %v312_v10 = vld [vmem:[%s5724_s1 + $0x630] sm:$0xff] }
  0x4f   :  { %1249 = vmatprep.subr.mxu0 %v191_v11  ;;  %1614 = vmatprep.subr.mxu1 %v193_v12  ;;  %v48_v11 = vld [vmem:[%s5725_s0 + $0x110] sm:$0xff]  ;;  %v51_v12 = vld [vmem:[%s5725_s0 + $0x128] sm:$0xff] }
  0x50   :  { %1250 = vmatpush1.msra.mxu0 %v190_v13  ;;  %1615 = vmatpush1.msra.mxu1 %v192_v14  ;;  %v303_v13 = vld [vmem:[%s5724_s1 + $0x5e8] sm:$0xff]  ;;  %v305_v14 = vld [vmem:[%s5724_s1 + $0x5f8] sm:$0xff] }
  0x51   :  { %614 = vmatmul.mubr.f32.gmra.mxu0 %v28_v15  ;;  %979 = vmatmul.mubr.f32.gmra.mxu1 %v28_v15  ;;  %v302_v15 = vld [vmem:[%s5724_s1 + $0x5e0] sm:$0xff] }
  0x52   :  { %2379 = vmatprep.mubr.msk.f32.mxu0 %vm356_vm0, %v31_v16  ;;  %2429 = vmatprep.mubr.msk.f32.mxu1 %vm356_vm0, %v31_v16  ;;  %v304_v16 = vld [vmem:[%s5724_s1 + $0x5f0] sm:$0xff] }
  0x53   :  { %1251 = vmatprep.subr.mxu0 %v183_v17  ;;  %1616 = vmatprep.subr.mxu1 %v185_v18  ;;  %v50_v17 = vld [vmem:[%s5725_s0 + $0x120] sm:$0xff]  ;;  %v53_v18 = vld [vmem:[%s5725_s0 + $0x138] sm:$0xff] }
  0x54   :  { %1252 = vmatpush1.msra.mxu0 %v182_v19  ;;  %1617 = vmatpush1.msra.mxu1 %v184_v20  ;;  %v295_v19 = vld [vmem:[%s5724_s1 + $0x5a8] sm:$0xff]  ;;  %v297_v20 = vld [vmem:[%s5724_s1 + $0x5b8] sm:$0xff] }
  0x55   :  { %620 = vmatmul.mubr.f32.gmra.mxu0 %v30_v21  ;;  %985 = vmatmul.mubr.f32.gmra.mxu1 %v30_v21  ;;  %v294_v21 = vld [vmem:[%s5724_s1 + $0x5a0] sm:$0xff] }
  0x56   :  { %2380 = vmatprep.mubr.msk.f32.mxu0 %vm356_vm0, %v33_v22  ;;  %2430 = vmatprep.mubr.msk.f32.mxu1 %vm356_vm0, %v33_v22  ;;  %v296_v22 = vld [vmem:[%s5724_s1 + $0x5b0] sm:$0xff] }
  0x57   :  { %1253 = vmatprep.subr.mxu0 %v175_v23  ;;  %1618 = vmatprep.subr.mxu1 %v177_v24  ;;  %v52_v23 = vld [vmem:[%s5725_s0 + $0x130] sm:$0xff]  ;;  %v55_v24 = vld [vmem:[%s5725_s0 + $0x148] sm:$0xff] }
  0x58   :  { %1254 = vmatpush1.msra.mxu0 %v174_v25  ;;  %1619 = vmatpush1.msra.mxu1 %v176_v26  ;;  %v287_v25 = vld [vmem:[%s5724_s1 + $0x568] sm:$0xff]  ;;  %v289_v26 = vld [vmem:[%s5724_s1 + $0x578] sm:$0xff] }
  0x59   :  { %626 = vmatmul.mubr.f32.gmra.mxu0 %v32_v27  ;;  %991 = vmatmul.mubr.f32.gmra.mxu1 %v32_v27  ;;  %v286_v27 = vld [vmem:[%s5724_s1 + $0x560] sm:$0xff] }
  0x5a   :  { %2381 = vmatprep.mubr.msk.f32.mxu0 %vm356_vm0, %v35_v28  ;;  %2431 = vmatprep.mubr.msk.f32.mxu1 %vm356_vm0, %v35_v28  ;;  %v288_v28 = vld [vmem:[%s5724_s1 + $0x570] sm:$0xff] }
  0x5b   :  { %1255 = vmatprep.subr.mxu0 %v167_v29  ;;  %1620 = vmatprep.subr.mxu1 %v169_v30  ;;  %v54_v29 = vld [vmem:[%s5725_s0 + $0x140] sm:$0xff]  ;;  %v57_v30 = vld [vmem:[%s5725_s0 + $0x158] sm:$0xff] }
  0x5c   :  { %1256 = vmatpush1.msra.mxu0 %v166_v31  ;;  %1621 = vmatpush1.msra.mxu1 %v168_v32  ;;  %v279_v31 = vld [vmem:[%s5724_s1 + $0x528] sm:$0xff]  ;;  %v281_v32 = vld [vmem:[%s5724_s1 + $0x538] sm:$0xff] }
  0x5d   :  { %632 = vmatmul.mubr.f32.gmra.mxu0 %v34_v33  ;;  %997 = vmatmul.mubr.f32.gmra.mxu1 %v34_v33  ;;  %v278_v33 = vld [vmem:[%s5724_s1 + $0x520] sm:$0xff] }
  0x5e   :  { %2382 = vmatprep.mubr.msk.f32.mxu0 %vm356_vm0, %v37_v34  ;;  %2432 = vmatprep.mubr.msk.f32.mxu1 %vm356_vm0, %v37_v34  ;;  %v280_v34 = vld [vmem:[%s5724_s1 + $0x530] sm:$0xff] }
  0x5f   :  { %1257 = vmatprep.subr.mxu0 %v159_v35  ;;  %1622 = vmatprep.subr.mxu1 %v161_v36  ;;  %v56_v35 = vld [vmem:[%s5725_s0 + $0x150] sm:$0xff]  ;;  %v59_v36 = vld [vmem:[%s5725_s0 + $0x168] sm:$0xff] }
  0x60   :  { %1258 = vmatpush1.msra.mxu0 %v158_v37  ;;  %1623 = vmatpush1.msra.mxu1 %v160_v38  ;;  %v271_v37 = vld [vmem:[%s5724_s1 + $0x4e8] sm:$0xff]  ;;  %v273_v38 = vld [vmem:[%s5724_s1 + $0x4f8] sm:$0xff] }
  0x61   :  { %638 = vmatmul.mubr.f32.gmra.mxu0 %v36_v39  ;;  %1003 = vmatmul.mubr.f32.gmra.mxu1 %v36_v39  ;;  %v270_v39 = vld [vmem:[%s5724_s1 + $0x4e0] sm:$0xff] }
  0x62   :  { %2383 = vmatprep.mubr.msk.f32.mxu0 %vm356_vm0, %v39_v40  ;;  %2433 = vmatprep.mubr.msk.f32.mxu1 %vm356_vm0, %v39_v40  ;;  %v272_v40 = vld [vmem:[%s5724_s1 + $0x4f0] sm:$0xff] }
  0x63   :  { %1259 = vmatprep.subr.mxu0 %v151_v41  ;;  %1624 = vmatprep.subr.mxu1 %v153_v42  ;;  %v58_v41 = vld [vmem:[%s5725_s0 + $0x160] sm:$0xff]  ;;  %v61_v42 = vld [vmem:[%s5725_s0 + $0x178] sm:$0xff] }
  0x64   :  { %1260 = vmatpush1.msra.mxu0 %v150_v43  ;;  %1625 = vmatpush1.msra.mxu1 %v152_v44  ;;  %v263_v43 = vld [vmem:[%s5724_s1 + $0x4a8] sm:$0xff]  ;;  %v265_v44 = vld [vmem:[%s5724_s1 + $0x4b8] sm:$0xff] }
  0x65   :  { %644 = vmatmul.mubr.f32.gmra.mxu0 %v38_v45  ;;  %1009 = vmatmul.mubr.f32.gmra.mxu1 %v38_v45  ;;  %v262_v45 = vld [vmem:[%s5724_s1 + $0x4a0] sm:$0xff] }
  0x66   :  { %2384 = vmatprep.mubr.msk.f32.mxu0 %vm356_vm0, %v41_v46  ;;  %2434 = vmatprep.mubr.msk.f32.mxu1 %vm356_vm0, %v41_v46  ;;  %v264_v46 = vld [vmem:[%s5724_s1 + $0x4b0] sm:$0xff] }
  0x67   :  { %1261 = vmatprep.subr.mxu0 %v143_v47  ;;  %1626 = vmatprep.subr.mxu1 %v145_v48  ;;  %v60_v47 = vld [vmem:[%s5725_s0 + $0x170] sm:$0xff]  ;;  %v63_v48 = vld [vmem:[%s5725_s0 + $0x188] sm:$0xff] }
  0x68   :  { %1262 = vmatpush1.msra.mxu0 %v142_v49  ;;  %1627 = vmatpush1.msra.mxu1 %v144_v50  ;;  %v255_v49 = vld [vmem:[%s5724_s1 + $0x468] sm:$0xff]  ;;  %v257_v50 = vld [vmem:[%s5724_s1 + $0x478] sm:$0xff] }
  0x69   :  { %650 = vmatmul.mubr.f32.gmra.mxu0 %v40_v51  ;;  %1015 = vmatmul.mubr.f32.gmra.mxu1 %v40_v51  ;;  %v254_v51 = vld [vmem:[%s5724_s1 + $0x460] sm:$0xff] }
  0x6a   :  { %2385 = vmatprep.mubr.msk.f32.mxu0 %vm356_vm0, %v43_v52  ;;  %2435 = vmatprep.mubr.msk.f32.mxu1 %vm356_vm0, %v43_v52  ;;  %v256_v52 = vld [vmem:[%s5724_s1 + $0x470] sm:$0xff] }
  0x6b   :  { %1263 = vmatprep.subr.mxu0 %v135_v53  ;;  %1628 = vmatprep.subr.mxu1 %v137_v54  ;;  %v62_v53 = vld [vmem:[%s5725_s0 + $0x180] sm:$0xff]  ;;  %v65_v54 = vld [vmem:[%s5725_s0 + $0x198] sm:$0xff] }
  0x6c   :  { %1264 = vmatpush1.msra.mxu0 %v134_v55  ;;  %1629 = vmatpush1.msra.mxu1 %v136_v56  ;;  %v247_v55 = vld [vmem:[%s5724_s1 + $0x428] sm:$0xff]  ;;  %v249_v56 = vld [vmem:[%s5724_s1 + $0x438] sm:$0xff] }
  0x6d   :  { %656 = vmatmul.mubr.f32.gmra.mxu0 %v42_v57  ;;  %1021 = vmatmul.mubr.f32.gmra.mxu1 %v42_v57  ;;  %v246_v57 = vld [vmem:[%s5724_s1 + $0x420] sm:$0xff] }
  0x6e   :  { %2386 = vmatprep.mubr.msk.f32.mxu0 %vm356_vm0, %v45_v58  ;;  %2436 = vmatprep.mubr.msk.f32.mxu1 %vm356_vm0, %v45_v58  ;;  %v248_v58 = vld [vmem:[%s5724_s1 + $0x430] sm:$0xff] }
  0x6f   :  { %1265 = vmatprep.subr.mxu0 %v127_v59  ;;  %1630 = vmatprep.subr.mxu1 %v129_v60  ;;  %v64_v59 = vld [vmem:[%s5725_s0 + $0x190] sm:$0xff]  ;;  %v67_v60 = vld [vmem:[%s5725_s0 + $0x1a8] sm:$0xff] }
  0x70   :  { %1266 = vmatpush1.msra.mxu0 %v126_v61  ;;  %1631 = vmatpush1.msra.mxu1 %v128_v62  ;;  %v66_v61 = vld [vmem:[%s5725_s0 + $0x1a0] sm:$0xff]  ;;  %v69_v62 = vld [vmem:[%s5725_s0 + $0x1b8] sm:$0xff] }
  0x71   :  { %662 = vmatmul.mubr.f32.gmra.mxu0 %v44_v63  ;;  %1027 = vmatmul.mubr.f32.gmra.mxu1 %v44_v63  ;;  %v68_v63 = vld [vmem:[%s5725_s0 + $0x1b0] sm:$0xff] }
  0x72   :  { %2387 = vmatprep.mubr.msk.f32.mxu0 %vm356_vm0, %v47_v0  ;;  %2437 = vmatprep.mubr.msk.f32.mxu1 %vm356_vm0, %v47_v0  ;;  %v71_v0 = vld [vmem:[%s5725_s0 + $0x1c8] sm:$0xff] }
  0x73   :  { %1267 = vmatprep.subr.mxu0 %v119_v1  ;;  %1632 = vmatprep.subr.mxu1 %v121_v2  ;;  %v70_v1 = vld [vmem:[%s5725_s0 + $0x1c0] sm:$0xff]  ;;  %v73_v2 = vld [vmem:[%s5725_s0 + $0x1d8] sm:$0xff] }
  0x74   :  { %1268 = vmatpush1.msra.mxu0 %v118_v3  ;;  %1633 = vmatpush1.msra.mxu1 %v120_v4  ;;  %v72_v3 = vld [vmem:[%s5725_s0 + $0x1d0] sm:$0xff]  ;;  %v75_v4 = vld [vmem:[%s5725_s0 + $0x1e8] sm:$0xff] }
  0x75   :  { %668 = vmatmul.mubr.f32.gmra.mxu0 %v46_v5  ;;  %1033 = vmatmul.mubr.f32.gmra.mxu1 %v46_v5  ;;  %v74_v5 = vld [vmem:[%s5725_s0 + $0x1e0] sm:$0xff] }
  0x76   :  { %2388 = vmatprep.mubr.msk.f32.mxu0 %vm356_vm0, %v49_v6  ;;  %2438 = vmatprep.mubr.msk.f32.mxu1 %vm356_vm0, %v49_v6  ;;  %v77_v6 = vld [vmem:[%s5725_s0 + $0x1f8] sm:$0xff] }
  0x77   :  { %1283 = vmatprep.subr.mxu0 %v311_v7  ;;  %1648 = vmatprep.subr.mxu1 %v313_v8  ;;  %v76_v7 = vld [vmem:[%s5725_s0 + $0x1f0] sm:$0xff]  ;;  %v79_v8 = vld [vmem:[%s5725_s0 + $0x208] sm:$0xff] }
  0x78   :  { %1284 = vmatpush2.msra.mxu0 %v310_v9  ;;  %1649 = vmatpush2.msra.mxu1 %v312_v10  ;;  %v78_v9 = vld [vmem:[%s5725_s0 + $0x200] sm:$0xff]  ;;  %v81_v10 = vld [vmem:[%s5725_s0 + $0x218] sm:$0xff] }
  0x79   :  { %674 = vmatmul.mubr.f32.gmra.mxu0 %v48_v11  ;;  %1039 = vmatmul.mubr.f32.gmra.mxu1 %v48_v11  ;;  %v80_v11 = vld [vmem:[%s5725_s0 + $0x210] sm:$0xff] }
  0x7a   :  { %2389 = vmatprep.mubr.msk.f32.mxu0 %vm356_vm0, %v51_v12  ;;  %2439 = vmatprep.mubr.msk.f32.mxu1 %vm356_vm0, %v51_v12  ;;  %v83_v12 = vld [vmem:[%s5725_s0 + $0x228] sm:$0xff] }
  0x7b   :  { %1285 = vmatprep.subr.mxu0 %v303_v13  ;;  %1650 = vmatprep.subr.mxu1 %v305_v14  ;;  %v82_v13 = vld [vmem:[%s5725_s0 + $0x220] sm:$0xff]  ;;  %v85_v14 = vld [vmem:[%s5725_s0 + $0x238] sm:$0xff] }
  0x7c   :  { %1286 = vmatpush2.msra.mxu0 %v302_v15  ;;  %1651 = vmatpush2.msra.mxu1 %v304_v16  ;;  %v84_v15 = vld [vmem:[%s5725_s0 + $0x230] sm:$0xff]  ;;  %v87_v16 = vld [vmem:[%s5725_s0 + $0x248] sm:$0xff] }
  0x7d   :  { %680 = vmatmul.mubr.f32.gmra.mxu0 %v50_v17  ;;  %1045 = vmatmul.mubr.f32.gmra.mxu1 %v50_v17  ;;  %v86_v17 = vld [vmem:[%s5725_s0 + $0x240] sm:$0xff] }
  0x7e   :  { %2390 = vmatprep.mubr.msk.f32.mxu0 %vm356_vm0, %v53_v18  ;;  %2440 = vmatprep.mubr.msk.f32.mxu1 %vm356_vm0, %v53_v18  ;;  %v89_v18 = vld [vmem:[%s5725_s0 + $0x258] sm:$0xff] }
  0x7f   :  { %1287 = vmatprep.subr.mxu0 %v295_v19  ;;  %1652 = vmatprep.subr.mxu1 %v297_v20  ;;  %v88_v19 = vld [vmem:[%s5725_s0 + $0x250] sm:$0xff]  ;;  %v91_v20 = vld [vmem:[%s5725_s0 + $0x268] sm:$0xff] }
  0x80   :  { %1288 = vmatpush2.msra.mxu0 %v294_v21  ;;  %1653 = vmatpush2.msra.mxu1 %v296_v22  ;;  %v90_v21 = vld [vmem:[%s5725_s0 + $0x260] sm:$0xff]  ;;  %v93_v22 = vld [vmem:[%s5725_s0 + $0x278] sm:$0xff] }
  0x81   :  { %686 = vmatmul.mubr.f32.gmra.mxu0 %v52_v23  ;;  %1051 = vmatmul.mubr.f32.gmra.mxu1 %v52_v23  ;;  %v92_v23 = vld [vmem:[%s5725_s0 + $0x270] sm:$0xff] }
  0x82   :  { %2391 = vmatprep.mubr.msk.f32.mxu0 %vm356_vm0, %v55_v24  ;;  %2441 = vmatprep.mubr.msk.f32.mxu1 %vm356_vm0, %v55_v24  ;;  %v95_v24 = vld [vmem:[%s5725_s0 + $0x288] sm:$0xff] }
  0x83   :  { %1289 = vmatprep.subr.mxu0 %v287_v25  ;;  %1654 = vmatprep.subr.mxu1 %v289_v26  ;;  %v94_v25 = vld [vmem:[%s5725_s0 + $0x280] sm:$0xff]  ;;  %v97_v26 = vld [vmem:[%s5725_s0 + $0x298] sm:$0xff] }
  0x84   :  { %1290 = vmatpush2.msra.mxu0 %v286_v27  ;;  %1655 = vmatpush2.msra.mxu1 %v288_v28  ;;  %v96_v27 = vld [vmem:[%s5725_s0 + $0x290] sm:$0xff]  ;;  %v99_v28 = vld [vmem:[%s5725_s0 + $0x2a8] sm:$0xff] }
  0x85   :  { %692 = vmatmul.mubr.f32.gmra.mxu0 %v54_v29  ;;  %1057 = vmatmul.mubr.f32.gmra.mxu1 %v54_v29  ;;  %v98_v29 = vld [vmem:[%s5725_s0 + $0x2a0] sm:$0xff] }
  0x86   :  { %2392 = vmatprep.mubr.msk.f32.mxu0 %vm356_vm0, %v57_v30  ;;  %2442 = vmatprep.mubr.msk.f32.mxu1 %vm356_vm0, %v57_v30  ;;  %v101_v30 = vld [vmem:[%s5725_s0 + $0x2b8] sm:$0xff] }
  0x87   :  { %1291 = vmatprep.subr.mxu0 %v279_v31  ;;  %1656 = vmatprep.subr.mxu1 %v281_v32  ;;  %v100_v31 = vld [vmem:[%s5725_s0 + $0x2b0] sm:$0xff]  ;;  %v103_v32 = vld [vmem:[%s5725_s0 + $0x2c8] sm:$0xff] }
  0x88   :  { %1292 = vmatpush2.msra.mxu0 %v278_v33  ;;  %1657 = vmatpush2.msra.mxu1 %v280_v34  ;;  %v102_v33 = vld [vmem:[%s5725_s0 + $0x2c0] sm:$0xff]  ;;  %v105_v34 = vld [vmem:[%s5725_s0 + $0x2d8] sm:$0xff] }
  0x89   :  { %698 = vmatmul.mubr.f32.gmra.mxu0 %v56_v35  ;;  %1063 = vmatmul.mubr.f32.gmra.mxu1 %v56_v35  ;;  %v104_v35 = vld [vmem:[%s5725_s0 + $0x2d0] sm:$0xff] }
  0x8a   :  { %2393 = vmatprep.mubr.msk.f32.mxu0 %vm356_vm0, %v59_v36  ;;  %2443 = vmatprep.mubr.msk.f32.mxu1 %vm356_vm0, %v59_v36  ;;  %v316_v36 = vlaneseq }
  0x8b   :  { %1293 = vmatprep.subr.mxu0 %v271_v37  ;;  %1658 = vmatprep.subr.mxu1 %v273_v38  ;;  %v107_v37 = vld [vmem:[%s5725_s0 + $0x2e8] sm:$0xff]  ;;  %v106_v38 = vld [vmem:[%s5725_s0 + $0x2e0] sm:$0xff] }
  0x8c   :  { %1294 = vmatpush2.msra.mxu0 %v270_v39  ;;  %1659 = vmatpush2.msra.mxu1 %v272_v40  ;;  %v3668_v39 = vshrl.u32 %v316_v36, 7  ;;  %v109_v40 = vld [vmem:[%s5725_s0 + $0x2f8] sm:$0xff] }
  0x8d   :  { %704 = vmatmul.mubr.f32.gmra.mxu0 %v58_v41  ;;  %1069 = vmatmul.mubr.f32.gmra.mxu1 %v58_v41  ;;  %v108_v41 = vld [vmem:[%s5725_s0 + $0x2f0] sm:$0xff] }
  0x8e   :  { %2394 = vmatprep.mubr.msk.f32.mxu0 %vm356_vm0, %v61_v42  ;;  %2444 = vmatprep.mubr.msk.f32.mxu1 %vm356_vm0, %v61_v42  ;;  %v318_v42 = vsub.s32 0, %v3668_v39 }
  0x8f   :  { %1295 = vmatprep.subr.mxu0 %v263_v43  ;;  %1660 = vmatprep.subr.mxu1 %v265_v44  ;;  %v326_v43 = vsub.s32 2, %v3668_v39  ;;  %v111_v44 = vld [vmem:[%s5725_s0 + $0x308] sm:$0xff] }
  0x90   :  { %1296 = vmatpush2.msra.mxu0 %v262_v45  ;;  %1661 = vmatpush2.msra.mxu1 %v264_v46  ;;  %v314_v45 = vld [vmem:[%s5726_s2] sm:$0xff]  ;;  %v322_v46 = vsub.s32 1, %v3668_v39 }
  0x91   :  { %710 = vmatmul.mubr.f32.gmra.mxu0 %v60_v47  ;;  %1075 = vmatmul.mubr.f32.gmra.mxu1 %v60_v47  ;;  %v330_v47 = vsub.s32 3, %v3668_v39 }
  0x92   :  { %2395 = vmatprep.mubr.msk.f32.mxu0 %vm356_vm0, %v63_v48  ;;  %2445 = vmatprep.mubr.msk.f32.mxu1 %vm356_vm0, %v63_v48  ;;  %v3690_v48 = vrot.slane %v314_v45, %v318_v42 }
  0x93   :  { %1297 = vmatprep.subr.mxu0 %v255_v49  ;;  %1662 = vmatprep.subr.mxu1 %v257_v50  ;;  %v110_v49 = vld [vmem:[%s5725_s0 + $0x300] sm:$0xff]  ;;  %v3695_v50 = vrot.slane %v314_v45, %v326_v43 }
  0x94   :  { %1298 = vmatpush2.msra.mxu0 %v254_v51  ;;  %1663 = vmatpush2.msra.mxu1 %v256_v52  ;;  %v113_v51 = vld [vmem:[%s5725_s0 + $0x318] sm:$0xff]  ;;  %v3700_v52 = vrot.slane %v314_v45, %v322_v46 }
  0x95   :  { %716 = vmatmul.mubr.f32.gmra.mxu0 %v62_v53  ;;  %1081 = vmatmul.mubr.f32.gmra.mxu1 %v62_v53  ;;  %v3702_v53 = vrot.slane %v314_v45, %v330_v47 }
  0x96   :  { %2396 = vmatprep.mubr.msk.f32.mxu0 %vm356_vm0, %v65_v54  ;;  %2446 = vmatprep.mubr.msk.f32.mxu1 %vm356_vm0, %v65_v54 }
  0x97   :  { %1299 = vmatprep.subr.mxu0 %v247_v55  ;;  %1664 = vmatprep.subr.mxu1 %v249_v56 }
  0x98   :  { %1300 = vmatpush2.msra.mxu0 %v246_v57  ;;  %1665 = vmatpush2.msra.mxu1 %v248_v58  ;;  %v112_v58 = vld [vmem:[%s5725_s0 + $0x310] sm:$0xff] }
  0x99   :  { %722 = vmatmul.mubr.f32.gmra.mxu0 %v64_v59  ;;  %1087 = vmatmul.mubr.f32.gmra.mxu1 %v64_v59 }
  0x9a   :  { %2397 = vmatprep.mubr.msk.f32.mxu0 %vm356_vm0, %v67_v60  ;;  %2447 = vmatprep.mubr.msk.f32.mxu1 %vm356_vm0, %v67_v60 }
  0x9d   :  { %728 = vmatmul.mubr.f32.gmra.mxu0 %v66_v61  ;;  %1093 = vmatmul.mubr.f32.gmra.mxu1 %v66_v61 }
  0x9e   :  { %2398 = vmatprep.mubr.msk.f32.mxu0 %vm356_vm0, %v69_v62  ;;  %2448 = vmatprep.mubr.msk.f32.mxu1 %vm356_vm0, %v69_v62 }
  0xa1   :  { %734 = vmatmul.mubr.f32.gmra.mxu0 %v68_v63  ;;  %1099 = vmatmul.mubr.f32.gmra.mxu1 %v68_v63 }
  0xa2   :  { %2399 = vmatprep.mubr.msk.f32.mxu0 %vm356_vm0, %v71_v0  ;;  %2449 = vmatprep.mubr.msk.f32.mxu1 %vm356_vm0, %v71_v0 }
  0xa5   :  { %740 = vmatmul.mubr.f32.gmra.mxu0 %v70_v1  ;;  %1105 = vmatmul.mubr.f32.gmra.mxu1 %v70_v1 }
  0xa6   :  { %2400 = vmatprep.mubr.msk.f32.mxu0 %vm356_vm0, %v73_v2  ;;  %2450 = vmatprep.mubr.msk.f32.mxu1 %vm356_vm0, %v73_v2 }
  0xa9   :  { %746 = vmatmul.mubr.f32.gmra.mxu0 %v72_v3  ;;  %1111 = vmatmul.mubr.f32.gmra.mxu1 %v72_v3  ;;  %v2571_v3 = vld [vmem:[%s5725_s0 + $0x8] sm:$0xff] }
  0xaa   :  { %2401 = vmatprep.mubr.msk.f32.mxu0 %vm356_vm0, %v75_v4  ;;  %2451 = vmatprep.mubr.msk.f32.mxu1 %vm356_vm0, %v75_v4 }
  0xad   :  { %752 = vmatmul.mubr.f32.gmra.mxu0 %v74_v5  ;;  %1117 = vmatmul.mubr.f32.gmra.mxu1 %v74_v5 }
  0xae   :  { %2402 = vmatprep.mubr.msk.f32.mxu0 %vm356_vm0, %v77_v6  ;;  %2452 = vmatprep.mubr.msk.f32.mxu1 %vm356_vm0, %v77_v6 }
  0xb1   :  { %758 = vmatmul.mubr.f32.gmra.mxu0 %v76_v7  ;;  %1123 = vmatmul.mubr.f32.gmra.mxu1 %v76_v7 }
  0xb2   :  { %2403 = vmatprep.mubr.msk.f32.mxu0 %vm356_vm0, %v79_v8  ;;  %2453 = vmatprep.mubr.msk.f32.mxu1 %vm356_vm0, %v79_v8 }
  0xb5   :  { %764 = vmatmul.mubr.f32.gmra.mxu0 %v78_v9  ;;  %1129 = vmatmul.mubr.f32.gmra.mxu1 %v78_v9 }
  0xb6   :  { %2404 = vmatprep.mubr.msk.f32.mxu0 %vm356_vm0, %v81_v10  ;;  %2454 = vmatprep.mubr.msk.f32.mxu1 %vm356_vm0, %v81_v10  ;;  %v2572_v10 = vld [vmem:[%s5725_s0] sm:$0xff] }
  0xb9   :  { %770 = vmatmul.mubr.f32.gmra.mxu0 %v80_v11  ;;  %1135 = vmatmul.mubr.f32.gmra.mxu1 %v80_v11 }
  0xba   :  { %2405 = vmatprep.mubr.msk.f32.mxu0 %vm356_vm0, %v83_v12  ;;  %2455 = vmatprep.mubr.msk.f32.mxu1 %vm356_vm0, %v83_v12 }
  0xbd   :  { %776 = vmatmul.mubr.f32.gmra.mxu0 %v82_v13  ;;  %1141 = vmatmul.mubr.f32.gmra.mxu1 %v82_v13  ;;  %v2573_v13 = vld [vmem:[%s5725_s0 + $0x18] sm:$0xff] }
  0xbe   :  { %2406 = vmatprep.mubr.msk.f32.mxu0 %vm356_vm0, %v85_v14  ;;  %2456 = vmatprep.mubr.msk.f32.mxu1 %vm356_vm0, %v85_v14 }
  0xc1   :  { %782 = vmatmul.mubr.f32.gmra.mxu0 %v84_v15  ;;  %1147 = vmatmul.mubr.f32.gmra.mxu1 %v84_v15 }
  0xc2   :  { %2407 = vmatprep.mubr.msk.f32.mxu0 %vm356_vm0, %v87_v16  ;;  %2457 = vmatprep.mubr.msk.f32.mxu1 %vm356_vm0, %v87_v16 }
  0xc5   :  { %788 = vmatmul.mubr.f32.gmra.mxu0 %v86_v17  ;;  %1153 = vmatmul.mubr.f32.gmra.mxu1 %v86_v17 }
  0xc6   :  { %2408 = vmatprep.mubr.msk.f32.mxu0 %vm356_vm0, %v89_v18  ;;  %2458 = vmatprep.mubr.msk.f32.mxu1 %vm356_vm0, %v89_v18 }
  0xc9   :  { %794 = vmatmul.mubr.f32.gmra.mxu0 %v88_v19  ;;  %1159 = vmatmul.mubr.f32.gmra.mxu1 %v88_v19 }
  0xca   :  { %2409 = vmatprep.mubr.msk.f32.mxu0 %vm356_vm0, %v91_v20  ;;  %2459 = vmatprep.mubr.msk.f32.mxu1 %vm356_vm0, %v91_v20  ;;  %v2574_v20 = vld [vmem:[%s5725_s0 + $0x10] sm:$0xff] }
  0xcd   :  { %800 = vmatmul.mubr.f32.gmra.mxu0 %v90_v21  ;;  %1165 = vmatmul.mubr.f32.gmra.mxu1 %v90_v21 }
  0xce   :  { %2410 = vmatprep.mubr.msk.f32.mxu0 %vm356_vm0, %v93_v22  ;;  %2460 = vmatprep.mubr.msk.f32.mxu1 %vm356_vm0, %v93_v22 }
  0xd1   :  { %806 = vmatmul.mubr.f32.gmra.mxu0 %v92_v23  ;;  %1171 = vmatmul.mubr.f32.gmra.mxu1 %v92_v23  ;;  %v2575_v23 = vld [vmem:[%s5725_s0 + $0x28] sm:$0xff] }
  0xd2   :  { %2411 = vmatprep.mubr.msk.f32.mxu0 %vm356_vm0, %v95_v24  ;;  %2461 = vmatprep.mubr.msk.f32.mxu1 %vm356_vm0, %v95_v24 }
  0xd5   :  { %812 = vmatmul.mubr.f32.gmra.mxu0 %v94_v25  ;;  %1177 = vmatmul.mubr.f32.gmra.mxu1 %v94_v25 }
  0xd6   :  { %2412 = vmatprep.mubr.msk.f32.mxu0 %vm356_vm0, %v97_v26  ;;  %2462 = vmatprep.mubr.msk.f32.mxu1 %vm356_vm0, %v97_v26 }
  0xd9   :  { %818 = vmatmul.mubr.f32.gmra.mxu0 %v96_v27  ;;  %1183 = vmatmul.mubr.f32.gmra.mxu1 %v96_v27 }
  0xda   :  { %2413 = vmatprep.mubr.msk.f32.mxu0 %vm356_vm0, %v99_v28  ;;  %2463 = vmatprep.mubr.msk.f32.mxu1 %vm356_vm0, %v99_v28 }
  0xdd   :  { %824 = vmatmul.mubr.f32.gmra.mxu0 %v98_v29  ;;  %1189 = vmatmul.mubr.f32.gmra.mxu1 %v98_v29 }
  0xde   :  { %2414 = vmatprep.mubr.msk.f32.mxu0 %vm356_vm0, %v101_v30  ;;  %2464 = vmatprep.mubr.msk.f32.mxu1 %vm356_vm0, %v101_v30  ;;  %v2576_v30 = vld [vmem:[%s5725_s0 + $0x20] sm:$0xff] }
  0xe1   :  { %830 = vmatmul.mubr.f32.gmra.mxu0 %v100_v31  ;;  %1195 = vmatmul.mubr.f32.gmra.mxu1 %v100_v31 }
  0xe2   :  { %2415 = vmatprep.mubr.msk.f32.mxu0 %vm356_vm0, %v103_v32  ;;  %2465 = vmatprep.mubr.msk.f32.mxu1 %vm356_vm0, %v103_v32 }
  0xe5   :  { %836 = vmatmul.mubr.f32.gmra.mxu0 %v102_v33  ;;  %1201 = vmatmul.mubr.f32.gmra.mxu1 %v102_v33  ;;  %v2577_v33 = vld [vmem:[%s5725_s0 + $0x38] sm:$0xff] }
  0xe6   :  { %2416 = vmatprep.mubr.msk.f32.mxu0 %vm356_vm0, %v105_v34  ;;  %2466 = vmatprep.mubr.msk.f32.mxu1 %vm356_vm0, %v105_v34 }
  0xe9   :  { %842 = vmatmul.mubr.f32.gmra.mxu0 %v104_v35  ;;  %1207 = vmatmul.mubr.f32.gmra.mxu1 %v104_v35 }
  0xea   :  { %2417 = vmatprep.mubr.msk.f32.mxu0 %vm356_vm0, %v107_v37  ;;  %2467 = vmatprep.mubr.msk.f32.mxu1 %vm356_vm0, %v107_v37 }
  0xed   :  { %848 = vmatmul.mubr.f32.gmra.mxu0 %v106_v38  ;;  %1213 = vmatmul.mubr.f32.gmra.mxu1 %v106_v38 }
  0xee   :  { %2418 = vmatprep.mubr.msk.f32.mxu0 %vm356_vm0, %v109_v40  ;;  %2468 = vmatprep.mubr.msk.f32.mxu1 %vm356_vm0, %v109_v40 }
  0xf1   :  { %854 = vmatmul.mubr.f32.gmra.mxu0 %v108_v41  ;;  %1219 = vmatmul.mubr.f32.gmra.mxu1 %v108_v41  ;;  %v2578_v41 = vld [vmem:[%s5725_s0 + $0x30] sm:$0xff] }
  0xf2   :  { %2419 = vmatprep.mubr.msk.f32.mxu0 %vm356_vm0, %v111_v44  ;;  %2469 = vmatprep.mubr.msk.f32.mxu1 %vm356_vm0, %v111_v44  ;;  %v2579_v44 = vld [vmem:[%s5725_s0 + $0x48] sm:$0xff] }
  0xf5   :  { %v573_v54 = vpop.f32.mrf.mxu0  ;;  %860 = vmatmul.mubr.f32.gmra.mxu0 %v110_v49  ;;  %v938_v55 = vpop.f32.mrf.mxu1  ;;  %1225 = vmatmul.mubr.f32.gmra.mxu1 %v110_v49 }
  0xf6   :  { %v574_v56 = vadd.f32 %v573_v54, %v3690_v48  ;;  %v939_v57 = vadd.f32 %v938_v55, %v3695_v50  ;;  %2420 = vmatprep.mubr.msk.f32.mxu0 %vm356_vm0, %v113_v51  ;;  %2470 = vmatprep.mubr.msk.f32.mxu1 %vm356_vm0, %v113_v51  ;;  %v2580_v55 = vld [vmem:[%s5725_s0 + $0x40] sm:$0xff] }
  0xf7   :  { %v575_v59 = vpop.f32.mrf.mxu0  ;;  %v940_v60 = vpop.f32.mrf.mxu1 }
  0xf8   :  { %1967 = vst [vmem:[%s5727_s3] sm:$0xff] %v574_v56  ;;  %1969 = vst [vmem:[%s5727_s3 + $0x10] sm:$0xff] %v939_v57  ;;  %v576_v61 = vadd.f32 %v575_v59, %v3700_v52  ;;  %v941_v62 = vadd.f32 %v940_v60, %v3702_v53 }
  0xf9   :  { %v579_v63 = vpop.f32.mrf.mxu0  ;;  %866 = vmatmul.mubr.f32.gmra.mxu0 %v112_v58  ;;  %v944_v0 = vpop.f32.mrf.mxu1  ;;  %1231 = vmatmul.mubr.f32.gmra.mxu1 %v112_v58  ;;  %v2581_v58 = vld [vmem:[%s5725_s0 + $0x58] sm:$0xff] }
  0xfa   :  { %1968 = vst [vmem:[%s5727_s3 + $0x8] sm:$0xff] %v576_v61  ;;  %1970 = vst [vmem:[%s5727_s3 + $0x18] sm:$0xff] %v941_v62  ;;  %v580_v1 = vadd.f32 %v579_v63, %v3690_v48  ;;  %v945_v2 = vadd.f32 %v944_v0, %v3695_v50  ;;  %2471 = vmatprep.mubr.msk.f32.mxu0 %vm356_vm0, %v2571_v3  ;;  %2521 = vmatprep.mubr.msk.f32.mxu1 %vm356_vm0, %v2571_v3 }
  0xfb   :  { %v581_v4 = vpop.f32.mrf.mxu0  ;;  %v946_v5 = vpop.f32.mrf.mxu1 }
  0xfc   :  { %1975 = vst [vmem:[%s5727_s3 + $0x40] sm:$0xff] %v580_v1  ;;  %1977 = vst [vmem:[%s5727_s3 + $0x50] sm:$0xff] %v945_v2  ;;  %v582_v6 = vadd.f32 %v581_v4, %v3700_v52  ;;  %v947_v7 = vadd.f32 %v946_v5, %v3702_v53  ;;  %v2582_v1 = vld [vmem:[%s5725_s0 + $0x50] sm:$0xff]  ;;  %v2583_v4 = vld [vmem:[%s5725_s0 + $0x68] sm:$0xff] }
  0xfd   :  { %v585_v8 = vpop.f32.mrf.mxu0  ;;  %v950_v9 = vpop.f32.mrf.mxu1  ;;  %1302 = vmatmul.mubr.f32.vlgmr.msra.gmra.mxu0 %v2572_v10  ;;  %1667 = vmatmul.mubr.f32.vlgmr.msra.gmra.mxu1 %v2572_v10 }
  0xfe   :  { %1976 = vst [vmem:[%s5727_s3 + $0x48] sm:$0xff] %v582_v6  ;;  %1978 = vst [vmem:[%s5727_s3 + $0x58] sm:$0xff] %v947_v7  ;;  %v586_v11 = vadd.f32 %v585_v8, %v3690_v48  ;;  %v951_v12 = vadd.f32 %v950_v9, %v3695_v50  ;;  %2472 = vmatprep.mubr.msk.f32.mxu0 %vm356_vm0, %v2573_v13  ;;  %2522 = vmatprep.mubr.msk.f32.mxu1 %vm356_vm0, %v2573_v13 }
  0xff   :  { %v587_v14 = vpop.f32.mrf.mxu0  ;;  %v952_v15 = vpop.f32.mrf.mxu1 }
 0x100   :  { %1983 = vst [vmem:[%s5727_s3 + $0x80] sm:$0xff] %v586_v11  ;;  %1985 = vst [vmem:[%s5727_s3 + $0x90] sm:$0xff] %v951_v12  ;;  %v588_v16 = vadd.f32 %v587_v14, %v3700_v52  ;;  %v953_v17 = vadd.f32 %v952_v15, %v3702_v53  ;;  %v2584_v11 = vld [vmem:[%s5725_s0 + $0x60] sm:$0xff]  ;;  %v2585_v14 = vld [vmem:[%s5725_s0 + $0x78] sm:$0xff] }
 0x101   :  { %v591_v18 = vpop.f32.mrf.mxu0  ;;  %v956_v19 = vpop.f32.mrf.mxu1  ;;  %1308 = vmatmul.mubr.f32.gmra.mxu0 %v2574_v20  ;;  %1673 = vmatmul.mubr.f32.gmra.mxu1 %v2574_v20 }
 0x102   :  { %1984 = vst [vmem:[%s5727_s3 + $0x88] sm:$0xff] %v588_v16  ;;  %1986 = vst [vmem:[%s5727_s3 + $0x98] sm:$0xff] %v953_v17  ;;  %v592_v21 = vadd.f32 %v591_v18, %v3690_v48  ;;  %v957_v22 = vadd.f32 %v956_v19, %v3695_v50  ;;  %2473 = vmatprep.mubr.msk.f32.mxu0 %vm356_vm0, %v2575_v23  ;;  %2523 = vmatprep.mubr.msk.f32.mxu1 %vm356_vm0, %v2575_v23 }
 0x103   :  { %v593_v24 = vpop.f32.mrf.mxu0  ;;  %v958_v25 = vpop.f32.mrf.mxu1 }
 0x104   :  { %1991 = vst [vmem:[%s5727_s3 + $0xc0] sm:$0xff] %v592_v21  ;;  %1993 = vst [vmem:[%s5727_s3 + $0xd0] sm:$0xff] %v957_v22  ;;  %v594_v26 = vadd.f32 %v593_v24, %v3700_v52  ;;  %v959_v27 = vadd.f32 %v958_v25, %v3702_v53  ;;  %v2586_v21 = vld [vmem:[%s5725_s0 + $0x70] sm:$0xff]  ;;  %v2587_v24 = vld [vmem:[%s5725_s0 + $0x88] sm:$0xff] }
 0x105   :  { %v597_v28 = vpop.f32.mrf.mxu0  ;;  %v962_v29 = vpop.f32.mrf.mxu1  ;;  %1314 = vmatmul.mubr.f32.gmra.mxu0 %v2576_v30  ;;  %1679 = vmatmul.mubr.f32.gmra.mxu1 %v2576_v30 }
 0x106   :  { %1992 = vst [vmem:[%s5727_s3 + $0xc8] sm:$0xff] %v594_v26  ;;  %1994 = vst [vmem:[%s5727_s3 + $0xd8] sm:$0xff] %v959_v27  ;;  %v598_v31 = vadd.f32 %v597_v28, %v3690_v48  ;;  %v963_v32 = vadd.f32 %v962_v29, %v3695_v50  ;;  %2474 = vmatprep.mubr.msk.f32.mxu0 %vm356_vm0, %v2577_v33  ;;  %2524 = vmatprep.mubr.msk.f32.mxu1 %vm356_vm0, %v2577_v33 }
 0x107   :  { %v599_v34 = vpop.f32.mrf.mxu0  ;;  %v964_v35 = vpop.f32.mrf.mxu1 }
 0x108   :  { %1999 = vst [vmem:[%s5727_s3 + $0x100] sm:$0xff] %v598_v31  ;;  %2001 = vst [vmem:[%s5727_s3 + $0x110] sm:$0xff] %v963_v32  ;;  %v600_v36 = vadd.f32 %v599_v34, %v3700_v52  ;;  %v965_v37 = vadd.f32 %v964_v35, %v3702_v53  ;;  %v2588_v31 = vld [vmem:[%s5725_s0 + $0x80] sm:$0xff]  ;;  %v2589_v34 = vld [vmem:[%s5725_s0 + $0x98] sm:$0xff] }
 0x109   :  { %v603_v38 = vpop.f32.mrf.mxu0  ;;  %v968_v40 = vpop.f32.mrf.mxu1  ;;  %1320 = vmatmul.mubr.f32.gmra.mxu0 %v2578_v41  ;;  %1685 = vmatmul.mubr.f32.gmra.mxu1 %v2578_v41 }
 0x10a   :  { %2000 = vst [vmem:[%s5727_s3 + $0x108] sm:$0xff] %v600_v36  ;;  %2002 = vst [vmem:[%s5727_s3 + $0x118] sm:$0xff] %v965_v37  ;;  %v604_v42 = vadd.f32 %v603_v38, %v3690_v48  ;;  %v969_v43 = vadd.f32 %v968_v40, %v3695_v50  ;;  %2475 = vmatprep.mubr.msk.f32.mxu0 %vm356_vm0, %v2579_v44  ;;  %2525 = vmatprep.mubr.msk.f32.mxu1 %vm356_vm0, %v2579_v44 }
 0x10b   :  { %v605_v45 = vpop.f32.mrf.mxu0  ;;  %v970_v46 = vpop.f32.mrf.mxu1 }
 0x10c   :  { %2007 = vst [vmem:[%s5727_s3 + $0x140] sm:$0xff] %v604_v42  ;;  %2009 = vst [vmem:[%s5727_s3 + $0x150] sm:$0xff] %v969_v43  ;;  %v606_v47 = vadd.f32 %v605_v45, %v3700_v52  ;;  %v971_v49 = vadd.f32 %v970_v46, %v3702_v53  ;;  %v2590_v42 = vld [vmem:[%s5725_s0 + $0x90] sm:$0xff]  ;;  %v2591_v45 = vld [vmem:[%s5725_s0 + $0xa8] sm:$0xff] }
 0x10d   :  { %v609_v51 = vpop.f32.mrf.mxu0  ;;  %v974_v54 = vpop.f32.mrf.mxu1  ;;  %1326 = vmatmul.mubr.f32.gmra.mxu0 %v2580_v55  ;;  %1691 = vmatmul.mubr.f32.gmra.mxu1 %v2580_v55 }
 0x10e   :  { %2008 = vst [vmem:[%s5727_s3 + $0x148] sm:$0xff] %v606_v47  ;;  %2010 = vst [vmem:[%s5727_s3 + $0x158] sm:$0xff] %v971_v49  ;;  %v610_v56 = vadd.f32 %v609_v51, %v3690_v48  ;;  %v975_v57 = vadd.f32 %v974_v54, %v3695_v50  ;;  %2476 = vmatprep.mubr.msk.f32.mxu0 %vm356_vm0, %v2581_v58  ;;  %2526 = vmatprep.mubr.msk.f32.mxu1 %vm356_vm0, %v2581_v58 }
 0x10f   :  { %v611_v59 = vpop.f32.mrf.mxu0  ;;  %v976_v60 = vpop.f32.mrf.mxu1 }
 0x110   :  { %2015 = vst [vmem:[%s5727_s3 + $0x180] sm:$0xff] %v610_v56  ;;  %2017 = vst [vmem:[%s5727_s3 + $0x190] sm:$0xff] %v975_v57  ;;  %v612_v61 = vadd.f32 %v611_v59, %v3700_v52  ;;  %v977_v62 = vadd.f32 %v976_v60, %v3702_v53  ;;  %v2592_v56 = vld [vmem:[%s5725_s0 + $0xa0] sm:$0xff]  ;;  %v2593_v59 = vld [vmem:[%s5725_s0 + $0xb8] sm:$0xff] }
 0x111   :  { %v615_v63 = vpop.f32.mrf.mxu0  ;;  %v980_v0 = vpop.f32.mrf.mxu1  ;;  %1332 = vmatmul.mubr.f32.gmra.mxu0 %v2582_v1  ;;  %1697 = vmatmul.mubr.f32.gmra.mxu1 %v2582_v1 }
 0x112   :  { %2016 = vst [vmem:[%s5727_s3 + $0x188] sm:$0xff] %v612_v61  ;;  %2018 = vst [vmem:[%s5727_s3 + $0x198] sm:$0xff] %v977_v62  ;;  %v616_v2 = vadd.f32 %v615_v63, %v3690_v48  ;;  %v981_v3 = vadd.f32 %v980_v0, %v3695_v50  ;;  %2477 = vmatprep.mubr.msk.f32.mxu0 %vm356_vm0, %v2583_v4  ;;  %2527 = vmatprep.mubr.msk.f32.mxu1 %vm356_vm0, %v2583_v4 }
 0x113   :  { %v617_v5 = vpop.f32.mrf.mxu0  ;;  %v982_v6 = vpop.f32.mrf.mxu1 }
 0x114   :  { %2023 = vst [vmem:[%s5727_s3 + $0x1c0] sm:$0xff] %v616_v2  ;;  %2025 = vst [vmem:[%s5727_s3 + $0x1d0] sm:$0xff] %v981_v3  ;;  %v618_v7 = vadd.f32 %v617_v5, %v3700_v52  ;;  %v983_v8 = vadd.f32 %v982_v6, %v3702_v53  ;;  %v2594_v2 = vld [vmem:[%s5725_s0 + $0xb0] sm:$0xff]  ;;  %v2595_v5 = vld [vmem:[%s5725_s0 + $0xc8] sm:$0xff] }
 0x115   :  { %v621_v9 = vpop.f32.mrf.mxu0  ;;  %v986_v10 = vpop.f32.mrf.mxu1  ;;  %1338 = vmatmul.mubr.f32.gmra.mxu0 %v2584_v11  ;;  %1703 = vmatmul.mubr.f32.gmra.mxu1 %v2584_v11 }
 0x116   :  { %2024 = vst [vmem:[%s5727_s3 + $0x1c8] sm:$0xff] %v618_v7  ;;  %2026 = vst [vmem:[%s5727_s3 + $0x1d8] sm:$0xff] %v983_v8  ;;  %v622_v12 = vadd.f32 %v621_v9, %v3690_v48  ;;  %v987_v13 = vadd.f32 %v986_v10, %v3695_v50  ;;  %2478 = vmatprep.mubr.msk.f32.mxu0 %vm356_vm0, %v2585_v14  ;;  %2528 = vmatprep.mubr.msk.f32.mxu1 %vm356_vm0, %v2585_v14 }
 0x117   :  { %v623_v15 = vpop.f32.mrf.mxu0  ;;  %v988_v16 = vpop.f32.mrf.mxu1 }
 0x118   :  { %2031 = vst [vmem:[%s5727_s3 + $0x200] sm:$0xff] %v622_v12  ;;  %2033 = vst [vmem:[%s5727_s3 + $0x210] sm:$0xff] %v987_v13  ;;  %v624_v17 = vadd.f32 %v623_v15, %v3700_v52  ;;  %v989_v18 = vadd.f32 %v988_v16, %v3702_v53  ;;  %v2596_v12 = vld [vmem:[%s5725_s0 + $0xc0] sm:$0xff]  ;;  %v2597_v15 = vld [vmem:[%s5725_s0 + $0xd8] sm:$0xff] }
 0x119   :  { %v627_v19 = vpop.f32.mrf.mxu0  ;;  %v992_v20 = vpop.f32.mrf.mxu1  ;;  %1344 = vmatmul.mubr.f32.gmra.mxu0 %v2586_v21  ;;  %1709 = vmatmul.mubr.f32.gmra.mxu1 %v2586_v21 }
 0x11a   :  { %2032 = vst [vmem:[%s5727_s3 + $0x208] sm:$0xff] %v624_v17  ;;  %2034 = vst [vmem:[%s5727_s3 + $0x218] sm:$0xff] %v989_v18  ;;  %v628_v22 = vadd.f32 %v627_v19, %v3690_v48  ;;  %v993_v23 = vadd.f32 %v992_v20, %v3695_v50  ;;  %2479 = vmatprep.mubr.msk.f32.mxu0 %vm356_vm0, %v2587_v24  ;;  %2529 = vmatprep.mubr.msk.f32.mxu1 %vm356_vm0, %v2587_v24 }
 0x11b   :  { %v629_v25 = vpop.f32.mrf.mxu0  ;;  %v994_v26 = vpop.f32.mrf.mxu1 }
 0x11c   :  { %2039 = vst [vmem:[%s5727_s3 + $0x240] sm:$0xff] %v628_v22  ;;  %2041 = vst [vmem:[%s5727_s3 + $0x250] sm:$0xff] %v993_v23  ;;  %v630_v27 = vadd.f32 %v629_v25, %v3700_v52  ;;  %v995_v28 = vadd.f32 %v994_v26, %v3702_v53  ;;  %v2598_v22 = vld [vmem:[%s5725_s0 + $0xd0] sm:$0xff]  ;;  %v2599_v25 = vld [vmem:[%s5725_s0 + $0xe8] sm:$0xff] }
 0x11d   :  { %v633_v29 = vpop.f32.mrf.mxu0  ;;  %v998_v30 = vpop.f32.mrf.mxu1  ;;  %1350 = vmatmul.mubr.f32.gmra.mxu0 %v2588_v31  ;;  %1715 = vmatmul.mubr.f32.gmra.mxu1 %v2588_v31 }
 0x11e   :  { %2040 = vst [vmem:[%s5727_s3 + $0x248] sm:$0xff] %v630_v27  ;;  %2042 = vst [vmem:[%s5727_s3 + $0x258] sm:$0xff] %v995_v28  ;;  %v634_v32 = vadd.f32 %v633_v29, %v3690_v48  ;;  %v999_v33 = vadd.f32 %v998_v30, %v3695_v50  ;;  %2480 = vmatprep.mubr.msk.f32.mxu0 %vm356_vm0, %v2589_v34  ;;  %2530 = vmatprep.mubr.msk.f32.mxu1 %vm356_vm0, %v2589_v34 }
 0x11f   :  { %v635_v35 = vpop.f32.mrf.mxu0  ;;  %v1000_v36 = vpop.f32.mrf.mxu1 }
 0x120   :  { %2047 = vst [vmem:[%s5727_s3 + $0x280] sm:$0xff] %v634_v32  ;;  %2049 = vst [vmem:[%s5727_s3 + $0x290] sm:$0xff] %v999_v33  ;;  %v636_v37 = vadd.f32 %v635_v35, %v3700_v52  ;;  %v1001_v38 = vadd.f32 %v1000_v36, %v3702_v53  ;;  %v2600_v32 = vld [vmem:[%s5725_s0 + $0xe0] sm:$0xff]  ;;  %v2601_v35 = vld [vmem:[%s5725_s0 + $0xf8] sm:$0xff] }
 0x121   :  { %v639_v40 = vpop.f32.mrf.mxu0  ;;  %v1004_v41 = vpop.f32.mrf.mxu1  ;;  %1356 = vmatmul.mubr.f32.gmra.mxu0 %v2590_v42  ;;  %1721 = vmatmul.mubr.f32.gmra.mxu1 %v2590_v42 }
 0x122   :  { %2048 = vst [vmem:[%s5727_s3 + $0x288] sm:$0xff] %v636_v37  ;;  %2050 = vst [vmem:[%s5727_s3 + $0x298] sm:$0xff] %v1001_v38  ;;  %v640_v43 = vadd.f32 %v639_v40, %v3690_v48  ;;  %v1005_v44 = vadd.f32 %v1004_v41, %v3695_v50  ;;  %2481 = vmatprep.mubr.msk.f32.mxu0 %vm356_vm0, %v2591_v45  ;;  %2531 = vmatprep.mubr.msk.f32.mxu1 %vm356_vm0, %v2591_v45 }
 0x123   :  { %v641_v46 = vpop.f32.mrf.mxu0  ;;  %v1006_v47 = vpop.f32.mrf.mxu1 }
 0x124   :  { %2055 = vst [vmem:[%s5727_s3 + $0x2c0] sm:$0xff] %v640_v43  ;;  %2057 = vst [vmem:[%s5727_s3 + $0x2d0] sm:$0xff] %v1005_v44  ;;  %v642_v49 = vadd.f32 %v641_v46, %v3700_v52  ;;  %v1007_v51 = vadd.f32 %v1006_v47, %v3702_v53  ;;  %v2602_v43 = vld [vmem:[%s5725_s0 + $0xf0] sm:$0xff]  ;;  %v2603_v46 = vld [vmem:[%s5725_s0 + $0x108] sm:$0xff] }
 0x125   :  { %v645_v54 = vpop.f32.mrf.mxu0  ;;  %v1010_v55 = vpop.f32.mrf.mxu1  ;;  %1362 = vmatmul.mubr.f32.gmra.mxu0 %v2592_v56  ;;  %1727 = vmatmul.mubr.f32.gmra.mxu1 %v2592_v56 }
 0x126   :  { %2056 = vst [vmem:[%s5727_s3 + $0x2c8] sm:$0xff] %v642_v49  ;;  %2058 = vst [vmem:[%s5727_s3 + $0x2d8] sm:$0xff] %v1007_v51  ;;  %v646_v57 = vadd.f32 %v645_v54, %v3690_v48  ;;  %v1011_v58 = vadd.f32 %v1010_v55, %v3695_v50  ;;  %2482 = vmatprep.mubr.msk.f32.mxu0 %vm356_vm0, %v2593_v59  ;;  %2532 = vmatprep.mubr.msk.f32.mxu1 %vm356_vm0, %v2593_v59 }
 0x127   :  { %v647_v60 = vpop.f32.mrf.mxu0  ;;  %v1012_v61 = vpop.f32.mrf.mxu1 }
 0x128   :  { %2063 = vst [vmem:[%s5727_s3 + $0x300] sm:$0xff] %v646_v57  ;;  %2065 = vst [vmem:[%s5727_s3 + $0x310] sm:$0xff] %v1011_v58  ;;  %v648_v62 = vadd.f32 %v647_v60, %v3700_v52  ;;  %v1013_v63 = vadd.f32 %v1012_v61, %v3702_v53  ;;  %v2604_v57 = vld [vmem:[%s5725_s0 + $0x100] sm:$0xff]  ;;  %v2605_v60 = vld [vmem:[%s5725_s0 + $0x118] sm:$0xff] }
 0x129   :  { %v651_v0 = vpop.f32.mrf.mxu0  ;;  %v1016_v1 = vpop.f32.mrf.mxu1  ;;  %1368 = vmatmul.mubr.f32.gmra.mxu0 %v2594_v2  ;;  %1733 = vmatmul.mubr.f32.gmra.mxu1 %v2594_v2 }
 0x12a   :  { %2064 = vst [vmem:[%s5727_s3 + $0x308] sm:$0xff] %v648_v62  ;;  %2066 = vst [vmem:[%s5727_s3 + $0x318] sm:$0xff] %v1013_v63  ;;  %v652_v3 = vadd.f32 %v651_v0, %v3690_v48  ;;  %v1017_v4 = vadd.f32 %v1016_v1, %v3695_v50  ;;  %2483 = vmatprep.mubr.msk.f32.mxu0 %vm356_vm0, %v2595_v5  ;;  %2533 = vmatprep.mubr.msk.f32.mxu1 %vm356_vm0, %v2595_v5 }
 0x12b   :  { %v653_v6 = vpop.f32.mrf.mxu0  ;;  %v1018_v7 = vpop.f32.mrf.mxu1 }
 0x12c   :  { %2071 = vst [vmem:[%s5727_s3 + $0x340] sm:$0xff] %v652_v3  ;;  %2073 = vst [vmem:[%s5727_s3 + $0x350] sm:$0xff] %v1017_v4  ;;  %v654_v8 = vadd.f32 %v653_v6, %v3700_v52  ;;  %v1019_v9 = vadd.f32 %v1018_v7, %v3702_v53  ;;  %v2606_v3 = vld [vmem:[%s5725_s0 + $0x110] sm:$0xff]  ;;  %v2607_v6 = vld [vmem:[%s5725_s0 + $0x128] sm:$0xff] }
 0x12d   :  { %v657_v10 = vpop.f32.mrf.mxu0  ;;  %v1022_v11 = vpop.f32.mrf.mxu1  ;;  %1374 = vmatmul.mubr.f32.gmra.mxu0 %v2596_v12  ;;  %1739 = vmatmul.mubr.f32.gmra.mxu1 %v2596_v12 }
 0x12e   :  { %2072 = vst [vmem:[%s5727_s3 + $0x348] sm:$0xff] %v654_v8  ;;  %2074 = vst [vmem:[%s5727_s3 + $0x358] sm:$0xff] %v1019_v9  ;;  %v658_v13 = vadd.f32 %v657_v10, %v3690_v48  ;;  %v1023_v14 = vadd.f32 %v1022_v11, %v3695_v50  ;;  %2484 = vmatprep.mubr.msk.f32.mxu0 %vm356_vm0, %v2597_v15  ;;  %2534 = vmatprep.mubr.msk.f32.mxu1 %vm356_vm0, %v2597_v15 }
 0x12f   :  { %v659_v16 = vpop.f32.mrf.mxu0  ;;  %v1024_v17 = vpop.f32.mrf.mxu1 }
 0x130   :  { %2079 = vst [vmem:[%s5727_s3 + $0x380] sm:$0xff] %v658_v13  ;;  %2081 = vst [vmem:[%s5727_s3 + $0x390] sm:$0xff] %v1023_v14  ;;  %v660_v18 = vadd.f32 %v659_v16, %v3700_v52  ;;  %v1025_v19 = vadd.f32 %v1024_v17, %v3702_v53  ;;  %v2608_v13 = vld [vmem:[%s5725_s0 + $0x120] sm:$0xff]  ;;  %v2609_v16 = vld [vmem:[%s5725_s0 + $0x138] sm:$0xff] }
 0x131   :  { %v663_v20 = vpop.f32.mrf.mxu0  ;;  %v1028_v21 = vpop.f32.mrf.mxu1  ;;  %1380 = vmatmul.mubr.f32.gmra.mxu0 %v2598_v22  ;;  %1745 = vmatmul.mubr.f32.gmra.mxu1 %v2598_v22 }
 0x132   :  { %2080 = vst [vmem:[%s5727_s3 + $0x388] sm:$0xff] %v660_v18  ;;  %2082 = vst [vmem:[%s5727_s3 + $0x398] sm:$0xff] %v1025_v19  ;;  %v664_v23 = vadd.f32 %v663_v20, %v3690_v48  ;;  %v1029_v24 = vadd.f32 %v1028_v21, %v3695_v50  ;;  %2485 = vmatprep.mubr.msk.f32.mxu0 %vm356_vm0, %v2599_v25  ;;  %2535 = vmatprep.mubr.msk.f32.mxu1 %vm356_vm0, %v2599_v25 }
 0x133   :  { %v665_v26 = vpop.f32.mrf.mxu0  ;;  %v1030_v27 = vpop.f32.mrf.mxu1 }
 0x134   :  { %2087 = vst [vmem:[%s5727_s3 + $0x3c0] sm:$0xff] %v664_v23  ;;  %2089 = vst [vmem:[%s5727_s3 + $0x3d0] sm:$0xff] %v1029_v24  ;;  %v666_v28 = vadd.f32 %v665_v26, %v3700_v52  ;;  %v1031_v29 = vadd.f32 %v1030_v27, %v3702_v53  ;;  %v2610_v23 = vld [vmem:[%s5725_s0 + $0x130] sm:$0xff]  ;;  %v2611_v26 = vld [vmem:[%s5725_s0 + $0x148] sm:$0xff] }
 0x135   :  { %v669_v30 = vpop.f32.mrf.mxu0  ;;  %v1034_v31 = vpop.f32.mrf.mxu1  ;;  %1386 = vmatmul.mubr.f32.gmra.mxu0 %v2600_v32  ;;  %1751 = vmatmul.mubr.f32.gmra.mxu1 %v2600_v32 }
 0x136   :  { %2088 = vst [vmem:[%s5727_s3 + $0x3c8] sm:$0xff] %v666_v28  ;;  %2090 = vst [vmem:[%s5727_s3 + $0x3d8] sm:$0xff] %v1031_v29  ;;  %v670_v33 = vadd.f32 %v669_v30, %v3690_v48  ;;  %v1035_v34 = vadd.f32 %v1034_v31, %v3695_v50  ;;  %2486 = vmatprep.mubr.msk.f32.mxu0 %vm356_vm0, %v2601_v35  ;;  %2536 = vmatprep.mubr.msk.f32.mxu1 %vm356_vm0, %v2601_v35 }
 0x137   :  { %v671_v36 = vpop.f32.mrf.mxu0  ;;  %v1036_v37 = vpop.f32.mrf.mxu1 }
 0x138   :  { %2095 = vst [vmem:[%s5727_s3 + $0x400] sm:$0xff] %v670_v33  ;;  %2097 = vst [vmem:[%s5727_s3 + $0x410] sm:$0xff] %v1035_v34  ;;  %v672_v38 = vadd.f32 %v671_v36, %v3700_v52  ;;  %v1037_v40 = vadd.f32 %v1036_v37, %v3702_v53  ;;  %v2612_v33 = vld [vmem:[%s5725_s0 + $0x140] sm:$0xff]  ;;  %v2613_v36 = vld [vmem:[%s5725_s0 + $0x158] sm:$0xff] }
 0x139   :  { %v675_v41 = vpop.f32.mrf.mxu0  ;;  %v1040_v42 = vpop.f32.mrf.mxu1  ;;  %1392 = vmatmul.mubr.f32.gmra.mxu0 %v2602_v43  ;;  %1757 = vmatmul.mubr.f32.gmra.mxu1 %v2602_v43 }
 0x13a   :  { %2096 = vst [vmem:[%s5727_s3 + $0x408] sm:$0xff] %v672_v38  ;;  %2098 = vst [vmem:[%s5727_s3 + $0x418] sm:$0xff] %v1037_v40  ;;  %v676_v44 = vadd.f32 %v675_v41, %v3690_v48  ;;  %v1041_v45 = vadd.f32 %v1040_v42, %v3695_v50  ;;  %2487 = vmatprep.mubr.msk.f32.mxu0 %vm356_vm0, %v2603_v46  ;;  %2537 = vmatprep.mubr.msk.f32.mxu1 %vm356_vm0, %v2603_v46 }
 0x13b   :  { %v677_v47 = vpop.f32.mrf.mxu0  ;;  %v1042_v49 = vpop.f32.mrf.mxu1 }
 0x13c   :  { %2103 = vst [vmem:[%s5727_s3 + $0x440] sm:$0xff] %v676_v44  ;;  %2105 = vst [vmem:[%s5727_s3 + $0x450] sm:$0xff] %v1041_v45  ;;  %v678_v51 = vadd.f32 %v677_v47, %v3700_v52  ;;  %v1043_v54 = vadd.f32 %v1042_v49, %v3702_v53  ;;  %v2614_v44 = vld [vmem:[%s5725_s0 + $0x150] sm:$0xff]  ;;  %v2615_v47 = vld [vmem:[%s5725_s0 + $0x168] sm:$0xff] }
 0x13d   :  { %v681_v55 = vpop.f32.mrf.mxu0  ;;  %v1046_v56 = vpop.f32.mrf.mxu1  ;;  %1398 = vmatmul.mubr.f32.gmra.mxu0 %v2604_v57  ;;  %1763 = vmatmul.mubr.f32.gmra.mxu1 %v2604_v57 }
 0x13e   :  { %2104 = vst [vmem:[%s5727_s3 + $0x448] sm:$0xff] %v678_v51  ;;  %2106 = vst [vmem:[%s5727_s3 + $0x458] sm:$0xff] %v1043_v54  ;;  %v682_v58 = vadd.f32 %v681_v55, %v3690_v48  ;;  %v1047_v59 = vadd.f32 %v1046_v56, %v3695_v50  ;;  %2488 = vmatprep.mubr.msk.f32.mxu0 %vm356_vm0, %v2605_v60  ;;  %2538 = vmatprep.mubr.msk.f32.mxu1 %vm356_vm0, %v2605_v60 }
 0x13f   :  { %v683_v61 = vpop.f32.mrf.mxu0  ;;  %v1048_v62 = vpop.f32.mrf.mxu1 }
 0x140   :  { %2111 = vst [vmem:[%s5727_s3 + $0x480] sm:$0xff] %v682_v58  ;;  %2113 = vst [vmem:[%s5727_s3 + $0x490] sm:$0xff] %v1047_v59  ;;  %v684_v63 = vadd.f32 %v683_v61, %v3700_v52  ;;  %v1049_v0 = vadd.f32 %v1048_v62, %v3702_v53  ;;  %v2616_v58 = vld [vmem:[%s5725_s0 + $0x160] sm:$0xff]  ;;  %v2617_v61 = vld [vmem:[%s5725_s0 + $0x178] sm:$0xff] }
 0x141   :  { %v687_v1 = vpop.f32.mrf.mxu0  ;;  %v1052_v2 = vpop.f32.mrf.mxu1  ;;  %1404 = vmatmul.mubr.f32.gmra.mxu0 %v2606_v3  ;;  %1769 = vmatmul.mubr.f32.gmra.mxu1 %v2606_v3 }
 0x142   :  { %2112 = vst [vmem:[%s5727_s3 + $0x488] sm:$0xff] %v684_v63  ;;  %2114 = vst [vmem:[%s5727_s3 + $0x498] sm:$0xff] %v1049_v0  ;;  %v688_v4 = vadd.f32 %v687_v1, %v3690_v48  ;;  %v1053_v5 = vadd.f32 %v1052_v2, %v3695_v50  ;;  %2489 = vmatprep.mubr.msk.f32.mxu0 %vm356_vm0, %v2607_v6  ;;  %2539 = vmatprep.mubr.msk.f32.mxu1 %vm356_vm0, %v2607_v6 }
 0x143   :  { %v689_v7 = vpop.f32.mrf.mxu0  ;;  %v1054_v8 = vpop.f32.mrf.mxu1 }
 0x144   :  { %2119 = vst [vmem:[%s5727_s3 + $0x4c0] sm:$0xff] %v688_v4  ;;  %2121 = vst [vmem:[%s5727_s3 + $0x4d0] sm:$0xff] %v1053_v5  ;;  %v690_v9 = vadd.f32 %v689_v7, %v3700_v52  ;;  %v1055_v10 = vadd.f32 %v1054_v8, %v3702_v53  ;;  %v2618_v4 = vld [vmem:[%s5725_s0 + $0x170] sm:$0xff]  ;;  %v2619_v7 = vld [vmem:[%s5725_s0 + $0x188] sm:$0xff] }
 0x145   :  { %v693_v11 = vpop.f32.mrf.mxu0  ;;  %v1058_v12 = vpop.f32.mrf.mxu1  ;;  %1410 = vmatmul.mubr.f32.gmra.mxu0 %v2608_v13  ;;  %1775 = vmatmul.mubr.f32.gmra.mxu1 %v2608_v13 }
 0x146   :  { %2120 = vst [vmem:[%s5727_s3 + $0x4c8] sm:$0xff] %v690_v9  ;;  %2122 = vst [vmem:[%s5727_s3 + $0x4d8] sm:$0xff] %v1055_v10  ;;  %v694_v14 = vadd.f32 %v693_v11, %v3690_v48  ;;  %v1059_v15 = vadd.f32 %v1058_v12, %v3695_v50  ;;  %2490 = vmatprep.mubr.msk.f32.mxu0 %vm356_vm0, %v2609_v16  ;;  %2540 = vmatprep.mubr.msk.f32.mxu1 %vm356_vm0, %v2609_v16 }
 0x147   :  { %v695_v17 = vpop.f32.mrf.mxu0  ;;  %v1060_v18 = vpop.f32.mrf.mxu1 }
 0x148   :  { %2127 = vst [vmem:[%s5727_s3 + $0x500] sm:$0xff] %v694_v14  ;;  %2129 = vst [vmem:[%s5727_s3 + $0x510] sm:$0xff] %v1059_v15  ;;  %v696_v19 = vadd.f32 %v695_v17, %v3700_v52  ;;  %v1061_v20 = vadd.f32 %v1060_v18, %v3702_v53  ;;  %v2620_v14 = vld [vmem:[%s5725_s0 + $0x180] sm:$0xff]  ;;  %v2621_v17 = vld [vmem:[%s5725_s0 + $0x198] sm:$0xff] }
 0x149   :  { %v699_v21 = vpop.f32.mrf.mxu0  ;;  %v1064_v22 = vpop.f32.mrf.mxu1  ;;  %1416 = vmatmul.mubr.f32.gmra.mxu0 %v2610_v23  ;;  %1781 = vmatmul.mubr.f32.gmra.mxu1 %v2610_v23 }
 0x14a   :  { %2128 = vst [vmem:[%s5727_s3 + $0x508] sm:$0xff] %v696_v19  ;;  %2130 = vst [vmem:[%s5727_s3 + $0x518] sm:$0xff] %v1061_v20  ;;  %v700_v24 = vadd.f32 %v699_v21, %v3690_v48  ;;  %v1065_v25 = vadd.f32 %v1064_v22, %v3695_v50  ;;  %2491 = vmatprep.mubr.msk.f32.mxu0 %vm356_vm0, %v2611_v26  ;;  %2541 = vmatprep.mubr.msk.f32.mxu1 %vm356_vm0, %v2611_v26 }
 0x14b   :  { %v701_v27 = vpop.f32.mrf.mxu0  ;;  %v1066_v28 = vpop.f32.mrf.mxu1 }
 0x14c   :  { %2135 = vst [vmem:[%s5727_s3 + $0x540] sm:$0xff] %v700_v24  ;;  %2137 = vst [vmem:[%s5727_s3 + $0x550] sm:$0xff] %v1065_v25  ;;  %v702_v29 = vadd.f32 %v701_v27, %v3700_v52  ;;  %v1067_v30 = vadd.f32 %v1066_v28, %v3702_v53  ;;  %v2622_v24 = vld [vmem:[%s5725_s0 + $0x190] sm:$0xff]  ;;  %v2623_v27 = vld [vmem:[%s5725_s0 + $0x1a8] sm:$0xff] }
 0x14d   :  { %v705_v31 = vpop.f32.mrf.mxu0  ;;  %v1070_v32 = vpop.f32.mrf.mxu1  ;;  %1422 = vmatmul.mubr.f32.gmra.mxu0 %v2612_v33  ;;  %1787 = vmatmul.mubr.f32.gmra.mxu1 %v2612_v33 }
 0x14e   :  { %2136 = vst [vmem:[%s5727_s3 + $0x548] sm:$0xff] %v702_v29  ;;  %2138 = vst [vmem:[%s5727_s3 + $0x558] sm:$0xff] %v1067_v30  ;;  %v706_v34 = vadd.f32 %v705_v31, %v3690_v48  ;;  %v1071_v35 = vadd.f32 %v1070_v32, %v3695_v50  ;;  %2492 = vmatprep.mubr.msk.f32.mxu0 %vm356_vm0, %v2613_v36  ;;  %2542 = vmatprep.mubr.msk.f32.mxu1 %vm356_vm0, %v2613_v36 }
 0x14f   :  { %v707_v37 = vpop.f32.mrf.mxu0  ;;  %v1072_v38 = vpop.f32.mrf.mxu1 }
 0x150   :  { %2143 = vst [vmem:[%s5727_s3 + $0x580] sm:$0xff] %v706_v34  ;;  %2145 = vst [vmem:[%s5727_s3 + $0x590] sm:$0xff] %v1071_v35  ;;  %v708_v40 = vadd.f32 %v707_v37, %v3700_v52  ;;  %v1073_v41 = vadd.f32 %v1072_v38, %v3702_v53  ;;  %v2624_v34 = vld [vmem:[%s5725_s0 + $0x1a0] sm:$0xff]  ;;  %v2625_v37 = vld [vmem:[%s5725_s0 + $0x1b8] sm:$0xff] }
 0x151   :  { %v711_v42 = vpop.f32.mrf.mxu0  ;;  %v1076_v43 = vpop.f32.mrf.mxu1  ;;  %1428 = vmatmul.mubr.f32.gmra.mxu0 %v2614_v44  ;;  %1793 = vmatmul.mubr.f32.gmra.mxu1 %v2614_v44 }
 0x152   :  { %2144 = vst [vmem:[%s5727_s3 + $0x588] sm:$0xff] %v708_v40  ;;  %2146 = vst [vmem:[%s5727_s3 + $0x598] sm:$0xff] %v1073_v41  ;;  %v712_v45 = vadd.f32 %v711_v42, %v3690_v48  ;;  %v1077_v46 = vadd.f32 %v1076_v43, %v3695_v50  ;;  %2493 = vmatprep.mubr.msk.f32.mxu0 %vm356_vm0, %v2615_v47  ;;  %2543 = vmatprep.mubr.msk.f32.mxu1 %vm356_vm0, %v2615_v47 }
 0x153   :  { %v713_v49 = vpop.f32.mrf.mxu0  ;;  %v1078_v51 = vpop.f32.mrf.mxu1 }
 0x154   :  { %2151 = vst [vmem:[%s5727_s3 + $0x5c0] sm:$0xff] %v712_v45  ;;  %2153 = vst [vmem:[%s5727_s3 + $0x5d0] sm:$0xff] %v1077_v46  ;;  %v714_v54 = vadd.f32 %v713_v49, %v3700_v52  ;;  %v1079_v55 = vadd.f32 %v1078_v51, %v3702_v53  ;;  %v2626_v45 = vld [vmem:[%s5725_s0 + $0x1b0] sm:$0xff]  ;;  %v2627_v49 = vld [vmem:[%s5725_s0 + $0x1c8] sm:$0xff] }
 0x155   :  { %v717_v56 = vpop.f32.mrf.mxu0  ;;  %v1082_v57 = vpop.f32.mrf.mxu1  ;;  %1434 = vmatmul.mubr.f32.gmra.mxu0 %v2616_v58  ;;  %1799 = vmatmul.mubr.f32.gmra.mxu1 %v2616_v58 }
 0x156   :  { %2152 = vst [vmem:[%s5727_s3 + $0x5c8] sm:$0xff] %v714_v54  ;;  %2154 = vst [vmem:[%s5727_s3 + $0x5d8] sm:$0xff] %v1079_v55  ;;  %v718_v59 = vadd.f32 %v717_v56, %v3690_v48  ;;  %v1083_v60 = vadd.f32 %v1082_v57, %v3695_v50  ;;  %2494 = vmatprep.mubr.msk.f32.mxu0 %vm356_vm0, %v2617_v61  ;;  %2544 = vmatprep.mubr.msk.f32.mxu1 %vm356_vm0, %v2617_v61 }
 0x157   :  { %v719_v62 = vpop.f32.mrf.mxu0  ;;  %v1084_v63 = vpop.f32.mrf.mxu1 }
 0x158   :  { %2159 = vst [vmem:[%s5727_s3 + $0x600] sm:$0xff] %v718_v59  ;;  %2161 = vst [vmem:[%s5727_s3 + $0x610] sm:$0xff] %v1083_v60  ;;  %v720_v0 = vadd.f32 %v719_v62, %v3700_v52  ;;  %v1085_v1 = vadd.f32 %v1084_v63, %v3702_v53  ;;  %v2628_v59 = vld [vmem:[%s5725_s0 + $0x1c0] sm:$0xff]  ;;  %v2629_v62 = vld [vmem:[%s5725_s0 + $0x1d8] sm:$0xff] }
 0x159   :  { %v723_v2 = vpop.f32.mrf.mxu0  ;;  %v1088_v3 = vpop.f32.mrf.mxu1  ;;  %1440 = vmatmul.mubr.f32.gmra.mxu0 %v2618_v4  ;;  %1805 = vmatmul.mubr.f32.gmra.mxu1 %v2618_v4 }
 0x15a   :  { %2160 = vst [vmem:[%s5727_s3 + $0x608] sm:$0xff] %v720_v0  ;;  %2162 = vst [vmem:[%s5727_s3 + $0x618] sm:$0xff] %v1085_v1  ;;  %v724_v5 = vadd.f32 %v723_v2, %v3690_v48  ;;  %v1089_v6 = vadd.f32 %v1088_v3, %v3695_v50  ;;  %2495 = vmatprep.mubr.msk.f32.mxu0 %vm356_vm0, %v2619_v7  ;;  %2545 = vmatprep.mubr.msk.f32.mxu1 %vm356_vm0, %v2619_v7 }
 0x15b   :  { %v725_v8 = vpop.f32.mrf.mxu0  ;;  %v1090_v9 = vpop.f32.mrf.mxu1 }
 0x15c   :  { %2167 = vst [vmem:[%s5727_s3 + $0x640] sm:$0xff] %v724_v5  ;;  %2169 = vst [vmem:[%s5727_s3 + $0x650] sm:$0xff] %v1089_v6  ;;  %v726_v10 = vadd.f32 %v725_v8, %v3700_v52  ;;  %v1091_v11 = vadd.f32 %v1090_v9, %v3702_v53  ;;  %v2630_v5 = vld [vmem:[%s5725_s0 + $0x1d0] sm:$0xff]  ;;  %v2631_v8 = vld [vmem:[%s5725_s0 + $0x1e8] sm:$0xff] }
 0x15d   :  { %v729_v12 = vpop.f32.mrf.mxu0  ;;  %v1094_v13 = vpop.f32.mrf.mxu1  ;;  %1446 = vmatmul.mubr.f32.gmra.mxu0 %v2620_v14  ;;  %1811 = vmatmul.mubr.f32.gmra.mxu1 %v2620_v14 }
 0x15e   :  { %2168 = vst [vmem:[%s5727_s3 + $0x648] sm:$0xff] %v726_v10  ;;  %2170 = vst [vmem:[%s5727_s3 + $0x658] sm:$0xff] %v1091_v11  ;;  %v730_v15 = vadd.f32 %v729_v12, %v3690_v48  ;;  %v1095_v16 = vadd.f32 %v1094_v13, %v3695_v50  ;;  %2496 = vmatprep.mubr.msk.f32.mxu0 %vm356_vm0, %v2621_v17  ;;  %2546 = vmatprep.mubr.msk.f32.mxu1 %vm356_vm0, %v2621_v17 }
 0x15f   :  { %v731_v18 = vpop.f32.mrf.mxu0  ;;  %v1096_v19 = vpop.f32.mrf.mxu1 }
 0x160   :  { %2175 = vst [vmem:[%s5727_s3 + $0x680] sm:$0xff] %v730_v15  ;;  %2177 = vst [vmem:[%s5727_s3 + $0x690] sm:$0xff] %v1095_v16  ;;  %v732_v20 = vadd.f32 %v731_v18, %v3700_v52  ;;  %v1097_v21 = vadd.f32 %v1096_v19, %v3702_v53  ;;  %v2632_v15 = vld [vmem:[%s5725_s0 + $0x1e0] sm:$0xff]  ;;  %v2633_v18 = vld [vmem:[%s5725_s0 + $0x1f8] sm:$0xff] }
 0x161   :  { %v735_v22 = vpop.f32.mrf.mxu0  ;;  %v1100_v23 = vpop.f32.mrf.mxu1  ;;  %1452 = vmatmul.mubr.f32.gmra.mxu0 %v2622_v24  ;;  %1817 = vmatmul.mubr.f32.gmra.mxu1 %v2622_v24 }
 0x162   :  { %2176 = vst [vmem:[%s5727_s3 + $0x688] sm:$0xff] %v732_v20  ;;  %2178 = vst [vmem:[%s5727_s3 + $0x698] sm:$0xff] %v1097_v21  ;;  %v736_v25 = vadd.f32 %v735_v22, %v3690_v48  ;;  %v1101_v26 = vadd.f32 %v1100_v23, %v3695_v50  ;;  %2497 = vmatprep.mubr.msk.f32.mxu0 %vm356_vm0, %v2623_v27  ;;  %2547 = vmatprep.mubr.msk.f32.mxu1 %vm356_vm0, %v2623_v27 }
 0x163   :  { %v737_v28 = vpop.f32.mrf.mxu0  ;;  %v1102_v29 = vpop.f32.mrf.mxu1 }
 0x164   :  { %2183 = vst [vmem:[%s5727_s3 + $0x6c0] sm:$0xff] %v736_v25  ;;  %2185 = vst [vmem:[%s5727_s3 + $0x6d0] sm:$0xff] %v1101_v26  ;;  %v738_v30 = vadd.f32 %v737_v28, %v3700_v52  ;;  %v1103_v31 = vadd.f32 %v1102_v29, %v3702_v53  ;;  %v2634_v25 = vld [vmem:[%s5725_s0 + $0x1f0] sm:$0xff]  ;;  %v2635_v28 = vld [vmem:[%s5725_s0 + $0x208] sm:$0xff] }
 0x165   :  { %v741_v32 = vpop.f32.mrf.mxu0  ;;  %v1106_v33 = vpop.f32.mrf.mxu1  ;;  %1458 = vmatmul.mubr.f32.gmra.mxu0 %v2624_v34  ;;  %1823 = vmatmul.mubr.f32.gmra.mxu1 %v2624_v34 }
 0x166   :  { %2184 = vst [vmem:[%s5727_s3 + $0x6c8] sm:$0xff] %v738_v30  ;;  %2186 = vst [vmem:[%s5727_s3 + $0x6d8] sm:$0xff] %v1103_v31  ;;  %v742_v35 = vadd.f32 %v741_v32, %v3690_v48  ;;  %v1107_v36 = vadd.f32 %v1106_v33, %v3695_v50  ;;  %2498 = vmatprep.mubr.msk.f32.mxu0 %vm356_vm0, %v2625_v37  ;;  %2548 = vmatprep.mubr.msk.f32.mxu1 %vm356_vm0, %v2625_v37 }
 0x167   :  { %v743_v38 = vpop.f32.mrf.mxu0  ;;  %v1108_v40 = vpop.f32.mrf.mxu1 }
 0x168   :  { %2191 = vst [vmem:[%s5727_s3 + $0x700] sm:$0xff] %v742_v35  ;;  %2193 = vst [vmem:[%s5727_s3 + $0x710] sm:$0xff] %v1107_v36  ;;  %v744_v41 = vadd.f32 %v743_v38, %v3700_v52  ;;  %v1109_v42 = vadd.f32 %v1108_v40, %v3702_v53  ;;  %v2636_v35 = vld [vmem:[%s5725_s0 + $0x200] sm:$0xff]  ;;  %v2637_v38 = vld [vmem:[%s5725_s0 + $0x218] sm:$0xff] }
 0x169   :  { %v747_v43 = vpop.f32.mrf.mxu0  ;;  %v1112_v44 = vpop.f32.mrf.mxu1  ;;  %1464 = vmatmul.mubr.f32.gmra.mxu0 %v2626_v45  ;;  %1829 = vmatmul.mubr.f32.gmra.mxu1 %v2626_v45 }
 0x16a   :  { %2192 = vst [vmem:[%s5727_s3 + $0x708] sm:$0xff] %v744_v41  ;;  %2194 = vst [vmem:[%s5727_s3 + $0x718] sm:$0xff] %v1109_v42  ;;  %v748_v46 = vadd.f32 %v747_v43, %v3690_v48  ;;  %v1113_v47 = vadd.f32 %v1112_v44, %v3695_v50  ;;  %2499 = vmatprep.mubr.msk.f32.mxu0 %vm356_vm0, %v2627_v49  ;;  %2549 = vmatprep.mubr.msk.f32.mxu1 %vm356_vm0, %v2627_v49 }
 0x16b   :  { %v749_v51 = vpop.f32.mrf.mxu0  ;;  %v1114_v54 = vpop.f32.mrf.mxu1 }
 0x16c   :  { %2199 = vst [vmem:[%s5727_s3 + $0x740] sm:$0xff] %v748_v46  ;;  %2201 = vst [vmem:[%s5727_s3 + $0x750] sm:$0xff] %v1113_v47  ;;  %v750_v55 = vadd.f32 %v749_v51, %v3700_v52  ;;  %v1115_v56 = vadd.f32 %v1114_v54, %v3702_v53  ;;  %v2638_v46 = vld [vmem:[%s5725_s0 + $0x210] sm:$0xff]  ;;  %v2639_v51 = vld [vmem:[%s5725_s0 + $0x228] sm:$0xff] }
 0x16d   :  { %v753_v57 = vpop.f32.mrf.mxu0  ;;  %v1118_v58 = vpop.f32.mrf.mxu1  ;;  %1470 = vmatmul.mubr.f32.gmra.mxu0 %v2628_v59  ;;  %1835 = vmatmul.mubr.f32.gmra.mxu1 %v2628_v59 }
 0x16e   :  { %2200 = vst [vmem:[%s5727_s3 + $0x748] sm:$0xff] %v750_v55  ;;  %2202 = vst [vmem:[%s5727_s3 + $0x758] sm:$0xff] %v1115_v56  ;;  %v754_v60 = vadd.f32 %v753_v57, %v3690_v48  ;;  %v1119_v61 = vadd.f32 %v1118_v58, %v3695_v50  ;;  %2500 = vmatprep.mubr.msk.f32.mxu0 %vm356_vm0, %v2629_v62  ;;  %2550 = vmatprep.mubr.msk.f32.mxu1 %vm356_vm0, %v2629_v62 }
 0x16f   :  { %v755_v63 = vpop.f32.mrf.mxu0  ;;  %v1120_v0 = vpop.f32.mrf.mxu1 }
 0x170   :  { %2207 = vst [vmem:[%s5727_s3 + $0x780] sm:$0xff] %v754_v60  ;;  %2209 = vst [vmem:[%s5727_s3 + $0x790] sm:$0xff] %v1119_v61  ;;  %v756_v1 = vadd.f32 %v755_v63, %v3700_v52  ;;  %v1121_v2 = vadd.f32 %v1120_v0, %v3702_v53  ;;  %v2640_v60 = vld [vmem:[%s5725_s0 + $0x220] sm:$0xff]  ;;  %v2641_v63 = vld [vmem:[%s5725_s0 + $0x238] sm:$0xff] }
 0x171   :  { %v759_v3 = vpop.f32.mrf.mxu0  ;;  %v1124_v4 = vpop.f32.mrf.mxu1  ;;  %1476 = vmatmul.mubr.f32.gmra.mxu0 %v2630_v5  ;;  %1841 = vmatmul.mubr.f32.gmra.mxu1 %v2630_v5 }
 0x172   :  { %2208 = vst [vmem:[%s5727_s3 + $0x788] sm:$0xff] %v756_v1  ;;  %2210 = vst [vmem:[%s5727_s3 + $0x798] sm:$0xff] %v1121_v2  ;;  %v760_v6 = vadd.f32 %v759_v3, %v3690_v48  ;;  %v1125_v7 = vadd.f32 %v1124_v4, %v3695_v50  ;;  %2501 = vmatprep.mubr.msk.f32.mxu0 %vm356_vm0, %v2631_v8  ;;  %2551 = vmatprep.mubr.msk.f32.mxu1 %vm356_vm0, %v2631_v8 }
 0x173   :  { %v761_v9 = vpop.f32.mrf.mxu0  ;;  %v1126_v10 = vpop.f32.mrf.mxu1 }
 0x174   :  { %2215 = vst [vmem:[%s5727_s3 + $0x7c0] sm:$0xff] %v760_v6  ;;  %2217 = vst [vmem:[%s5727_s3 + $0x7d0] sm:$0xff] %v1125_v7  ;;  %v762_v11 = vadd.f32 %v761_v9, %v3700_v52  ;;  %v1127_v12 = vadd.f32 %v1126_v10, %v3702_v53  ;;  %v2642_v6 = vld [vmem:[%s5725_s0 + $0x230] sm:$0xff]  ;;  %v2643_v9 = vld [vmem:[%s5725_s0 + $0x248] sm:$0xff] }
 0x175   :  { %v765_v13 = vpop.f32.mrf.mxu0  ;;  %v1130_v14 = vpop.f32.mrf.mxu1  ;;  %1482 = vmatmul.mubr.f32.gmra.mxu0 %v2632_v15  ;;  %1847 = vmatmul.mubr.f32.gmra.mxu1 %v2632_v15 }
 0x176   :  { %2216 = vst [vmem:[%s5727_s3 + $0x7c8] sm:$0xff] %v762_v11  ;;  %2218 = vst [vmem:[%s5727_s3 + $0x7d8] sm:$0xff] %v1127_v12  ;;  %v766_v16 = vadd.f32 %v765_v13, %v3690_v48  ;;  %v1131_v17 = vadd.f32 %v1130_v14, %v3695_v50  ;;  %2502 = vmatprep.mubr.msk.f32.mxu0 %vm356_vm0, %v2633_v18  ;;  %2552 = vmatprep.mubr.msk.f32.mxu1 %vm356_vm0, %v2633_v18 }
 0x177   :  { %v767_v19 = vpop.f32.mrf.mxu0  ;;  %v1132_v20 = vpop.f32.mrf.mxu1 }
 0x178   :  { %2223 = vst [vmem:[%s5727_s3 + $0x800] sm:$0xff] %v766_v16  ;;  %2225 = vst [vmem:[%s5727_s3 + $0x810] sm:$0xff] %v1131_v17  ;;  %v768_v21 = vadd.f32 %v767_v19, %v3700_v52  ;;  %v1133_v22 = vadd.f32 %v1132_v20, %v3702_v53  ;;  %v2644_v16 = vld [vmem:[%s5725_s0 + $0x240] sm:$0xff]  ;;  %v2645_v19 = vld [vmem:[%s5725_s0 + $0x258] sm:$0xff] }
 0x179   :  { %v771_v23 = vpop.f32.mrf.mxu0  ;;  %v1136_v24 = vpop.f32.mrf.mxu1  ;;  %1488 = vmatmul.mubr.f32.gmra.mxu0 %v2634_v25  ;;  %1853 = vmatmul.mubr.f32.gmra.mxu1 %v2634_v25 }
 0x17a   :  { %2224 = vst [vmem:[%s5727_s3 + $0x808] sm:$0xff] %v768_v21  ;;  %2226 = vst [vmem:[%s5727_s3 + $0x818] sm:$0xff] %v1133_v22  ;;  %v772_v26 = vadd.f32 %v771_v23, %v3690_v48  ;;  %v1137_v27 = vadd.f32 %v1136_v24, %v3695_v50  ;;  %2503 = vmatprep.mubr.msk.f32.mxu0 %vm356_vm0, %v2635_v28  ;;  %2553 = vmatprep.mubr.msk.f32.mxu1 %vm356_vm0, %v2635_v28 }
 0x17b   :  { %v773_v29 = vpop.f32.mrf.mxu0  ;;  %v1138_v30 = vpop.f32.mrf.mxu1 }
 0x17c   :  { %2231 = vst [vmem:[%s5727_s3 + $0x840] sm:$0xff] %v772_v26  ;;  %2233 = vst [vmem:[%s5727_s3 + $0x850] sm:$0xff] %v1137_v27  ;;  %v774_v31 = vadd.f32 %v773_v29, %v3700_v52  ;;  %v1139_v32 = vadd.f32 %v1138_v30, %v3702_v53  ;;  %v2646_v26 = vld [vmem:[%s5725_s0 + $0x250] sm:$0xff]  ;;  %v2647_v29 = vld [vmem:[%s5725_s0 + $0x268] sm:$0xff] }
 0x17d   :  { %v777_v33 = vpop.f32.mrf.mxu0  ;;  %v1142_v34 = vpop.f32.mrf.mxu1  ;;  %1494 = vmatmul.mubr.f32.gmra.mxu0 %v2636_v35  ;;  %1859 = vmatmul.mubr.f32.gmra.mxu1 %v2636_v35 }
 0x17e   :  { %2232 = vst [vmem:[%s5727_s3 + $0x848] sm:$0xff] %v774_v31  ;;  %2234 = vst [vmem:[%s5727_s3 + $0x858] sm:$0xff] %v1139_v32  ;;  %v778_v36 = vadd.f32 %v777_v33, %v3690_v48  ;;  %v1143_v37 = vadd.f32 %v1142_v34, %v3695_v50  ;;  %2504 = vmatprep.mubr.msk.f32.mxu0 %vm356_vm0, %v2637_v38  ;;  %2554 = vmatprep.mubr.msk.f32.mxu1 %vm356_vm0, %v2637_v38 }
 0x17f   :  { %v779_v40 = vpop.f32.mrf.mxu0  ;;  %v1144_v41 = vpop.f32.mrf.mxu1 }
 0x180   :  { %2239 = vst [vmem:[%s5727_s3 + $0x880] sm:$0xff] %v778_v36  ;;  %2241 = vst [vmem:[%s5727_s3 + $0x890] sm:$0xff] %v1143_v37  ;;  %v780_v42 = vadd.f32 %v779_v40, %v3700_v52  ;;  %v1145_v43 = vadd.f32 %v1144_v41, %v3702_v53  ;;  %v2648_v36 = vld [vmem:[%s5725_s0 + $0x260] sm:$0xff]  ;;  %v2649_v40 = vld [vmem:[%s5725_s0 + $0x278] sm:$0xff] }
 0x181   :  { %v783_v44 = vpop.f32.mrf.mxu0  ;;  %v1148_v45 = vpop.f32.mrf.mxu1  ;;  %1500 = vmatmul.mubr.f32.gmra.mxu0 %v2638_v46  ;;  %1865 = vmatmul.mubr.f32.gmra.mxu1 %v2638_v46 }
 0x182   :  { %2240 = vst [vmem:[%s5727_s3 + $0x888] sm:$0xff] %v780_v42  ;;  %2242 = vst [vmem:[%s5727_s3 + $0x898] sm:$0xff] %v1145_v43  ;;  %v784_v47 = vadd.f32 %v783_v44, %v3690_v48  ;;  %v1149_v49 = vadd.f32 %v1148_v45, %v3695_v50  ;;  %2505 = vmatprep.mubr.msk.f32.mxu0 %vm356_vm0, %v2639_v51  ;;  %2555 = vmatprep.mubr.msk.f32.mxu1 %vm356_vm0, %v2639_v51 }
 0x183   :  { %v785_v54 = vpop.f32.mrf.mxu0  ;;  %v1150_v55 = vpop.f32.mrf.mxu1 }
 0x184   :  { %2247 = vst [vmem:[%s5727_s3 + $0x8c0] sm:$0xff] %v784_v47  ;;  %2249 = vst [vmem:[%s5727_s3 + $0x8d0] sm:$0xff] %v1149_v49  ;;  %v786_v56 = vadd.f32 %v785_v54, %v3700_v52  ;;  %v1151_v57 = vadd.f32 %v1150_v55, %v3702_v53  ;;  %v2650_v47 = vld [vmem:[%s5725_s0 + $0x270] sm:$0xff]  ;;  %v2651_v54 = vld [vmem:[%s5725_s0 + $0x288] sm:$0xff] }
 0x185   :  { %v789_v58 = vpop.f32.mrf.mxu0  ;;  %v1154_v59 = vpop.f32.mrf.mxu1  ;;  %1506 = vmatmul.mubr.f32.gmra.mxu0 %v2640_v60  ;;  %1871 = vmatmul.mubr.f32.gmra.mxu1 %v2640_v60 }
 0x186   :  { %2248 = vst [vmem:[%s5727_s3 + $0x8c8] sm:$0xff] %v786_v56  ;;  %2250 = vst [vmem:[%s5727_s3 + $0x8d8] sm:$0xff] %v1151_v57  ;;  %v790_v61 = vadd.f32 %v789_v58, %v3690_v48  ;;  %v1155_v62 = vadd.f32 %v1154_v59, %v3695_v50  ;;  %2506 = vmatprep.mubr.msk.f32.mxu0 %vm356_vm0, %v2641_v63  ;;  %2556 = vmatprep.mubr.msk.f32.mxu1 %vm356_vm0, %v2641_v63 }
 0x187   :  { %v791_v0 = vpop.f32.mrf.mxu0  ;;  %v1156_v1 = vpop.f32.mrf.mxu1 }
 0x188   :  { %2255 = vst [vmem:[%s5727_s3 + $0x900] sm:$0xff] %v790_v61  ;;  %2257 = vst [vmem:[%s5727_s3 + $0x910] sm:$0xff] %v1155_v62  ;;  %v792_v2 = vadd.f32 %v791_v0, %v3700_v52  ;;  %v1157_v3 = vadd.f32 %v1156_v1, %v3702_v53  ;;  %v2652_v61 = vld [vmem:[%s5725_s0 + $0x280] sm:$0xff]  ;;  %v2653_v0 = vld [vmem:[%s5725_s0 + $0x298] sm:$0xff] }
 0x189   :  { %v795_v4 = vpop.f32.mrf.mxu0  ;;  %v1160_v5 = vpop.f32.mrf.mxu1  ;;  %1512 = vmatmul.mubr.f32.gmra.mxu0 %v2642_v6  ;;  %1877 = vmatmul.mubr.f32.gmra.mxu1 %v2642_v6 }
 0x18a   :  { %2256 = vst [vmem:[%s5727_s3 + $0x908] sm:$0xff] %v792_v2  ;;  %2258 = vst [vmem:[%s5727_s3 + $0x918] sm:$0xff] %v1157_v3  ;;  %v796_v7 = vadd.f32 %v795_v4, %v3690_v48  ;;  %v1161_v8 = vadd.f32 %v1160_v5, %v3695_v50  ;;  %2507 = vmatprep.mubr.msk.f32.mxu0 %vm356_vm0, %v2643_v9  ;;  %2557 = vmatprep.mubr.msk.f32.mxu1 %vm356_vm0, %v2643_v9 }
 0x18b   :  { %v797_v10 = vpop.f32.mrf.mxu0  ;;  %v1162_v11 = vpop.f32.mrf.mxu1 }
 0x18c   :  { %2263 = vst [vmem:[%s5727_s3 + $0x940] sm:$0xff] %v796_v7  ;;  %2265 = vst [vmem:[%s5727_s3 + $0x950] sm:$0xff] %v1161_v8  ;;  %v798_v12 = vadd.f32 %v797_v10, %v3700_v52  ;;  %v1163_v13 = vadd.f32 %v1162_v11, %v3702_v53  ;;  %v2654_v7 = vld [vmem:[%s5725_s0 + $0x290] sm:$0xff]  ;;  %v2655_v10 = vld [vmem:[%s5725_s0 + $0x2a8] sm:$0xff] }
 0x18d   :  { %v801_v14 = vpop.f32.mrf.mxu0  ;;  %v1166_v15 = vpop.f32.mrf.mxu1  ;;  %1518 = vmatmul.mubr.f32.gmra.mxu0 %v2644_v16  ;;  %1883 = vmatmul.mubr.f32.gmra.mxu1 %v2644_v16 }
 0x18e   :  { %2264 = vst [vmem:[%s5727_s3 + $0x948] sm:$0xff] %v798_v12  ;;  %2266 = vst [vmem:[%s5727_s3 + $0x958] sm:$0xff] %v1163_v13  ;;  %v802_v17 = vadd.f32 %v801_v14, %v3690_v48  ;;  %v1167_v18 = vadd.f32 %v1166_v15, %v3695_v50  ;;  %2508 = vmatprep.mubr.msk.f32.mxu0 %vm356_vm0, %v2645_v19  ;;  %2558 = vmatprep.mubr.msk.f32.mxu1 %vm356_vm0, %v2645_v19 }
 0x18f   :  { %v803_v20 = vpop.f32.mrf.mxu0  ;;  %v1168_v21 = vpop.f32.mrf.mxu1 }
 0x190   :  { %2271 = vst [vmem:[%s5727_s3 + $0x980] sm:$0xff] %v802_v17  ;;  %2273 = vst [vmem:[%s5727_s3 + $0x990] sm:$0xff] %v1167_v18  ;;  %v804_v22 = vadd.f32 %v803_v20, %v3700_v52  ;;  %v1169_v23 = vadd.f32 %v1168_v21, %v3702_v53  ;;  %v2656_v17 = vld [vmem:[%s5725_s0 + $0x2a0] sm:$0xff]  ;;  %v2657_v20 = vld [vmem:[%s5725_s0 + $0x2b8] sm:$0xff] }
 0x191   :  { %v807_v24 = vpop.f32.mrf.mxu0  ;;  %v1172_v25 = vpop.f32.mrf.mxu1  ;;  %1524 = vmatmul.mubr.f32.gmra.mxu0 %v2646_v26  ;;  %1889 = vmatmul.mubr.f32.gmra.mxu1 %v2646_v26 }
 0x192   :  { %2272 = vst [vmem:[%s5727_s3 + $0x988] sm:$0xff] %v804_v22  ;;  %2274 = vst [vmem:[%s5727_s3 + $0x998] sm:$0xff] %v1169_v23  ;;  %v808_v27 = vadd.f32 %v807_v24, %v3690_v48  ;;  %v1173_v28 = vadd.f32 %v1172_v25, %v3695_v50  ;;  %2509 = vmatprep.mubr.msk.f32.mxu0 %vm356_vm0, %v2647_v29  ;;  %2559 = vmatprep.mubr.msk.f32.mxu1 %vm356_vm0, %v2647_v29 }
 0x193   :  { %v809_v30 = vpop.f32.mrf.mxu0  ;;  %v1174_v31 = vpop.f32.mrf.mxu1 }
 0x194   :  { %2279 = vst [vmem:[%s5727_s3 + $0x9c0] sm:$0xff] %v808_v27  ;;  %2281 = vst [vmem:[%s5727_s3 + $0x9d0] sm:$0xff] %v1173_v28  ;;  %v810_v32 = vadd.f32 %v809_v30, %v3700_v52  ;;  %v1175_v33 = vadd.f32 %v1174_v31, %v3702_v53  ;;  %v2658_v27 = vld [vmem:[%s5725_s0 + $0x2b0] sm:$0xff]  ;;  %v2659_v30 = vld [vmem:[%s5725_s0 + $0x2c8] sm:$0xff] }
 0x195   :  { %v813_v34 = vpop.f32.mrf.mxu0  ;;  %v1178_v35 = vpop.f32.mrf.mxu1  ;;  %1530 = vmatmul.mubr.f32.gmra.mxu0 %v2648_v36  ;;  %1895 = vmatmul.mubr.f32.gmra.mxu1 %v2648_v36 }
 0x196   :  { %2280 = vst [vmem:[%s5727_s3 + $0x9c8] sm:$0xff] %v810_v32  ;;  %2282 = vst [vmem:[%s5727_s3 + $0x9d8] sm:$0xff] %v1175_v33  ;;  %v814_v37 = vadd.f32 %v813_v34, %v3690_v48  ;;  %v1179_v38 = vadd.f32 %v1178_v35, %v3695_v50  ;;  %2510 = vmatprep.mubr.msk.f32.mxu0 %vm356_vm0, %v2649_v40  ;;  %2560 = vmatprep.mubr.msk.f32.mxu1 %vm356_vm0, %v2649_v40 }
 0x197   :  { %v815_v41 = vpop.f32.mrf.mxu0  ;;  %v1180_v42 = vpop.f32.mrf.mxu1 }
 0x198   :  { %2287 = vst [vmem:[%s5727_s3 + $0xa00] sm:$0xff] %v814_v37  ;;  %2289 = vst [vmem:[%s5727_s3 + $0xa10] sm:$0xff] %v1179_v38  ;;  %v816_v43 = vadd.f32 %v815_v41, %v3700_v52  ;;  %v1181_v44 = vadd.f32 %v1180_v42, %v3702_v53  ;;  %v2660_v37 = vld [vmem:[%s5725_s0 + $0x2c0] sm:$0xff]  ;;  %v2661_v41 = vld [vmem:[%s5725_s0 + $0x2d8] sm:$0xff] }
 0x199   :  { %v819_v45 = vpop.f32.mrf.mxu0  ;;  %v1184_v46 = vpop.f32.mrf.mxu1  ;;  %1536 = vmatmul.mubr.f32.gmra.mxu0 %v2650_v47  ;;  %1901 = vmatmul.mubr.f32.gmra.mxu1 %v2650_v47 }
 0x19a   :  { %2288 = vst [vmem:[%s5727_s3 + $0xa08] sm:$0xff] %v816_v43  ;;  %2290 = vst [vmem:[%s5727_s3 + $0xa18] sm:$0xff] %v1181_v44  ;;  %v820_v49 = vadd.f32 %v819_v45, %v3690_v48  ;;  %v1185_v51 = vadd.f32 %v1184_v46, %v3695_v50  ;;  %2511 = vmatprep.mubr.msk.f32.mxu0 %vm356_vm0, %v2651_v54  ;;  %2561 = vmatprep.mubr.msk.f32.mxu1 %vm356_vm0, %v2651_v54 }
 0x19b   :  { %v821_v55 = vpop.f32.mrf.mxu0  ;;  %v1186_v56 = vpop.f32.mrf.mxu1 }
 0x19c   :  { %2295 = vst [vmem:[%s5727_s3 + $0xa40] sm:$0xff] %v820_v49  ;;  %2297 = vst [vmem:[%s5727_s3 + $0xa50] sm:$0xff] %v1185_v51  ;;  %v822_v57 = vadd.f32 %v821_v55, %v3700_v52  ;;  %v1187_v58 = vadd.f32 %v1186_v56, %v3702_v53  ;;  %v2662_v49 = vld [vmem:[%s5725_s0 + $0x2d0] sm:$0xff]  ;;  %v2663_v55 = vld [vmem:[%s5725_s0 + $0x2e8] sm:$0xff] }
 0x19d   :  { %v825_v59 = vpop.f32.mrf.mxu0  ;;  %v1190_v60 = vpop.f32.mrf.mxu1  ;;  %1542 = vmatmul.mubr.f32.gmra.mxu0 %v2652_v61  ;;  %1907 = vmatmul.mubr.f32.gmra.mxu1 %v2652_v61 }
 0x19e   :  { %2296 = vst [vmem:[%s5727_s3 + $0xa48] sm:$0xff] %v822_v57  ;;  %2298 = vst [vmem:[%s5727_s3 + $0xa58] sm:$0xff] %v1187_v58  ;;  %v826_v62 = vadd.f32 %v825_v59, %v3690_v48  ;;  %v1191_v63 = vadd.f32 %v1190_v60, %v3695_v50  ;;  %2512 = vmatprep.mubr.msk.f32.mxu0 %vm356_vm0, %v2653_v0  ;;  %2562 = vmatprep.mubr.msk.f32.mxu1 %vm356_vm0, %v2653_v0 }
 0x19f   :  { %v827_v1 = vpop.f32.mrf.mxu0  ;;  %v1192_v2 = vpop.f32.mrf.mxu1 }
 0x1a0   :  { %2303 = vst [vmem:[%s5727_s3 + $0xa80] sm:$0xff] %v826_v62  ;;  %2305 = vst [vmem:[%s5727_s3 + $0xa90] sm:$0xff] %v1191_v63  ;;  %v828_v3 = vadd.f32 %v827_v1, %v3700_v52  ;;  %v1193_v4 = vadd.f32 %v1192_v2, %v3702_v53  ;;  %v2664_v62 = vld [vmem:[%s5725_s0 + $0x2e0] sm:$0xff]  ;;  %v334_v63 = vsub.s32 4, %v3668_v39  ;;  %v2665_v2 = vld [vmem:[%s5725_s0 + $0x2f8] sm:$0xff] }
 0x1a1   :  { %v831_v5 = vpop.f32.mrf.mxu0  ;;  %v1196_v6 = vpop.f32.mrf.mxu1  ;;  %1548 = vmatmul.mubr.f32.gmra.mxu0 %v2654_v7  ;;  %1913 = vmatmul.mubr.f32.gmra.mxu1 %v2654_v7 }
 0x1a2   :  { %2304 = vst [vmem:[%s5727_s3 + $0xa88] sm:$0xff] %v828_v3  ;;  %2306 = vst [vmem:[%s5727_s3 + $0xa98] sm:$0xff] %v1193_v4  ;;  %v832_v8 = vadd.f32 %v831_v5, %v3690_v48  ;;  %v1197_v9 = vadd.f32 %v1196_v6, %v3695_v50  ;;  %2513 = vmatprep.mubr.msk.f32.mxu0 %vm356_vm0, %v2655_v10  ;;  %2563 = vmatprep.mubr.msk.f32.mxu1 %vm356_vm0, %v2655_v10  ;;  %v342_v3 = vsub.s32 6, %v3668_v39 }
 0x1a3   :  { %v833_v11 = vpop.f32.mrf.mxu0  ;;  %v1198_v12 = vpop.f32.mrf.mxu1 }
 0x1a4   :  { %2311 = vst [vmem:[%s5727_s3 + $0xac0] sm:$0xff] %v832_v8  ;;  %2313 = vst [vmem:[%s5727_s3 + $0xad0] sm:$0xff] %v1197_v9  ;;  %v834_v13 = vadd.f32 %v833_v11, %v3700_v52  ;;  %v1199_v14 = vadd.f32 %v1198_v12, %v3702_v53  ;;  %v338_v8 = vsub.s32 5, %v3668_v39  ;;  %v346_v9 = vsub.s32 7, %v3668_v39  ;;  %v2666_v12 = vld [vmem:[%s5725_s0 + $0x2f0] sm:$0xff] }
 0x1a5   :  { %v837_v15 = vpop.f32.mrf.mxu0  ;;  %v1202_v16 = vpop.f32.mrf.mxu1  ;;  %1554 = vmatmul.mubr.f32.gmra.mxu0 %v2656_v17  ;;  %1919 = vmatmul.mubr.f32.gmra.mxu1 %v2656_v17 }
 0x1a6   :  { %2312 = vst [vmem:[%s5727_s3 + $0xac8] sm:$0xff] %v834_v13  ;;  %2314 = vst [vmem:[%s5727_s3 + $0xad8] sm:$0xff] %v1199_v14  ;;  %v838_v18 = vadd.f32 %v837_v15, %v3690_v48  ;;  %v1203_v19 = vadd.f32 %v1202_v16, %v3695_v50  ;;  %2514 = vmatprep.mubr.msk.f32.mxu0 %vm356_vm0, %v2657_v20  ;;  %2564 = vmatprep.mubr.msk.f32.mxu1 %vm356_vm0, %v2657_v20  ;;  %v2667_v13 = vld [vmem:[%s5726_s2] sm:$0xff]  ;;  %v2668_v16 = vld [vmem:[%s5725_s0 + $0x308] sm:$0xff] }
 0x1a7   :  { %v839_v21 = vpop.f32.mrf.mxu0  ;;  %v1204_v22 = vpop.f32.mrf.mxu1  ;;  %v4878_v14 = vrot.slane %v2667_v13, %v334_v63  ;;  %v4893_v17 = vrot.slane %v2667_v13, %v342_v3  ;;  %v4903_v20 = vrot.slane %v2667_v13, %v338_v8 }
 0x1a8   :  { %2319 = vst [vmem:[%s5727_s3 + $0xb00] sm:$0xff] %v838_v18  ;;  %2321 = vst [vmem:[%s5727_s3 + $0xb10] sm:$0xff] %v1203_v19  ;;  %v840_v23 = vadd.f32 %v839_v21, %v3700_v52  ;;  %v1205_v24 = vadd.f32 %v1204_v22, %v3702_v53  ;;  %v4905_v21 = vrot.slane %v2667_v13, %v346_v9 }
 0x1a9   :  { %v843_v25 = vpop.f32.mrf.mxu0  ;;  %v1208_v26 = vpop.f32.mrf.mxu1  ;;  %1560 = vmatmul.mubr.f32.gmra.mxu0 %v2658_v27  ;;  %1925 = vmatmul.mubr.f32.gmra.mxu1 %v2658_v27 }
 0x1aa   :  { %2320 = vst [vmem:[%s5727_s3 + $0xb08] sm:$0xff] %v840_v23  ;;  %2322 = vst [vmem:[%s5727_s3 + $0xb18] sm:$0xff] %v1205_v24  ;;  %v844_v28 = vadd.f32 %v843_v25, %v3690_v48  ;;  %v1209_v29 = vadd.f32 %v1208_v26, %v3695_v50  ;;  %2515 = vmatprep.mubr.msk.f32.mxu0 %vm356_vm0, %v2659_v30  ;;  %2565 = vmatprep.mubr.msk.f32.mxu1 %vm356_vm0, %v2659_v30  ;;  %v2669_v23 = vld [vmem:[%s5725_s0 + $0x300] sm:$0xff]  ;;  %v2670_v25 = vld [vmem:[%s5725_s0 + $0x318] sm:$0xff] }
 0x1ab   :  { %v845_v31 = vpop.f32.mrf.mxu0  ;;  %v1210_v32 = vpop.f32.mrf.mxu1 }
 0x1ac   :  { %2327 = vst [vmem:[%s5727_s3 + $0xb40] sm:$0xff] %v844_v28  ;;  %2329 = vst [vmem:[%s5727_s3 + $0xb50] sm:$0xff] %v1209_v29  ;;  %v846_v33 = vadd.f32 %v845_v31, %v3700_v52  ;;  %v1211_v34 = vadd.f32 %v1210_v32, %v3702_v53  ;;  %v2671_v31 = vld [vmem:[%s5725_s0 + $0x310] sm:$0xff] }
 0x1ad   :  { %v849_v35 = vpop.f32.mrf.mxu0  ;;  %v1214_v36 = vpop.f32.mrf.mxu1  ;;  %1566 = vmatmul.mubr.f32.gmra.mxu0 %v2660_v37  ;;  %1931 = vmatmul.mubr.f32.gmra.mxu1 %v2660_v37 }
 0x1ae   :  { %2328 = vst [vmem:[%s5727_s3 + $0xb48] sm:$0xff] %v846_v33  ;;  %2330 = vst [vmem:[%s5727_s3 + $0xb58] sm:$0xff] %v1211_v34  ;;  %v850_v38 = vadd.f32 %v849_v35, %v3690_v48  ;;  %v1215_v40 = vadd.f32 %v1214_v36, %v3695_v50  ;;  %2516 = vmatprep.mubr.msk.f32.mxu0 %vm356_vm0, %v2661_v41  ;;  %2566 = vmatprep.mubr.msk.f32.mxu1 %vm356_vm0, %v2661_v41 }
 0x1af   :  { %v851_v42 = vpop.f32.mrf.mxu0  ;;  %v1216_v43 = vpop.f32.mrf.mxu1 }
 0x1b0   :  { %2335 = vst [vmem:[%s5727_s3 + $0xb80] sm:$0xff] %v850_v38  ;;  %2337 = vst [vmem:[%s5727_s3 + $0xb90] sm:$0xff] %v1215_v40  ;;  %v852_v44 = vadd.f32 %v851_v42, %v3700_v52  ;;  %v1217_v45 = vadd.f32 %v1216_v43, %v3702_v53 }
 0x1b1   :  { %v855_v46 = vpop.f32.mrf.mxu0  ;;  %v1220_v47 = vpop.f32.mrf.mxu1  ;;  %1572 = vmatmul.mubr.f32.gmra.mxu0 %v2662_v49  ;;  %1937 = vmatmul.mubr.f32.gmra.mxu1 %v2662_v49 }
 0x1b2   :  { %2336 = vst [vmem:[%s5727_s3 + $0xb88] sm:$0xff] %v852_v44  ;;  %2338 = vst [vmem:[%s5727_s3 + $0xb98] sm:$0xff] %v1217_v45  ;;  %v856_v51 = vadd.f32 %v855_v46, %v3690_v48  ;;  %v1221_v54 = vadd.f32 %v1220_v47, %v3695_v50  ;;  %2517 = vmatprep.mubr.msk.f32.mxu0 %vm356_vm0, %v2663_v55  ;;  %2567 = vmatprep.mubr.msk.f32.mxu1 %vm356_vm0, %v2663_v55 }
 0x1b3   :  { %v857_v56 = vpop.f32.mrf.mxu0  ;;  %v1222_v57 = vpop.f32.mrf.mxu1 }
 0x1b4   :  { %2343 = vst [vmem:[%s5727_s3 + $0xbc0] sm:$0xff] %v856_v51  ;;  %2345 = vst [vmem:[%s5727_s3 + $0xbd0] sm:$0xff] %v1221_v54  ;;  %v858_v58 = vadd.f32 %v857_v56, %v3700_v52  ;;  %v1223_v59 = vadd.f32 %v1222_v57, %v3702_v53 }
 0x1b5   :  { %v861_v60 = vpop.f32.mrf.mxu0  ;;  %v1226_v61 = vpop.f32.mrf.mxu1  ;;  %1578 = vmatmul.mubr.f32.gmra.mxu0 %v2664_v62  ;;  %1943 = vmatmul.mubr.f32.gmra.mxu1 %v2664_v62 }
 0x1b6   :  { %2344 = vst [vmem:[%s5727_s3 + $0xbc8] sm:$0xff] %v858_v58  ;;  %2346 = vst [vmem:[%s5727_s3 + $0xbd8] sm:$0xff] %v1223_v59  ;;  %v862_v0 = vadd.f32 %v861_v60, %v3690_v48  ;;  %v1227_v1 = vadd.f32 %v1226_v61, %v3695_v50  ;;  %2518 = vmatprep.mubr.msk.f32.mxu0 %vm356_vm0, %v2665_v2  ;;  %2568 = vmatprep.mubr.msk.f32.mxu1 %vm356_vm0, %v2665_v2 }
 0x1b7   :  { %v863_v4 = vpop.f32.mrf.mxu0  ;;  %v1228_v5 = vpop.f32.mrf.mxu1 }
 0x1b8   :  { %2351 = vst [vmem:[%s5727_s3 + $0xc00] sm:$0xff] %v862_v0  ;;  %2353 = vst [vmem:[%s5727_s3 + $0xc10] sm:$0xff] %v1227_v1  ;;  %v864_v6 = vadd.f32 %v863_v4, %v3700_v52  ;;  %v1229_v7 = vadd.f32 %v1228_v5, %v3702_v53 }
 0x1b9   :  { %v867_v10 = vpop.f32.mrf.mxu0  ;;  %v1232_v11 = vpop.f32.mrf.mxu1  ;;  %1584 = vmatmul.mubr.f32.gmra.mxu0 %v2666_v12  ;;  %1949 = vmatmul.mubr.f32.gmra.mxu1 %v2666_v12 }
 0x1ba   :  { %2352 = vst [vmem:[%s5727_s3 + $0xc08] sm:$0xff] %v864_v6  ;;  %2354 = vst [vmem:[%s5727_s3 + $0xc18] sm:$0xff] %v1229_v7  ;;  %v868_v39 = vadd.f32 %v867_v10, %v3690_v48  ;;  %v1233_v15 = vadd.f32 %v1232_v11, %v3695_v50  ;;  %2519 = vmatprep.mubr.msk.f32.mxu0 %vm356_vm0, %v2668_v16  ;;  %2569 = vmatprep.mubr.msk.f32.mxu1 %vm356_vm0, %v2668_v16 }
 0x1bb   :  { %v869_v18 = vpop.f32.mrf.mxu0  ;;  %v1234_v19 = vpop.f32.mrf.mxu1 }
 0x1bc   :  { %2359 = vst [vmem:[%s5727_s3 + $0xc40] sm:$0xff] %v868_v39  ;;  %2361 = vst [vmem:[%s5727_s3 + $0xc50] sm:$0xff] %v1233_v15  ;;  %v870_v48 = vadd.f32 %v869_v18, %v3700_v52  ;;  %v1235_v50 = vadd.f32 %v1234_v19, %v3702_v53 }
 0x1bd   :  { %v1303_v22 = vpop.f32.mrf.mxu0  ;;  %1590 = vmatmul.mubr.f32.gmra.mxu0 %v2669_v23  ;;  %v1668_v24 = vpop.f32.mrf.mxu1  ;;  %1955 = vmatmul.mubr.f32.gmra.mxu1 %v2669_v23 }
 0x1be   :  { %2360 = vst [vmem:[%s5727_s3 + $0xc48] sm:$0xff] %v870_v48  ;;  %2362 = vst [vmem:[%s5727_s3 + $0xc58] sm:$0xff] %v1235_v50  ;;  %v1304_v52 = vadd.f32 %v1303_v22, %v4878_v14  ;;  %v1669_v53 = vadd.f32 %v1668_v24, %v4893_v17  ;;  %2520 = vmatprep.mubr.msk.f32.mxu0 %vm356_vm0, %v2670_v25  ;;  %2570 = vmatprep.mubr.msk.f32.mxu1 %vm356_vm0, %v2670_v25 }
 0x1bf   :  { %v1305_v26 = vpop.f32.mrf.mxu0  ;;  %v1670_v27 = vpop.f32.mrf.mxu1 }
 0x1c0   :  { %1971 = vst [vmem:[%s5727_s3 + $0x20] sm:$0xff] %v1304_v52  ;;  %1973 = vst [vmem:[%s5727_s3 + $0x30] sm:$0xff] %v1669_v53  ;;  %v1306_v28 = vadd.f32 %v1305_v26, %v4903_v20  ;;  %v1671_v29 = vadd.f32 %v1670_v27, %v4905_v21 }
 0x1c1   :  { %v1309_v30 = vpop.f32.mrf.mxu0  ;;  %1596 = vmatmul.mubr.f32.gmra.mxu0 %v2671_v31  ;;  %v1674_v32 = vpop.f32.mrf.mxu1  ;;  %1961 = vmatmul.mubr.f32.gmra.mxu1 %v2671_v31 }
 0x1c2   :  { %1972 = vst [vmem:[%s5727_s3 + $0x28] sm:$0xff] %v1306_v28  ;;  %1974 = vst [vmem:[%s5727_s3 + $0x38] sm:$0xff] %v1671_v29  ;;  %v1310_v33 = vadd.f32 %v1309_v30, %v4878_v14  ;;  %v1675_v34 = vadd.f32 %v1674_v32, %v4893_v17 }
 0x1c3   :  { %v1311_v35 = vpop.f32.mrf.mxu0  ;;  %v1676_v36 = vpop.f32.mrf.mxu1 }
 0x1c4   :  { %1979 = vst [vmem:[%s5727_s3 + $0x60] sm:$0xff] %v1310_v33  ;;  %1981 = vst [vmem:[%s5727_s3 + $0x70] sm:$0xff] %v1675_v34  ;;  %v1312_v37 = vadd.f32 %v1311_v35, %v4903_v20  ;;  %v1677_v38 = vadd.f32 %v1676_v36, %v4905_v21 }
 0x1c5   :  { %v1315_v40 = vpop.f32.mrf.mxu0  ;;  %v1680_v41 = vpop.f32.mrf.mxu1 }
 0x1c6   :  { %1980 = vst [vmem:[%s5727_s3 + $0x68] sm:$0xff] %v1312_v37  ;;  %1982 = vst [vmem:[%s5727_s3 + $0x78] sm:$0xff] %v1677_v38  ;;  %v1316_v42 = vadd.f32 %v1315_v40, %v4878_v14  ;;  %v1681_v43 = vadd.f32 %v1680_v41, %v4893_v17 }
 0x1c7   :  { %v1317_v44 = vpop.f32.mrf.mxu0  ;;  %v1682_v45 = vpop.f32.mrf.mxu1 }
 0x1c8   :  { %1987 = vst [vmem:[%s5727_s3 + $0xa0] sm:$0xff] %v1316_v42  ;;  %1989 = vst [vmem:[%s5727_s3 + $0xb0] sm:$0xff] %v1681_v43  ;;  %v1318_v46 = vadd.f32 %v1317_v44, %v4903_v20  ;;  %v1683_v47 = vadd.f32 %v1682_v45, %v4905_v21 }
 0x1c9   :  { %v1321_v49 = vpop.f32.mrf.mxu0  ;;  %v1686_v51 = vpop.f32.mrf.mxu1 }
 0x1ca   :  { %1988 = vst [vmem:[%s5727_s3 + $0xa8] sm:$0xff] %v1318_v46  ;;  %1990 = vst [vmem:[%s5727_s3 + $0xb8] sm:$0xff] %v1683_v47  ;;  %v1322_v54 = vadd.f32 %v1321_v49, %v4878_v14  ;;  %v1687_v55 = vadd.f32 %v1686_v51, %v4893_v17 }
 0x1cb   :  { %v1323_v56 = vpop.f32.mrf.mxu0  ;;  %v1688_v57 = vpop.f32.mrf.mxu1 }
 0x1cc   :  { %1995 = vst [vmem:[%s5727_s3 + $0xe0] sm:$0xff] %v1322_v54  ;;  %1997 = vst [vmem:[%s5727_s3 + $0xf0] sm:$0xff] %v1687_v55  ;;  %v1324_v58 = vadd.f32 %v1323_v56, %v4903_v20  ;;  %v1689_v59 = vadd.f32 %v1688_v57, %v4905_v21 }
 0x1cd   :  { %v1327_v60 = vpop.f32.mrf.mxu0  ;;  %v1692_v61 = vpop.f32.mrf.mxu1 }
 0x1ce   :  { %1996 = vst [vmem:[%s5727_s3 + $0xe8] sm:$0xff] %v1324_v58  ;;  %1998 = vst [vmem:[%s5727_s3 + $0xf8] sm:$0xff] %v1689_v59  ;;  %v1328_v62 = vadd.f32 %v1327_v60, %v4878_v14  ;;  %v1693_v63 = vadd.f32 %v1692_v61, %v4893_v17 }
 0x1cf   :  { %v1329_v0 = vpop.f32.mrf.mxu0  ;;  %v1694_v1 = vpop.f32.mrf.mxu1 }
 0x1d0   :  { %2003 = vst [vmem:[%s5727_s3 + $0x120] sm:$0xff] %v1328_v62  ;;  %2005 = vst [vmem:[%s5727_s3 + $0x130] sm:$0xff] %v1693_v63  ;;  %v1330_v2 = vadd.f32 %v1329_v0, %v4903_v20  ;;  %v1695_v3 = vadd.f32 %v1694_v1, %v4905_v21 }
 0x1d1   :  { %v1333_v4 = vpop.f32.mrf.mxu0  ;;  %v1698_v5 = vpop.f32.mrf.mxu1 }
 0x1d2   :  { %2004 = vst [vmem:[%s5727_s3 + $0x128] sm:$0xff] %v1330_v2  ;;  %2006 = vst [vmem:[%s5727_s3 + $0x138] sm:$0xff] %v1695_v3  ;;  %v1334_v6 = vadd.f32 %v1333_v4, %v4878_v14  ;;  %v1699_v7 = vadd.f32 %v1698_v5, %v4893_v17 }
 0x1d3   :  { %v1335_v8 = vpop.f32.mrf.mxu0  ;;  %v1700_v9 = vpop.f32.mrf.mxu1 }
 0x1d4   :  { %2011 = vst [vmem:[%s5727_s3 + $0x160] sm:$0xff] %v1334_v6  ;;  %2013 = vst [vmem:[%s5727_s3 + $0x170] sm:$0xff] %v1699_v7  ;;  %v1336_v10 = vadd.f32 %v1335_v8, %v4903_v20  ;;  %v1701_v11 = vadd.f32 %v1700_v9, %v4905_v21 }
 0x1d5   :  { %v1339_v12 = vpop.f32.mrf.mxu0  ;;  %v1704_v13 = vpop.f32.mrf.mxu1 }
 0x1d6   :  { %2012 = vst [vmem:[%s5727_s3 + $0x168] sm:$0xff] %v1336_v10  ;;  %2014 = vst [vmem:[%s5727_s3 + $0x178] sm:$0xff] %v1701_v11  ;;  %v1340_v39 = vadd.f32 %v1339_v12, %v4878_v14  ;;  %v1705_v15 = vadd.f32 %v1704_v13, %v4893_v17 }
 0x1d7   :  { %v1341_v16 = vpop.f32.mrf.mxu0  ;;  %v1706_v18 = vpop.f32.mrf.mxu1 }
 0x1d8   :  { %2019 = vst [vmem:[%s5727_s3 + $0x1a0] sm:$0xff] %v1340_v39  ;;  %2021 = vst [vmem:[%s5727_s3 + $0x1b0] sm:$0xff] %v1705_v15  ;;  %v1342_v19 = vadd.f32 %v1341_v16, %v4903_v20  ;;  %v1707_v48 = vadd.f32 %v1706_v18, %v4905_v21 }
 0x1d9   :  { %v1345_v50 = vpop.f32.mrf.mxu0  ;;  %v1710_v22 = vpop.f32.mrf.mxu1 }
 0x1da   :  { %2020 = vst [vmem:[%s5727_s3 + $0x1a8] sm:$0xff] %v1342_v19  ;;  %2022 = vst [vmem:[%s5727_s3 + $0x1b8] sm:$0xff] %v1707_v48  ;;  %v1346_v23 = vadd.f32 %v1345_v50, %v4878_v14  ;;  %v1711_v24 = vadd.f32 %v1710_v22, %v4893_v17 }
 0x1db   :  { %v1347_v52 = vpop.f32.mrf.mxu0  ;;  %v1712_v53 = vpop.f32.mrf.mxu1 }
 0x1dc   :  { %2027 = vst [vmem:[%s5727_s3 + $0x1e0] sm:$0xff] %v1346_v23  ;;  %2029 = vst [vmem:[%s5727_s3 + $0x1f0] sm:$0xff] %v1711_v24  ;;  %v1348_v25 = vadd.f32 %v1347_v52, %v4903_v20  ;;  %v1713_v26 = vadd.f32 %v1712_v53, %v4905_v21 }
 0x1dd   :  { %v1351_v27 = vpop.f32.mrf.mxu0  ;;  %v1716_v28 = vpop.f32.mrf.mxu1 }
 0x1de   :  { %2028 = vst [vmem:[%s5727_s3 + $0x1e8] sm:$0xff] %v1348_v25  ;;  %2030 = vst [vmem:[%s5727_s3 + $0x1f8] sm:$0xff] %v1713_v26  ;;  %v1352_v29 = vadd.f32 %v1351_v27, %v4878_v14  ;;  %v1717_v30 = vadd.f32 %v1716_v28, %v4893_v17 }
 0x1df   :  { %v1353_v31 = vpop.f32.mrf.mxu0  ;;  %v1718_v32 = vpop.f32.mrf.mxu1 }
 0x1e0   :  { %2035 = vst [vmem:[%s5727_s3 + $0x220] sm:$0xff] %v1352_v29  ;;  %2037 = vst [vmem:[%s5727_s3 + $0x230] sm:$0xff] %v1717_v30  ;;  %v1354_v33 = vadd.f32 %v1353_v31, %v4903_v20  ;;  %v1719_v34 = vadd.f32 %v1718_v32, %v4905_v21 }
 0x1e1   :  { %v1357_v35 = vpop.f32.mrf.mxu0  ;;  %v1722_v36 = vpop.f32.mrf.mxu1 }
 0x1e2   :  { %2036 = vst [vmem:[%s5727_s3 + $0x228] sm:$0xff] %v1354_v33  ;;  %2038 = vst [vmem:[%s5727_s3 + $0x238] sm:$0xff] %v1719_v34  ;;  %v1358_v37 = vadd.f32 %v1357_v35, %v4878_v14  ;;  %v1723_v38 = vadd.f32 %v1722_v36, %v4893_v17 }
 0x1e3   :  { %v1359_v40 = vpop.f32.mrf.mxu0  ;;  %v1724_v41 = vpop.f32.mrf.mxu1 }
 0x1e4   :  { %2043 = vst [vmem:[%s5727_s3 + $0x260] sm:$0xff] %v1358_v37  ;;  %2045 = vst [vmem:[%s5727_s3 + $0x270] sm:$0xff] %v1723_v38  ;;  %v1360_v42 = vadd.f32 %v1359_v40, %v4903_v20  ;;  %v1725_v43 = vadd.f32 %v1724_v41, %v4905_v21 }
 0x1e5   :  { %v1363_v44 = vpop.f32.mrf.mxu0  ;;  %v1728_v45 = vpop.f32.mrf.mxu1 }
 0x1e6   :  { %2044 = vst [vmem:[%s5727_s3 + $0x268] sm:$0xff] %v1360_v42  ;;  %2046 = vst [vmem:[%s5727_s3 + $0x278] sm:$0xff] %v1725_v43  ;;  %v1364_v46 = vadd.f32 %v1363_v44, %v4878_v14  ;;  %v1729_v47 = vadd.f32 %v1728_v45, %v4893_v17 }
 0x1e7   :  { %v1365_v49 = vpop.f32.mrf.mxu0  ;;  %v1730_v51 = vpop.f32.mrf.mxu1 }
 0x1e8   :  { %2051 = vst [vmem:[%s5727_s3 + $0x2a0] sm:$0xff] %v1364_v46  ;;  %2053 = vst [vmem:[%s5727_s3 + $0x2b0] sm:$0xff] %v1729_v47  ;;  %v1366_v54 = vadd.f32 %v1365_v49, %v4903_v20  ;;  %v1731_v55 = vadd.f32 %v1730_v51, %v4905_v21 }
 0x1e9   :  { %v1369_v56 = vpop.f32.mrf.mxu0  ;;  %v1734_v57 = vpop.f32.mrf.mxu1 }
 0x1ea   :  { %2052 = vst [vmem:[%s5727_s3 + $0x2a8] sm:$0xff] %v1366_v54  ;;  %2054 = vst [vmem:[%s5727_s3 + $0x2b8] sm:$0xff] %v1731_v55  ;;  %v1370_v58 = vadd.f32 %v1369_v56, %v4878_v14  ;;  %v1735_v59 = vadd.f32 %v1734_v57, %v4893_v17 }
 0x1eb   :  { %v1371_v60 = vpop.f32.mrf.mxu0  ;;  %v1736_v61 = vpop.f32.mrf.mxu1 }
 0x1ec   :  { %2059 = vst [vmem:[%s5727_s3 + $0x2e0] sm:$0xff] %v1370_v58  ;;  %2061 = vst [vmem:[%s5727_s3 + $0x2f0] sm:$0xff] %v1735_v59  ;;  %v1372_v62 = vadd.f32 %v1371_v60, %v4903_v20  ;;  %v1737_v63 = vadd.f32 %v1736_v61, %v4905_v21 }
 0x1ed   :  { %v1375_v0 = vpop.f32.mrf.mxu0  ;;  %v1740_v1 = vpop.f32.mrf.mxu1 }
 0x1ee   :  { %2060 = vst [vmem:[%s5727_s3 + $0x2e8] sm:$0xff] %v1372_v62  ;;  %2062 = vst [vmem:[%s5727_s3 + $0x2f8] sm:$0xff] %v1737_v63  ;;  %v1376_v2 = vadd.f32 %v1375_v0, %v4878_v14  ;;  %v1741_v3 = vadd.f32 %v1740_v1, %v4893_v17 }
 0x1ef   :  { %v1377_v4 = vpop.f32.mrf.mxu0  ;;  %v1742_v5 = vpop.f32.mrf.mxu1 }
 0x1f0   :  { %2067 = vst [vmem:[%s5727_s3 + $0x320] sm:$0xff] %v1376_v2  ;;  %2069 = vst [vmem:[%s5727_s3 + $0x330] sm:$0xff] %v1741_v3  ;;  %v1378_v6 = vadd.f32 %v1377_v4, %v4903_v20  ;;  %v1743_v7 = vadd.f32 %v1742_v5, %v4905_v21 }
 0x1f1   :  { %v1381_v8 = vpop.f32.mrf.mxu0  ;;  %v1746_v9 = vpop.f32.mrf.mxu1 }
 0x1f2   :  { %2068 = vst [vmem:[%s5727_s3 + $0x328] sm:$0xff] %v1378_v6  ;;  %2070 = vst [vmem:[%s5727_s3 + $0x338] sm:$0xff] %v1743_v7  ;;  %v1382_v10 = vadd.f32 %v1381_v8, %v4878_v14  ;;  %v1747_v11 = vadd.f32 %v1746_v9, %v4893_v17 }
 0x1f3   :  { %v1383_v12 = vpop.f32.mrf.mxu0  ;;  %v1748_v13 = vpop.f32.mrf.mxu1 }
 0x1f4   :  { %2075 = vst [vmem:[%s5727_s3 + $0x360] sm:$0xff] %v1382_v10  ;;  %2077 = vst [vmem:[%s5727_s3 + $0x370] sm:$0xff] %v1747_v11  ;;  %v1384_v39 = vadd.f32 %v1383_v12, %v4903_v20  ;;  %v1749_v15 = vadd.f32 %v1748_v13, %v4905_v21 }
 0x1f5   :  { %v1387_v16 = vpop.f32.mrf.mxu0  ;;  %v1752_v18 = vpop.f32.mrf.mxu1 }
 0x1f6   :  { %2076 = vst [vmem:[%s5727_s3 + $0x368] sm:$0xff] %v1384_v39  ;;  %2078 = vst [vmem:[%s5727_s3 + $0x378] sm:$0xff] %v1749_v15  ;;  %v1388_v19 = vadd.f32 %v1387_v16, %v4878_v14  ;;  %v1753_v48 = vadd.f32 %v1752_v18, %v4893_v17 }
 0x1f7   :  { %v1389_v50 = vpop.f32.mrf.mxu0  ;;  %v1754_v22 = vpop.f32.mrf.mxu1 }
 0x1f8   :  { %2083 = vst [vmem:[%s5727_s3 + $0x3a0] sm:$0xff] %v1388_v19  ;;  %2085 = vst [vmem:[%s5727_s3 + $0x3b0] sm:$0xff] %v1753_v48  ;;  %v1390_v23 = vadd.f32 %v1389_v50, %v4903_v20  ;;  %v1755_v24 = vadd.f32 %v1754_v22, %v4905_v21 }
 0x1f9   :  { %v1393_v52 = vpop.f32.mrf.mxu0  ;;  %v1758_v53 = vpop.f32.mrf.mxu1 }
 0x1fa   :  { %2084 = vst [vmem:[%s5727_s3 + $0x3a8] sm:$0xff] %v1390_v23  ;;  %2086 = vst [vmem:[%s5727_s3 + $0x3b8] sm:$0xff] %v1755_v24  ;;  %v1394_v25 = vadd.f32 %v1393_v52, %v4878_v14  ;;  %v1759_v26 = vadd.f32 %v1758_v53, %v4893_v17 }
 0x1fb   :  { %v1395_v27 = vpop.f32.mrf.mxu0  ;;  %v1760_v28 = vpop.f32.mrf.mxu1 }
 0x1fc   :  { %2091 = vst [vmem:[%s5727_s3 + $0x3e0] sm:$0xff] %v1394_v25  ;;  %2093 = vst [vmem:[%s5727_s3 + $0x3f0] sm:$0xff] %v1759_v26  ;;  %v1396_v29 = vadd.f32 %v1395_v27, %v4903_v20  ;;  %v1761_v30 = vadd.f32 %v1760_v28, %v4905_v21 }
 0x1fd   :  { %v1399_v31 = vpop.f32.mrf.mxu0  ;;  %v1764_v32 = vpop.f32.mrf.mxu1 }
 0x1fe   :  { %2092 = vst [vmem:[%s5727_s3 + $0x3e8] sm:$0xff] %v1396_v29  ;;  %2094 = vst [vmem:[%s5727_s3 + $0x3f8] sm:$0xff] %v1761_v30  ;;  %v1400_v33 = vadd.f32 %v1399_v31, %v4878_v14  ;;  %v1765_v34 = vadd.f32 %v1764_v32, %v4893_v17 }
 0x1ff   :  { %v1401_v35 = vpop.f32.mrf.mxu0  ;;  %v1766_v36 = vpop.f32.mrf.mxu1 }
 0x200   :  { %2099 = vst [vmem:[%s5727_s3 + $0x420] sm:$0xff] %v1400_v33  ;;  %2101 = vst [vmem:[%s5727_s3 + $0x430] sm:$0xff] %v1765_v34  ;;  %v1402_v37 = vadd.f32 %v1401_v35, %v4903_v20  ;;  %v1767_v38 = vadd.f32 %v1766_v36, %v4905_v21 }
 0x201   :  { %v1405_v40 = vpop.f32.mrf.mxu0  ;;  %v1770_v41 = vpop.f32.mrf.mxu1 }
 0x202   :  { %2100 = vst [vmem:[%s5727_s3 + $0x428] sm:$0xff] %v1402_v37  ;;  %2102 = vst [vmem:[%s5727_s3 + $0x438] sm:$0xff] %v1767_v38  ;;  %v1406_v42 = vadd.f32 %v1405_v40, %v4878_v14  ;;  %v1771_v43 = vadd.f32 %v1770_v41, %v4893_v17 }
 0x203   :  { %v1407_v44 = vpop.f32.mrf.mxu0  ;;  %v1772_v45 = vpop.f32.mrf.mxu1 }
 0x204   :  { %2107 = vst [vmem:[%s5727_s3 + $0x460] sm:$0xff] %v1406_v42  ;;  %2109 = vst [vmem:[%s5727_s3 + $0x470] sm:$0xff] %v1771_v43  ;;  %v1408_v46 = vadd.f32 %v1407_v44, %v4903_v20  ;;  %v1773_v47 = vadd.f32 %v1772_v45, %v4905_v21 }
 0x205   :  { %v1411_v49 = vpop.f32.mrf.mxu0  ;;  %v1776_v51 = vpop.f32.mrf.mxu1 }
 0x206   :  { %2108 = vst [vmem:[%s5727_s3 + $0x468] sm:$0xff] %v1408_v46  ;;  %2110 = vst [vmem:[%s5727_s3 + $0x478] sm:$0xff] %v1773_v47  ;;  %v1412_v54 = vadd.f32 %v1411_v49, %v4878_v14  ;;  %v1777_v55 = vadd.f32 %v1776_v51, %v4893_v17 }
 0x207   :  { %v1413_v56 = vpop.f32.mrf.mxu0  ;;  %v1778_v57 = vpop.f32.mrf.mxu1 }
 0x208   :  { %2115 = vst [vmem:[%s5727_s3 + $0x4a0] sm:$0xff] %v1412_v54  ;;  %2117 = vst [vmem:[%s5727_s3 + $0x4b0] sm:$0xff] %v1777_v55  ;;  %v1414_v58 = vadd.f32 %v1413_v56, %v4903_v20  ;;  %v1779_v59 = vadd.f32 %v1778_v57, %v4905_v21 }
 0x209   :  { %v1417_v60 = vpop.f32.mrf.mxu0  ;;  %v1782_v61 = vpop.f32.mrf.mxu1 }
 0x20a   :  { %2116 = vst [vmem:[%s5727_s3 + $0x4a8] sm:$0xff] %v1414_v58  ;;  %2118 = vst [vmem:[%s5727_s3 + $0x4b8] sm:$0xff] %v1779_v59  ;;  %v1418_v62 = vadd.f32 %v1417_v60, %v4878_v14  ;;  %v1783_v63 = vadd.f32 %v1782_v61, %v4893_v17 }
 0x20b   :  { %v1419_v0 = vpop.f32.mrf.mxu0  ;;  %v1784_v1 = vpop.f32.mrf.mxu1 }
 0x20c   :  { %2123 = vst [vmem:[%s5727_s3 + $0x4e0] sm:$0xff] %v1418_v62  ;;  %2125 = vst [vmem:[%s5727_s3 + $0x4f0] sm:$0xff] %v1783_v63  ;;  %v1420_v2 = vadd.f32 %v1419_v0, %v4903_v20  ;;  %v1785_v3 = vadd.f32 %v1784_v1, %v4905_v21 }
 0x20d   :  { %v1423_v4 = vpop.f32.mrf.mxu0  ;;  %v1788_v5 = vpop.f32.mrf.mxu1 }
 0x20e   :  { %2124 = vst [vmem:[%s5727_s3 + $0x4e8] sm:$0xff] %v1420_v2  ;;  %2126 = vst [vmem:[%s5727_s3 + $0x4f8] sm:$0xff] %v1785_v3  ;;  %v1424_v6 = vadd.f32 %v1423_v4, %v4878_v14  ;;  %v1789_v7 = vadd.f32 %v1788_v5, %v4893_v17 }
 0x20f   :  { %v1425_v8 = vpop.f32.mrf.mxu0  ;;  %v1790_v9 = vpop.f32.mrf.mxu1 }
 0x210   :  { %2131 = vst [vmem:[%s5727_s3 + $0x520] sm:$0xff] %v1424_v6  ;;  %2133 = vst [vmem:[%s5727_s3 + $0x530] sm:$0xff] %v1789_v7  ;;  %v1426_v10 = vadd.f32 %v1425_v8, %v4903_v20  ;;  %v1791_v11 = vadd.f32 %v1790_v9, %v4905_v21 }
 0x211   :  { %v1429_v12 = vpop.f32.mrf.mxu0  ;;  %v1794_v13 = vpop.f32.mrf.mxu1 }
 0x212   :  { %2132 = vst [vmem:[%s5727_s3 + $0x528] sm:$0xff] %v1426_v10  ;;  %2134 = vst [vmem:[%s5727_s3 + $0x538] sm:$0xff] %v1791_v11  ;;  %v1430_v39 = vadd.f32 %v1429_v12, %v4878_v14  ;;  %v1795_v15 = vadd.f32 %v1794_v13, %v4893_v17 }
 0x213   :  { %v1431_v16 = vpop.f32.mrf.mxu0  ;;  %v1796_v18 = vpop.f32.mrf.mxu1 }
 0x214   :  { %2139 = vst [vmem:[%s5727_s3 + $0x560] sm:$0xff] %v1430_v39  ;;  %2141 = vst [vmem:[%s5727_s3 + $0x570] sm:$0xff] %v1795_v15  ;;  %v1432_v19 = vadd.f32 %v1431_v16, %v4903_v20  ;;  %v1797_v48 = vadd.f32 %v1796_v18, %v4905_v21 }
 0x215   :  { %v1435_v50 = vpop.f32.mrf.mxu0  ;;  %v1800_v22 = vpop.f32.mrf.mxu1 }
 0x216   :  { %2140 = vst [vmem:[%s5727_s3 + $0x568] sm:$0xff] %v1432_v19  ;;  %2142 = vst [vmem:[%s5727_s3 + $0x578] sm:$0xff] %v1797_v48  ;;  %v1436_v23 = vadd.f32 %v1435_v50, %v4878_v14  ;;  %v1801_v24 = vadd.f32 %v1800_v22, %v4893_v17 }
 0x217   :  { %v1437_v52 = vpop.f32.mrf.mxu0  ;;  %v1802_v53 = vpop.f32.mrf.mxu1 }
 0x218   :  { %2147 = vst [vmem:[%s5727_s3 + $0x5a0] sm:$0xff] %v1436_v23  ;;  %2149 = vst [vmem:[%s5727_s3 + $0x5b0] sm:$0xff] %v1801_v24  ;;  %v1438_v25 = vadd.f32 %v1437_v52, %v4903_v20  ;;  %v1803_v26 = vadd.f32 %v1802_v53, %v4905_v21 }
 0x219   :  { %v1441_v27 = vpop.f32.mrf.mxu0  ;;  %v1806_v28 = vpop.f32.mrf.mxu1 }
 0x21a   :  { %2148 = vst [vmem:[%s5727_s3 + $0x5a8] sm:$0xff] %v1438_v25  ;;  %2150 = vst [vmem:[%s5727_s3 + $0x5b8] sm:$0xff] %v1803_v26  ;;  %v1442_v29 = vadd.f32 %v1441_v27, %v4878_v14  ;;  %v1807_v30 = vadd.f32 %v1806_v28, %v4893_v17 }
 0x21b   :  { %v1443_v31 = vpop.f32.mrf.mxu0  ;;  %v1808_v32 = vpop.f32.mrf.mxu1 }
 0x21c   :  { %2155 = vst [vmem:[%s5727_s3 + $0x5e0] sm:$0xff] %v1442_v29  ;;  %2157 = vst [vmem:[%s5727_s3 + $0x5f0] sm:$0xff] %v1807_v30  ;;  %v1444_v33 = vadd.f32 %v1443_v31, %v4903_v20  ;;  %v1809_v34 = vadd.f32 %v1808_v32, %v4905_v21 }
 0x21d   :  { %v1447_v35 = vpop.f32.mrf.mxu0  ;;  %v1812_v36 = vpop.f32.mrf.mxu1 }
 0x21e   :  { %2156 = vst [vmem:[%s5727_s3 + $0x5e8] sm:$0xff] %v1444_v33  ;;  %2158 = vst [vmem:[%s5727_s3 + $0x5f8] sm:$0xff] %v1809_v34  ;;  %v1448_v37 = vadd.f32 %v1447_v35, %v4878_v14  ;;  %v1813_v38 = vadd.f32 %v1812_v36, %v4893_v17 }
 0x21f   :  { %v1449_v40 = vpop.f32.mrf.mxu0  ;;  %v1814_v41 = vpop.f32.mrf.mxu1 }
 0x220   :  { %2163 = vst [vmem:[%s5727_s3 + $0x620] sm:$0xff] %v1448_v37  ;;  %2165 = vst [vmem:[%s5727_s3 + $0x630] sm:$0xff] %v1813_v38  ;;  %v1450_v42 = vadd.f32 %v1449_v40, %v4903_v20  ;;  %v1815_v43 = vadd.f32 %v1814_v41, %v4905_v21 }
 0x221   :  { %v1453_v44 = vpop.f32.mrf.mxu0  ;;  %v1818_v45 = vpop.f32.mrf.mxu1 }
 0x222   :  { %2164 = vst [vmem:[%s5727_s3 + $0x628] sm:$0xff] %v1450_v42  ;;  %2166 = vst [vmem:[%s5727_s3 + $0x638] sm:$0xff] %v1815_v43  ;;  %v1454_v46 = vadd.f32 %v1453_v44, %v4878_v14  ;;  %v1819_v47 = vadd.f32 %v1818_v45, %v4893_v17 }
 0x223   :  { %v1455_v49 = vpop.f32.mrf.mxu0  ;;  %v1820_v51 = vpop.f32.mrf.mxu1 }
 0x224   :  { %2171 = vst [vmem:[%s5727_s3 + $0x660] sm:$0xff] %v1454_v46  ;;  %2173 = vst [vmem:[%s5727_s3 + $0x670] sm:$0xff] %v1819_v47  ;;  %v1456_v54 = vadd.f32 %v1455_v49, %v4903_v20  ;;  %v1821_v55 = vadd.f32 %v1820_v51, %v4905_v21 }
 0x225   :  { %v1459_v56 = vpop.f32.mrf.mxu0  ;;  %v1824_v57 = vpop.f32.mrf.mxu1 }
 0x226   :  { %2172 = vst [vmem:[%s5727_s3 + $0x668] sm:$0xff] %v1456_v54  ;;  %2174 = vst [vmem:[%s5727_s3 + $0x678] sm:$0xff] %v1821_v55  ;;  %v1460_v58 = vadd.f32 %v1459_v56, %v4878_v14  ;;  %v1825_v59 = vadd.f32 %v1824_v57, %v4893_v17 }
 0x227   :  { %v1461_v60 = vpop.f32.mrf.mxu0  ;;  %v1826_v61 = vpop.f32.mrf.mxu1 }
 0x228   :  { %2179 = vst [vmem:[%s5727_s3 + $0x6a0] sm:$0xff] %v1460_v58  ;;  %2181 = vst [vmem:[%s5727_s3 + $0x6b0] sm:$0xff] %v1825_v59  ;;  %v1462_v62 = vadd.f32 %v1461_v60, %v4903_v20  ;;  %v1827_v63 = vadd.f32 %v1826_v61, %v4905_v21 }
 0x229   :  { %v1465_v0 = vpop.f32.mrf.mxu0  ;;  %v1830_v1 = vpop.f32.mrf.mxu1 }
 0x22a   :  { %2180 = vst [vmem:[%s5727_s3 + $0x6a8] sm:$0xff] %v1462_v62  ;;  %2182 = vst [vmem:[%s5727_s3 + $0x6b8] sm:$0xff] %v1827_v63  ;;  %v1466_v2 = vadd.f32 %v1465_v0, %v4878_v14  ;;  %v1831_v3 = vadd.f32 %v1830_v1, %v4893_v17 }
 0x22b   :  { %v1467_v4 = vpop.f32.mrf.mxu0  ;;  %v1832_v5 = vpop.f32.mrf.mxu1 }
 0x22c   :  { %2187 = vst [vmem:[%s5727_s3 + $0x6e0] sm:$0xff] %v1466_v2  ;;  %2189 = vst [vmem:[%s5727_s3 + $0x6f0] sm:$0xff] %v1831_v3  ;;  %v1468_v6 = vadd.f32 %v1467_v4, %v4903_v20  ;;  %v1833_v7 = vadd.f32 %v1832_v5, %v4905_v21 }
 0x22d   :  { %v1471_v8 = vpop.f32.mrf.mxu0  ;;  %v1836_v9 = vpop.f32.mrf.mxu1 }
 0x22e   :  { %2188 = vst [vmem:[%s5727_s3 + $0x6e8] sm:$0xff] %v1468_v6  ;;  %2190 = vst [vmem:[%s5727_s3 + $0x6f8] sm:$0xff] %v1833_v7  ;;  %v1472_v10 = vadd.f32 %v1471_v8, %v4878_v14  ;;  %v1837_v11 = vadd.f32 %v1836_v9, %v4893_v17 }
 0x22f   :  { %v1473_v12 = vpop.f32.mrf.mxu0  ;;  %v1838_v13 = vpop.f32.mrf.mxu1 }
 0x230   :  { %2195 = vst [vmem:[%s5727_s3 + $0x720] sm:$0xff] %v1472_v10  ;;  %2197 = vst [vmem:[%s5727_s3 + $0x730] sm:$0xff] %v1837_v11  ;;  %v1474_v39 = vadd.f32 %v1473_v12, %v4903_v20  ;;  %v1839_v15 = vadd.f32 %v1838_v13, %v4905_v21 }
 0x231   :  { %v1477_v16 = vpop.f32.mrf.mxu0  ;;  %v1842_v18 = vpop.f32.mrf.mxu1 }
 0x232   :  { %2196 = vst [vmem:[%s5727_s3 + $0x728] sm:$0xff] %v1474_v39  ;;  %2198 = vst [vmem:[%s5727_s3 + $0x738] sm:$0xff] %v1839_v15  ;;  %v1478_v19 = vadd.f32 %v1477_v16, %v4878_v14  ;;  %v1843_v48 = vadd.f32 %v1842_v18, %v4893_v17 }
 0x233   :  { %v1479_v50 = vpop.f32.mrf.mxu0  ;;  %v1844_v22 = vpop.f32.mrf.mxu1 }
 0x234   :  { %2203 = vst [vmem:[%s5727_s3 + $0x760] sm:$0xff] %v1478_v19  ;;  %2205 = vst [vmem:[%s5727_s3 + $0x770] sm:$0xff] %v1843_v48  ;;  %v1480_v23 = vadd.f32 %v1479_v50, %v4903_v20  ;;  %v1845_v24 = vadd.f32 %v1844_v22, %v4905_v21 }
 0x235   :  { %v1483_v52 = vpop.f32.mrf.mxu0  ;;  %v1848_v53 = vpop.f32.mrf.mxu1 }
 0x236   :  { %2204 = vst [vmem:[%s5727_s3 + $0x768] sm:$0xff] %v1480_v23  ;;  %2206 = vst [vmem:[%s5727_s3 + $0x778] sm:$0xff] %v1845_v24  ;;  %v1484_v25 = vadd.f32 %v1483_v52, %v4878_v14  ;;  %v1849_v26 = vadd.f32 %v1848_v53, %v4893_v17 }
 0x237   :  { %v1485_v27 = vpop.f32.mrf.mxu0  ;;  %v1850_v28 = vpop.f32.mrf.mxu1 }
 0x238   :  { %2211 = vst [vmem:[%s5727_s3 + $0x7a0] sm:$0xff] %v1484_v25  ;;  %2213 = vst [vmem:[%s5727_s3 + $0x7b0] sm:$0xff] %v1849_v26  ;;  %v1486_v29 = vadd.f32 %v1485_v27, %v4903_v20  ;;  %v1851_v30 = vadd.f32 %v1850_v28, %v4905_v21 }
 0x239   :  { %v1489_v31 = vpop.f32.mrf.mxu0  ;;  %v1854_v32 = vpop.f32.mrf.mxu1 }
 0x23a   :  { %2212 = vst [vmem:[%s5727_s3 + $0x7a8] sm:$0xff] %v1486_v29  ;;  %2214 = vst [vmem:[%s5727_s3 + $0x7b8] sm:$0xff] %v1851_v30  ;;  %v1490_v33 = vadd.f32 %v1489_v31, %v4878_v14  ;;  %v1855_v34 = vadd.f32 %v1854_v32, %v4893_v17 }
 0x23b   :  { %v1491_v35 = vpop.f32.mrf.mxu0  ;;  %v1856_v36 = vpop.f32.mrf.mxu1 }
 0x23c   :  { %2219 = vst [vmem:[%s5727_s3 + $0x7e0] sm:$0xff] %v1490_v33  ;;  %2221 = vst [vmem:[%s5727_s3 + $0x7f0] sm:$0xff] %v1855_v34  ;;  %v1492_v37 = vadd.f32 %v1491_v35, %v4903_v20  ;;  %v1857_v38 = vadd.f32 %v1856_v36, %v4905_v21 }
 0x23d   :  { %v1495_v40 = vpop.f32.mrf.mxu0  ;;  %v1860_v41 = vpop.f32.mrf.mxu1 }
 0x23e   :  { %2220 = vst [vmem:[%s5727_s3 + $0x7e8] sm:$0xff] %v1492_v37  ;;  %2222 = vst [vmem:[%s5727_s3 + $0x7f8] sm:$0xff] %v1857_v38  ;;  %v1496_v42 = vadd.f32 %v1495_v40, %v4878_v14  ;;  %v1861_v43 = vadd.f32 %v1860_v41, %v4893_v17 }
 0x23f   :  { %v1497_v44 = vpop.f32.mrf.mxu0  ;;  %v1862_v45 = vpop.f32.mrf.mxu1 }
 0x240   :  { %2227 = vst [vmem:[%s5727_s3 + $0x820] sm:$0xff] %v1496_v42  ;;  %2229 = vst [vmem:[%s5727_s3 + $0x830] sm:$0xff] %v1861_v43  ;;  %v1498_v46 = vadd.f32 %v1497_v44, %v4903_v20  ;;  %v1863_v47 = vadd.f32 %v1862_v45, %v4905_v21 }
 0x241   :  { %v1501_v49 = vpop.f32.mrf.mxu0  ;;  %v1866_v51 = vpop.f32.mrf.mxu1 }
 0x242   :  { %2228 = vst [vmem:[%s5727_s3 + $0x828] sm:$0xff] %v1498_v46  ;;  %2230 = vst [vmem:[%s5727_s3 + $0x838] sm:$0xff] %v1863_v47  ;;  %v1502_v54 = vadd.f32 %v1501_v49, %v4878_v14  ;;  %v1867_v55 = vadd.f32 %v1866_v51, %v4893_v17 }
 0x243   :  { %v1503_v56 = vpop.f32.mrf.mxu0  ;;  %v1868_v57 = vpop.f32.mrf.mxu1 }
 0x244   :  { %2235 = vst [vmem:[%s5727_s3 + $0x860] sm:$0xff] %v1502_v54  ;;  %2237 = vst [vmem:[%s5727_s3 + $0x870] sm:$0xff] %v1867_v55  ;;  %v1504_v58 = vadd.f32 %v1503_v56, %v4903_v20  ;;  %v1869_v59 = vadd.f32 %v1868_v57, %v4905_v21 }
 0x245   :  { %v1507_v60 = vpop.f32.mrf.mxu0  ;;  %v1872_v61 = vpop.f32.mrf.mxu1 }
 0x246   :  { %2236 = vst [vmem:[%s5727_s3 + $0x868] sm:$0xff] %v1504_v58  ;;  %2238 = vst [vmem:[%s5727_s3 + $0x878] sm:$0xff] %v1869_v59  ;;  %v1508_v62 = vadd.f32 %v1507_v60, %v4878_v14  ;;  %v1873_v63 = vadd.f32 %v1872_v61, %v4893_v17 }
 0x247   :  { %v1509_v0 = vpop.f32.mrf.mxu0  ;;  %v1874_v1 = vpop.f32.mrf.mxu1 }
 0x248   :  { %2243 = vst [vmem:[%s5727_s3 + $0x8a0] sm:$0xff] %v1508_v62  ;;  %2245 = vst [vmem:[%s5727_s3 + $0x8b0] sm:$0xff] %v1873_v63  ;;  %v1510_v2 = vadd.f32 %v1509_v0, %v4903_v20  ;;  %v1875_v3 = vadd.f32 %v1874_v1, %v4905_v21 }
 0x249   :  { %v1513_v4 = vpop.f32.mrf.mxu0  ;;  %v1878_v5 = vpop.f32.mrf.mxu1 }
 0x24a   :  { %2244 = vst [vmem:[%s5727_s3 + $0x8a8] sm:$0xff] %v1510_v2  ;;  %2246 = vst [vmem:[%s5727_s3 + $0x8b8] sm:$0xff] %v1875_v3  ;;  %v1514_v6 = vadd.f32 %v1513_v4, %v4878_v14  ;;  %v1879_v7 = vadd.f32 %v1878_v5, %v4893_v17 }
 0x24b   :  { %v1515_v8 = vpop.f32.mrf.mxu0  ;;  %v1880_v9 = vpop.f32.mrf.mxu1 }
 0x24c   :  { %2251 = vst [vmem:[%s5727_s3 + $0x8e0] sm:$0xff] %v1514_v6  ;;  %2253 = vst [vmem:[%s5727_s3 + $0x8f0] sm:$0xff] %v1879_v7  ;;  %v1516_v10 = vadd.f32 %v1515_v8, %v4903_v20  ;;  %v1881_v11 = vadd.f32 %v1880_v9, %v4905_v21 }
 0x24d   :  { %v1519_v12 = vpop.f32.mrf.mxu0  ;;  %v1884_v13 = vpop.f32.mrf.mxu1 }
 0x24e   :  { %2252 = vst [vmem:[%s5727_s3 + $0x8e8] sm:$0xff] %v1516_v10  ;;  %2254 = vst [vmem:[%s5727_s3 + $0x8f8] sm:$0xff] %v1881_v11  ;;  %v1520_v39 = vadd.f32 %v1519_v12, %v4878_v14  ;;  %v1885_v15 = vadd.f32 %v1884_v13, %v4893_v17 }
 0x24f   :  { %v1521_v16 = vpop.f32.mrf.mxu0  ;;  %v1886_v18 = vpop.f32.mrf.mxu1 }
 0x250   :  { %2259 = vst [vmem:[%s5727_s3 + $0x920] sm:$0xff] %v1520_v39  ;;  %2261 = vst [vmem:[%s5727_s3 + $0x930] sm:$0xff] %v1885_v15  ;;  %v1522_v19 = vadd.f32 %v1521_v16, %v4903_v20  ;;  %v1887_v48 = vadd.f32 %v1886_v18, %v4905_v21 }
 0x251   :  { %v1525_v50 = vpop.f32.mrf.mxu0  ;;  %v1890_v22 = vpop.f32.mrf.mxu1 }
 0x252   :  { %2260 = vst [vmem:[%s5727_s3 + $0x928] sm:$0xff] %v1522_v19  ;;  %2262 = vst [vmem:[%s5727_s3 + $0x938] sm:$0xff] %v1887_v48  ;;  %v1526_v23 = vadd.f32 %v1525_v50, %v4878_v14  ;;  %v1891_v24 = vadd.f32 %v1890_v22, %v4893_v17 }
 0x253   :  { %v1527_v52 = vpop.f32.mrf.mxu0  ;;  %v1892_v53 = vpop.f32.mrf.mxu1 }
 0x254   :  { %2267 = vst [vmem:[%s5727_s3 + $0x960] sm:$0xff] %v1526_v23  ;;  %2269 = vst [vmem:[%s5727_s3 + $0x970] sm:$0xff] %v1891_v24  ;;  %v1528_v25 = vadd.f32 %v1527_v52, %v4903_v20  ;;  %v1893_v26 = vadd.f32 %v1892_v53, %v4905_v21 }
 0x255   :  { %v1531_v27 = vpop.f32.mrf.mxu0  ;;  %v1896_v28 = vpop.f32.mrf.mxu1 }
 0x256   :  { %2268 = vst [vmem:[%s5727_s3 + $0x968] sm:$0xff] %v1528_v25  ;;  %2270 = vst [vmem:[%s5727_s3 + $0x978] sm:$0xff] %v1893_v26  ;;  %v1532_v29 = vadd.f32 %v1531_v27, %v4878_v14  ;;  %v1897_v30 = vadd.f32 %v1896_v28, %v4893_v17 }
 0x257   :  { %v1533_v31 = vpop.f32.mrf.mxu0  ;;  %v1898_v32 = vpop.f32.mrf.mxu1 }
 0x258   :  { %2275 = vst [vmem:[%s5727_s3 + $0x9a0] sm:$0xff] %v1532_v29  ;;  %2277 = vst [vmem:[%s5727_s3 + $0x9b0] sm:$0xff] %v1897_v30  ;;  %v1534_v33 = vadd.f32 %v1533_v31, %v4903_v20  ;;  %v1899_v34 = vadd.f32 %v1898_v32, %v4905_v21 }
 0x259   :  { %v1537_v35 = vpop.f32.mrf.mxu0  ;;  %v1902_v36 = vpop.f32.mrf.mxu1 }
 0x25a   :  { %2276 = vst [vmem:[%s5727_s3 + $0x9a8] sm:$0xff] %v1534_v33  ;;  %2278 = vst [vmem:[%s5727_s3 + $0x9b8] sm:$0xff] %v1899_v34  ;;  %v1538_v37 = vadd.f32 %v1537_v35, %v4878_v14  ;;  %v1903_v38 = vadd.f32 %v1902_v36, %v4893_v17 }
 0x25b   :  { %v1539_v40 = vpop.f32.mrf.mxu0  ;;  %v1904_v41 = vpop.f32.mrf.mxu1 }
 0x25c   :  { %2283 = vst [vmem:[%s5727_s3 + $0x9e0] sm:$0xff] %v1538_v37  ;;  %2285 = vst [vmem:[%s5727_s3 + $0x9f0] sm:$0xff] %v1903_v38  ;;  %v1540_v42 = vadd.f32 %v1539_v40, %v4903_v20  ;;  %v1905_v43 = vadd.f32 %v1904_v41, %v4905_v21 }
 0x25d   :  { %v1543_v44 = vpop.f32.mrf.mxu0  ;;  %v1908_v45 = vpop.f32.mrf.mxu1 }
 0x25e   :  { %2284 = vst [vmem:[%s5727_s3 + $0x9e8] sm:$0xff] %v1540_v42  ;;  %2286 = vst [vmem:[%s5727_s3 + $0x9f8] sm:$0xff] %v1905_v43  ;;  %v1544_v46 = vadd.f32 %v1543_v44, %v4878_v14  ;;  %v1909_v47 = vadd.f32 %v1908_v45, %v4893_v17 }
 0x25f   :  { %v1545_v49 = vpop.f32.mrf.mxu0  ;;  %v1910_v51 = vpop.f32.mrf.mxu1 }
 0x260   :  { %2291 = vst [vmem:[%s5727_s3 + $0xa20] sm:$0xff] %v1544_v46  ;;  %2293 = vst [vmem:[%s5727_s3 + $0xa30] sm:$0xff] %v1909_v47  ;;  %v1546_v54 = vadd.f32 %v1545_v49, %v4903_v20  ;;  %v1911_v55 = vadd.f32 %v1910_v51, %v4905_v21 }
 0x261   :  { %v1549_v56 = vpop.f32.mrf.mxu0  ;;  %v1914_v57 = vpop.f32.mrf.mxu1 }
 0x262   :  { %2292 = vst [vmem:[%s5727_s3 + $0xa28] sm:$0xff] %v1546_v54  ;;  %2294 = vst [vmem:[%s5727_s3 + $0xa38] sm:$0xff] %v1911_v55  ;;  %v1550_v58 = vadd.f32 %v1549_v56, %v4878_v14  ;;  %v1915_v59 = vadd.f32 %v1914_v57, %v4893_v17 }
 0x263   :  { %v1551_v60 = vpop.f32.mrf.mxu0  ;;  %v1916_v61 = vpop.f32.mrf.mxu1 }
 0x264   :  { %2299 = vst [vmem:[%s5727_s3 + $0xa60] sm:$0xff] %v1550_v58  ;;  %2301 = vst [vmem:[%s5727_s3 + $0xa70] sm:$0xff] %v1915_v59  ;;  %v1552_v62 = vadd.f32 %v1551_v60, %v4903_v20  ;;  %v1917_v63 = vadd.f32 %v1916_v61, %v4905_v21 }
 0x265   :  { %v1555_v0 = vpop.f32.mrf.mxu0  ;;  %v1920_v1 = vpop.f32.mrf.mxu1 }
 0x266   :  { %2300 = vst [vmem:[%s5727_s3 + $0xa68] sm:$0xff] %v1552_v62  ;;  %2302 = vst [vmem:[%s5727_s3 + $0xa78] sm:$0xff] %v1917_v63  ;;  %v1556_v2 = vadd.f32 %v1555_v0, %v4878_v14  ;;  %v1921_v3 = vadd.f32 %v1920_v1, %v4893_v17 }
 0x267   :  { %v1557_v4 = vpop.f32.mrf.mxu0  ;;  %v1922_v5 = vpop.f32.mrf.mxu1 }
 0x268   :  { %2307 = vst [vmem:[%s5727_s3 + $0xaa0] sm:$0xff] %v1556_v2  ;;  %2309 = vst [vmem:[%s5727_s3 + $0xab0] sm:$0xff] %v1921_v3  ;;  %v1558_v6 = vadd.f32 %v1557_v4, %v4903_v20  ;;  %v1923_v7 = vadd.f32 %v1922_v5, %v4905_v21 }
 0x269   :  { %v1561_v8 = vpop.f32.mrf.mxu0  ;;  %v1926_v9 = vpop.f32.mrf.mxu1 }
 0x26a   :  { %2308 = vst [vmem:[%s5727_s3 + $0xaa8] sm:$0xff] %v1558_v6  ;;  %2310 = vst [vmem:[%s5727_s3 + $0xab8] sm:$0xff] %v1923_v7  ;;  %v1562_v10 = vadd.f32 %v1561_v8, %v4878_v14  ;;  %v1927_v11 = vadd.f32 %v1926_v9, %v4893_v17 }
 0x26b   :  { %v1563_v12 = vpop.f32.mrf.mxu0  ;;  %v1928_v13 = vpop.f32.mrf.mxu1 }
 0x26c   :  { %2315 = vst [vmem:[%s5727_s3 + $0xae0] sm:$0xff] %v1562_v10  ;;  %2317 = vst [vmem:[%s5727_s3 + $0xaf0] sm:$0xff] %v1927_v11  ;;  %v1564_v39 = vadd.f32 %v1563_v12, %v4903_v20  ;;  %v1929_v15 = vadd.f32 %v1928_v13, %v4905_v21 }
 0x26d   :  { %v1567_v16 = vpop.f32.mrf.mxu0  ;;  %v1932_v18 = vpop.f32.mrf.mxu1 }
 0x26e   :  { %2316 = vst [vmem:[%s5727_s3 + $0xae8] sm:$0xff] %v1564_v39  ;;  %2318 = vst [vmem:[%s5727_s3 + $0xaf8] sm:$0xff] %v1929_v15  ;;  %v1568_v19 = vadd.f32 %v1567_v16, %v4878_v14  ;;  %v1933_v48 = vadd.f32 %v1932_v18, %v4893_v17 }
 0x26f   :  { %v1569_v50 = vpop.f32.mrf.mxu0  ;;  %v1934_v22 = vpop.f32.mrf.mxu1 }
 0x270   :  { %2323 = vst [vmem:[%s5727_s3 + $0xb20] sm:$0xff] %v1568_v19  ;;  %2325 = vst [vmem:[%s5727_s3 + $0xb30] sm:$0xff] %v1933_v48  ;;  %v1570_v23 = vadd.f32 %v1569_v50, %v4903_v20  ;;  %v1935_v24 = vadd.f32 %v1934_v22, %v4905_v21 }
 0x271   :  { %v1573_v52 = vpop.f32.mrf.mxu0  ;;  %v1938_v53 = vpop.f32.mrf.mxu1 }
 0x272   :  { %2324 = vst [vmem:[%s5727_s3 + $0xb28] sm:$0xff] %v1570_v23  ;;  %2326 = vst [vmem:[%s5727_s3 + $0xb38] sm:$0xff] %v1935_v24  ;;  %v1574_v25 = vadd.f32 %v1573_v52, %v4878_v14  ;;  %v1939_v26 = vadd.f32 %v1938_v53, %v4893_v17 }
 0x273   :  { %v1575_v27 = vpop.f32.mrf.mxu0  ;;  %v1940_v28 = vpop.f32.mrf.mxu1 }
 0x274   :  { %2331 = vst [vmem:[%s5727_s3 + $0xb60] sm:$0xff] %v1574_v25  ;;  %2333 = vst [vmem:[%s5727_s3 + $0xb70] sm:$0xff] %v1939_v26  ;;  %v1576_v29 = vadd.f32 %v1575_v27, %v4903_v20  ;;  %v1941_v30 = vadd.f32 %v1940_v28, %v4905_v21 }
 0x275   :  { %v1579_v31 = vpop.f32.mrf.mxu0  ;;  %v1944_v32 = vpop.f32.mrf.mxu1 }
 0x276   :  { %2332 = vst [vmem:[%s5727_s3 + $0xb68] sm:$0xff] %v1576_v29  ;;  %2334 = vst [vmem:[%s5727_s3 + $0xb78] sm:$0xff] %v1941_v30  ;;  %v1580_v33 = vadd.f32 %v1579_v31, %v4878_v14  ;;  %v1945_v34 = vadd.f32 %v1944_v32, %v4893_v17 }
 0x277   :  { %v1581_v35 = vpop.f32.mrf.mxu0  ;;  %v1946_v36 = vpop.f32.mrf.mxu1 }
 0x278   :  { %2339 = vst [vmem:[%s5727_s3 + $0xba0] sm:$0xff] %v1580_v33  ;;  %2341 = vst [vmem:[%s5727_s3 + $0xbb0] sm:$0xff] %v1945_v34  ;;  %v1582_v37 = vadd.f32 %v1581_v35, %v4903_v20  ;;  %v1947_v38 = vadd.f32 %v1946_v36, %v4905_v21 }
 0x279   :  { %v1585_v40 = vpop.f32.mrf.mxu0  ;;  %v1950_v41 = vpop.f32.mrf.mxu1 }
 0x27a   :  { %2340 = vst [vmem:[%s5727_s3 + $0xba8] sm:$0xff] %v1582_v37  ;;  %2342 = vst [vmem:[%s5727_s3 + $0xbb8] sm:$0xff] %v1947_v38  ;;  %v1586_v42 = vadd.f32 %v1585_v40, %v4878_v14  ;;  %v1951_v43 = vadd.f32 %v1950_v41, %v4893_v17 }
 0x27b   :  { %v1587_v44 = vpop.f32.mrf.mxu0  ;;  %v1952_v45 = vpop.f32.mrf.mxu1 }
 0x27c   :  { %2347 = vst [vmem:[%s5727_s3 + $0xbe0] sm:$0xff] %v1586_v42  ;;  %2349 = vst [vmem:[%s5727_s3 + $0xbf0] sm:$0xff] %v1951_v43  ;;  %v1588_v46 = vadd.f32 %v1587_v44, %v4903_v20  ;;  %v1953_v47 = vadd.f32 %v1952_v45, %v4905_v21 }
 0x27d   :  { %v1591_v49 = vpop.f32.mrf.mxu0  ;;  %v1956_v51 = vpop.f32.mrf.mxu1 }
 0x27e   :  { %2348 = vst [vmem:[%s5727_s3 + $0xbe8] sm:$0xff] %v1588_v46  ;;  %2350 = vst [vmem:[%s5727_s3 + $0xbf8] sm:$0xff] %v1953_v47  ;;  %v1592_v54 = vadd.f32 %v1591_v49, %v4878_v14  ;;  %v1957_v55 = vadd.f32 %v1956_v51, %v4893_v17 }
 0x27f   :  { %v1593_v56 = vpop.f32.mrf.mxu0  ;;  %v1958_v57 = vpop.f32.mrf.mxu1 }
 0x280   :  { %2355 = vst [vmem:[%s5727_s3 + $0xc20] sm:$0xff] %v1592_v54  ;;  %2357 = vst [vmem:[%s5727_s3 + $0xc30] sm:$0xff] %v1957_v55  ;;  %v1594_v58 = vadd.f32 %v1593_v56, %v4903_v20  ;;  %v1959_v59 = vadd.f32 %v1958_v57, %v4905_v21 }
 0x281   :  { %v1597_v60 = vpop.f32.mrf.mxu0  ;;  %v1962_v61 = vpop.f32.mrf.mxu1 }
 0x282   :  { %2356 = vst [vmem:[%s5727_s3 + $0xc28] sm:$0xff] %v1594_v58  ;;  %2358 = vst [vmem:[%s5727_s3 + $0xc38] sm:$0xff] %v1959_v59  ;;  %v1598_v62 = vadd.f32 %v1597_v60, %v4878_v14  ;;  %v1963_v63 = vadd.f32 %v1962_v61, %v4893_v17 }
 0x283   :  { %v1599_v0 = vpop.f32.mrf.mxu0  ;;  %v1964_v1 = vpop.f32.mrf.mxu1 }
 0x284   :  { %2363 = vst [vmem:[%s5727_s3 + $0xc60] sm:$0xff] %v1598_v62  ;;  %2365 = vst [vmem:[%s5727_s3 + $0xc70] sm:$0xff] %v1963_v63  ;;  %v1600_v2 = vadd.f32 %v1599_v0, %v4903_v20  ;;  %v1965_v3 = vadd.f32 %v1964_v1, %v4905_v21 }
 0x286   :  { %2364 = vst [vmem:[%s5727_s3 + $0xc68] sm:$0xff] %v1600_v2  ;;  %2366 = vst [vmem:[%s5727_s3 + $0xc78] sm:$0xff] %v1965_v3 }

// kernel: reverse
= control target key start
LH: loop header
LB: loop body
LE: loop exit
PB: predicated region body
PF: predicated region fallthrough
CT: control target
= control target key end

     0   :  { %v2_v0 = vlaneseq  ;;  %s318_s0 = inlined_call_operand.vmem [shape: f32[256,2], index: 0, kind: input, shape index: {}]   ;;  %s319_s1 = inlined_call_operand.vmem [shape: f32[256,2], index: 1, kind: output, shape index: {}]  }
   0x2   :  { %v3_v1 = vsub.s32 127, %v2_v0 }
   0x4   :  { %4 = vset.pattern.permute.xlu0 %v3_v1 }
   0x5   :  { %s278_s6 = smov 0   ;;  %s280_s7 = smov 0  }
   0x6   :  { %s282_s8 = smov 0  }
   0x7 LB: > { %s208_s9 = sadd.s32 4294967295, %s266_s8   ;;  %s19_s10 = sadd.s32 1, %s262_s7  ;;  %s266_s8 = sphi %s282_s8, %s10_s8   ;;  %s262_s7 = sphi %s280_s7, %s321_s7   ;;  %s258_s6 = sphi %s278_s6, %s320_s6  }
   0x8   : > { %p20_p0 = scmp.ge.s32.totalorder %s19_s10, 2  ;;  %p210_p1 = scmp.ge.s32.totalorder %s266_s8, 2 }
   0x9   : > { %s38_s11 = sand.u32 (!%p210_p1), 1, %s266_s8   ;;  %s41_s12 = ssub.s32 (!%p210_p1), 1, %s262_s7 }
   0xa   : > { %s323_s10 = smov (%p20_p0, %s19_s10), 0  ;;  %36 = sbr.rel (%p210_p1) target bundleno = 17 (0x11), region = 16 }
   0xb   : > { %s211_s13 = sshll.u32 (!%p210_p1), %s38_s11, 1  ;;  %s212_s14 = sshll.u32 (!%p210_p1), %s41_s12, 1 }
   0xc   : > { %s45_s17 = scalar_lea.vmem (!%p210_p1), %s318_s0, %s212_s14  ;;  %s40_s18 = scalar_lea.vmem (!%p210_p1), [#allocation1], %s211_s13 }
   0xf   : > { %v62_v2 = vld [vmem:[%s45_s17] sm:$0x3] }
  0x10   : > { %63 = vst [vmem:[%s40_s18] sm:$0x3] %v62_v2 }
  0x11 PF: > { %p213_p2 = scmp.ge.s32.totalorder %s266_s8, 1  ;;  %p80_p3 = scmp.lt.s32.totalorder %s266_s8, 3 }
  0x13   : > { %p81_p4 = pnand %p213_p2, %p80_p3 }
  0x14   : > { %s91_s19 = sand.u32 (!%p81_p4), 1, %s208_s9   ;;  %s217_s23 = sshll.u32 (!%p81_p4), %s258_s6, 1 }
  0x15   : > { %84 = sbr.rel (%p81_p4) target bundleno = 176 (0xb0), region = 50  ;;  %s214_s20 = sshll.u32 (!%p81_p4), %s91_s19, 1 }
  0x16   : > { %s93_s21 = scalar_lea.vmem (!%p81_p4), [#allocation1], %s214_s20  ;;  %s97_s22 = scalar_lea.vmem (!%p81_p4), [#allocation3], %s214_s20 }
  0x17   : > { %s123_s26 = scalar_lea.vmem (!%p81_p4), %s319_s1, %s217_s23 }
  0x1a   : > { %v101_v3 = vld [vmem:[%s93_s21] sm:$0x3] }
  0x1b   : > { %102 = vst [vmem:[#allocation0] sm:$0x3] %v101_v3 }
  0x22   : > { %v104_v4 = vld [vmem:[#allocation0] sm:$0xff] }
  0x23   : > { %105 = vperm.xlu0 %4, %v104_v4  }
  0x9e   : > { %v106_v5 = vpop.permute.xlu0 %105 }
  0x9f   : > { %107 = vst [vmem:[#allocation2] sm:$0xff] %v106_v5 }
  0xa6   : > { %v112_v6 = vld [vmem:[#allocation2] sm:$0x3] }
  0xa7   : > { %115 = vst [vmem:[%s97_s22] sm:$0x3] %v112_v6 }
  0xae   : > { %v140_v7 = vld [vmem:[%s97_s22] sm:$0x3] }
  0xaf   : > { %141 = vst [vmem:[%s123_s26] sm:$0x3] %v140_v7 }
  0xb0 PF: > { %s10_s8 = sadd.s32 1, %s266_s8   ;;  %s320_s6 = smov %s262_s7 }
  0xb1   : > { %p7_p5 = scmp.ge.s32.totalorder %s10_s8, 4   ;;  %s321_s7 = smov %s323_s10 }
  0xb3   :  { %9 = sbr.rel (!%p7_p5) target bundleno = 7 (0x7), region = 110 }

// kernel: dlstm_forward.4
= control target key start
LH: loop header
LB: loop body
LE: loop exit
PB: predicated region body
PF: predicated region fallthrough
CT: control target
= control target key end

     0   :  { %vm705_vm1 = vmmov 1   ;;  %s1375_s25 = smov 0   ;;  %s1684_s0 = inlined_call_operand.vmem [shape: f32[200,4,512], index: 0, kind: input, shape index: {}]   ;;  %s1685_s1 = inlined_call_operand.vmem [shape: f32[200,4,128], index: 1, kind: input, shape index: {}]   ;;  %s1686_s2 = inlined_call_operand.vmem [shape: f32[256,512], index: 2, kind: input, shape index: {}]   ;;  %s1687_s3 = inlined_call_operand.vmem [shape: f32[200,4,128], index: 3, kind: output, shape index: {}]  }
   0x1   :  { %v730_v0 = vld [vmem:[%s1686_s2] sm:$0xff]  ;;  %v735_v1 = vld [vmem:[%s1686_s2 + $0x8] sm:$0xff]  ;;  %v740_v2 = vld [vmem:[%s1686_s2 + $0x10] sm:$0xff] }
   0x2   :  { %1778 = vst [vmem:[#allocation2_spill] sm:$0xff] %v730_v0  ;;  %1779 = vst [vmem:[#allocation3_spill] sm:$0xff] %v735_v1  ;;  %v745_v3 = vld [vmem:[%s1686_s2 + $0x18] sm:$0xff]  ;;  %v750_v4 = vld [vmem:[%s1686_s2 + $0x20] sm:$0xff] }
   0x3   :  { %1780 = vst [vmem:[#allocation4_spill] sm:$0xff] %v740_v2  ;;  %1781 = vst [vmem:[#allocation5_spill] sm:$0xff] %v745_v3  ;;  %v755_v5 = vld [vmem:[%s1686_s2 + $0x28] sm:$0xff]  ;;  %v760_v6 = vld [vmem:[%s1686_s2 + $0x30] sm:$0xff] }
   0x4   :  { %1782 = vst [vmem:[#allocation6_spill] sm:$0xff] %v750_v4  ;;  %1783 = vst [vmem:[#allocation7_spill] sm:$0xff] %v755_v5  ;;  %v765_v7 = vld [vmem:[%s1686_s2 + $0x38] sm:$0xff]  ;;  %v770_v8 = vld [vmem:[%s1686_s2 + $0x40] sm:$0xff] }
   0x5   :  { %1784 = vst [vmem:[#allocation8_spill] sm:$0xff] %v760_v6  ;;  %1785 = vst [vmem:[#allocation9_spill] sm:$0xff] %v765_v7  ;;  %v775_v9 = vld [vmem:[%s1686_s2 + $0x48] sm:$0xff]  ;;  %v780_v10 = vld [vmem:[%s1686_s2 + $0x50] sm:$0xff]  ;;  %v1371_v7 = vmov 0.0  }
   0x6   :  { %1786 = vst [vmem:[#allocation10_spill] sm:$0xff] %v770_v8  ;;  %1787 = vst [vmem:[#allocation11_spill] sm:$0xff] %v775_v9  ;;  %v785_v11 = vld [vmem:[%s1686_s2 + $0x58] sm:$0xff]  ;;  %v790_v12 = vld [vmem:[%s1686_s2 + $0x60] sm:$0xff] }
   0x7   :  { %1788 = vst [vmem:[#allocation12_spill] sm:$0xff] %v780_v10  ;;  %1789 = vst [vmem:[#allocation13_spill] sm:$0xff] %v785_v11  ;;  %v795_v13 = vld [vmem:[%s1686_s2 + $0x68] sm:$0xff]  ;;  %v800_v14 = vld [vmem:[%s1686_s2 + $0x70] sm:$0xff] }
   0x8   :  { %1790 = vst [vmem:[#allocation14_spill] sm:$0xff] %v790_v12  ;;  %1791 = vst [vmem:[#allocation15_spill] sm:$0xff] %v795_v13  ;;  %v805_v15 = vld [vmem:[%s1686_s2 + $0x78] sm:$0xff]  ;;  %v810_v16 = vld [vmem:[%s1686_s2 + $0x80] sm:$0xff] }
   0x9   :  { %1792 = vst [vmem:[#allocation16_spill] sm:$0xff] %v800_v14  ;;  %1793 = vst [vmem:[#allocation17_spill] sm:$0xff] %v805_v15  ;;  %v815_v17 = vld [vmem:[%s1686_s2 + $0x88] sm:$0xff]  ;;  %v820_v18 = vld [vmem:[%s1686_s2 + $0x90] sm:$0xff] }
   0xa   :  { %1794 = vst [vmem:[#allocation18_spill] sm:$0xff] %v810_v16  ;;  %1795 = vst [vmem:[#allocation19_spill] sm:$0xff] %v815_v17  ;;  %v825_v19 = vld [vmem:[%s1686_s2 + $0x98] sm:$0xff]  ;;  %v830_v20 = vld [vmem:[%s1686_s2 + $0xa0] sm:$0xff] }
   0xb   :  { %1796 = vst [vmem:[#allocation20_spill] sm:$0xff] %v820_v18  ;;  %1797 = vst [vmem:[#allocation21_spill] sm:$0xff] %v830_v20  ;;  %v835_v21 = vld [vmem:[%s1686_s2 + $0xa8] sm:$0xff]  ;;  %v840_v22 = vld [vmem:[%s1686_s2 + $0xb0] sm:$0xff] }
   0xc   :  { %1798 = vst [vmem:[#allocation22_spill] sm:$0xff] %v835_v21  ;;  %v845_v23 = vld [vmem:[%s1686_s2 + $0xb8] sm:$0xff]  ;;  %v850_v24 = vld [vmem:[%s1686_s2 + $0xc0] sm:$0xff]  ;;  %v855_v25 = vld [vmem:[%s1686_s2 + $0xc8] sm:$0xff] }
   0xd   :  { %1799 = vst [vmem:[#allocation23_spill] sm:$0xff] %v845_v23  ;;  %1800 = vst [vmem:[#allocation24_spill] sm:$0xff] %v850_v24  ;;  %v860_v26 = vld [vmem:[%s1686_s2 + $0xd0] sm:$0xff]  ;;  %v865_v27 = vld [vmem:[%s1686_s2 + $0xd8] sm:$0xff] }
   0xe   :  { %1801 = vst [vmem:[#allocation25_spill] sm:$0xff] %v855_v25  ;;  %v870_v28 = vld [vmem:[%s1686_s2 + $0xe0] sm:$0xff]  ;;  %v875_v29 = vld [vmem:[%s1686_s2 + $0xe8] sm:$0xff]  ;;  %v880_v30 = vld [vmem:[%s1686_s2 + $0xf0] sm:$0xff] }
   0xf   :  { %v885_v31 = vld [vmem:[%s1686_s2 + $0xf8] sm:$0xff]  ;;  %v890_v32 = vld [vmem:[%s1686_s2 + $0x100] sm:$0xff]  ;;  %v895_v33 = vld [vmem:[%s1686_s2 + $0x108] sm:$0xff] }
  0x10   :  { %v900_v34 = vld [vmem:[%s1686_s2 + $0x110] sm:$0xff]  ;;  %v905_v35 = vld [vmem:[%s1686_s2 + $0x118] sm:$0xff]  ;;  %v910_v36 = vld [vmem:[%s1686_s2 + $0x120] sm:$0xff] }
  0x11   :  { %v915_v37 = vld [vmem:[%s1686_s2 + $0x128] sm:$0xff]  ;;  %v920_v38 = vld [vmem:[%s1686_s2 + $0x130] sm:$0xff]  ;;  %v925_v39 = vld [vmem:[%s1686_s2 + $0x138] sm:$0xff] }
  0x12   :  { %v930_v40 = vld [vmem:[%s1686_s2 + $0x140] sm:$0xff]  ;;  %v935_v41 = vld [vmem:[%s1686_s2 + $0x148] sm:$0xff]  ;;  %v940_v42 = vld [vmem:[%s1686_s2 + $0x150] sm:$0xff] }
  0x13   :  { %v945_v43 = vld [vmem:[%s1686_s2 + $0x158] sm:$0xff]  ;;  %v950_v44 = vld [vmem:[%s1686_s2 + $0x160] sm:$0xff]  ;;  %v955_v45 = vld [vmem:[%s1686_s2 + $0x168] sm:$0xff] }
  0x14   :  { %v960_v46 = vld [vmem:[%s1686_s2 + $0x170] sm:$0xff]  ;;  %v965_v47 = vld [vmem:[%s1686_s2 + $0x178] sm:$0xff]  ;;  %v970_v48 = vld [vmem:[%s1686_s2 + $0x180] sm:$0xff] }
  0x15   :  { %v975_v49 = vld [vmem:[%s1686_s2 + $0x188] sm:$0xff]  ;;  %v980_v50 = vld [vmem:[%s1686_s2 + $0x190] sm:$0xff]  ;;  %v985_v51 = vld [vmem:[%s1686_s2 + $0x198] sm:$0xff] }
  0x16   :  { %v990_v52 = vld [vmem:[%s1686_s2 + $0x1a0] sm:$0xff]  ;;  %v995_v53 = vld [vmem:[%s1686_s2 + $0x1a8] sm:$0xff]  ;;  %v1000_v54 = vld [vmem:[%s1686_s2 + $0x1b0] sm:$0xff] }
  0x17   :  { %v1005_v55 = vld [vmem:[%s1686_s2 + $0x1b8] sm:$0xff]  ;;  %v1010_v56 = vld [vmem:[%s1686_s2 + $0x1c0] sm:$0xff]  ;;  %v1015_v57 = vld [vmem:[%s1686_s2 + $0x1c8] sm:$0xff] }
  0x18   :  { %v1020_v58 = vld [vmem:[%s1686_s2 + $0x1d0] sm:$0xff]  ;;  %v1025_v59 = vld [vmem:[%s1686_s2 + $0x1d8] sm:$0xff]  ;;  %v1030_v60 = vld [vmem:[%s1686_s2 + $0x1e0] sm:$0xff] }
  0x19   :  { %v1035_v61 = vld [vmem:[%s1686_s2 + $0x1e8] sm:$0xff]  ;;  %v1040_v62 = vld [vmem:[%s1686_s2 + $0x1f0] sm:$0xff]  ;;  %v1045_v63 = vld [vmem:[%s1686_s2 + $0x1f8] sm:$0xff] }
  0x1a   :  { %v1050_v2 = vld [vmem:[%s1686_s2 + $0x200] sm:$0xff]  ;;  %v1055_v0 = vld [vmem:[%s1686_s2 + $0x208] sm:$0xff]  ;;  %v1060_v3 = vld [vmem:[%s1686_s2 + $0x210] sm:$0xff] }
  0x1b   :  { %1802 = vst [vmem:[#allocation26_spill] sm:$0xff] %v1050_v2  ;;  %1803 = vst [vmem:[#allocation27_spill] sm:$0xff] %v1055_v0  ;;  %v1065_v1 = vld [vmem:[%s1686_s2 + $0x218] sm:$0xff]  ;;  %v1070_v6 = vld [vmem:[%s1686_s2 + $0x220] sm:$0xff] }
  0x1c   :  { %1804 = vst [vmem:[#allocation28_spill] sm:$0xff] %v1060_v3  ;;  %1805 = vst [vmem:[#allocation29_spill] sm:$0xff] %v1065_v1  ;;  %v1075_v2 = vld [vmem:[%s1686_s2 + $0x228] sm:$0xff]  ;;  %v1080_v0 = vld [vmem:[%s1686_s2 + $0x230] sm:$0xff] }
  0x1d   :  { %1806 = vst [vmem:[#allocation30_spill] sm:$0xff] %v1070_v6  ;;  %1807 = vst [vmem:[#allocation31_spill] sm:$0xff] %v1075_v2  ;;  %v1085_v3 = vld [vmem:[%s1686_s2 + $0x238] sm:$0xff]  ;;  %v1090_v1 = vld [vmem:[%s1686_s2 + $0x240] sm:$0xff] }
  0x1e   :  { %1808 = vst [vmem:[#allocation32_spill] sm:$0xff] %v1080_v0  ;;  %1809 = vst [vmem:[#allocation33_spill] sm:$0xff] %v1085_v3  ;;  %v1095_v6 = vld [vmem:[%s1686_s2 + $0x248] sm:$0xff]  ;;  %v1100_v2 = vld [vmem:[%s1686_s2 + $0x250] sm:$0xff] }
  0x1f   :  { %1810 = vst [vmem:[#allocation34_spill] sm:$0xff] %v1090_v1  ;;  %1811 = vst [vmem:[#allocation35_spill] sm:$0xff] %v1095_v6  ;;  %v1105_v0 = vld [vmem:[%s1686_s2 + $0x258] sm:$0xff]  ;;  %v1110_v3 = vld [vmem:[%s1686_s2 + $0x260] sm:$0xff] }
  0x20   :  { %1812 = vst [vmem:[#allocation36_spill] sm:$0xff] %v1100_v2  ;;  %1813 = vst [vmem:[#allocation37_spill] sm:$0xff] %v1105_v0  ;;  %v1115_v1 = vld [vmem:[%s1686_s2 + $0x268] sm:$0xff]  ;;  %v1120_v6 = vld [vmem:[%s1686_s2 + $0x270] sm:$0xff] }
  0x21   :  { %1814 = vst [vmem:[#allocation38_spill] sm:$0xff] %v1110_v3  ;;  %1815 = vst [vmem:[#allocation39_spill] sm:$0xff] %v1115_v1  ;;  %v1125_v2 = vld [vmem:[%s1686_s2 + $0x278] sm:$0xff]  ;;  %v1130_v0 = vld [vmem:[%s1686_s2 + $0x280] sm:$0xff] }
  0x22   :  { %1816 = vst [vmem:[#allocation40_spill] sm:$0xff] %v1120_v6  ;;  %1817 = vst [vmem:[#allocation41_spill] sm:$0xff] %v1125_v2  ;;  %v1135_v3 = vld [vmem:[%s1686_s2 + $0x288] sm:$0xff]  ;;  %v1140_v1 = vld [vmem:[%s1686_s2 + $0x290] sm:$0xff] }
  0x23   :  { %1818 = vst [vmem:[#allocation42_spill] sm:$0xff] %v1130_v0  ;;  %1819 = vst [vmem:[#allocation43_spill] sm:$0xff] %v1135_v3  ;;  %v1145_v6 = vld [vmem:[%s1686_s2 + $0x298] sm:$0xff]  ;;  %v1150_v2 = vld [vmem:[%s1686_s2 + $0x2a0] sm:$0xff] }
  0x24   :  { %1820 = vst [vmem:[#allocation44_spill] sm:$0xff] %v1140_v1  ;;  %1821 = vst [vmem:[#allocation45_spill] sm:$0xff] %v1145_v6  ;;  %v1155_v0 = vld [vmem:[%s1686_s2 + $0x2a8] sm:$0xff]  ;;  %v1160_v3 = vld [vmem:[%s1686_s2 + $0x2b0] sm:$0xff] }
  0x25   :  { %1822 = vst [vmem:[#allocation46_spill] sm:$0xff] %v1150_v2  ;;  %1823 = vst [vmem:[#allocation47_spill] sm:$0xff] %v1155_v0  ;;  %v1165_v1 = vld [vmem:[%s1686_s2 + $0x2b8] sm:$0xff]  ;;  %v1170_v6 = vld [vmem:[%s1686_s2 + $0x2c0] sm:$0xff] }
  0x26   :  { %1824 = vst [vmem:[#allocation48_spill] sm:$0xff] %v1160_v3  ;;  %1825 = vst [vmem:[#allocation49_spill] sm:$0xff] %v1165_v1  ;;  %v1175_v2 = vld [vmem:[%s1686_s2 + $0x2c8] sm:$0xff]  ;;  %v1180_v0 = vld [vmem:[%s1686_s2 + $0x2d0] sm:$0xff] }
  0x27   :  { %1826 = vst [vmem:[#allocation50_spill] sm:$0xff] %v1170_v6  ;;  %1827 = vst [vmem:[#allocation51_spill] sm:$0xff] %v1175_v2  ;;  %v1185_v3 = vld [vmem:[%s1686_s2 + $0x2d8] sm:$0xff]  ;;  %v1190_v1 = vld [vmem:[%s1686_s2 + $0x2e0] sm:$0xff] }
  0x28   :  { %1828 = vst [vmem:[#allocation52_spill] sm:$0xff] %v1180_v0  ;;  %1829 = vst [vmem:[#allocation53_spill] sm:$0xff] %v1185_v3  ;;  %v1195_v6 = vld [vmem:[%s1686_s2 + $0x2e8] sm:$0xff]  ;;  %v1200_v2 = vld [vmem:[%s1686_s2 + $0x2f0] sm:$0xff]  ;;  %v142_v3 = vlaneseq }
  0x29   :  { %1830 = vst [vmem:[#allocation54_spill] sm:$0xff] %v1190_v1  ;;  %1831 = vst [vmem:[#allocation55_spill] sm:$0xff] %v1195_v6  ;;  %v1205_v0 = vld [vmem:[%s1686_s2 + $0x2f8] sm:$0xff]  ;;  %v1210_v1 = vld [vmem:[%s1686_s2 + $0x300] sm:$0xff] }
  0x2a   :  { %1832 = vst [vmem:[#allocation56_spill] sm:$0xff] %v1200_v2  ;;  %1833 = vst [vmem:[#allocation57_spill] sm:$0xff] %v1205_v0  ;;  %v1215_v6 = vld [vmem:[%s1686_s2 + $0x308] sm:$0xff]  ;;  %v1220_v2 = vld [vmem:[%s1686_s2 + $0x310] sm:$0xff] }
  0x2b   :  { %1834 = vst [vmem:[#allocation58_spill] sm:$0xff] %v1210_v1  ;;  %1835 = vst [vmem:[#allocation59_spill] sm:$0xff] %v1215_v6  ;;  %v1225_v0 = vld [vmem:[%s1686_s2 + $0x318] sm:$0xff]  ;;  %v1230_v4 = vld [vmem:[%s1686_s2 + $0x320] sm:$0xff] }
  0x2c   :  { %1836 = vst [vmem:[#allocation60_spill] sm:$0xff] %v1220_v2  ;;  %1837 = vst [vmem:[#allocation61_spill] sm:$0xff] %v1225_v0  ;;  %v1235_v1 = vld [vmem:[%s1686_s2 + $0x328] sm:$0xff]  ;;  %v1240_v6 = vld [vmem:[%s1686_s2 + $0x330] sm:$0xff] }
  0x2d   :  { %1838 = vst [vmem:[#allocation62_spill] sm:$0xff] %v1230_v4  ;;  %1839 = vst [vmem:[#allocation63_spill] sm:$0xff] %v1235_v1  ;;  %v1245_v2 = vld [vmem:[%s1686_s2 + $0x338] sm:$0xff]  ;;  %v1250_v0 = vld [vmem:[%s1686_s2 + $0x340] sm:$0xff] }
  0x2e   :  { %1840 = vst [vmem:[#allocation64_spill] sm:$0xff] %v1240_v6  ;;  %1841 = vst [vmem:[#allocation65_spill] sm:$0xff] %v1245_v2  ;;  %v1255_v4 = vld [vmem:[%s1686_s2 + $0x348] sm:$0xff]  ;;  %v1260_v1 = vld [vmem:[%s1686_s2 + $0x350] sm:$0xff]  ;;  %v143_v2 = vshrl.u32 %v142_v3, 7 }
  0x2f   :  { %1842 = vst [vmem:[#allocation66_spill] sm:$0xff] %v1250_v0  ;;  %1843 = vst [vmem:[#allocation67_spill] sm:$0xff] %v1255_v4  ;;  %v1265_v6 = vld [vmem:[%s1686_s2 + $0x358] sm:$0xff]  ;;  %v1270_v0 = vld [vmem:[%s1686_s2 + $0x360] sm:$0xff] }
  0x30   :  { %1844 = vst [vmem:[#allocation68_spill] sm:$0xff] %v1260_v1  ;;  %1845 = vst [vmem:[#allocation69_spill] sm:$0xff] %v1265_v6  ;;  %v1275_v4 = vld [vmem:[%s1686_s2 + $0x368] sm:$0xff]  ;;  %v1280_v1 = vld [vmem:[%s1686_s2 + $0x370] sm:$0xff]  ;;  %vm147_vm0 = vcmp.lt.s32.totalorder %v143_v2, 2 }
  0x31   :  { %1846 = vst [vmem:[#allocation70_spill] sm:$0xff] %v1270_v0  ;;  %1847 = vst [vmem:[#allocation71_spill] sm:$0xff] %v1275_v4  ;;  %v1285_v6 = vld [vmem:[%s1686_s2 + $0x378] sm:$0xff]  ;;  %v1290_v3 = vld [vmem:[%s1686_s2 + $0x380] sm:$0xff] }
  0x32   :  { %1848 = vst [vmem:[#allocation72_spill] sm:$0xff] %v1280_v1  ;;  %1849 = vst [vmem:[#allocation73_spill] sm:$0xff] %v1285_v6  ;;  %v1295_v0 = vld [vmem:[%s1686_s2 + $0x388] sm:$0xff]  ;;  %v1300_v4 = vld [vmem:[%s1686_s2 + $0x390] sm:$0xff] }
  0x33   :  { %1850 = vst [vmem:[#allocation74_spill] sm:$0xff] %v1290_v3  ;;  %1851 = vst [vmem:[#allocation75_spill] sm:$0xff] %v1295_v0  ;;  %v1305_v1 = vld [vmem:[%s1686_s2 + $0x398] sm:$0xff]  ;;  %v1310_v6 = vld [vmem:[%s1686_s2 + $0x3a0] sm:$0xff] }
  0x34   :  { %1852 = vst [vmem:[#allocation76_spill] sm:$0xff] %v1300_v4  ;;  %1853 = vst [vmem:[#allocation77_spill] sm:$0xff] %v1305_v1  ;;  %v1315_v3 = vld [vmem:[%s1686_s2 + $0x3a8] sm:$0xff]  ;;  %v1320_v0 = vld [vmem:[%s1686_s2 + $0x3b0] sm:$0xff] }
  0x35   :  { %1854 = vst [vmem:[#allocation78_spill] sm:$0xff] %v1310_v6  ;;  %1855 = vst [vmem:[#allocation79_spill] sm:$0xff] %v1315_v3  ;;  %v1325_v4 = vld [vmem:[%s1686_s2 + $0x3b8] sm:$0xff]  ;;  %v1330_v1 = vld [vmem:[%s1686_s2 + $0x3c0] sm:$0xff] }
  0x36   :  { %1856 = vst [vmem:[#allocation80_spill] sm:$0xff] %v1320_v0  ;;  %1857 = vst [vmem:[#allocation81_spill] sm:$0xff] %v1325_v4  ;;  %v1335_v6 = vld [vmem:[%s1686_s2 + $0x3c8] sm:$0xff]  ;;  %v1340_v0 = vld [vmem:[%s1686_s2 + $0x3d0] sm:$0xff] }
  0x37   :  { %1858 = vst [vmem:[#allocation82_spill] sm:$0xff] %v1330_v1  ;;  %1859 = vst [vmem:[#allocation83_spill] sm:$0xff] %v1335_v6  ;;  %v1345_v4 = vld [vmem:[%s1686_s2 + $0x3d8] sm:$0xff]  ;;  %v1350_v2 = vld [vmem:[%s1686_s2 + $0x3e0] sm:$0xff] }
  0x38   :  { %1860 = vst [vmem:[#allocation84_spill] sm:$0xff] %v1340_v0  ;;  %1861 = vst [vmem:[#allocation85_spill] sm:$0xff] %v1345_v4  ;;  %v1355_v3 = vld [vmem:[%s1686_s2 + $0x3e8] sm:$0xff]  ;;  %v1360_v1 = vld [vmem:[%s1686_s2 + $0x3f0] sm:$0xff]  ;;  %v706_v4 = vmov 0.0  }
  0x39   :  { %1862 = vst [vmem:[#allocation86_spill] sm:$0xff] %v1350_v2  ;;  %1863 = vst [vmem:[#allocation87_spill] sm:$0xff] %v1355_v3  ;;  %v1365_v0 = vld [vmem:[%s1686_s2 + $0x3f8] sm:$0xff]  ;;  %v1373_v3 = vmov 0.0  }
  0x3a   :  { %1864 = vst [vmem:[#allocation88_spill] sm:$0xff] %v1360_v1  ;;  %1865 = vst [vmem:[#allocation89_spill] sm:$0xff] %v1365_v0 }
  0x3b   :  { %vm150_vm2 = vmxor %vm147_vm0, %vm705_vm1 }
  0x3c   :  { %vm152_vm3 = vmxor %vm150_vm2, %vm705_vm1  ;;  %v1367_v6 = vsel %vm150_vm2, 1.0, %v706_v4 }
  0x3d   :  { %1866 = vst [vmem:[#allocation90_spill] sm:$0xff] %v1367_v6  ;;  %v1369_v2 = vsel %vm152_vm3, 1.0, %v706_v4 }
  0x3e   :  { %1867 = vst [vmem:[#allocation91_spill] sm:$0xff] %v1369_v2 }
  0x3f LB: > { %v1869_v5 = vld [vmem:[#allocation7_spill] sm:$0xff]  ;;  %v1870_v8 = vld [vmem:[#allocation10_spill] sm:$0xff]  ;;  %v1873_v20 = vld [vmem:[#allocation21_spill] sm:$0xff]  ;;  %1878 = vst [vmem:[#allocation92_spill] sm:$0xff] %v695_v7  ;;  %172 = vmatprep.subr.mxu0 %v1035_v61  ;;  %243 = vmatprep.subr.mxu1 %v1045_v63  ;;  %s619_s2 = sshll.u32 %s703_s25, 5  ;;  %s618_s29 = sshll.u32 %s703_s25, 3  ;;  %v695_v7 = vphi %v1371_v7, %v560_v7   ;;  %s703_s25 = sphi %s1375_s25, %s161_s25   ;;  %v699_v3 = vphi %v1373_v3, %v563_v3  }
  0x40   : > { %v1871_v16 = vld [vmem:[#allocation18_spill] sm:$0xff]  ;;  %v1872_v17 = vld [vmem:[#allocation19_spill] sm:$0xff]  ;;  %v1876_v25 = vld [vmem:[#allocation25_spill] sm:$0xff]  ;;  %173 = vmatpush1.msra.mxu0 %v1030_v60  ;;  %244 = vmatpush1.msra.mxu1 %v1040_v62  ;;  %s1650_s28 = scalar_lea.vmem %s1684_s0, %s619_s2  ;;  %s354_s5 = scalar_lea.vmem %s1685_s1, %s618_s29 }
  0x41   : > { %v1874_v23 = vld [vmem:[#allocation23_spill] sm:$0xff]  ;;  %v1875_v21 = vld [vmem:[#allocation22_spill] sm:$0xff]  ;;  %v1877_v24 = vld [vmem:[#allocation24_spill] sm:$0xff]  ;;  %174 = vmatprep.subr.mxu0 %v1015_v57  ;;  %245 = vmatprep.subr.mxu1 %v1025_v59  ;;  %s1667_s8 = scalar_lea.vmem %s1687_s3, %s618_s29  ;;  %s161_s25 = sadd.s32 1, %s703_s25  }
  0x42   : > { %175 = vmatpush1.msra.mxu0 %v1010_v56  ;;  %246 = vmatpush1.msra.mxu1 %v1020_v58  ;;  %v1879_v18 = vld [vmem:[#allocation20_spill] sm:$0xff]  ;;  %v1880_v13 = vld [vmem:[#allocation15_spill] sm:$0xff]  ;;  %v1881_v15 = vld [vmem:[#allocation17_spill] sm:$0xff]  ;;  %p158_p0 = scmp.ge.s32.totalorder %s161_s25, 100  }
  0x43   : > { %176 = vmatprep.subr.mxu0 %v995_v53  ;;  %247 = vmatprep.subr.mxu1 %v1005_v55  ;;  %v1882_v12 = vld [vmem:[#allocation14_spill] sm:$0xff]  ;;  %v1883_v14 = vld [vmem:[#allocation16_spill] sm:$0xff]  ;;  %v1884_v9 = vld [vmem:[#allocation11_spill] sm:$0xff] }
  0x44   : > { %177 = vmatpush1.msra.mxu0 %v990_v52  ;;  %248 = vmatpush1.msra.mxu1 %v1000_v54  ;;  %v1885_v11 = vld [vmem:[#allocation13_spill] sm:$0xff]  ;;  %v1886_v10 = vld [vmem:[#allocation12_spill] sm:$0xff]  ;;  %v1888_v7 = vld [vmem:[#allocation6_spill] sm:$0xff] }
  0x45   : > { %v1868_v2 = vld [vmem:[#allocation91_spill] sm:$0xff]  ;;  %178 = vmatprep.subr.mxu0 %v975_v49  ;;  %249 = vmatprep.subr.mxu1 %v985_v51  ;;  %v1887_v4 = vld [vmem:[#allocation9_spill] sm:$0xff]  ;;  %v1897_v1 = vld [vmem:[#allocation88_spill] sm:$0xff] }
  0x46   : > { %179 = vmatpush1.msra.mxu0 %v970_v48  ;;  %250 = vmatpush1.msra.mxu1 %v980_v50  ;;  %v1895_v0 = vld [vmem:[#allocation89_spill] sm:$0xff]  ;;  %v1918_v6 = vld [vmem:[#allocation90_spill] sm:$0xff] }
  0x47   : > { %180 = vmatprep.subr.mxu0 %v955_v45  ;;  %251 = vmatprep.subr.mxu1 %v965_v47 }
  0x48   : > { %181 = vmatpush1.msra.mxu0 %v950_v44  ;;  %252 = vmatpush1.msra.mxu1 %v960_v46 }
  0x49   : > { %182 = vmatprep.subr.mxu0 %v935_v41  ;;  %253 = vmatprep.subr.mxu1 %v945_v43 }
  0x4a   : > { %183 = vmatpush1.msra.mxu0 %v930_v40  ;;  %254 = vmatpush1.msra.mxu1 %v940_v42 }
  0x4b   : > { %184 = vmatprep.subr.mxu0 %v915_v37  ;;  %255 = vmatprep.subr.mxu1 %v925_v39 }
  0x4c   : > { %185 = vmatpush1.msra.mxu0 %v910_v36  ;;  %256 = vmatpush1.msra.mxu1 %v920_v38 }
  0x4d   : > { %186 = vmatprep.subr.mxu0 %v895_v33  ;;  %257 = vmatprep.subr.mxu1 %v905_v35 }
  0x4e   : > { %187 = vmatpush1.msra.mxu0 %v890_v32  ;;  %258 = vmatpush1.msra.mxu1 %v900_v34 }
  0x4f   : > { %188 = vmatprep.subr.mxu0 %v875_v29  ;;  %259 = vmatprep.subr.mxu1 %v885_v31 }
  0x50   : > { %189 = vmatpush1.msra.mxu0 %v870_v28  ;;  %260 = vmatpush1.msra.mxu1 %v880_v30 }
  0x51   : > { %190 = vmatprep.subr.mxu0 %v1876_v25  ;;  %261 = vmatprep.subr.mxu1 %v865_v27 }
  0x52   : > { %191 = vmatpush1.msra.mxu0 %v1877_v24  ;;  %262 = vmatpush1.msra.mxu1 %v860_v26 }
  0x53   : > { %192 = vmatprep.subr.mxu0 %v1875_v21  ;;  %263 = vmatprep.subr.mxu1 %v1874_v23 }
  0x54   : > { %193 = vmatpush1.msra.mxu0 %v1873_v20  ;;  %264 = vmatpush1.msra.mxu1 %v840_v22 }
  0x55   : > { %194 = vmatprep.subr.mxu0 %v1872_v17  ;;  %265 = vmatprep.subr.mxu1 %v825_v19 }
  0x56   : > { %195 = vmatpush1.msra.mxu0 %v1871_v16  ;;  %266 = vmatpush1.msra.mxu1 %v1879_v18  ;;  %v1898_v18 = vld [vmem:[#allocation83_spill] sm:$0xff] }
  0x57   : > { %196 = vmatprep.subr.mxu0 %v1880_v13  ;;  %267 = vmatprep.subr.mxu1 %v1881_v15  ;;  %v1889_v13 = vld [vmem:[#allocation8_spill] sm:$0xff]  ;;  %v1890_v15 = vld [vmem:[#allocation3_spill] sm:$0xff] }
  0x58   : > { %197 = vmatpush1.msra.mxu0 %v1882_v12  ;;  %268 = vmatpush1.msra.mxu1 %v1883_v14  ;;  %v1891_v12 = vld [vmem:[#allocation5_spill] sm:$0xff]  ;;  %v1892_v14 = vld [vmem:[#allocation2_spill] sm:$0xff] }
  0x59   : > { %198 = vmatprep.subr.mxu0 %v1884_v9  ;;  %269 = vmatprep.subr.mxu1 %v1885_v11  ;;  %v1893_v9 = vld [vmem:[#allocation4_spill] sm:$0xff]  ;;  %v1894_v11 = vld [vmem:[#allocation87_spill] sm:$0xff] }
  0x5a   : > { %199 = vmatpush1.msra.mxu0 %v1870_v8  ;;  %270 = vmatpush1.msra.mxu1 %v1886_v10  ;;  %v1896_v10 = vld [vmem:[#allocation86_spill] sm:$0xff] }
  0x5b   : > { %200 = vmatprep.subr.mxu0 %v1869_v5  ;;  %271 = vmatprep.subr.mxu1 %v1887_v4  ;;  %v1909_v4 = vld [vmem:[#allocation76_spill] sm:$0xff] }
  0x5c   : > { %201 = vmatpush1.msra.mxu0 %v1888_v7  ;;  %272 = vmatpush1.msra.mxu1 %v1889_v13  ;;  %v1899_v7 = vld [vmem:[#allocation85_spill] sm:$0xff]  ;;  %v1900_v13 = vld [vmem:[#allocation82_spill] sm:$0xff] }
  0x5d   : > { %202 = vmatprep.subr.mxu0 %v1890_v15  ;;  %273 = vmatprep.subr.mxu1 %v1891_v12  ;;  %v1901_v15 = vld [vmem:[#allocation84_spill] sm:$0xff]  ;;  %v1902_v12 = vld [vmem:[#allocation79_spill] sm:$0xff] }
  0x5e   : > { %203 = vmatpush1.msra.mxu0 %v1892_v14  ;;  %274 = vmatpush1.msra.mxu1 %v1893_v9  ;;  %v1903_v14 = vld [vmem:[#allocation81_spill] sm:$0xff]  ;;  %v1904_v9 = vld [vmem:[#allocation78_spill] sm:$0xff] }
  0x5f   : > { %204 = vmatprep.subr.mxu0 %v1894_v11  ;;  %275 = vmatprep.subr.mxu1 %v1895_v0  ;;  %v1905_v11 = vld [vmem:[#allocation80_spill] sm:$0xff]  ;;  %v1906_v0 = vld [vmem:[#allocation75_spill] sm:$0xff] }
  0x60   : > { %205 = vmatpush2.msra.mxu0 %v1896_v10  ;;  %276 = vmatpush2.msra.mxu1 %v1897_v1  ;;  %v1907_v10 = vld [vmem:[#allocation77_spill] sm:$0xff]  ;;  %v1908_v1 = vld [vmem:[#allocation74_spill] sm:$0xff] }
  0x61   : > { %206 = vmatprep.subr.mxu0 %v1898_v18  ;;  %277 = vmatprep.subr.mxu1 %v1899_v7  ;;  %v1910_v7 = vld [vmem:[#allocation71_spill] sm:$0xff]  ;;  %v1940_v18 = vld [vmem:[#allocation42_spill] sm:$0xff] }
  0x62   : > { %207 = vmatpush2.msra.mxu0 %v1900_v13  ;;  %278 = vmatpush2.msra.mxu1 %v1901_v15  ;;  %v1911_v13 = vld [vmem:[#allocation73_spill] sm:$0xff]  ;;  %v1912_v15 = vld [vmem:[#allocation70_spill] sm:$0xff] }
  0x63   : > { %208 = vmatprep.subr.mxu0 %v1902_v12  ;;  %279 = vmatprep.subr.mxu1 %v1903_v14  ;;  %v1913_v12 = vld [vmem:[#allocation72_spill] sm:$0xff]  ;;  %v1914_v14 = vld [vmem:[#allocation67_spill] sm:$0xff] }
  0x64   : > { %209 = vmatpush2.msra.mxu0 %v1904_v9  ;;  %280 = vmatpush2.msra.mxu1 %v1905_v11  ;;  %v1915_v9 = vld [vmem:[#allocation69_spill] sm:$0xff]  ;;  %v1916_v11 = vld [vmem:[#allocation66_spill] sm:$0xff] }
  0x65   : > { %210 = vmatprep.subr.mxu0 %v1906_v0  ;;  %281 = vmatprep.subr.mxu1 %v1907_v10  ;;  %v1917_v0 = vld [vmem:[#allocation68_spill] sm:$0xff]  ;;  %v1936_v10 = vld [vmem:[#allocation46_spill] sm:$0xff] }
  0x66   : > { %211 = vmatpush2.msra.mxu0 %v1908_v1  ;;  %282 = vmatpush2.msra.mxu1 %v1909_v4  ;;  %v166_v1 = vmul.f32 %v699_v3, %v1918_v6  ;;  %v1919_v4 = vld [vmem:[#allocation63_spill] sm:$0xff]  ;;  %v1928_v6 = vld [vmem:[#allocation54_spill] sm:$0xff] }
  0x67   : > { %212 = vmatprep.subr.mxu0 %v1910_v7  ;;  %283 = vmatprep.subr.mxu1 %v1911_v13  ;;  %v1920_v7 = vld [vmem:[#allocation65_spill] sm:$0xff]  ;;  %v1921_v13 = vld [vmem:[#allocation62_spill] sm:$0xff] }
  0x68   : > { %213 = vmatpush2.msra.mxu0 %v1912_v15  ;;  %284 = vmatpush2.msra.mxu1 %v1913_v12  ;;  %v1922_v15 = vld [vmem:[#allocation64_spill] sm:$0xff]  ;;  %v1923_v12 = vld [vmem:[#allocation59_spill] sm:$0xff] }
  0x69   : > { %214 = vmatprep.subr.mxu0 %v1914_v14  ;;  %285 = vmatprep.subr.mxu1 %v1915_v9  ;;  %v1924_v14 = vld [vmem:[#allocation61_spill] sm:$0xff]  ;;  %v1925_v9 = vld [vmem:[#allocation58_spill] sm:$0xff] }
  0x6a   : > { %215 = vmatpush2.msra.mxu0 %v1916_v11  ;;  %286 = vmatpush2.msra.mxu1 %v1917_v0  ;;  %v1926_v11 = vld [vmem:[#allocation55_spill] sm:$0xff]  ;;  %v1927_v0 = vld [vmem:[#allocation60_spill] sm:$0xff] }
  0x6b   : > { %216 = vmatprep.subr.mxu0 %v1919_v4  ;;  %287 = vmatprep.subr.mxu1 %v1920_v7  ;;  %v1929_v4 = vld [vmem:[#allocation57_spill] sm:$0xff]  ;;  %v1930_v7 = vld [vmem:[#allocation51_spill] sm:$0xff] }
  0x6c   : > { %217 = vmatpush2.msra.mxu0 %v1921_v13  ;;  %288 = vmatpush2.msra.mxu1 %v1922_v15  ;;  %v1931_v13 = vld [vmem:[#allocation56_spill] sm:$0xff]  ;;  %v1932_v15 = vld [vmem:[#allocation50_spill] sm:$0xff] }
  0x6d   : > { %218 = vmatprep.subr.mxu0 %v1923_v12  ;;  %289 = vmatprep.subr.mxu1 %v1924_v14  ;;  %v1933_v12 = vld [vmem:[#allocation53_spill] sm:$0xff]  ;;  %v1934_v14 = vld [vmem:[#allocation47_spill] sm:$0xff] }
  0x6e   : > { %219 = vmatpush2.msra.mxu0 %v1925_v9  ;;  %236 = vmatprep.mubr.f32.mxu0 %v166_v1  ;;  %v1935_v9 = vld [vmem:[#allocation52_spill] sm:$0xff] }
  0x6f   : > { %220 = vmatprep.subr.mxu0 %v1926_v11  ;;  %290 = vmatpush2.msra.mxu1 %v1927_v0  ;;  %v1937_v11 = vld [vmem:[#allocation49_spill] sm:$0xff]  ;;  %v1938_v0 = vld [vmem:[#allocation43_spill] sm:$0xff] }
  0x70   : > { %221 = vmatpush2.msra.mxu0 %v1928_v6  ;;  %291 = vmatprep.subr.mxu1 %v1929_v4  ;;  %v1939_v6 = vld [vmem:[#allocation48_spill] sm:$0xff] }
  0x71   : > { %222 = vmatprep.subr.mxu0 %v1930_v7  ;;  %292 = vmatpush2.msra.mxu1 %v1931_v13  ;;  %v1941_v7 = vld [vmem:[#allocation45_spill] sm:$0xff]  ;;  %v1943_v13 = vld [vmem:[#allocation39_spill] sm:$0xff] }
  0x72   : > { %223 = vmatpush2.msra.mxu0 %v1932_v15  ;;  %293 = vmatprep.subr.mxu1 %v1933_v12  ;;  %v1942_v4 = vmov %v1941_v7  ;;  %v1944_v15 = vld [vmem:[#allocation44_spill] sm:$0xff]  ;;  %v1945_v12 = vld [vmem:[#allocation38_spill] sm:$0xff] }
  0x73   : > { %224 = vmatprep.subr.mxu0 %v1934_v14  ;;  %294 = vmatpush2.msra.mxu1 %v1935_v9  ;;  %v1946_v14 = vld [vmem:[#allocation41_spill] sm:$0xff]  ;;  %v1947_v9 = vld [vmem:[#allocation35_spill] sm:$0xff] }
  0x74   : > { %225 = vmatpush2.msra.mxu0 %v1936_v10  ;;  %295 = vmatprep.subr.mxu1 %v1937_v11  ;;  %v1948_v10 = vld [vmem:[#allocation40_spill] sm:$0xff]  ;;  %v1949_v11 = vld [vmem:[#allocation34_spill] sm:$0xff] }
  0x75   : > { %226 = vmatprep.subr.mxu0 %v1938_v0  ;;  %296 = vmatpush2.msra.mxu1 %v1939_v6  ;;  %v1950_v0 = vld [vmem:[#allocation37_spill] sm:$0xff]  ;;  %v1951_v6 = vld [vmem:[#allocation31_spill] sm:$0xff] }
  0x76   : > { %227 = vmatpush2.msra.mxu0 %v1940_v18  ;;  %297 = vmatprep.subr.mxu1 %v1941_v7  ;;  %v165_v7 = vmul.f32 %v699_v3, %v1868_v2 }
  0x77   : > { %228 = vmatprep.subr.mxu0 %v1943_v13  ;;  %298 = vmatpush2.msra.mxu1 %v1944_v15  ;;  %v1952_v13 = vld [vmem:[#allocation36_spill] sm:$0xff]  ;;  %v1953_v15 = vld [vmem:[#allocation30_spill] sm:$0xff] }
  0x78   : > { %229 = vmatpush2.msra.mxu0 %v1945_v12  ;;  %299 = vmatprep.subr.mxu1 %v1946_v14  ;;  %v1954_v12 = vld [vmem:[#allocation33_spill] sm:$0xff]  ;;  %v1955_v14 = vld [vmem:[#allocation27_spill] sm:$0xff] }
  0x79   : > { %230 = vmatprep.subr.mxu0 %v1947_v9  ;;  %300 = vmatpush2.msra.mxu1 %v1948_v10  ;;  %v1956_v9 = vld [vmem:[#allocation32_spill] sm:$0xff]  ;;  %v1957_v10 = vld [vmem:[#allocation26_spill] sm:$0xff] }
  0x7a   : > { %231 = vmatpush2.msra.mxu0 %v1949_v11  ;;  %301 = vmatprep.subr.mxu1 %v1950_v0  ;;  %v1958_v11 = vld [vmem:[#allocation29_spill] sm:$0xff]  ;;  %v1959_v0 = vld [vmem:[#allocation28_spill] sm:$0xff] }
  0x7b   : > { %232 = vmatprep.subr.mxu0 %v1951_v6  ;;  %302 = vmatpush2.msra.mxu1 %v1952_v13 }
  0x7c   : > { %233 = vmatpush2.msra.mxu0 %v1953_v15  ;;  %303 = vmatprep.subr.mxu1 %v1954_v12 }
  0x7d   : > { %234 = vmatprep.subr.mxu0 %v1955_v14  ;;  %304 = vmatpush2.msra.mxu1 %v1956_v9 }
  0x7e   : > { %235 = vmatpush2.msra.mxu0 %v1957_v10  ;;  %305 = vmatprep.subr.mxu1 %v1958_v11 }
  0x7f   : > { %237 = vmatmul.mubr.f32.vlgmr.msra.gmra.mxu0 %v165_v7  ;;  %306 = vmatpush2.msra.mxu1 %v1959_v0 }
  0x80   : > { %307 = vmatprep.mubr.f32.mxu1 %v166_v1  ;;  %373 = vmatprep.subr.mxu0 %v1035_v61  ;;  %v1960_v1 = vld [vmem:[#allocation20_spill] sm:$0xff] }
  0x81   : > { %308 = vmatmul.mubr.f32.vlgmr.msra.gmra.mxu1 %v165_v7  ;;  %444 = vmatprep.subr.mxu1 %v1045_v63  ;;  %v1961_v7 = vld [vmem:[#allocation15_spill] sm:$0xff] }
  0x82   : > { %374 = vmatpush1.msra.mxu0 %v1030_v60  ;;  %445 = vmatpush1.msra.mxu1 %v1040_v62 }
  0x83   : > { %375 = vmatprep.subr.mxu0 %v1015_v57  ;;  %446 = vmatprep.subr.mxu1 %v1025_v59 }
  0x84   : > { %376 = vmatpush1.msra.mxu0 %v1010_v56  ;;  %447 = vmatpush1.msra.mxu1 %v1020_v58 }
  0x85   : > { %377 = vmatprep.subr.mxu0 %v995_v53  ;;  %448 = vmatprep.subr.mxu1 %v1005_v55 }
  0x86   : > { %378 = vmatpush1.msra.mxu0 %v990_v52  ;;  %449 = vmatpush1.msra.mxu1 %v1000_v54 }
  0x87   : > { %379 = vmatprep.subr.mxu0 %v975_v49  ;;  %450 = vmatprep.subr.mxu1 %v985_v51 }
  0x88   : > { %380 = vmatpush1.msra.mxu0 %v970_v48  ;;  %451 = vmatpush1.msra.mxu1 %v980_v50 }
  0x89   : > { %381 = vmatprep.subr.mxu0 %v955_v45  ;;  %452 = vmatprep.subr.mxu1 %v965_v47 }
  0x8a   : > { %382 = vmatpush1.msra.mxu0 %v950_v44  ;;  %453 = vmatpush1.msra.mxu1 %v960_v46 }
  0x8b   : > { %383 = vmatprep.subr.mxu0 %v935_v41  ;;  %454 = vmatprep.subr.mxu1 %v945_v43 }
  0x8c   : > { %384 = vmatpush1.msra.mxu0 %v930_v40  ;;  %455 = vmatpush1.msra.mxu1 %v940_v42 }
  0x8d   : > { %385 = vmatprep.subr.mxu0 %v915_v37  ;;  %456 = vmatprep.subr.mxu1 %v925_v39 }
  0x8e   : > { %386 = vmatpush1.msra.mxu0 %v910_v36  ;;  %457 = vmatpush1.msra.mxu1 %v920_v38 }
  0x8f   : > { %387 = vmatprep.subr.mxu0 %v895_v33  ;;  %458 = vmatprep.subr.mxu1 %v905_v35 }
  0x90   : > { %388 = vmatpush1.msra.mxu0 %v890_v32  ;;  %459 = vmatpush1.msra.mxu1 %v900_v34 }
  0x91   : > { %389 = vmatprep.subr.mxu0 %v875_v29  ;;  %460 = vmatprep.subr.mxu1 %v885_v31 }
  0x92   : > { %390 = vmatpush1.msra.mxu0 %v870_v28  ;;  %461 = vmatpush1.msra.mxu1 %v880_v30 }
  0x93   : > { %391 = vmatprep.subr.mxu0 %v1876_v25  ;;  %462 = vmatprep.subr.mxu1 %v865_v27  ;;  %v1963_v25 = vld [vmem:[#allocation14_spill] sm:$0xff] }
  0x94   : > { %392 = vmatpush1.msra.mxu0 %v1877_v24  ;;  %463 = vmatpush1.msra.mxu1 %v860_v26  ;;  %v1962_v24 = vld [vmem:[#allocation17_spill] sm:$0xff] }
  0x95   : > { %393 = vmatprep.subr.mxu0 %v1875_v21  ;;  %464 = vmatprep.subr.mxu1 %v1874_v23  ;;  %v1964_v21 = vld [vmem:[#allocation16_spill] sm:$0xff]  ;;  %v1965_v23 = vld [vmem:[#allocation11_spill] sm:$0xff] }
  0x96   : > { %394 = vmatpush1.msra.mxu0 %v1873_v20  ;;  %465 = vmatpush1.msra.mxu1 %v840_v22  ;;  %v1966_v20 = vld [vmem:[#allocation13_spill] sm:$0xff] }
  0x97   : > { %395 = vmatprep.subr.mxu0 %v1872_v17  ;;  %466 = vmatprep.subr.mxu1 %v825_v19  ;;  %v1967_v17 = vld [vmem:[#allocation12_spill] sm:$0xff] }
  0x98   : > { %396 = vmatpush1.msra.mxu0 %v1871_v16  ;;  %467 = vmatpush1.msra.mxu1 %v1960_v1  ;;  %v1968_v16 = vld [vmem:[#allocation9_spill] sm:$0xff]  ;;  %v1969_v1 = vld [vmem:[#allocation6_spill] sm:$0xff] }
  0x99   : > { %397 = vmatprep.subr.mxu0 %v1961_v7  ;;  %468 = vmatprep.subr.mxu1 %v1962_v24  ;;  %v1970_v7 = vld [vmem:[#allocation8_spill] sm:$0xff]  ;;  %v1971_v24 = vld [vmem:[#allocation3_spill] sm:$0xff] }
  0x9a   : > { %398 = vmatpush1.msra.mxu0 %v1963_v25  ;;  %469 = vmatpush1.msra.mxu1 %v1964_v21  ;;  %v1972_v25 = vld [vmem:[#allocation5_spill] sm:$0xff]  ;;  %v1973_v21 = vld [vmem:[#allocation2_spill] sm:$0xff] }
  0x9b   : > { %399 = vmatprep.subr.mxu0 %v1965_v23  ;;  %470 = vmatprep.subr.mxu1 %v1966_v20  ;;  %v1974_v23 = vld [vmem:[#allocation4_spill] sm:$0xff]  ;;  %v1975_v20 = vld [vmem:[#allocation87_spill] sm:$0xff] }
  0x9c   : > { %400 = vmatpush1.msra.mxu0 %v1870_v8  ;;  %471 = vmatpush1.msra.mxu1 %v1967_v17  ;;  %v1976_v8 = vld [vmem:[#allocation89_spill] sm:$0xff]  ;;  %v1977_v17 = vld [vmem:[#allocation86_spill] sm:$0xff] }
  0x9d   : > { %401 = vmatprep.subr.mxu0 %v1869_v5  ;;  %472 = vmatprep.subr.mxu1 %v1968_v16  ;;  %v1978_v5 = vld [vmem:[#allocation88_spill] sm:$0xff]  ;;  %v1979_v16 = vld [vmem:[#allocation83_spill] sm:$0xff] }
  0x9e   : > { %402 = vmatpush1.msra.mxu0 %v1969_v1  ;;  %473 = vmatpush1.msra.mxu1 %v1970_v7  ;;  %v1980_v1 = vld [vmem:[#allocation85_spill] sm:$0xff]  ;;  %v1981_v7 = vld [vmem:[#allocation82_spill] sm:$0xff] }
  0x9f   : > { %403 = vmatprep.subr.mxu0 %v1971_v24  ;;  %474 = vmatprep.subr.mxu1 %v1972_v25  ;;  %v1982_v24 = vld [vmem:[#allocation84_spill] sm:$0xff]  ;;  %v1983_v25 = vld [vmem:[#allocation79_spill] sm:$0xff] }
  0xa0   : > { %404 = vmatpush1.msra.mxu0 %v1973_v21  ;;  %475 = vmatpush1.msra.mxu1 %v1974_v23  ;;  %v1984_v21 = vld [vmem:[#allocation81_spill] sm:$0xff]  ;;  %v1985_v23 = vld [vmem:[#allocation78_spill] sm:$0xff] }
  0xa1   : > { %405 = vmatprep.subr.mxu0 %v1975_v20  ;;  %476 = vmatprep.subr.mxu1 %v1976_v8  ;;  %v1986_v20 = vld [vmem:[#allocation80_spill] sm:$0xff]  ;;  %v1987_v8 = vld [vmem:[#allocation75_spill] sm:$0xff] }
  0xa2   : > { %406 = vmatpush2.msra.mxu0 %v1977_v17  ;;  %477 = vmatpush2.msra.mxu1 %v1978_v5  ;;  %v1988_v17 = vld [vmem:[#allocation77_spill] sm:$0xff]  ;;  %v1989_v5 = vld [vmem:[#allocation74_spill] sm:$0xff] }
  0xa3   : > { %407 = vmatprep.subr.mxu0 %v1979_v16  ;;  %478 = vmatprep.subr.mxu1 %v1980_v1  ;;  %v1990_v16 = vld [vmem:[#allocation76_spill] sm:$0xff]  ;;  %v1991_v1 = vld [vmem:[#allocation71_spill] sm:$0xff] }
  0xa4   : > { %408 = vmatpush2.msra.mxu0 %v1981_v7  ;;  %479 = vmatpush2.msra.mxu1 %v1982_v24  ;;  %v1992_v7 = vld [vmem:[#allocation73_spill] sm:$0xff]  ;;  %v1993_v24 = vld [vmem:[#allocation70_spill] sm:$0xff] }
  0xa5   : > { %409 = vmatprep.subr.mxu0 %v1983_v25  ;;  %480 = vmatprep.subr.mxu1 %v1984_v21  ;;  %v1994_v25 = vld [vmem:[#allocation72_spill] sm:$0xff]  ;;  %v1995_v21 = vld [vmem:[#allocation67_spill] sm:$0xff] }
  0xa6   : > { %410 = vmatpush2.msra.mxu0 %v1985_v23  ;;  %481 = vmatpush2.msra.mxu1 %v1986_v20  ;;  %v1996_v23 = vld [vmem:[#allocation69_spill] sm:$0xff]  ;;  %v1997_v20 = vld [vmem:[#allocation66_spill] sm:$0xff] }
  0xa7   : > { %411 = vmatprep.subr.mxu0 %v1987_v8  ;;  %482 = vmatprep.subr.mxu1 %v1988_v17  ;;  %v1998_v8 = vld [vmem:[#allocation68_spill] sm:$0xff]  ;;  %v1999_v17 = vld [vmem:[#allocation63_spill] sm:$0xff] }
  0xa8   : > { %412 = vmatpush2.msra.mxu0 %v1989_v5  ;;  %483 = vmatpush2.msra.mxu1 %v1990_v16  ;;  %v2000_v5 = vld [vmem:[#allocation65_spill] sm:$0xff]  ;;  %v2001_v16 = vld [vmem:[#allocation62_spill] sm:$0xff] }
  0xa9   : > { %413 = vmatprep.subr.mxu0 %v1991_v1  ;;  %484 = vmatprep.subr.mxu1 %v1992_v7  ;;  %v2002_v1 = vld [vmem:[#allocation64_spill] sm:$0xff]  ;;  %v2003_v7 = vld [vmem:[#allocation59_spill] sm:$0xff] }
  0xaa   : > { %414 = vmatpush2.msra.mxu0 %v1993_v24  ;;  %485 = vmatpush2.msra.mxu1 %v1994_v25  ;;  %v2004_v24 = vld [vmem:[#allocation61_spill] sm:$0xff]  ;;  %v2005_v25 = vld [vmem:[#allocation58_spill] sm:$0xff] }
  0xab   : > { %415 = vmatprep.subr.mxu0 %v1995_v21  ;;  %486 = vmatprep.subr.mxu1 %v1996_v23  ;;  %v2006_v21 = vld [vmem:[#allocation60_spill] sm:$0xff]  ;;  %v2007_v23 = vld [vmem:[#allocation55_spill] sm:$0xff] }
  0xac   : > { %416 = vmatpush2.msra.mxu0 %v1997_v20  ;;  %487 = vmatpush2.msra.mxu1 %v1998_v8  ;;  %v2008_v20 = vld [vmem:[#allocation57_spill] sm:$0xff]  ;;  %v2009_v8 = vld [vmem:[#allocation54_spill] sm:$0xff] }
  0xad   : > { %417 = vmatprep.subr.mxu0 %v1999_v17  ;;  %488 = vmatprep.subr.mxu1 %v2000_v5  ;;  %v2010_v17 = vld [vmem:[#allocation56_spill] sm:$0xff]  ;;  %v2011_v5 = vld [vmem:[#allocation51_spill] sm:$0xff] }
  0xae   : > { %418 = vmatpush2.msra.mxu0 %v2001_v16  ;;  %489 = vmatpush2.msra.mxu1 %v2002_v1  ;;  %v2012_v16 = vld [vmem:[#allocation53_spill] sm:$0xff]  ;;  %v2013_v1 = vld [vmem:[#allocation50_spill] sm:$0xff] }
  0xaf   : > { %419 = vmatprep.subr.mxu0 %v2003_v7  ;;  %490 = vmatprep.subr.mxu1 %v2004_v24  ;;  %v2014_v7 = vld [vmem:[#allocation52_spill] sm:$0xff]  ;;  %v2015_v24 = vld [vmem:[#allocation47_spill] sm:$0xff] }
  0xb0   : > { %420 = vmatpush2.msra.mxu0 %v2005_v25  ;;  %491 = vmatpush2.msra.mxu1 %v2006_v21  ;;  %v2016_v25 = vld [vmem:[#allocation49_spill] sm:$0xff]  ;;  %v2017_v21 = vld [vmem:[#allocation46_spill] sm:$0xff] }
  0xb1   : > { %421 = vmatprep.subr.mxu0 %v2007_v23  ;;  %492 = vmatprep.subr.mxu1 %v2008_v20  ;;  %v2018_v23 = vld [vmem:[#allocation48_spill] sm:$0xff]  ;;  %v2019_v20 = vld [vmem:[#allocation43_spill] sm:$0xff] }
  0xb2   : > { %422 = vmatpush2.msra.mxu0 %v2009_v8  ;;  %493 = vmatpush2.msra.mxu1 %v2010_v17  ;;  %v2020_v8 = vld [vmem:[#allocation44_spill] sm:$0xff]  ;;  %v2021_v17 = vld [vmem:[#allocation39_spill] sm:$0xff] }
  0xb3   : > { %423 = vmatprep.subr.mxu0 %v2011_v5  ;;  %494 = vmatprep.subr.mxu1 %v2012_v16  ;;  %v2022_v5 = vld [vmem:[#allocation41_spill] sm:$0xff]  ;;  %v2023_v16 = vld [vmem:[#allocation38_spill] sm:$0xff] }
  0xb4   : > { %424 = vmatpush2.msra.mxu0 %v2013_v1  ;;  %495 = vmatpush2.msra.mxu1 %v2014_v7  ;;  %v2024_v1 = vld [vmem:[#allocation40_spill] sm:$0xff]  ;;  %v2025_v7 = vld [vmem:[#allocation35_spill] sm:$0xff] }
  0xb5   : > { %425 = vmatprep.subr.mxu0 %v2015_v24  ;;  %496 = vmatprep.subr.mxu1 %v2016_v25  ;;  %v2026_v24 = vld [vmem:[#allocation37_spill] sm:$0xff]  ;;  %v2027_v25 = vld [vmem:[#allocation34_spill] sm:$0xff] }
  0xb6   : > { %426 = vmatpush2.msra.mxu0 %v2017_v21  ;;  %497 = vmatpush2.msra.mxu1 %v2018_v23  ;;  %v170_v23 = vld [vmem:[%s1650_s28] sm:$0xff] }
  0xb7   : > { %427 = vmatprep.subr.mxu0 %v2019_v20  ;;  %498 = vmatprep.subr.mxu1 %v1942_v4 }
  0xb8   : > { %428 = vmatpush2.msra.mxu0 %v1940_v18  ;;  %499 = vmatpush2.msra.mxu1 %v2020_v8 }
  0xb9   : > { %429 = vmatprep.subr.mxu0 %v2021_v17  ;;  %500 = vmatprep.subr.mxu1 %v2022_v5 }
  0xba   : > { %430 = vmatpush2.msra.mxu0 %v2023_v16  ;;  %501 = vmatpush2.msra.mxu1 %v2024_v1 }
  0xbb   : > { %431 = vmatprep.subr.mxu0 %v2025_v7  ;;  %502 = vmatprep.subr.mxu1 %v2026_v24 }
  0xbc   : > { %432 = vmatpush2.msra.mxu0 %v2027_v25  ;;  %503 = vmatpush2.msra.mxu1 %v1952_v13 }
  0xbd   : > { %433 = vmatprep.subr.mxu0 %v1951_v6  ;;  %504 = vmatprep.subr.mxu1 %v1954_v12 }
  0xbe   : > { %434 = vmatpush2.msra.mxu0 %v1953_v15  ;;  %505 = vmatpush2.msra.mxu1 %v1956_v9 }
  0xbf   : > { %435 = vmatprep.subr.mxu0 %v1955_v14  ;;  %506 = vmatprep.subr.mxu1 %v1958_v11 }
  0xc0   : > { %436 = vmatpush2.msra.mxu0 %v1957_v10  ;;  %507 = vmatpush2.msra.mxu1 %v1959_v0  ;;  %v171_v0 = vld [vmem:[%s1650_s28 + $0x8] sm:$0xff] }
 0x13f   : > { %v238_v21 = vpop.f32.mrf.mxu0 }
 0x141   : > { %v240_v20 = vpop.f32.mrf.mxu0  ;;  %v309_v8 = vpop.f32.mrf.mxu1 }
 0x142   : > { %v318_v17 = vcombine.low %v238_v21, %v240_v20  ;;  %v355_v21 = vld [vmem:[%s354_s5] sm:$0xf] }
 0x143   : > { %v311_v16 = vpop.f32.mrf.mxu1 }
 0x144   : > { %v322_v5 = vadd.f32 %v318_v17, %v170_v23  ;;  %v319_v24 = vcombine.low %v309_v8, %v311_v16 }
 0x146   : > { %v602_v1 = vmul.f32 -1.442695, %v322_v5  ;;  %v331_v7 = vrot.slane %v322_v5, 4  ;;  %v323_v4 = vadd.f32 %v319_v24, %v171_v0  ;;  %v356_v0 = vsub.f32 1.0, %v355_v21  ;;  %v2028_v5 = vld [vmem:[#allocation92_spill] sm:$0xff] }
 0x148   : > { %649 = vpow2.f32 %v602_v1  ;;  %v603_v25 = vmul.f32 -1.442695, %v331_v7  ;;  %v341_v6 = vrot.slane %v323_v4, 4 }
 0x14a   : > { %651 = vpow2.f32 %v603_v25  ;;  %v604_v9 = vmul.f32 -1.442695, %v341_v6 }
 0x14c   : > { %653 = vpow2.f32 %v604_v9  ;;  %v1659_v9 = vld [vmem:[%s354_s5 + $0x4] sm:$0xf] }
 0x155   : > { %v650_v10 = vpop.eup %649 }
 0x156   : > { %v327_v11 = vadd.f32 1.0, %v650_v10 }
 0x157   : > { %v652_v12 = vpop.eup %651 }
 0x158   : > { %655 = vrcp.f32 %v327_v11  ;;  %v336_v13 = vadd.f32 1.0, %v652_v12  ;;  %v358_v11 = vmul.f32 %v2028_v5, %v356_v0 }
 0x159   : > { %657 = vtanh.f32 %v323_v4  ;;  %v654_v23 = vpop.eup %653 }
 0x15a   : > { %659 = vrcp.f32 %v336_v13  ;;  %v346_v6 = vadd.f32 1.0, %v654_v23  ;;  %v557_v13 = vsub.f32 1.0, %v1659_v9  ;;  %v361_v23 = vmul.f32 %v699_v3, %v356_v0 }
 0x15c   : > { %661 = vrcp.f32 %v346_v6 }
 0x165   : > { %v656_v20 = vpop.eup %655 }
 0x166   : > { %v658_v8 = vpop.eup %657 }
 0x167   : > { %v660_v17 = vpop.eup %659  ;;  %v350_v16 = vmul.f32 %v658_v8, %v656_v20  ;;  %v2029_v8 = vld [vmem:[#allocation90_spill] sm:$0xff] }
 0x168   : > { %v349_v10 = vmul.f32 %v2028_v5, %v660_v17 }
 0x169   : > { %v662_v24 = vpop.eup %661 }
 0x16a   : > { %v351_v12 = vadd.f32 %v350_v16, %v349_v10 }
 0x16c   : > { %663 = vtanh.f32 %v351_v12  ;;  %v357_v4 = vmul.f32 %v355_v21, %v351_v12 }
 0x16e   : > { %v359_v1 = vadd.f32 %v358_v11, %v357_v4 }
 0x170   : > { %v559_v7 = vmul.f32 %v557_v13, %v359_v1 }
 0x179   : > { %v664_v25 = vpop.eup %663 }
 0x17a   : > { %v353_v14 = vmul.f32 %v664_v25, %v662_v24 }
 0x17c   : > { %v360_v17 = vmul.f32 %v355_v21, %v353_v14  ;;  %v607_v21 = vld [vmem:[%s1650_s28 + $0x10] sm:$0xff] }
 0x17e   : > { %v362_v20 = vadd.f32 %v361_v23, %v360_v17 }
 0x180   : > { %364 = vst [vmem:[%s1667_s8] sm:$0xf] %v362_v20  ;;  %v367_v6 = vmul.f32 %v362_v20, %v2029_v8  ;;  %v562_v5 = vmul.f32 %v557_v13, %v362_v20  ;;  %v366_v10 = vmul.f32 %v362_v20, %v1868_v2  ;;  %v608_v13 = vld [vmem:[%s1650_s28 + $0x18] sm:$0xff] }
 0x182   : > { %437 = vmatprep.mubr.f32.mxu0 %v367_v6  ;;  %508 = vmatprep.mubr.f32.mxu1 %v367_v6 }
 0x183   : > { %438 = vmatmul.mubr.f32.vlgmr.msra.gmra.mxu0 %v366_v10  ;;  %509 = vmatmul.mubr.f32.vlgmr.msra.gmra.mxu1 %v366_v10 }
 0x243   : > { %v439_v3 = vpop.f32.mrf.mxu0  ;;  %v510_v14 = vpop.f32.mrf.mxu1 }
 0x245   : > { %v441_v0 = vpop.f32.mrf.mxu0  ;;  %v512_v12 = vpop.f32.mrf.mxu1 }
 0x246   : > { %v519_v16 = vcombine.low %v439_v3, %v441_v0  ;;  %v520_v25 = vcombine.low %v510_v14, %v512_v12 }
 0x248   : > { %v523_v11 = vadd.f32 %v607_v21, %v519_v16  ;;  %v524_v17 = vadd.f32 %v608_v13, %v520_v25 }
 0x24a   : > { %v609_v4 = vmul.f32 -1.442695, %v523_v11  ;;  %v532_v24 = vrot.slane %v523_v11, 4  ;;  %v542_v20 = vrot.slane %v524_v17, 4 }
 0x24c   : > { %665 = vpow2.f32 %v609_v4  ;;  %v610_v23 = vmul.f32 -1.442695, %v532_v24  ;;  %v611_v8 = vmul.f32 -1.442695, %v542_v20 }
 0x24e   : > { %667 = vpow2.f32 %v610_v23 }
 0x24f   : > { %669 = vpow2.f32 %v611_v8 }
 0x259   : > { %v666_v6 = vpop.eup %665 }
 0x25a   : > { %v528_v2 = vadd.f32 1.0, %v666_v6 }
 0x25b   : > { %v668_v10 = vpop.eup %667 }
 0x25c   : > { %671 = vrcp.f32 %v528_v2  ;;  %v537_v15 = vadd.f32 1.0, %v668_v10  ;;  %v670_v3 = vpop.eup %669 }
 0x25d   : > { %673 = vtanh.f32 %v524_v17  ;;  %v547_v16 = vadd.f32 1.0, %v670_v3 }
 0x25e   : > { %675 = vrcp.f32 %v537_v15 }
 0x25f   : > { %677 = vrcp.f32 %v547_v16 }
 0x269   : > { %v672_v21 = vpop.eup %671 }
 0x26a   : > { %v674_v0 = vpop.eup %673 }
 0x26b   : > { %v676_v14 = vpop.eup %675  ;;  %v551_v12 = vmul.f32 %v674_v0, %v672_v21 }
 0x26c   : > { %v550_v11 = vmul.f32 %v676_v14, %v359_v1  ;;  %v678_v25 = vpop.eup %677 }
 0x26e   : > { %v552_v4 = vadd.f32 %v551_v12, %v550_v11 }
 0x270   : > { %679 = vtanh.f32 %v552_v4  ;;  %v558_v24 = vmul.f32 %v1659_v9, %v552_v4 }
 0x272   : > { %v560_v7 = vadd.f32 %v559_v7, %v558_v24  }
 0x27d   : > { %v680_v23 = vpop.eup %679 }
 0x27e   : > { %v554_v2 = vmul.f32 %v680_v23, %v678_v25 }
 0x280   : > { %v561_v13 = vmul.f32 %v1659_v9, %v554_v2  ;;  %160 = sbr.rel (!%p158_p0) target bundleno = 63 (0x3f), region = 45 }
 0x282   : > { %v563_v3 = vadd.f32 %v562_v5, %v561_v13  }
 0x284   : > { %617 = vst [vmem:[%s1667_s8 + $0x4] sm:$0xf] %v563_v3 }

// kernel: dlstm_forward.5
= control target key start
LH: loop header
LB: loop body
LE: loop exit
PB: predicated region body
PF: predicated region fallthrough
CT: control target
= control target key end

     0   :  { %s3624_s26 = smov 0   ;;  %s4436_s0 = inlined_call_operand.vmem [shape: f32[5,2,5080], index: 0, kind: input, shape index: {}]   ;;  %s4437_s1 = inlined_call_operand.vmem [shape: f32[5,5080,128], index: 1, kind: input, shape index: {}]   ;;  %s4438_s2 = inlined_call_operand.vmem [shape: f32[1,128], index: 2, kind: input, shape index: {}]   ;;  %s4439_s3 = inlined_call_operand.vmem [shape: f32[128,32], index: 3, kind: input, shape index: {}]   ;;  %s4440_s4 = inlined_call_operand.vmem [shape: f32[1,32], index: 4, kind: input, shape index: {}]   ;;  %s4441_s5 = inlined_call_operand.vmem [shape: f32[32,1], index: 5, kind: input, shape index: {}]   ;;  %s4442_s6 = inlined_call_operand.<no memory space> [shape: f32[1,1], index: 6, kind: input, shape index: {}]   ;;  %s4443_s7 = inlined_call_operand.vmem [shape: f32[2,1], index: 7, kind: output, shape index: {}]  }
   0x1   :  { %v12_v0 = vstv %s4442_s6 }
   0x2   :  { %13 = vst [vmem:[#allocation3] sm:$0x1] %v12_v0 }
   0x3 LB: > { %s3630_s27 = sadd.s32 4294967295, %s3574_s26   ;;  %p2798_p0 = scmp.ge.s32.totalorder %s3574_s26, 1  ;;  %s3574_s26 = sphi %s3624_s26, %s19_s26  }
   0x4   : > { %p244_p1 = scmp.lt.s32.totalorder %s3574_s26, 6 }
   0x6   : > { %p245_p2 = pnand %p2798_p0, %p244_p1 }
   0x7   : > { %p276_p3 = scmp.lt.s32.totalorder (!%p245_p2), %s3630_s27, 4  ;;  %p2801_p4 = scmp.ne.s32.totalorder (!%p245_p2), %s3630_s27, 0 }
   0x8   : > { %248 = sbr.rel (%p245_p2) target bundleno = 1006 (0x3ee), region = 48 }
   0xd   : > { %s277_s6 = scalar_select %p276_p3, %s3630_s27, 4 }
   0xe   : > { %289 = sbr.rel (%p2801_p4) target bundleno = 21 (0x15), region = 52 }
   0xf   : > { %s3543_s28 = smul.u32 80, %s277_s6 }
  0x10   : > { %s3544_s29 = smul.u32 5080, %s277_s6 }
  0x11   : > { %s3639_s9 = scalar_lea.vmem %s4436_s0, %s3543_s28 }
  0x12   : > { %s3644_s12 = scalar_lea.vmem %s4437_s1, %s3544_s29 }
  0x13   : > { %v3576_v1 = vmov 0.0  }
  0x14   : > { %290 = vst [vmem:[#allocation2] sm:$0x3] %v3576_v1 }
  0x15 PF: > { %v333_v2 = vld [vmem:[%s3644_s12 + $0xf8] sm:$0xff]  ;;  %v332_v6 = vld [vmem:[%s3644_s12 + $0xf0] sm:$0xff]  ;;  %v331_v10 = vld [vmem:[%s3644_s12 + $0xe8] sm:$0xff]  ;;  %v3577_v32 = vmov 1983009808   ;;  %v951_v34 = vlaneseq  ;;  %vm1156_vm0 = vcmask 719872  }
  0x16   : > { %v365_v3 = vld [vmem:[%s3644_s12 + $0x1f8] sm:$0xff]  ;;  %2810 = vmatprep.subr.mxu0 %v333_v2  ;;  %v364_v7 = vld [vmem:[%s3644_s12 + $0x1f0] sm:$0xff]  ;;  %v363_v11 = vld [vmem:[%s3644_s12 + $0x1e8] sm:$0xff]  ;;  %v949_v33 = vunpack.c.l.s4 %v3577_v32  ;;  %p2803_p5 = scmp.ne.s32.totalorder %s3630_s27, 4 }
  0x17   : > { %v317_v4 = vld [vmem:[%s3644_s12 + $0x78] sm:$0xff]  ;;  %2845 = vmatprep.subr.mxu1 %v365_v3  ;;  %v316_v8 = vld [vmem:[%s3644_s12 + $0x70] sm:$0xff]  ;;  %v315_v12 = vld [vmem:[%s3644_s12 + $0x68] sm:$0xff]  ;;  %v952_v44 = vshrl.u32 %v951_v34, 7 }
  0x18   : > { %v349_v5 = vld [vmem:[%s3644_s12 + $0x178] sm:$0xff]  ;;  %2811 = vmatpush3.msra.mxu0 %v317_v4  ;;  %v348_v9 = vld [vmem:[%s3644_s12 + $0x170] sm:$0xff]  ;;  %v347_v13 = vld [vmem:[%s3644_s12 + $0x168] sm:$0xff]  ;;  %v950_v43 = vunpack.c.0.s8 %v949_v33 }
  0x19   : > { %2846 = vmatpush3.msra.mxu1 %v349_v5  ;;  %2812 = vmatprep.subr.mxu0 %v332_v6  ;;  %v330_v14 = vld [vmem:[%s3644_s12 + $0xe0] sm:$0xff]  ;;  %v329_v18 = vld [vmem:[%s3644_s12 + $0xd8] sm:$0xff]  ;;  %v328_v22 = vld [vmem:[%s3644_s12 + $0xd0] sm:$0xff] }
  0x1a   : > { %2847 = vmatprep.subr.mxu1 %v364_v7  ;;  %2813 = vmatpush3.msra.mxu0 %v316_v8  ;;  %v362_v15 = vld [vmem:[%s3644_s12 + $0x1e0] sm:$0xff]  ;;  %v361_v19 = vld [vmem:[%s3644_s12 + $0x1d8] sm:$0xff]  ;;  %v360_v23 = vld [vmem:[%s3644_s12 + $0x1d0] sm:$0xff]  ;;  %v3693_v53 = vsub.s32 %v950_v43, %v952_v44 }
  0x1b   : > { %2848 = vmatpush3.msra.mxu1 %v348_v9  ;;  %2814 = vmatprep.subr.mxu0 %v331_v10  ;;  %v314_v16 = vld [vmem:[%s3644_s12 + $0x60] sm:$0xff]  ;;  %v313_v20 = vld [vmem:[%s3644_s12 + $0x58] sm:$0xff]  ;;  %v312_v24 = vld [vmem:[%s3644_s12 + $0x50] sm:$0xff] }
  0x1c   : > { %2849 = vmatprep.subr.mxu1 %v363_v11  ;;  %v346_v17 = vld [vmem:[%s3644_s12 + $0x160] sm:$0xff]  ;;  %2815 = vmatpush3.msra.mxu0 %v315_v12  ;;  %v345_v21 = vld [vmem:[%s3644_s12 + $0x158] sm:$0xff]  ;;  %v344_v25 = vld [vmem:[%s3644_s12 + $0x150] sm:$0xff] }
  0x1d   : > { %2850 = vmatpush3.msra.mxu1 %v347_v13  ;;  %2816 = vmatprep.subr.mxu0 %v330_v14  ;;  %v327_v26 = vld [vmem:[%s3644_s12 + $0xc8] sm:$0xff]  ;;  %v326_v30 = vld [vmem:[%s3644_s12 + $0xc0] sm:$0xff]  ;;  %v325_v37 = vld [vmem:[%s3644_s12 + $0xb8] sm:$0xff] }
  0x1e   : > { %2851 = vmatprep.subr.mxu1 %v362_v15  ;;  %2817 = vmatpush3.msra.mxu0 %v314_v16  ;;  %v359_v27 = vld [vmem:[%s3644_s12 + $0x1c8] sm:$0xff]  ;;  %v358_v31 = vld [vmem:[%s3644_s12 + $0x1c0] sm:$0xff]  ;;  %v357_v38 = vld [vmem:[%s3644_s12 + $0x1b8] sm:$0xff] }
  0x1f   : > { %2852 = vmatpush3.msra.mxu1 %v346_v17  ;;  %2818 = vmatprep.subr.mxu0 %v329_v18  ;;  %v311_v28 = vld [vmem:[%s3644_s12 + $0x48] sm:$0xff]  ;;  %v310_v35 = vld [vmem:[%s3644_s12 + $0x40] sm:$0xff]  ;;  %v309_v39 = vld [vmem:[%s3644_s12 + $0x38] sm:$0xff] }
  0x20   : > { %2853 = vmatprep.subr.mxu1 %v361_v19  ;;  %2819 = vmatpush3.msra.mxu0 %v313_v20  ;;  %v343_v29 = vld [vmem:[%s3644_s12 + $0x148] sm:$0xff]  ;;  %v342_v36 = vld [vmem:[%s3644_s12 + $0x140] sm:$0xff]  ;;  %v341_v40 = vld [vmem:[%s3644_s12 + $0x138] sm:$0xff] }
  0x21   : > { %2854 = vmatpush3.msra.mxu1 %v345_v21  ;;  %2820 = vmatprep.subr.mxu0 %v328_v22  ;;  %v324_v41 = vld [vmem:[%s3644_s12 + $0xb0] sm:$0xff]  ;;  %v323_v47 = vld [vmem:[%s3644_s12 + $0xa8] sm:$0xff]  ;;  %v322_v51 = vld [vmem:[%s3644_s12 + $0xa0] sm:$0xff] }
  0x22   : > { %2855 = vmatprep.subr.mxu1 %v360_v23  ;;  %2821 = vmatpush3.msra.mxu0 %v312_v24  ;;  %v356_v42 = vld [vmem:[%s3644_s12 + $0x1b0] sm:$0xff]  ;;  %v355_v48 = vld [vmem:[%s3644_s12 + $0x1a8] sm:$0xff]  ;;  %v354_v52 = vld [vmem:[%s3644_s12 + $0x1a0] sm:$0xff] }
  0x23   : > { %2856 = vmatpush3.msra.mxu1 %v344_v25  ;;  %2822 = vmatprep.subr.mxu0 %v327_v26  ;;  %v308_v45 = vld [vmem:[%s3644_s12 + $0x30] sm:$0xff]  ;;  %v307_v49 = vld [vmem:[%s3644_s12 + $0x28] sm:$0xff]  ;;  %v306_v54 = vld [vmem:[%s3644_s12 + $0x20] sm:$0xff] }
  0x24   : > { %2857 = vmatprep.subr.mxu1 %v359_v27  ;;  %2823 = vmatpush3.msra.mxu0 %v311_v28  ;;  %v340_v46 = vld [vmem:[%s3644_s12 + $0x130] sm:$0xff]  ;;  %v339_v50 = vld [vmem:[%s3644_s12 + $0x128] sm:$0xff]  ;;  %v338_v55 = vld [vmem:[%s3644_s12 + $0x120] sm:$0xff] }
  0x25   : > { %2858 = vmatpush3.msra.mxu1 %v343_v29  ;;  %2824 = vmatprep.subr.mxu0 %v326_v30  ;;  %v292_v56 = vld [vmem:[%s3639_s9] sm:$0xff]  ;;  %v321_v57 = vld [vmem:[%s3644_s12 + $0x98] sm:$0xff]  ;;  %v320_v62 = vld [vmem:[%s3644_s12 + $0x90] sm:$0xff] }
  0x26   : > { %2859 = vmatprep.subr.mxu1 %v358_v31  ;;  %2825 = vmatpush3.msra.mxu0 %v310_v35  ;;  %v353_v58 = vld [vmem:[%s3644_s12 + $0x198] sm:$0xff]  ;;  %v947_v59 = vcombine.high %v292_v56, %v292_v56  ;;  %v352_v63 = vld [vmem:[%s3644_s12 + $0x190] sm:$0xff]  ;;  %v954_v0 = vrot.slane %v292_v56, %v3693_v53  ;;  %v319_v4 = vld [vmem:[%s3644_s12 + $0x88] sm:$0xff] }
  0x27   : > { %2860 = vmatpush3.msra.mxu1 %v342_v36  ;;  %2826 = vmatprep.subr.mxu0 %v325_v37  ;;  %v305_v60 = vld [vmem:[%s3644_s12 + $0x18] sm:$0xff]  ;;  %v304_v1 = vld [vmem:[%s3644_s12 + $0x10] sm:$0xff]  ;;  %v351_v5 = vld [vmem:[%s3644_s12 + $0x188] sm:$0xff] }
  0x28   : > { %2861 = vmatprep.subr.mxu1 %v357_v38  ;;  %2827 = vmatpush3.msra.mxu0 %v309_v39  ;;  %v337_v61 = vld [vmem:[%s3644_s12 + $0x118] sm:$0xff]  ;;  %v336_v2 = vld [vmem:[%s3644_s12 + $0x110] sm:$0xff]  ;;  %v961_v3 = vrot.slane %v947_v59, %v3693_v53  ;;  %v303_v6 = vld [vmem:[%s3644_s12 + $0x8] sm:$0xff]  ;;  %v962_v10 = vcombine.high %v954_v0, %v954_v0 }
  0x29   : > { %2862 = vmatpush3.msra.mxu1 %v341_v40  ;;  %2828 = vmatprep.subr.mxu0 %v324_v41  ;;  %v335_v7 = vld [vmem:[%s3644_s12 + $0x108] sm:$0xff]  ;;  %v318_v8 = vld [vmem:[%s3644_s12 + $0x80] sm:$0xff]  ;;  %v397_v14 = vld [vmem:[%s3644_s12 + $0x2f8] sm:$0xff] }
  0x2a   : > { %2863 = vmatprep.subr.mxu1 %v356_v42  ;;  %2829 = vmatpush3.msra.mxu0 %v308_v45  ;;  %v350_v9 = vld [vmem:[%s3644_s12 + $0x180] sm:$0xff]  ;;  %v963_v12 = vcombine.high %v961_v3, %v961_v3  ;;  %v429_v15 = vld [vmem:[%s3644_s12 + $0x3f8] sm:$0xff]  ;;  %v396_v18 = vld [vmem:[%s3644_s12 + $0x2f0] sm:$0xff] }
  0x2b   : > { %2864 = vmatpush3.msra.mxu1 %v340_v46  ;;  %2830 = vmatprep.subr.mxu0 %v323_v47  ;;  %v302_v11 = vld [vmem:[%s3644_s12] sm:$0xff]  ;;  %v381_v16 = vld [vmem:[%s3644_s12 + $0x278] sm:$0xff]  ;;  %v428_v19 = vld [vmem:[%s3644_s12 + $0x3f0] sm:$0xff] }
  0x2c   : > { %2865 = vmatprep.subr.mxu1 %v355_v48  ;;  %2831 = vmatpush3.msra.mxu0 %v307_v49  ;;  %v334_v13 = vld [vmem:[%s3644_s12 + $0x100] sm:$0xff]  ;;  %v413_v17 = vld [vmem:[%s3644_s12 + $0x378] sm:$0xff]  ;;  %v380_v20 = vld [vmem:[%s3644_s12 + $0x270] sm:$0xff] }
  0x2d   : > { %2866 = vmatpush3.msra.mxu1 %v339_v50  ;;  %2832 = vmatprep.subr.mxu0 %v322_v51  ;;  %v412_v21 = vld [vmem:[%s3644_s12 + $0x370] sm:$0xff]  ;;  %v395_v22 = vld [vmem:[%s3644_s12 + $0x2e8] sm:$0xff]  ;;  %v394_v26 = vld [vmem:[%s3644_s12 + $0x2e0] sm:$0xff] }
  0x2e   : > { %2867 = vmatprep.subr.mxu1 %v354_v52  ;;  %2833 = vmatpush3.msra.mxu0 %v306_v54  ;;  %v427_v23 = vld [vmem:[%s3644_s12 + $0x3e8] sm:$0xff]  ;;  %v426_v27 = vld [vmem:[%s3644_s12 + $0x3e0] sm:$0xff]  ;;  %v393_v30 = vld [vmem:[%s3644_s12 + $0x2d8] sm:$0xff] }
  0x2f   : > { %2868 = vmatpush3.msra.mxu1 %v338_v55  ;;  %2834 = vmatprep.subr.mxu0 %v321_v57  ;;  %v379_v24 = vld [vmem:[%s3644_s12 + $0x268] sm:$0xff]  ;;  %v378_v28 = vld [vmem:[%s3644_s12 + $0x260] sm:$0xff]  ;;  %v425_v31 = vld [vmem:[%s3644_s12 + $0x3d8] sm:$0xff] }
  0x30   : > { %2869 = vmatprep.subr.mxu1 %v353_v58  ;;  %2835 = vmatpush3.msra.mxu0 %v305_v60  ;;  %v411_v25 = vld [vmem:[%s3644_s12 + $0x368] sm:$0xff]  ;;  %v410_v29 = vld [vmem:[%s3644_s12 + $0x360] sm:$0xff]  ;;  %v377_v32 = vld [vmem:[%s3644_s12 + $0x258] sm:$0xff] }
  0x31   : > { %2870 = vmatpush3.msra.mxu1 %v337_v61  ;;  %2836 = vmatprep.subr.mxu0 %v320_v62  ;;  %v409_v33 = vld [vmem:[%s3644_s12 + $0x358] sm:$0xff]  ;;  %v392_v34 = vld [vmem:[%s3644_s12 + $0x2d0] sm:$0xff]  ;;  %v391_v38 = vld [vmem:[%s3644_s12 + $0x2c8] sm:$0xff] }
  0x32   : > { %2871 = vmatprep.subr.mxu1 %v352_v63  ;;  %2837 = vmatpush3.msra.mxu0 %v304_v1  ;;  %v424_v35 = vld [vmem:[%s3644_s12 + $0x3d0] sm:$0xff]  ;;  %v423_v39 = vld [vmem:[%s3644_s12 + $0x3c8] sm:$0xff]  ;;  %v390_v42 = vld [vmem:[%s3644_s12 + $0x2c0] sm:$0xff] }
  0x33   : > { %2872 = vmatpush3.msra.mxu1 %v336_v2  ;;  %2838 = vmatprep.subr.mxu0 %v319_v4  ;;  %v376_v36 = vld [vmem:[%s3644_s12 + $0x250] sm:$0xff]  ;;  %v375_v40 = vld [vmem:[%s3644_s12 + $0x248] sm:$0xff]  ;;  %v422_v43 = vld [vmem:[%s3644_s12 + $0x3c0] sm:$0xff] }
  0x34   : > { %2873 = vmatprep.subr.mxu1 %v351_v5  ;;  %2839 = vmatpush3.msra.mxu0 %v303_v6  ;;  %v408_v37 = vld [vmem:[%s3644_s12 + $0x350] sm:$0xff]  ;;  %v407_v41 = vld [vmem:[%s3644_s12 + $0x348] sm:$0xff]  ;;  %v374_v44 = vld [vmem:[%s3644_s12 + $0x240] sm:$0xff] }
  0x35   : > { %2874 = vmatpush3.msra.mxu1 %v335_v7  ;;  %2840 = vmatprep.subr.mxu0 %v318_v8  ;;  %v406_v45 = vld [vmem:[%s3644_s12 + $0x340] sm:$0xff]  ;;  %v389_v46 = vld [vmem:[%s3644_s12 + $0x2b8] sm:$0xff]  ;;  %v388_v50 = vld [vmem:[%s3644_s12 + $0x2b0] sm:$0xff] }
  0x36   : > { %2875 = vmatprep.subr.mxu1 %v350_v9  ;;  %2841 = vmatpush3.msra.mxu0 %v302_v11  ;;  %v421_v47 = vld [vmem:[%s3644_s12 + $0x3b8] sm:$0xff]  ;;  %v420_v51 = vld [vmem:[%s3644_s12 + $0x3b0] sm:$0xff]  ;;  %v387_v55 = vld [vmem:[%s3644_s12 + $0x2a8] sm:$0xff] }
  0x37   : > { %1223 = vmatprep.mubr.f32.mxu0 %v962_v10  ;;  %2876 = vmatpush3.msra.mxu1 %v334_v13  ;;  %v373_v48 = vld [vmem:[%s3644_s12 + $0x238] sm:$0xff]  ;;  %v372_v52 = vld [vmem:[%s3644_s12 + $0x230] sm:$0xff]  ;;  %v419_v56 = vld [vmem:[%s3644_s12 + $0x3a8] sm:$0xff] }
  0x38   : > { %1293 = vmatprep.mubr.f32.mxu1 %v963_v12  ;;  %1224 = vmatmul.mubr.f32.vlgmr.msra.gmra.mxu0 %v954_v0  ;;  %v405_v49 = vld [vmem:[%s3644_s12 + $0x338] sm:$0xff]  ;;  %v404_v54 = vld [vmem:[%s3644_s12 + $0x330] sm:$0xff]  ;;  %v293_v57 = vld [vmem:[%s3639_s9 + $0x8] sm:$0xff] }
  0x39   : > { %1294 = vmatmul.mubr.f32.vlgmr.msra.gmra.mxu1 %v961_v3  ;;  %2880 = vmatprep.subr.mxu0 %v397_v14  ;;  %v371_v58 = vld [vmem:[%s3644_s12 + $0x228] sm:$0xff]  ;;  %v386_v60 = vld [vmem:[%s3644_s12 + $0x2a0] sm:$0xff]  ;;  %v964_v0 = vcombine.high %v293_v57, %v293_v57  ;;  %v385_v1 = vld [vmem:[%s3644_s12 + $0x298] sm:$0xff]  ;;  %v971_v7 = vrot.slane %v293_v57, %v3693_v53 }
  0x3a   : > { %2915 = vmatprep.subr.mxu1 %v429_v15  ;;  %2881 = vmatpush3.msra.mxu0 %v381_v16  ;;  %v403_v59 = vld [vmem:[%s3644_s12 + $0x328] sm:$0xff]  ;;  %v418_v61 = vld [vmem:[%s3644_s12 + $0x3a0] sm:$0xff]  ;;  %v417_v2 = vld [vmem:[%s3644_s12 + $0x398] sm:$0xff] }
  0x3b   : > { %2916 = vmatpush3.msra.mxu1 %v413_v17  ;;  %2882 = vmatprep.subr.mxu0 %v396_v18  ;;  %v370_v62 = vld [vmem:[%s3644_s12 + $0x220] sm:$0xff]  ;;  %v369_v3 = vld [vmem:[%s3644_s12 + $0x218] sm:$0xff]  ;;  %v384_v5 = vld [vmem:[%s3644_s12 + $0x290] sm:$0xff]  ;;  %v978_v10 = vrot.slane %v964_v0, %v3693_v53  ;;  %v979_v17 = vcombine.high %v971_v7, %v971_v7 }
  0x3c   : > { %2917 = vmatprep.subr.mxu1 %v428_v19  ;;  %2883 = vmatpush3.msra.mxu0 %v380_v20  ;;  %v402_v63 = vld [vmem:[%s3644_s12 + $0x320] sm:$0xff]  ;;  %v401_v4 = vld [vmem:[%s3644_s12 + $0x318] sm:$0xff]  ;;  %v416_v6 = vld [vmem:[%s3644_s12 + $0x390] sm:$0xff] }
  0x3d   : > { %2918 = vmatpush3.msra.mxu1 %v412_v21  ;;  %2884 = vmatprep.subr.mxu0 %v395_v22  ;;  %v368_v8 = vld [vmem:[%s3644_s12 + $0x210] sm:$0xff]  ;;  %v383_v11 = vld [vmem:[%s3644_s12 + $0x288] sm:$0xff]  ;;  %v382_v15 = vld [vmem:[%s3644_s12 + $0x280] sm:$0xff]  ;;  %v980_v19 = vcombine.high %v978_v10, %v978_v10 }
  0x3e   : > { %2919 = vmatprep.subr.mxu1 %v427_v23  ;;  %2885 = vmatpush3.msra.mxu0 %v379_v24  ;;  %v400_v9 = vld [vmem:[%s3644_s12 + $0x310] sm:$0xff]  ;;  %v415_v12 = vld [vmem:[%s3644_s12 + $0x388] sm:$0xff]  ;;  %v414_v16 = vld [vmem:[%s3644_s12 + $0x380] sm:$0xff] }
  0x3f   : > { %2920 = vmatpush3.msra.mxu1 %v411_v25  ;;  %2886 = vmatprep.subr.mxu0 %v394_v26  ;;  %v367_v13 = vld [vmem:[%s3644_s12 + $0x208] sm:$0xff]  ;;  %v366_v18 = vld [vmem:[%s3644_s12 + $0x200] sm:$0xff]  ;;  %v461_v21 = vld [vmem:[%s3644_s12 + $0x4f8] sm:$0xff] }
  0x40   : > { %2921 = vmatprep.subr.mxu1 %v426_v27  ;;  %2887 = vmatpush3.msra.mxu0 %v378_v28  ;;  %v399_v14 = vld [vmem:[%s3644_s12 + $0x308] sm:$0xff]  ;;  %v398_v20 = vld [vmem:[%s3644_s12 + $0x300] sm:$0xff]  ;;  %v493_v22 = vld [vmem:[%s3644_s12 + $0x5f8] sm:$0xff] }
  0x41   : > { %2922 = vmatpush3.msra.mxu1 %v410_v29  ;;  %2888 = vmatprep.subr.mxu0 %v393_v30  ;;  %v445_v23 = vld [vmem:[%s3644_s12 + $0x478] sm:$0xff]  ;;  %v460_v25 = vld [vmem:[%s3644_s12 + $0x4f0] sm:$0xff]  ;;  %v459_v29 = vld [vmem:[%s3644_s12 + $0x4e8] sm:$0xff] }
  0x42   : > { %2923 = vmatprep.subr.mxu1 %v425_v31  ;;  %2889 = vmatpush3.msra.mxu0 %v377_v32  ;;  %v477_v24 = vld [vmem:[%s3644_s12 + $0x578] sm:$0xff]  ;;  %v492_v26 = vld [vmem:[%s3644_s12 + $0x5f0] sm:$0xff]  ;;  %v491_v30 = vld [vmem:[%s3644_s12 + $0x5e8] sm:$0xff] }
  0x43   : > { %2924 = vmatpush3.msra.mxu1 %v409_v33  ;;  %2890 = vmatprep.subr.mxu0 %v392_v34  ;;  %v444_v27 = vld [vmem:[%s3644_s12 + $0x470] sm:$0xff]  ;;  %v443_v31 = vld [vmem:[%s3644_s12 + $0x468] sm:$0xff]  ;;  %v458_v33 = vld [vmem:[%s3644_s12 + $0x4e0] sm:$0xff] }
  0x44   : > { %2925 = vmatprep.subr.mxu1 %v424_v35  ;;  %2891 = vmatpush3.msra.mxu0 %v376_v36  ;;  %v476_v28 = vld [vmem:[%s3644_s12 + $0x570] sm:$0xff]  ;;  %v475_v32 = vld [vmem:[%s3644_s12 + $0x568] sm:$0xff]  ;;  %v490_v34 = vld [vmem:[%s3644_s12 + $0x5e0] sm:$0xff] }
  0x45   : > { %2926 = vmatpush3.msra.mxu1 %v408_v37  ;;  %2892 = vmatprep.subr.mxu0 %v391_v38  ;;  %v442_v35 = vld [vmem:[%s3644_s12 + $0x460] sm:$0xff]  ;;  %v457_v37 = vld [vmem:[%s3644_s12 + $0x4d8] sm:$0xff]  ;;  %v294_v0 = vld [vmem:[%s3639_s9 + $0x10] sm:$0xff] }
  0x46   : > { %2927 = vmatprep.subr.mxu1 %v423_v39  ;;  %2893 = vmatpush3.msra.mxu0 %v375_v40  ;;  %v474_v36 = vld [vmem:[%s3644_s12 + $0x560] sm:$0xff]  ;;  %v489_v38 = vld [vmem:[%s3644_s12 + $0x5d8] sm:$0xff] }
  0x47   : > { %2928 = vmatpush3.msra.mxu1 %v407_v41  ;;  %2894 = vmatprep.subr.mxu0 %v390_v42  ;;  %v441_v39 = vld [vmem:[%s3644_s12 + $0x458] sm:$0xff]  ;;  %v456_v41 = vld [vmem:[%s3644_s12 + $0x4d0] sm:$0xff] }
  0x48   : > { %2929 = vmatprep.subr.mxu1 %v422_v43  ;;  %2895 = vmatpush3.msra.mxu0 %v374_v44  ;;  %v473_v40 = vld [vmem:[%s3644_s12 + $0x558] sm:$0xff]  ;;  %v488_v42 = vld [vmem:[%s3644_s12 + $0x5d0] sm:$0xff] }
  0x49   : > { %2930 = vmatpush3.msra.mxu1 %v406_v45  ;;  %2896 = vmatprep.subr.mxu0 %v389_v46  ;;  %v440_v43 = vld [vmem:[%s3644_s12 + $0x450] sm:$0xff]  ;;  %v455_v45 = vld [vmem:[%s3644_s12 + $0x4c8] sm:$0xff]  ;;  %v469_v57 = vld [vmem:[%s3644_s12 + $0x538] sm:$0xff] }
  0x4a   : > { %2931 = vmatprep.subr.mxu1 %v421_v47  ;;  %2897 = vmatpush3.msra.mxu0 %v373_v48  ;;  %v472_v44 = vld [vmem:[%s3644_s12 + $0x550] sm:$0xff]  ;;  %v487_v46 = vld [vmem:[%s3644_s12 + $0x5c8] sm:$0xff] }
  0x4b   : > { %2932 = vmatpush3.msra.mxu1 %v405_v49  ;;  %2898 = vmatprep.subr.mxu0 %v388_v50  ;;  %v439_v47 = vld [vmem:[%s3644_s12 + $0x448] sm:$0xff]  ;;  %v454_v49 = vld [vmem:[%s3644_s12 + $0x4c0] sm:$0xff] }
  0x4c   : > { %2933 = vmatprep.subr.mxu1 %v420_v51  ;;  %2899 = vmatpush3.msra.mxu0 %v372_v52  ;;  %v471_v48 = vld [vmem:[%s3644_s12 + $0x548] sm:$0xff]  ;;  %v486_v50 = vld [vmem:[%s3644_s12 + $0x5c0] sm:$0xff] }
  0x4d   : > { %2934 = vmatpush3.msra.mxu1 %v404_v54  ;;  %2900 = vmatprep.subr.mxu0 %v387_v55  ;;  %v438_v51 = vld [vmem:[%s3644_s12 + $0x440] sm:$0xff]  ;;  %v453_v54 = vld [vmem:[%s3644_s12 + $0x4b8] sm:$0xff] }
  0x4e   : > { %2935 = vmatprep.subr.mxu1 %v419_v56  ;;  %2901 = vmatpush3.msra.mxu0 %v371_v58  ;;  %v470_v52 = vld [vmem:[%s3644_s12 + $0x540] sm:$0xff]  ;;  %v485_v55 = vld [vmem:[%s3644_s12 + $0x5b8] sm:$0xff]  ;;  %v452_v58 = vld [vmem:[%s3644_s12 + $0x4b0] sm:$0xff] }
  0x4f   : > { %2936 = vmatpush3.msra.mxu1 %v403_v59  ;;  %2902 = vmatprep.subr.mxu0 %v386_v60  ;;  %v437_v56 = vld [vmem:[%s3644_s12 + $0x438] sm:$0xff]  ;;  %v484_v59 = vld [vmem:[%s3644_s12 + $0x5b0] sm:$0xff] }
  0x50   : > { %2937 = vmatprep.subr.mxu1 %v418_v61  ;;  %2903 = vmatpush3.msra.mxu0 %v370_v62  ;;  %v436_v60 = vld [vmem:[%s3644_s12 + $0x430] sm:$0xff]  ;;  %v451_v62 = vld [vmem:[%s3644_s12 + $0x4a8] sm:$0xff] }
  0x51   : > { %2938 = vmatpush3.msra.mxu1 %v402_v63  ;;  %2904 = vmatprep.subr.mxu0 %v385_v1  ;;  %v468_v61 = vld [vmem:[%s3644_s12 + $0x530] sm:$0xff]  ;;  %v483_v63 = vld [vmem:[%s3644_s12 + $0x5a8] sm:$0xff] }
  0x52   : > { %2939 = vmatprep.subr.mxu1 %v417_v2  ;;  %2905 = vmatpush3.msra.mxu0 %v369_v3  ;;  %v435_v1 = vld [vmem:[%s3644_s12 + $0x428] sm:$0xff]  ;;  %v450_v3 = vld [vmem:[%s3644_s12 + $0x4a0] sm:$0xff] }
  0x53   : > { %2940 = vmatpush3.msra.mxu1 %v401_v4  ;;  %2906 = vmatprep.subr.mxu0 %v384_v5  ;;  %v467_v2 = vld [vmem:[%s3644_s12 + $0x528] sm:$0xff]  ;;  %v482_v4 = vld [vmem:[%s3644_s12 + $0x5a0] sm:$0xff] }
  0x54   : > { %2941 = vmatprep.subr.mxu1 %v416_v6  ;;  %2907 = vmatpush3.msra.mxu0 %v368_v8  ;;  %v434_v5 = vld [vmem:[%s3644_s12 + $0x420] sm:$0xff]  ;;  %v449_v8 = vld [vmem:[%s3644_s12 + $0x498] sm:$0xff] }
  0x55   : > { %2942 = vmatpush3.msra.mxu1 %v400_v9  ;;  %2908 = vmatprep.subr.mxu0 %v383_v11  ;;  %v466_v6 = vld [vmem:[%s3644_s12 + $0x520] sm:$0xff]  ;;  %v481_v9 = vld [vmem:[%s3644_s12 + $0x598] sm:$0xff] }
  0x56   : > { %2943 = vmatprep.subr.mxu1 %v415_v12  ;;  %2909 = vmatpush3.msra.mxu0 %v367_v13  ;;  %v465_v11 = vld [vmem:[%s3644_s12 + $0x518] sm:$0xff]  ;;  %v448_v12 = vld [vmem:[%s3644_s12 + $0x490] sm:$0xff] }
  0x57   : > { %2944 = vmatpush3.msra.mxu1 %v399_v14  ;;  %2910 = vmatprep.subr.mxu0 %v382_v15  ;;  %v480_v13 = vld [vmem:[%s3644_s12 + $0x590] sm:$0xff]  ;;  %v988_v14 = vrot.slane %v294_v0, %v3693_v53 }
  0x58   : > { %2945 = vmatprep.subr.mxu1 %v414_v16  ;;  %2911 = vmatpush3.msra.mxu0 %v366_v18  ;;  %v432_v15 = vld [vmem:[%s3644_s12 + $0x410] sm:$0xff]  ;;  %v447_v18 = vld [vmem:[%s3644_s12 + $0x488] sm:$0xff] }
  0x59   : > { %1363 = vmatprep.mubr.f32.mxu0 %v979_v17  ;;  %2946 = vmatpush3.msra.mxu1 %v398_v20  ;;  %v464_v16 = vld [vmem:[%s3644_s12 + $0x510] sm:$0xff]  ;;  %v431_v20 = vld [vmem:[%s3644_s12 + $0x408] sm:$0xff] }
  0x5a   : > { %1433 = vmatprep.mubr.f32.mxu1 %v980_v19  ;;  %1364 = vmatmul.mubr.f32.vlgmr.msra.gmra.mxu0 %v971_v7  ;;  %v981_v7 = vcombine.high %v294_v0, %v294_v0  ;;  %v479_v19 = vld [vmem:[%s3644_s12 + $0x588] sm:$0xff]  ;;  %v533_v0 = vld [vmem:[%s3644_s12 + $0x738] sm:$0xff] }
  0x5b   : > { %1434 = vmatmul.mubr.f32.vlgmr.msra.gmra.mxu1 %v978_v10  ;;  %2950 = vmatprep.subr.mxu0 %v461_v21  ;;  %v433_v10 = vld [vmem:[%s3644_s12 + $0x418] sm:$0xff]  ;;  %v463_v21 = vld [vmem:[%s3644_s12 + $0x508] sm:$0xff] }
  0x5c   : > { %2985 = vmatprep.subr.mxu1 %v493_v22  ;;  %2951 = vmatpush3.msra.mxu0 %v445_v23  ;;  %v995_v17 = vrot.slane %v981_v7, %v3693_v53  ;;  %v446_v22 = vld [vmem:[%s3644_s12 + $0x480] sm:$0xff]  ;;  %v295_v7 = vld [vmem:[%s3639_s9 + $0x18] sm:$0xff] }
  0x5d   : > { %2986 = vmatpush3.msra.mxu1 %v477_v24  ;;  %2952 = vmatprep.subr.mxu0 %v460_v25  ;;  %v478_v23 = vld [vmem:[%s3644_s12 + $0x580] sm:$0xff]  ;;  %v996_v24 = vcombine.high %v988_v14, %v988_v14 }
  0x5e   : > { %2987 = vmatprep.subr.mxu1 %v492_v26  ;;  %2953 = vmatpush3.msra.mxu0 %v444_v27  ;;  %v430_v25 = vld [vmem:[%s3644_s12 + $0x400] sm:$0xff]  ;;  %v997_v26 = vcombine.high %v995_v17, %v995_v17 }
  0x5f   : > { %2988 = vmatpush3.msra.mxu1 %v476_v28  ;;  %2954 = vmatprep.subr.mxu0 %v459_v29  ;;  %v462_v27 = vld [vmem:[%s3644_s12 + $0x500] sm:$0xff]  ;;  %v525_v28 = vld [vmem:[%s3644_s12 + $0x6f8] sm:$0xff] }
  0x60   : > { %2989 = vmatprep.subr.mxu1 %v491_v30  ;;  %2955 = vmatpush3.msra.mxu0 %v443_v31  ;;  %v557_v29 = vld [vmem:[%s3644_s12 + $0x7f8] sm:$0xff] }
  0x61   : > { %2990 = vmatpush3.msra.mxu1 %v475_v32  ;;  %2956 = vmatprep.subr.mxu0 %v458_v33  ;;  %v509_v30 = vld [vmem:[%s3644_s12 + $0x678] sm:$0xff]  ;;  %v524_v32 = vld [vmem:[%s3644_s12 + $0x6f0] sm:$0xff] }
  0x62   : > { %2991 = vmatprep.subr.mxu1 %v490_v34  ;;  %2957 = vmatpush3.msra.mxu0 %v442_v35  ;;  %v541_v31 = vld [vmem:[%s3644_s12 + $0x778] sm:$0xff]  ;;  %v556_v33 = vld [vmem:[%s3644_s12 + $0x7f0] sm:$0xff] }
  0x63   : > { %2992 = vmatpush3.msra.mxu1 %v474_v36  ;;  %2958 = vmatprep.subr.mxu0 %v457_v37  ;;  %v508_v34 = vld [vmem:[%s3644_s12 + $0x670] sm:$0xff]  ;;  %v523_v36 = vld [vmem:[%s3644_s12 + $0x6e8] sm:$0xff] }
  0x64   : > { %2993 = vmatprep.subr.mxu1 %v489_v38  ;;  %2959 = vmatpush3.msra.mxu0 %v441_v39  ;;  %v540_v35 = vld [vmem:[%s3644_s12 + $0x770] sm:$0xff]  ;;  %v555_v37 = vld [vmem:[%s3644_s12 + $0x7e8] sm:$0xff] }
  0x65   : > { %2994 = vmatpush3.msra.mxu1 %v473_v40  ;;  %2960 = vmatprep.subr.mxu0 %v456_v41  ;;  %v507_v38 = vld [vmem:[%s3644_s12 + $0x668] sm:$0xff]  ;;  %v522_v40 = vld [vmem:[%s3644_s12 + $0x6e0] sm:$0xff] }
  0x66   : > { %2995 = vmatprep.subr.mxu1 %v488_v42  ;;  %2961 = vmatpush3.msra.mxu0 %v440_v43  ;;  %v539_v39 = vld [vmem:[%s3644_s12 + $0x768] sm:$0xff]  ;;  %v554_v41 = vld [vmem:[%s3644_s12 + $0x7e0] sm:$0xff] }
  0x67   : > { %2996 = vmatpush3.msra.mxu1 %v472_v44  ;;  %2962 = vmatprep.subr.mxu0 %v455_v45  ;;  %v506_v42 = vld [vmem:[%s3644_s12 + $0x660] sm:$0xff]  ;;  %v521_v44 = vld [vmem:[%s3644_s12 + $0x6d8] sm:$0xff] }
  0x68   : > { %2997 = vmatprep.subr.mxu1 %v487_v46  ;;  %2963 = vmatpush3.msra.mxu0 %v439_v47  ;;  %v538_v43 = vld [vmem:[%s3644_s12 + $0x760] sm:$0xff]  ;;  %v553_v45 = vld [vmem:[%s3644_s12 + $0x7d8] sm:$0xff] }
  0x69   : > { %2998 = vmatpush3.msra.mxu1 %v471_v48  ;;  %2964 = vmatprep.subr.mxu0 %v454_v49  ;;  %v505_v46 = vld [vmem:[%s3644_s12 + $0x658] sm:$0xff]  ;;  %v520_v48 = vld [vmem:[%s3644_s12 + $0x6d0] sm:$0xff] }
  0x6a   : > { %2999 = vmatprep.subr.mxu1 %v486_v50  ;;  %2965 = vmatpush3.msra.mxu0 %v438_v51  ;;  %v537_v47 = vld [vmem:[%s3644_s12 + $0x758] sm:$0xff]  ;;  %v552_v49 = vld [vmem:[%s3644_s12 + $0x7d0] sm:$0xff] }
  0x6b   : > { %3000 = vmatpush3.msra.mxu1 %v470_v52  ;;  %2966 = vmatprep.subr.mxu0 %v453_v54  ;;  %v504_v50 = vld [vmem:[%s3644_s12 + $0x650] sm:$0xff]  ;;  %v519_v52 = vld [vmem:[%s3644_s12 + $0x6c8] sm:$0xff] }
  0x6c   : > { %3001 = vmatprep.subr.mxu1 %v485_v55  ;;  %2967 = vmatpush3.msra.mxu0 %v437_v56  ;;  %v536_v51 = vld [vmem:[%s3644_s12 + $0x750] sm:$0xff]  ;;  %v551_v54 = vld [vmem:[%s3644_s12 + $0x7c8] sm:$0xff] }
  0x6d   : > { %3002 = vmatpush3.msra.mxu1 %v469_v57  ;;  %2968 = vmatprep.subr.mxu0 %v452_v58  ;;  %v503_v55 = vld [vmem:[%s3644_s12 + $0x648] sm:$0xff]  ;;  %v518_v57 = vld [vmem:[%s3644_s12 + $0x6c0] sm:$0xff] }
  0x6e   : > { %3003 = vmatprep.subr.mxu1 %v484_v59  ;;  %2969 = vmatpush3.msra.mxu0 %v436_v60  ;;  %v535_v56 = vld [vmem:[%s3644_s12 + $0x748] sm:$0xff]  ;;  %v550_v58 = vld [vmem:[%s3644_s12 + $0x7c0] sm:$0xff] }
  0x6f   : > { %3004 = vmatpush3.msra.mxu1 %v468_v61  ;;  %2970 = vmatprep.subr.mxu0 %v451_v62  ;;  %v502_v59 = vld [vmem:[%s3644_s12 + $0x640] sm:$0xff]  ;;  %v517_v61 = vld [vmem:[%s3644_s12 + $0x6b8] sm:$0xff] }
  0x70   : > { %3005 = vmatprep.subr.mxu1 %v483_v63  ;;  %2971 = vmatpush3.msra.mxu0 %v435_v1  ;;  %v534_v60 = vld [vmem:[%s3644_s12 + $0x740] sm:$0xff]  ;;  %v549_v62 = vld [vmem:[%s3644_s12 + $0x7b8] sm:$0xff]  ;;  %v516_v1 = vld [vmem:[%s3644_s12 + $0x6b0] sm:$0xff] }
  0x71   : > { %3006 = vmatpush3.msra.mxu1 %v467_v2  ;;  %2972 = vmatprep.subr.mxu0 %v450_v3  ;;  %v501_v63 = vld [vmem:[%s3644_s12 + $0x638] sm:$0xff]  ;;  %v548_v2 = vld [vmem:[%s3644_s12 + $0x7b0] sm:$0xff] }
  0x72   : > { %3007 = vmatprep.subr.mxu1 %v482_v4  ;;  %2973 = vmatpush3.msra.mxu0 %v434_v5  ;;  %v500_v3 = vld [vmem:[%s3644_s12 + $0x630] sm:$0xff]  ;;  %v515_v5 = vld [vmem:[%s3644_s12 + $0x6a8] sm:$0xff] }
  0x73   : > { %3008 = vmatpush3.msra.mxu1 %v466_v6  ;;  %2974 = vmatprep.subr.mxu0 %v449_v8  ;;  %v532_v4 = vld [vmem:[%s3644_s12 + $0x730] sm:$0xff]  ;;  %v547_v6 = vld [vmem:[%s3644_s12 + $0x7a8] sm:$0xff] }
  0x74   : > { %3009 = vmatprep.subr.mxu1 %v481_v9  ;;  %2975 = vmatpush3.msra.mxu0 %v433_v10  ;;  %v499_v8 = vld [vmem:[%s3644_s12 + $0x628] sm:$0xff]  ;;  %v514_v10 = vld [vmem:[%s3644_s12 + $0x6a0] sm:$0xff] }
  0x75   : > { %3010 = vmatpush3.msra.mxu1 %v465_v11  ;;  %2976 = vmatprep.subr.mxu0 %v448_v12  ;;  %v531_v9 = vld [vmem:[%s3644_s12 + $0x728] sm:$0xff]  ;;  %v546_v11 = vld [vmem:[%s3644_s12 + $0x7a0] sm:$0xff] }
  0x76   : > { %3011 = vmatprep.subr.mxu1 %v480_v13  ;;  %2977 = vmatpush3.msra.mxu0 %v432_v15  ;;  %v498_v12 = vld [vmem:[%s3644_s12 + $0x620] sm:$0xff]  ;;  %v513_v15 = vld [vmem:[%s3644_s12 + $0x698] sm:$0xff] }
  0x77   : > { %3012 = vmatpush3.msra.mxu1 %v464_v16  ;;  %2978 = vmatprep.subr.mxu0 %v447_v18  ;;  %v530_v13 = vld [vmem:[%s3644_s12 + $0x720] sm:$0xff]  ;;  %v545_v16 = vld [vmem:[%s3644_s12 + $0x798] sm:$0xff] }
  0x78   : > { %3013 = vmatprep.subr.mxu1 %v479_v19  ;;  %2979 = vmatpush3.msra.mxu0 %v431_v20  ;;  %v529_v18 = vld [vmem:[%s3644_s12 + $0x718] sm:$0xff]  ;;  %v512_v19 = vld [vmem:[%s3644_s12 + $0x690] sm:$0xff] }
  0x79   : > { %3014 = vmatpush3.msra.mxu1 %v463_v21  ;;  %2980 = vmatprep.subr.mxu0 %v446_v22  ;;  %v544_v20 = vld [vmem:[%s3644_s12 + $0x790] sm:$0xff]  ;;  %v1005_v21 = vrot.slane %v295_v7, %v3693_v53 }
  0x7a   : > { %3015 = vmatprep.subr.mxu1 %v478_v23  ;;  %2981 = vmatpush3.msra.mxu0 %v430_v25  ;;  %v496_v22 = vld [vmem:[%s3644_s12 + $0x610] sm:$0xff]  ;;  %v511_v25 = vld [vmem:[%s3644_s12 + $0x688] sm:$0xff] }
  0x7b   : > { %1503 = vmatprep.mubr.f32.mxu0 %v996_v24  ;;  %3016 = vmatpush3.msra.mxu1 %v462_v27  ;;  %v528_v23 = vld [vmem:[%s3644_s12 + $0x710] sm:$0xff]  ;;  %v495_v27 = vld [vmem:[%s3644_s12 + $0x608] sm:$0xff] }
  0x7c   : > { %1573 = vmatprep.mubr.f32.mxu1 %v997_v26  ;;  %1504 = vmatmul.mubr.f32.vlgmr.msra.gmra.mxu0 %v988_v14  ;;  %v998_v14 = vcombine.high %v295_v7, %v295_v7  ;;  %v543_v26 = vld [vmem:[%s3644_s12 + $0x788] sm:$0xff]  ;;  %v597_v7 = vld [vmem:[%s3644_s12 + $0x938] sm:$0xff] }
  0x7d   : > { %1574 = vmatmul.mubr.f32.vlgmr.msra.gmra.mxu1 %v995_v17  ;;  %3020 = vmatprep.subr.mxu0 %v525_v28  ;;  %v497_v17 = vld [vmem:[%s3644_s12 + $0x618] sm:$0xff]  ;;  %v527_v28 = vld [vmem:[%s3644_s12 + $0x708] sm:$0xff] }
  0x7e   : > { %3055 = vmatprep.subr.mxu1 %v557_v29  ;;  %3021 = vmatpush3.msra.mxu0 %v509_v30  ;;  %v1012_v24 = vrot.slane %v998_v14, %v3693_v53  ;;  %v510_v29 = vld [vmem:[%s3644_s12 + $0x680] sm:$0xff] }
  0x7f   : > { %3056 = vmatpush3.msra.mxu1 %v541_v31  ;;  %3022 = vmatprep.subr.mxu0 %v524_v32  ;;  %v542_v30 = vld [vmem:[%s3644_s12 + $0x780] sm:$0xff]  ;;  %v1013_v31 = vcombine.high %v1005_v21, %v1005_v21 }
  0x80   : > { %3057 = vmatprep.subr.mxu1 %v556_v33  ;;  %3023 = vmatpush3.msra.mxu0 %v508_v34  ;;  %v494_v32 = vld [vmem:[%s3644_s12 + $0x600] sm:$0xff]  ;;  %v1014_v33 = vcombine.high %v1012_v24, %v1012_v24 }
  0x81   : > { %3058 = vmatpush3.msra.mxu1 %v540_v35  ;;  %3024 = vmatprep.subr.mxu0 %v523_v36  ;;  %v526_v34 = vld [vmem:[%s3644_s12 + $0x700] sm:$0xff]  ;;  %v589_v35 = vld [vmem:[%s3644_s12 + $0x8f8] sm:$0xff] }
  0x82   : > { %3059 = vmatprep.subr.mxu1 %v555_v37  ;;  %3025 = vmatpush3.msra.mxu0 %v507_v38  ;;  %v621_v36 = vld [vmem:[%s3644_s12 + $0x9f8] sm:$0xff]  ;;  %v296_v14 = vld [vmem:[%s3639_s9 + $0x20] sm:$0xff] }
  0x83   : > { %3060 = vmatpush3.msra.mxu1 %v539_v39  ;;  %3026 = vmatprep.subr.mxu0 %v522_v40  ;;  %v573_v37 = vld [vmem:[%s3644_s12 + $0x878] sm:$0xff]  ;;  %v588_v39 = vld [vmem:[%s3644_s12 + $0x8f0] sm:$0xff] }
  0x84   : > { %3061 = vmatprep.subr.mxu1 %v554_v41  ;;  %3027 = vmatpush3.msra.mxu0 %v506_v42  ;;  %v605_v38 = vld [vmem:[%s3644_s12 + $0x978] sm:$0xff]  ;;  %v620_v40 = vld [vmem:[%s3644_s12 + $0x9f0] sm:$0xff] }
  0x85   : > { %3062 = vmatpush3.msra.mxu1 %v538_v43  ;;  %3028 = vmatprep.subr.mxu0 %v521_v44  ;;  %v572_v41 = vld [vmem:[%s3644_s12 + $0x870] sm:$0xff]  ;;  %v587_v43 = vld [vmem:[%s3644_s12 + $0x8e8] sm:$0xff] }
  0x86   : > { %3063 = vmatprep.subr.mxu1 %v553_v45  ;;  %3029 = vmatpush3.msra.mxu0 %v505_v46  ;;  %v604_v42 = vld [vmem:[%s3644_s12 + $0x970] sm:$0xff]  ;;  %v619_v44 = vld [vmem:[%s3644_s12 + $0x9e8] sm:$0xff] }
  0x87   : > { %3064 = vmatpush3.msra.mxu1 %v537_v47  ;;  %3030 = vmatprep.subr.mxu0 %v520_v48  ;;  %v571_v45 = vld [vmem:[%s3644_s12 + $0x868] sm:$0xff]  ;;  %v586_v47 = vld [vmem:[%s3644_s12 + $0x8e0] sm:$0xff] }
  0x88   : > { %3065 = vmatprep.subr.mxu1 %v552_v49  ;;  %3031 = vmatpush3.msra.mxu0 %v504_v50  ;;  %v603_v46 = vld [vmem:[%s3644_s12 + $0x968] sm:$0xff]  ;;  %v618_v48 = vld [vmem:[%s3644_s12 + $0x9e0] sm:$0xff] }
  0x89   : > { %3066 = vmatpush3.msra.mxu1 %v536_v51  ;;  %3032 = vmatprep.subr.mxu0 %v519_v52  ;;  %v570_v49 = vld [vmem:[%s3644_s12 + $0x860] sm:$0xff]  ;;  %v585_v51 = vld [vmem:[%s3644_s12 + $0x8d8] sm:$0xff] }
  0x8a   : > { %3067 = vmatprep.subr.mxu1 %v551_v54  ;;  %3033 = vmatpush3.msra.mxu0 %v503_v55  ;;  %v602_v50 = vld [vmem:[%s3644_s12 + $0x960] sm:$0xff]  ;;  %v617_v52 = vld [vmem:[%s3644_s12 + $0x9d8] sm:$0xff] }
  0x8b   : > { %3068 = vmatpush3.msra.mxu1 %v535_v56  ;;  %3034 = vmatprep.subr.mxu0 %v518_v57  ;;  %v569_v54 = vld [vmem:[%s3644_s12 + $0x858] sm:$0xff]  ;;  %v584_v56 = vld [vmem:[%s3644_s12 + $0x8d0] sm:$0xff] }
  0x8c   : > { %3069 = vmatprep.subr.mxu1 %v550_v58  ;;  %3035 = vmatpush3.msra.mxu0 %v502_v59  ;;  %v601_v55 = vld [vmem:[%s3644_s12 + $0x958] sm:$0xff]  ;;  %v616_v57 = vld [vmem:[%s3644_s12 + $0x9d0] sm:$0xff] }
  0x8d   : > { %3070 = vmatpush3.msra.mxu1 %v534_v60  ;;  %3036 = vmatprep.subr.mxu0 %v517_v61  ;;  %v568_v58 = vld [vmem:[%s3644_s12 + $0x850] sm:$0xff]  ;;  %v583_v60 = vld [vmem:[%s3644_s12 + $0x8c8] sm:$0xff] }
  0x8e   : > { %3071 = vmatprep.subr.mxu1 %v549_v62  ;;  %3037 = vmatpush3.msra.mxu0 %v501_v63  ;;  %v600_v59 = vld [vmem:[%s3644_s12 + $0x950] sm:$0xff]  ;;  %v615_v61 = vld [vmem:[%s3644_s12 + $0x9c8] sm:$0xff] }
  0x8f   : > { %3072 = vmatpush3.msra.mxu1 %v533_v0  ;;  %3038 = vmatprep.subr.mxu0 %v516_v1  ;;  %v567_v62 = vld [vmem:[%s3644_s12 + $0x848] sm:$0xff]  ;;  %v582_v0 = vld [vmem:[%s3644_s12 + $0x8c0] sm:$0xff] }
  0x90   : > { %3073 = vmatprep.subr.mxu1 %v548_v2  ;;  %3039 = vmatpush3.msra.mxu0 %v500_v3  ;;  %v599_v63 = vld [vmem:[%s3644_s12 + $0x948] sm:$0xff]  ;;  %v614_v1 = vld [vmem:[%s3644_s12 + $0x9c0] sm:$0xff] }
  0x91   : > { %3074 = vmatpush3.msra.mxu1 %v532_v4  ;;  %3040 = vmatprep.subr.mxu0 %v515_v5  ;;  %v566_v2 = vld [vmem:[%s3644_s12 + $0x840] sm:$0xff]  ;;  %v581_v4 = vld [vmem:[%s3644_s12 + $0x8b8] sm:$0xff] }
  0x92   : > { %3075 = vmatprep.subr.mxu1 %v547_v6  ;;  %3041 = vmatpush3.msra.mxu0 %v499_v8  ;;  %v598_v3 = vld [vmem:[%s3644_s12 + $0x940] sm:$0xff]  ;;  %v613_v5 = vld [vmem:[%s3644_s12 + $0x9b8] sm:$0xff]  ;;  %v580_v8 = vld [vmem:[%s3644_s12 + $0x8b0] sm:$0xff] }
  0x93   : > { %3076 = vmatpush3.msra.mxu1 %v531_v9  ;;  %3042 = vmatprep.subr.mxu0 %v514_v10  ;;  %v565_v6 = vld [vmem:[%s3644_s12 + $0x838] sm:$0xff]  ;;  %v612_v9 = vld [vmem:[%s3644_s12 + $0x9b0] sm:$0xff] }
  0x94   : > { %3077 = vmatprep.subr.mxu1 %v546_v11  ;;  %3043 = vmatpush3.msra.mxu0 %v498_v12  ;;  %v564_v10 = vld [vmem:[%s3644_s12 + $0x830] sm:$0xff]  ;;  %v579_v12 = vld [vmem:[%s3644_s12 + $0x8a8] sm:$0xff] }
  0x95   : > { %3078 = vmatpush3.msra.mxu1 %v530_v13  ;;  %3044 = vmatprep.subr.mxu0 %v513_v15  ;;  %v596_v11 = vld [vmem:[%s3644_s12 + $0x930] sm:$0xff]  ;;  %v611_v13 = vld [vmem:[%s3644_s12 + $0x9a8] sm:$0xff] }
  0x96   : > { %3079 = vmatprep.subr.mxu1 %v545_v16  ;;  %3045 = vmatpush3.msra.mxu0 %v497_v17  ;;  %v563_v15 = vld [vmem:[%s3644_s12 + $0x828] sm:$0xff]  ;;  %v578_v17 = vld [vmem:[%s3644_s12 + $0x8a0] sm:$0xff] }
  0x97   : > { %3080 = vmatpush3.msra.mxu1 %v529_v18  ;;  %3046 = vmatprep.subr.mxu0 %v512_v19  ;;  %v595_v16 = vld [vmem:[%s3644_s12 + $0x928] sm:$0xff]  ;;  %v610_v18 = vld [vmem:[%s3644_s12 + $0x9a0] sm:$0xff] }
  0x98   : > { %3081 = vmatprep.subr.mxu1 %v544_v20  ;;  %3047 = vmatpush3.msra.mxu0 %v496_v22  ;;  %v562_v19 = vld [vmem:[%s3644_s12 + $0x820] sm:$0xff]  ;;  %v577_v22 = vld [vmem:[%s3644_s12 + $0x898] sm:$0xff] }
  0x99   : > { %3082 = vmatpush3.msra.mxu1 %v528_v23  ;;  %3048 = vmatprep.subr.mxu0 %v511_v25  ;;  %v594_v20 = vld [vmem:[%s3644_s12 + $0x920] sm:$0xff]  ;;  %v609_v23 = vld [vmem:[%s3644_s12 + $0x998] sm:$0xff] }
  0x9a   : > { %3083 = vmatprep.subr.mxu1 %v543_v26  ;;  %3049 = vmatpush3.msra.mxu0 %v495_v27  ;;  %v593_v25 = vld [vmem:[%s3644_s12 + $0x918] sm:$0xff]  ;;  %v576_v26 = vld [vmem:[%s3644_s12 + $0x890] sm:$0xff] }
  0x9b   : > { %3084 = vmatpush3.msra.mxu1 %v527_v28  ;;  %3050 = vmatprep.subr.mxu0 %v510_v29  ;;  %v608_v27 = vld [vmem:[%s3644_s12 + $0x990] sm:$0xff]  ;;  %v1022_v28 = vrot.slane %v296_v14, %v3693_v53 }
  0x9c   : > { %3085 = vmatprep.subr.mxu1 %v542_v30  ;;  %3051 = vmatpush3.msra.mxu0 %v494_v32  ;;  %v560_v29 = vld [vmem:[%s3644_s12 + $0x810] sm:$0xff]  ;;  %v575_v32 = vld [vmem:[%s3644_s12 + $0x888] sm:$0xff] }
  0x9d   : > { %1643 = vmatprep.mubr.f32.mxu0 %v1013_v31  ;;  %3086 = vmatpush3.msra.mxu1 %v526_v34  ;;  %v592_v30 = vld [vmem:[%s3644_s12 + $0x910] sm:$0xff]  ;;  %v559_v34 = vld [vmem:[%s3644_s12 + $0x808] sm:$0xff] }
  0x9e   : > { %1713 = vmatprep.mubr.f32.mxu1 %v1014_v33  ;;  %1644 = vmatmul.mubr.f32.vlgmr.msra.gmra.mxu0 %v1005_v21  ;;  %v1015_v21 = vcombine.high %v296_v14, %v296_v14  ;;  %v607_v33 = vld [vmem:[%s3644_s12 + $0x988] sm:$0xff]  ;;  %v661_v14 = vld [vmem:[%s3644_s12 + $0xb38] sm:$0xff] }
  0x9f   : > { %1714 = vmatmul.mubr.f32.vlgmr.msra.gmra.mxu1 %v1012_v24  ;;  %3090 = vmatprep.subr.mxu0 %v589_v35  ;;  %v561_v24 = vld [vmem:[%s3644_s12 + $0x818] sm:$0xff]  ;;  %v591_v35 = vld [vmem:[%s3644_s12 + $0x908] sm:$0xff] }
  0xa0   : > { %3125 = vmatprep.subr.mxu1 %v621_v36  ;;  %3091 = vmatpush3.msra.mxu0 %v573_v37  ;;  %v1029_v31 = vrot.slane %v1015_v21, %v3693_v53  ;;  %v574_v36 = vld [vmem:[%s3644_s12 + $0x880] sm:$0xff]  ;;  %v297_v21 = vld [vmem:[%s3639_s9 + $0x28] sm:$0xff] }
  0xa1   : > { %3126 = vmatpush3.msra.mxu1 %v605_v38  ;;  %3092 = vmatprep.subr.mxu0 %v588_v39  ;;  %v606_v37 = vld [vmem:[%s3644_s12 + $0x980] sm:$0xff]  ;;  %v1030_v38 = vcombine.high %v1022_v28, %v1022_v28 }
  0xa2   : > { %3127 = vmatprep.subr.mxu1 %v620_v40  ;;  %3093 = vmatpush3.msra.mxu0 %v572_v41  ;;  %v558_v39 = vld [vmem:[%s3644_s12 + $0x800] sm:$0xff]  ;;  %v1031_v40 = vcombine.high %v1029_v31, %v1029_v31 }
  0xa3   : > { %3128 = vmatpush3.msra.mxu1 %v604_v42  ;;  %3094 = vmatprep.subr.mxu0 %v587_v43  ;;  %v590_v41 = vld [vmem:[%s3644_s12 + $0x900] sm:$0xff]  ;;  %v653_v42 = vld [vmem:[%s3644_s12 + $0xaf8] sm:$0xff] }
  0xa4   : > { %3129 = vmatprep.subr.mxu1 %v619_v44  ;;  %3095 = vmatpush3.msra.mxu0 %v571_v45  ;;  %v685_v43 = vld [vmem:[%s3644_s12 + $0xbf8] sm:$0xff] }
  0xa5   : > { %3130 = vmatpush3.msra.mxu1 %v603_v46  ;;  %3096 = vmatprep.subr.mxu0 %v586_v47  ;;  %v637_v44 = vld [vmem:[%s3644_s12 + $0xa78] sm:$0xff]  ;;  %v652_v46 = vld [vmem:[%s3644_s12 + $0xaf0] sm:$0xff] }
  0xa6   : > { %3131 = vmatprep.subr.mxu1 %v618_v48  ;;  %3097 = vmatpush3.msra.mxu0 %v570_v49  ;;  %v669_v45 = vld [vmem:[%s3644_s12 + $0xb78] sm:$0xff]  ;;  %v684_v47 = vld [vmem:[%s3644_s12 + $0xbf0] sm:$0xff] }
  0xa7   : > { %3132 = vmatpush3.msra.mxu1 %v602_v50  ;;  %3098 = vmatprep.subr.mxu0 %v585_v51  ;;  %v636_v48 = vld [vmem:[%s3644_s12 + $0xa70] sm:$0xff]  ;;  %v651_v50 = vld [vmem:[%s3644_s12 + $0xae8] sm:$0xff] }
  0xa8   : > { %3133 = vmatprep.subr.mxu1 %v617_v52  ;;  %3099 = vmatpush3.msra.mxu0 %v569_v54  ;;  %v668_v49 = vld [vmem:[%s3644_s12 + $0xb70] sm:$0xff]  ;;  %v683_v51 = vld [vmem:[%s3644_s12 + $0xbe8] sm:$0xff] }
  0xa9   : > { %3134 = vmatpush3.msra.mxu1 %v601_v55  ;;  %3100 = vmatprep.subr.mxu0 %v584_v56  ;;  %v635_v52 = vld [vmem:[%s3644_s12 + $0xa68] sm:$0xff]  ;;  %v650_v55 = vld [vmem:[%s3644_s12 + $0xae0] sm:$0xff] }
  0xaa   : > { %3135 = vmatprep.subr.mxu1 %v616_v57  ;;  %3101 = vmatpush3.msra.mxu0 %v568_v58  ;;  %v667_v54 = vld [vmem:[%s3644_s12 + $0xb68] sm:$0xff]  ;;  %v682_v56 = vld [vmem:[%s3644_s12 + $0xbe0] sm:$0xff] }
  0xab   : > { %3136 = vmatpush3.msra.mxu1 %v600_v59  ;;  %3102 = vmatprep.subr.mxu0 %v583_v60  ;;  %v634_v57 = vld [vmem:[%s3644_s12 + $0xa60] sm:$0xff]  ;;  %v649_v59 = vld [vmem:[%s3644_s12 + $0xad8] sm:$0xff] }
  0xac   : > { %3137 = vmatprep.subr.mxu1 %v615_v61  ;;  %3103 = vmatpush3.msra.mxu0 %v567_v62  ;;  %v666_v58 = vld [vmem:[%s3644_s12 + $0xb60] sm:$0xff]  ;;  %v681_v60 = vld [vmem:[%s3644_s12 + $0xbd8] sm:$0xff] }
  0xad   : > { %3138 = vmatpush3.msra.mxu1 %v599_v63  ;;  %3104 = vmatprep.subr.mxu0 %v582_v0  ;;  %v633_v61 = vld [vmem:[%s3644_s12 + $0xa58] sm:$0xff]  ;;  %v648_v63 = vld [vmem:[%s3644_s12 + $0xad0] sm:$0xff] }
  0xae   : > { %3139 = vmatprep.subr.mxu1 %v614_v1  ;;  %3105 = vmatpush3.msra.mxu0 %v566_v2  ;;  %v665_v62 = vld [vmem:[%s3644_s12 + $0xb58] sm:$0xff]  ;;  %v680_v0 = vld [vmem:[%s3644_s12 + $0xbd0] sm:$0xff] }
  0xaf   : > { %3140 = vmatpush3.msra.mxu1 %v598_v3  ;;  %3106 = vmatprep.subr.mxu0 %v581_v4  ;;  %v632_v1 = vld [vmem:[%s3644_s12 + $0xa50] sm:$0xff]  ;;  %v647_v3 = vld [vmem:[%s3644_s12 + $0xac8] sm:$0xff] }
  0xb0   : > { %3141 = vmatprep.subr.mxu1 %v613_v5  ;;  %3107 = vmatpush3.msra.mxu0 %v565_v6  ;;  %v664_v2 = vld [vmem:[%s3644_s12 + $0xb50] sm:$0xff]  ;;  %v679_v4 = vld [vmem:[%s3644_s12 + $0xbc8] sm:$0xff] }
  0xb1   : > { %3142 = vmatpush3.msra.mxu1 %v597_v7  ;;  %3108 = vmatprep.subr.mxu0 %v580_v8  ;;  %v631_v5 = vld [vmem:[%s3644_s12 + $0xa48] sm:$0xff]  ;;  %v646_v7 = vld [vmem:[%s3644_s12 + $0xac0] sm:$0xff] }
  0xb2   : > { %3143 = vmatprep.subr.mxu1 %v612_v9  ;;  %3109 = vmatpush3.msra.mxu0 %v564_v10  ;;  %v663_v6 = vld [vmem:[%s3644_s12 + $0xb48] sm:$0xff]  ;;  %v678_v8 = vld [vmem:[%s3644_s12 + $0xbc0] sm:$0xff] }
  0xb3   : > { %3144 = vmatpush3.msra.mxu1 %v596_v11  ;;  %3110 = vmatprep.subr.mxu0 %v579_v12  ;;  %v630_v9 = vld [vmem:[%s3644_s12 + $0xa40] sm:$0xff]  ;;  %v645_v11 = vld [vmem:[%s3644_s12 + $0xab8] sm:$0xff] }
  0xb4   : > { %3145 = vmatprep.subr.mxu1 %v611_v13  ;;  %3111 = vmatpush3.msra.mxu0 %v563_v15  ;;  %v662_v10 = vld [vmem:[%s3644_s12 + $0xb40] sm:$0xff]  ;;  %v677_v12 = vld [vmem:[%s3644_s12 + $0xbb8] sm:$0xff]  ;;  %v644_v15 = vld [vmem:[%s3644_s12 + $0xab0] sm:$0xff] }
  0xb5   : > { %3146 = vmatpush3.msra.mxu1 %v595_v16  ;;  %3112 = vmatprep.subr.mxu0 %v578_v17  ;;  %v629_v13 = vld [vmem:[%s3644_s12 + $0xa38] sm:$0xff]  ;;  %v676_v16 = vld [vmem:[%s3644_s12 + $0xbb0] sm:$0xff] }
  0xb6   : > { %3147 = vmatprep.subr.mxu1 %v610_v18  ;;  %3113 = vmatpush3.msra.mxu0 %v562_v19  ;;  %v628_v17 = vld [vmem:[%s3644_s12 + $0xa30] sm:$0xff]  ;;  %v643_v19 = vld [vmem:[%s3644_s12 + $0xaa8] sm:$0xff] }
  0xb7   : > { %3148 = vmatpush3.msra.mxu1 %v594_v20  ;;  %3114 = vmatprep.subr.mxu0 %v577_v22  ;;  %v660_v18 = vld [vmem:[%s3644_s12 + $0xb30] sm:$0xff]  ;;  %v675_v20 = vld [vmem:[%s3644_s12 + $0xba8] sm:$0xff] }
  0xb8   : > { %3149 = vmatprep.subr.mxu1 %v609_v23  ;;  %3115 = vmatpush3.msra.mxu0 %v561_v24  ;;  %v627_v22 = vld [vmem:[%s3644_s12 + $0xa28] sm:$0xff]  ;;  %v642_v24 = vld [vmem:[%s3644_s12 + $0xaa0] sm:$0xff] }
  0xb9   : > { %3150 = vmatpush3.msra.mxu1 %v593_v25  ;;  %3116 = vmatprep.subr.mxu0 %v576_v26  ;;  %v659_v23 = vld [vmem:[%s3644_s12 + $0xb28] sm:$0xff]  ;;  %v674_v25 = vld [vmem:[%s3644_s12 + $0xba0] sm:$0xff] }
  0xba   : > { %3151 = vmatprep.subr.mxu1 %v608_v27  ;;  %3117 = vmatpush3.msra.mxu0 %v560_v29  ;;  %v626_v26 = vld [vmem:[%s3644_s12 + $0xa20] sm:$0xff]  ;;  %v641_v29 = vld [vmem:[%s3644_s12 + $0xa98] sm:$0xff] }
  0xbb   : > { %3152 = vmatpush3.msra.mxu1 %v592_v30  ;;  %3118 = vmatprep.subr.mxu0 %v575_v32  ;;  %v658_v27 = vld [vmem:[%s3644_s12 + $0xb20] sm:$0xff]  ;;  %v673_v30 = vld [vmem:[%s3644_s12 + $0xb98] sm:$0xff] }
  0xbc   : > { %3153 = vmatprep.subr.mxu1 %v607_v33  ;;  %3119 = vmatpush3.msra.mxu0 %v559_v34  ;;  %v657_v32 = vld [vmem:[%s3644_s12 + $0xb18] sm:$0xff]  ;;  %v640_v33 = vld [vmem:[%s3644_s12 + $0xa90] sm:$0xff] }
  0xbd   : > { %3154 = vmatpush3.msra.mxu1 %v591_v35  ;;  %3120 = vmatprep.subr.mxu0 %v574_v36  ;;  %v672_v34 = vld [vmem:[%s3644_s12 + $0xb90] sm:$0xff]  ;;  %v1039_v35 = vrot.slane %v297_v21, %v3693_v53 }
  0xbe   : > { %3155 = vmatprep.subr.mxu1 %v606_v37  ;;  %3121 = vmatpush3.msra.mxu0 %v558_v39  ;;  %v624_v36 = vld [vmem:[%s3644_s12 + $0xa10] sm:$0xff]  ;;  %v639_v39 = vld [vmem:[%s3644_s12 + $0xa88] sm:$0xff] }
  0xbf   : > { %1783 = vmatprep.mubr.f32.mxu0 %v1030_v38  ;;  %3156 = vmatpush3.msra.mxu1 %v590_v41  ;;  %v656_v37 = vld [vmem:[%s3644_s12 + $0xb10] sm:$0xff]  ;;  %v623_v41 = vld [vmem:[%s3644_s12 + $0xa08] sm:$0xff] }
  0xc0   : > { %1853 = vmatprep.mubr.f32.mxu1 %v1031_v40  ;;  %1784 = vmatmul.mubr.f32.vlgmr.msra.gmra.mxu0 %v1022_v28  ;;  %v1032_v28 = vcombine.high %v297_v21, %v297_v21  ;;  %v671_v40 = vld [vmem:[%s3644_s12 + $0xb88] sm:$0xff]  ;;  %v725_v21 = vld [vmem:[%s3644_s12 + $0xd38] sm:$0xff] }
  0xc1   : > { %1854 = vmatmul.mubr.f32.vlgmr.msra.gmra.mxu1 %v1029_v31  ;;  %3160 = vmatprep.subr.mxu0 %v653_v42  ;;  %v625_v31 = vld [vmem:[%s3644_s12 + $0xa18] sm:$0xff]  ;;  %v655_v42 = vld [vmem:[%s3644_s12 + $0xb08] sm:$0xff] }
  0xc2   : > { %3195 = vmatprep.subr.mxu1 %v685_v43  ;;  %3161 = vmatpush3.msra.mxu0 %v637_v44  ;;  %v1046_v38 = vrot.slane %v1032_v28, %v3693_v53  ;;  %v638_v43 = vld [vmem:[%s3644_s12 + $0xa80] sm:$0xff]  ;;  %v298_v28 = vld [vmem:[%s3639_s9 + $0x30] sm:$0xff] }
  0xc3   : > { %3196 = vmatpush3.msra.mxu1 %v669_v45  ;;  %3162 = vmatprep.subr.mxu0 %v652_v46  ;;  %v670_v44 = vld [vmem:[%s3644_s12 + $0xb80] sm:$0xff]  ;;  %v1047_v45 = vcombine.high %v1039_v35, %v1039_v35 }
  0xc4   : > { %3197 = vmatprep.subr.mxu1 %v684_v47  ;;  %3163 = vmatpush3.msra.mxu0 %v636_v48  ;;  %v622_v46 = vld [vmem:[%s3644_s12 + $0xa00] sm:$0xff]  ;;  %v1048_v47 = vcombine.high %v1046_v38, %v1046_v38 }
  0xc5   : > { %3198 = vmatpush3.msra.mxu1 %v668_v49  ;;  %3164 = vmatprep.subr.mxu0 %v651_v50  ;;  %v654_v48 = vld [vmem:[%s3644_s12 + $0xb00] sm:$0xff]  ;;  %v717_v49 = vld [vmem:[%s3644_s12 + $0xcf8] sm:$0xff] }
  0xc6   : > { %3199 = vmatprep.subr.mxu1 %v683_v51  ;;  %3165 = vmatpush3.msra.mxu0 %v635_v52  ;;  %v749_v50 = vld [vmem:[%s3644_s12 + $0xdf8] sm:$0xff] }
  0xc7   : > { %3200 = vmatpush3.msra.mxu1 %v667_v54  ;;  %3166 = vmatprep.subr.mxu0 %v650_v55  ;;  %v701_v51 = vld [vmem:[%s3644_s12 + $0xc78] sm:$0xff]  ;;  %v716_v54 = vld [vmem:[%s3644_s12 + $0xcf0] sm:$0xff] }
  0xc8   : > { %3201 = vmatprep.subr.mxu1 %v682_v56  ;;  %3167 = vmatpush3.msra.mxu0 %v634_v57  ;;  %v733_v52 = vld [vmem:[%s3644_s12 + $0xd78] sm:$0xff]  ;;  %v748_v55 = vld [vmem:[%s3644_s12 + $0xdf0] sm:$0xff] }
  0xc9   : > { %3202 = vmatpush3.msra.mxu1 %v666_v58  ;;  %3168 = vmatprep.subr.mxu0 %v649_v59  ;;  %v700_v56 = vld [vmem:[%s3644_s12 + $0xc70] sm:$0xff]  ;;  %v715_v58 = vld [vmem:[%s3644_s12 + $0xce8] sm:$0xff] }
  0xca   : > { %3203 = vmatprep.subr.mxu1 %v681_v60  ;;  %3169 = vmatpush3.msra.mxu0 %v633_v61  ;;  %v732_v57 = vld [vmem:[%s3644_s12 + $0xd70] sm:$0xff]  ;;  %v747_v59 = vld [vmem:[%s3644_s12 + $0xde8] sm:$0xff] }
  0xcb   : > { %3204 = vmatpush3.msra.mxu1 %v665_v62  ;;  %3170 = vmatprep.subr.mxu0 %v648_v63  ;;  %v699_v60 = vld [vmem:[%s3644_s12 + $0xc68] sm:$0xff]  ;;  %v714_v62 = vld [vmem:[%s3644_s12 + $0xce0] sm:$0xff] }
  0xcc   : > { %3205 = vmatprep.subr.mxu1 %v680_v0  ;;  %3171 = vmatpush3.msra.mxu0 %v632_v1  ;;  %v731_v61 = vld [vmem:[%s3644_s12 + $0xd68] sm:$0xff]  ;;  %v746_v63 = vld [vmem:[%s3644_s12 + $0xde0] sm:$0xff] }
  0xcd   : > { %3206 = vmatpush3.msra.mxu1 %v664_v2  ;;  %3172 = vmatprep.subr.mxu0 %v647_v3  ;;  %v698_v0 = vld [vmem:[%s3644_s12 + $0xc60] sm:$0xff]  ;;  %v713_v2 = vld [vmem:[%s3644_s12 + $0xcd8] sm:$0xff] }
  0xce   : > { %3207 = vmatprep.subr.mxu1 %v679_v4  ;;  %3173 = vmatpush3.msra.mxu0 %v631_v5  ;;  %v730_v1 = vld [vmem:[%s3644_s12 + $0xd60] sm:$0xff]  ;;  %v745_v3 = vld [vmem:[%s3644_s12 + $0xdd8] sm:$0xff] }
  0xcf   : > { %3208 = vmatpush3.msra.mxu1 %v663_v6  ;;  %3174 = vmatprep.subr.mxu0 %v646_v7  ;;  %v697_v4 = vld [vmem:[%s3644_s12 + $0xc58] sm:$0xff]  ;;  %v712_v6 = vld [vmem:[%s3644_s12 + $0xcd0] sm:$0xff] }
  0xd0   : > { %3209 = vmatprep.subr.mxu1 %v678_v8  ;;  %3175 = vmatpush3.msra.mxu0 %v630_v9  ;;  %v729_v5 = vld [vmem:[%s3644_s12 + $0xd58] sm:$0xff]  ;;  %v744_v7 = vld [vmem:[%s3644_s12 + $0xdd0] sm:$0xff] }
  0xd1   : > { %3210 = vmatpush3.msra.mxu1 %v662_v10  ;;  %3176 = vmatprep.subr.mxu0 %v645_v11  ;;  %v696_v8 = vld [vmem:[%s3644_s12 + $0xc50] sm:$0xff]  ;;  %v711_v10 = vld [vmem:[%s3644_s12 + $0xcc8] sm:$0xff] }
  0xd2   : > { %3211 = vmatprep.subr.mxu1 %v677_v12  ;;  %3177 = vmatpush3.msra.mxu0 %v629_v13  ;;  %v728_v9 = vld [vmem:[%s3644_s12 + $0xd50] sm:$0xff]  ;;  %v743_v11 = vld [vmem:[%s3644_s12 + $0xdc8] sm:$0xff] }
  0xd3   : > { %3212 = vmatpush3.msra.mxu1 %v661_v14  ;;  %3178 = vmatprep.subr.mxu0 %v644_v15  ;;  %v695_v12 = vld [vmem:[%s3644_s12 + $0xc48] sm:$0xff]  ;;  %v710_v14 = vld [vmem:[%s3644_s12 + $0xcc0] sm:$0xff] }
  0xd4   : > { %3213 = vmatprep.subr.mxu1 %v676_v16  ;;  %3179 = vmatpush3.msra.mxu0 %v628_v17  ;;  %v727_v13 = vld [vmem:[%s3644_s12 + $0xd48] sm:$0xff]  ;;  %v742_v15 = vld [vmem:[%s3644_s12 + $0xdc0] sm:$0xff] }
  0xd5   : > { %3214 = vmatpush3.msra.mxu1 %v660_v18  ;;  %3180 = vmatprep.subr.mxu0 %v643_v19  ;;  %v694_v16 = vld [vmem:[%s3644_s12 + $0xc40] sm:$0xff]  ;;  %v709_v18 = vld [vmem:[%s3644_s12 + $0xcb8] sm:$0xff] }
  0xd6   : > { %3215 = vmatprep.subr.mxu1 %v675_v20  ;;  %3181 = vmatpush3.msra.mxu0 %v627_v22  ;;  %v726_v17 = vld [vmem:[%s3644_s12 + $0xd40] sm:$0xff]  ;;  %v741_v19 = vld [vmem:[%s3644_s12 + $0xdb8] sm:$0xff]  ;;  %v708_v22 = vld [vmem:[%s3644_s12 + $0xcb0] sm:$0xff] }
  0xd7   : > { %3216 = vmatpush3.msra.mxu1 %v659_v23  ;;  %3182 = vmatprep.subr.mxu0 %v642_v24  ;;  %v693_v20 = vld [vmem:[%s3644_s12 + $0xc38] sm:$0xff]  ;;  %v740_v23 = vld [vmem:[%s3644_s12 + $0xdb0] sm:$0xff] }
  0xd8   : > { %3217 = vmatprep.subr.mxu1 %v674_v25  ;;  %3183 = vmatpush3.msra.mxu0 %v626_v26  ;;  %v692_v24 = vld [vmem:[%s3644_s12 + $0xc30] sm:$0xff]  ;;  %v707_v26 = vld [vmem:[%s3644_s12 + $0xca8] sm:$0xff] }
  0xd9   : > { %3218 = vmatpush3.msra.mxu1 %v658_v27  ;;  %3184 = vmatprep.subr.mxu0 %v641_v29  ;;  %v724_v25 = vld [vmem:[%s3644_s12 + $0xd30] sm:$0xff]  ;;  %v739_v27 = vld [vmem:[%s3644_s12 + $0xda8] sm:$0xff] }
  0xda   : > { %3219 = vmatprep.subr.mxu1 %v673_v30  ;;  %3185 = vmatpush3.msra.mxu0 %v625_v31  ;;  %v691_v29 = vld [vmem:[%s3644_s12 + $0xc28] sm:$0xff]  ;;  %v706_v31 = vld [vmem:[%s3644_s12 + $0xca0] sm:$0xff] }
  0xdb   : > { %3220 = vmatpush3.msra.mxu1 %v657_v32  ;;  %3186 = vmatprep.subr.mxu0 %v640_v33  ;;  %v723_v30 = vld [vmem:[%s3644_s12 + $0xd28] sm:$0xff]  ;;  %v738_v32 = vld [vmem:[%s3644_s12 + $0xda0] sm:$0xff] }
  0xdc   : > { %3221 = vmatprep.subr.mxu1 %v672_v34  ;;  %3187 = vmatpush3.msra.mxu0 %v624_v36  ;;  %v690_v33 = vld [vmem:[%s3644_s12 + $0xc20] sm:$0xff]  ;;  %v705_v36 = vld [vmem:[%s3644_s12 + $0xc98] sm:$0xff] }
  0xdd   : > { %3222 = vmatpush3.msra.mxu1 %v656_v37  ;;  %3188 = vmatprep.subr.mxu0 %v639_v39  ;;  %v722_v34 = vld [vmem:[%s3644_s12 + $0xd20] sm:$0xff]  ;;  %v737_v37 = vld [vmem:[%s3644_s12 + $0xd98] sm:$0xff] }
  0xde   : > { %3223 = vmatprep.subr.mxu1 %v671_v40  ;;  %3189 = vmatpush3.msra.mxu0 %v623_v41  ;;  %v721_v39 = vld [vmem:[%s3644_s12 + $0xd18] sm:$0xff]  ;;  %v704_v40 = vld [vmem:[%s3644_s12 + $0xc90] sm:$0xff] }
  0xdf   : > { %3224 = vmatpush3.msra.mxu1 %v655_v42  ;;  %3190 = vmatprep.subr.mxu0 %v638_v43  ;;  %v736_v41 = vld [vmem:[%s3644_s12 + $0xd90] sm:$0xff]  ;;  %v1056_v42 = vrot.slane %v298_v28, %v3693_v53 }
  0xe0   : > { %3225 = vmatprep.subr.mxu1 %v670_v44  ;;  %3191 = vmatpush3.msra.mxu0 %v622_v46  ;;  %v688_v43 = vld [vmem:[%s3644_s12 + $0xc10] sm:$0xff]  ;;  %v703_v46 = vld [vmem:[%s3644_s12 + $0xc88] sm:$0xff] }
  0xe1   : > { %1923 = vmatprep.mubr.f32.mxu0 %v1047_v45  ;;  %3226 = vmatpush3.msra.mxu1 %v654_v48  ;;  %v720_v44 = vld [vmem:[%s3644_s12 + $0xd10] sm:$0xff]  ;;  %v687_v48 = vld [vmem:[%s3644_s12 + $0xc08] sm:$0xff] }
  0xe2   : > { %1993 = vmatprep.mubr.f32.mxu1 %v1048_v47  ;;  %1924 = vmatmul.mubr.f32.vlgmr.msra.gmra.mxu0 %v1039_v35  ;;  %v1049_v35 = vcombine.high %v298_v28, %v298_v28  ;;  %v735_v47 = vld [vmem:[%s3644_s12 + $0xd88] sm:$0xff]  ;;  %v789_v28 = vld [vmem:[%s3644_s12 + $0xf38] sm:$0xff] }
  0xe3   : > { %1994 = vmatmul.mubr.f32.vlgmr.msra.gmra.mxu1 %v1046_v38  ;;  %3230 = vmatprep.subr.mxu0 %v717_v49  ;;  %v689_v38 = vld [vmem:[%s3644_s12 + $0xc18] sm:$0xff]  ;;  %v719_v49 = vld [vmem:[%s3644_s12 + $0xd08] sm:$0xff] }
  0xe4   : > { %3265 = vmatprep.subr.mxu1 %v749_v50  ;;  %3231 = vmatpush3.msra.mxu0 %v701_v51  ;;  %v1063_v45 = vrot.slane %v1049_v35, %v3693_v53  ;;  %v702_v50 = vld [vmem:[%s3644_s12 + $0xc80] sm:$0xff]  ;;  %v299_v35 = vld [vmem:[%s3639_s9 + $0x38] sm:$0xff] }
  0xe5   : > { %3266 = vmatpush3.msra.mxu1 %v733_v52  ;;  %3232 = vmatprep.subr.mxu0 %v716_v54  ;;  %v734_v51 = vld [vmem:[%s3644_s12 + $0xd80] sm:$0xff]  ;;  %v1064_v52 = vcombine.high %v1056_v42, %v1056_v42 }
  0xe6   : > { %3267 = vmatprep.subr.mxu1 %v748_v55  ;;  %3233 = vmatpush3.msra.mxu0 %v700_v56  ;;  %v686_v54 = vld [vmem:[%s3644_s12 + $0xc00] sm:$0xff]  ;;  %v1065_v55 = vcombine.high %v1063_v45, %v1063_v45 }
  0xe7   : > { %3268 = vmatpush3.msra.mxu1 %v732_v57  ;;  %3234 = vmatprep.subr.mxu0 %v715_v58  ;;  %v718_v56 = vld [vmem:[%s3644_s12 + $0xd00] sm:$0xff]  ;;  %v781_v57 = vld [vmem:[%s3644_s12 + $0xef8] sm:$0xff] }
  0xe8   : > { %3269 = vmatprep.subr.mxu1 %v747_v59  ;;  %3235 = vmatpush3.msra.mxu0 %v699_v60  ;;  %v813_v58 = vld [vmem:[%s3644_s12 + $0xff8] sm:$0xff] }
  0xe9   : > { %3270 = vmatpush3.msra.mxu1 %v731_v61  ;;  %3236 = vmatprep.subr.mxu0 %v714_v62  ;;  %v765_v59 = vld [vmem:[%s3644_s12 + $0xe78] sm:$0xff]  ;;  %v780_v61 = vld [vmem:[%s3644_s12 + $0xef0] sm:$0xff] }
  0xea   : > { %3271 = vmatprep.subr.mxu1 %v746_v63  ;;  %3237 = vmatpush3.msra.mxu0 %v698_v0  ;;  %v797_v60 = vld [vmem:[%s3644_s12 + $0xf78] sm:$0xff]  ;;  %v812_v62 = vld [vmem:[%s3644_s12 + $0xff0] sm:$0xff] }
  0xeb   : > { %3272 = vmatpush3.msra.mxu1 %v730_v1  ;;  %3238 = vmatprep.subr.mxu0 %v713_v2  ;;  %v764_v63 = vld [vmem:[%s3644_s12 + $0xe70] sm:$0xff]  ;;  %v779_v1 = vld [vmem:[%s3644_s12 + $0xee8] sm:$0xff] }
  0xec   : > { %3273 = vmatprep.subr.mxu1 %v745_v3  ;;  %3239 = vmatpush3.msra.mxu0 %v697_v4  ;;  %v796_v0 = vld [vmem:[%s3644_s12 + $0xf70] sm:$0xff]  ;;  %v811_v2 = vld [vmem:[%s3644_s12 + $0xfe8] sm:$0xff] }
  0xed   : > { %3274 = vmatpush3.msra.mxu1 %v729_v5  ;;  %3240 = vmatprep.subr.mxu0 %v712_v6  ;;  %v763_v3 = vld [vmem:[%s3644_s12 + $0xe68] sm:$0xff]  ;;  %v778_v5 = vld [vmem:[%s3644_s12 + $0xee0] sm:$0xff] }
  0xee   : > { %3275 = vmatprep.subr.mxu1 %v744_v7  ;;  %3241 = vmatpush3.msra.mxu0 %v696_v8  ;;  %v795_v4 = vld [vmem:[%s3644_s12 + $0xf68] sm:$0xff]  ;;  %v810_v6 = vld [vmem:[%s3644_s12 + $0xfe0] sm:$0xff] }
  0xef   : > { %3276 = vmatpush3.msra.mxu1 %v728_v9  ;;  %3242 = vmatprep.subr.mxu0 %v711_v10  ;;  %v762_v7 = vld [vmem:[%s3644_s12 + $0xe60] sm:$0xff]  ;;  %v777_v9 = vld [vmem:[%s3644_s12 + $0xed8] sm:$0xff] }
  0xf0   : > { %3277 = vmatprep.subr.mxu1 %v743_v11  ;;  %3243 = vmatpush3.msra.mxu0 %v695_v12  ;;  %v794_v8 = vld [vmem:[%s3644_s12 + $0xf60] sm:$0xff]  ;;  %v809_v10 = vld [vmem:[%s3644_s12 + $0xfd8] sm:$0xff] }
  0xf1   : > { %3278 = vmatpush3.msra.mxu1 %v727_v13  ;;  %3244 = vmatprep.subr.mxu0 %v710_v14  ;;  %v761_v11 = vld [vmem:[%s3644_s12 + $0xe58] sm:$0xff]  ;;  %v776_v13 = vld [vmem:[%s3644_s12 + $0xed0] sm:$0xff] }
  0xf2   : > { %3279 = vmatprep.subr.mxu1 %v742_v15  ;;  %3245 = vmatpush3.msra.mxu0 %v694_v16  ;;  %v793_v12 = vld [vmem:[%s3644_s12 + $0xf58] sm:$0xff]  ;;  %v808_v14 = vld [vmem:[%s3644_s12 + $0xfd0] sm:$0xff] }
  0xf3   : > { %3280 = vmatpush3.msra.mxu1 %v726_v17  ;;  %3246 = vmatprep.subr.mxu0 %v709_v18  ;;  %v760_v15 = vld [vmem:[%s3644_s12 + $0xe50] sm:$0xff]  ;;  %v775_v17 = vld [vmem:[%s3644_s12 + $0xec8] sm:$0xff] }
  0xf4   : > { %3281 = vmatprep.subr.mxu1 %v741_v19  ;;  %3247 = vmatpush3.msra.mxu0 %v693_v20  ;;  %v792_v16 = vld [vmem:[%s3644_s12 + $0xf50] sm:$0xff]  ;;  %v807_v18 = vld [vmem:[%s3644_s12 + $0xfc8] sm:$0xff] }
  0xf5   : > { %3282 = vmatpush3.msra.mxu1 %v725_v21  ;;  %3248 = vmatprep.subr.mxu0 %v708_v22  ;;  %v759_v19 = vld [vmem:[%s3644_s12 + $0xe48] sm:$0xff]  ;;  %v774_v21 = vld [vmem:[%s3644_s12 + $0xec0] sm:$0xff] }
  0xf6   : > { %3283 = vmatprep.subr.mxu1 %v740_v23  ;;  %3249 = vmatpush3.msra.mxu0 %v692_v24  ;;  %v791_v20 = vld [vmem:[%s3644_s12 + $0xf48] sm:$0xff]  ;;  %v806_v22 = vld [vmem:[%s3644_s12 + $0xfc0] sm:$0xff] }
  0xf7   : > { %3284 = vmatpush3.msra.mxu1 %v724_v25  ;;  %3250 = vmatprep.subr.mxu0 %v707_v26  ;;  %v758_v23 = vld [vmem:[%s3644_s12 + $0xe40] sm:$0xff]  ;;  %v773_v25 = vld [vmem:[%s3644_s12 + $0xeb8] sm:$0xff] }
  0xf8   : > { %3285 = vmatprep.subr.mxu1 %v739_v27  ;;  %3251 = vmatpush3.msra.mxu0 %v691_v29  ;;  %v790_v24 = vld [vmem:[%s3644_s12 + $0xf40] sm:$0xff]  ;;  %v805_v26 = vld [vmem:[%s3644_s12 + $0xfb8] sm:$0xff]  ;;  %v772_v29 = vld [vmem:[%s3644_s12 + $0xeb0] sm:$0xff] }
  0xf9   : > { %3286 = vmatpush3.msra.mxu1 %v723_v30  ;;  %3252 = vmatprep.subr.mxu0 %v706_v31  ;;  %v757_v27 = vld [vmem:[%s3644_s12 + $0xe38] sm:$0xff]  ;;  %v804_v30 = vld [vmem:[%s3644_s12 + $0xfb0] sm:$0xff] }
  0xfa   : > { %3287 = vmatprep.subr.mxu1 %v738_v32  ;;  %3253 = vmatpush3.msra.mxu0 %v690_v33  ;;  %v756_v31 = vld [vmem:[%s3644_s12 + $0xe30] sm:$0xff]  ;;  %v771_v33 = vld [vmem:[%s3644_s12 + $0xea8] sm:$0xff] }
  0xfb   : > { %3288 = vmatpush3.msra.mxu1 %v722_v34  ;;  %3254 = vmatprep.subr.mxu0 %v705_v36  ;;  %v788_v32 = vld [vmem:[%s3644_s12 + $0xf30] sm:$0xff]  ;;  %v803_v34 = vld [vmem:[%s3644_s12 + $0xfa8] sm:$0xff] }
  0xfc   : > { %3289 = vmatprep.subr.mxu1 %v737_v37  ;;  %3255 = vmatpush3.msra.mxu0 %v689_v38  ;;  %v755_v36 = vld [vmem:[%s3644_s12 + $0xe28] sm:$0xff]  ;;  %v770_v38 = vld [vmem:[%s3644_s12 + $0xea0] sm:$0xff] }
  0xfd   : > { %3290 = vmatpush3.msra.mxu1 %v721_v39  ;;  %3256 = vmatprep.subr.mxu0 %v704_v40  ;;  %v787_v37 = vld [vmem:[%s3644_s12 + $0xf28] sm:$0xff]  ;;  %v802_v39 = vld [vmem:[%s3644_s12 + $0xfa0] sm:$0xff] }
  0xfe   : > { %3291 = vmatprep.subr.mxu1 %v736_v41  ;;  %3257 = vmatpush3.msra.mxu0 %v688_v43  ;;  %v754_v40 = vld [vmem:[%s3644_s12 + $0xe20] sm:$0xff]  ;;  %v769_v43 = vld [vmem:[%s3644_s12 + $0xe98] sm:$0xff] }
  0xff   : > { %3292 = vmatpush3.msra.mxu1 %v720_v44  ;;  %3258 = vmatprep.subr.mxu0 %v703_v46  ;;  %v786_v41 = vld [vmem:[%s3644_s12 + $0xf20] sm:$0xff]  ;;  %v801_v44 = vld [vmem:[%s3644_s12 + $0xf98] sm:$0xff] }
 0x100   : > { %3293 = vmatprep.subr.mxu1 %v735_v47  ;;  %3259 = vmatpush3.msra.mxu0 %v687_v48  ;;  %v785_v46 = vld [vmem:[%s3644_s12 + $0xf18] sm:$0xff]  ;;  %v768_v47 = vld [vmem:[%s3644_s12 + $0xe90] sm:$0xff] }
 0x101   : > { %3294 = vmatpush3.msra.mxu1 %v719_v49  ;;  %3260 = vmatprep.subr.mxu0 %v702_v50  ;;  %v800_v48 = vld [vmem:[%s3644_s12 + $0xf90] sm:$0xff]  ;;  %v1073_v49 = vrot.slane %v299_v35, %v3693_v53 }
 0x102   : > { %3295 = vmatprep.subr.mxu1 %v734_v51  ;;  %3261 = vmatpush3.msra.mxu0 %v686_v54  ;;  %v752_v50 = vld [vmem:[%s3644_s12 + $0xe10] sm:$0xff]  ;;  %v767_v54 = vld [vmem:[%s3644_s12 + $0xe88] sm:$0xff] }
 0x103   : > { %2063 = vmatprep.mubr.f32.mxu0 %v1064_v52  ;;  %3296 = vmatpush3.msra.mxu1 %v718_v56  ;;  %v784_v51 = vld [vmem:[%s3644_s12 + $0xf10] sm:$0xff]  ;;  %v751_v56 = vld [vmem:[%s3644_s12 + $0xe08] sm:$0xff] }
 0x104   : > { %2133 = vmatprep.mubr.f32.mxu1 %v1065_v55  ;;  %2064 = vmatmul.mubr.f32.vlgmr.msra.gmra.mxu0 %v1056_v42  ;;  %v1066_v42 = vcombine.high %v299_v35, %v299_v35  ;;  %v799_v55 = vld [vmem:[%s3644_s12 + $0xf88] sm:$0xff]  ;;  %v853_v35 = vld [vmem:[%s3644_s12 + $0x1138] sm:$0xff] }
 0x105   : > { %2134 = vmatmul.mubr.f32.vlgmr.msra.gmra.mxu1 %v1063_v45  ;;  %3300 = vmatprep.subr.mxu0 %v781_v57  ;;  %v753_v45 = vld [vmem:[%s3644_s12 + $0xe18] sm:$0xff]  ;;  %v783_v57 = vld [vmem:[%s3644_s12 + $0xf08] sm:$0xff] }
 0x106   : > { %3335 = vmatprep.subr.mxu1 %v813_v58  ;;  %3301 = vmatpush3.msra.mxu0 %v765_v59  ;;  %v1080_v52 = vrot.slane %v1066_v42, %v3693_v53  ;;  %v766_v58 = vld [vmem:[%s3644_s12 + $0xe80] sm:$0xff] }
 0x107   : > { %3336 = vmatpush3.msra.mxu1 %v797_v60  ;;  %3302 = vmatprep.subr.mxu0 %v780_v61  ;;  %v798_v59 = vld [vmem:[%s3644_s12 + $0xf80] sm:$0xff]  ;;  %v1081_v60 = vcombine.high %v1073_v49, %v1073_v49 }
 0x108   : > { %3337 = vmatprep.subr.mxu1 %v812_v62  ;;  %3303 = vmatpush3.msra.mxu0 %v764_v63  ;;  %v750_v61 = vld [vmem:[%s3644_s12 + $0xe00] sm:$0xff]  ;;  %v1082_v62 = vcombine.high %v1080_v52, %v1080_v52 }
 0x109   : > { %3338 = vmatpush3.msra.mxu1 %v796_v0  ;;  %3304 = vmatprep.subr.mxu0 %v779_v1  ;;  %v782_v63 = vld [vmem:[%s3644_s12 + $0xf00] sm:$0xff]  ;;  %v845_v0 = vld [vmem:[%s3644_s12 + $0x10f8] sm:$0xff] }
 0x10a   : > { %3339 = vmatprep.subr.mxu1 %v811_v2  ;;  %3305 = vmatpush3.msra.mxu0 %v763_v3  ;;  %v877_v1 = vld [vmem:[%s3644_s12 + $0x11f8] sm:$0xff]  ;;  %v300_v42 = vld [vmem:[%s3639_s9 + $0x40] sm:$0xff] }
 0x10b   : > { %3340 = vmatpush3.msra.mxu1 %v795_v4  ;;  %3306 = vmatprep.subr.mxu0 %v778_v5  ;;  %v829_v2 = vld [vmem:[%s3644_s12 + $0x1078] sm:$0xff]  ;;  %v844_v4 = vld [vmem:[%s3644_s12 + $0x10f0] sm:$0xff] }
 0x10c   : > { %3341 = vmatprep.subr.mxu1 %v810_v6  ;;  %3307 = vmatpush3.msra.mxu0 %v762_v7  ;;  %v861_v3 = vld [vmem:[%s3644_s12 + $0x1178] sm:$0xff]  ;;  %v876_v5 = vld [vmem:[%s3644_s12 + $0x11f0] sm:$0xff] }
 0x10d   : > { %3342 = vmatpush3.msra.mxu1 %v794_v8  ;;  %3308 = vmatprep.subr.mxu0 %v777_v9  ;;  %v828_v6 = vld [vmem:[%s3644_s12 + $0x1070] sm:$0xff]  ;;  %v843_v8 = vld [vmem:[%s3644_s12 + $0x10e8] sm:$0xff] }
 0x10e   : > { %3343 = vmatprep.subr.mxu1 %v809_v10  ;;  %3309 = vmatpush3.msra.mxu0 %v761_v11  ;;  %v860_v7 = vld [vmem:[%s3644_s12 + $0x1170] sm:$0xff]  ;;  %v875_v9 = vld [vmem:[%s3644_s12 + $0x11e8] sm:$0xff] }
 0x10f   : > { %3344 = vmatpush3.msra.mxu1 %v793_v12  ;;  %3310 = vmatprep.subr.mxu0 %v776_v13  ;;  %v827_v10 = vld [vmem:[%s3644_s12 + $0x1068] sm:$0xff]  ;;  %v842_v12 = vld [vmem:[%s3644_s12 + $0x10e0] sm:$0xff] }
 0x110   : > { %3345 = vmatprep.subr.mxu1 %v808_v14  ;;  %3311 = vmatpush3.msra.mxu0 %v760_v15  ;;  %v859_v11 = vld [vmem:[%s3644_s12 + $0x1168] sm:$0xff]  ;;  %v874_v13 = vld [vmem:[%s3644_s12 + $0x11e0] sm:$0xff] }
 0x111   : > { %3346 = vmatpush3.msra.mxu1 %v792_v16  ;;  %3312 = vmatprep.subr.mxu0 %v775_v17  ;;  %v826_v14 = vld [vmem:[%s3644_s12 + $0x1060] sm:$0xff]  ;;  %v841_v16 = vld [vmem:[%s3644_s12 + $0x10d8] sm:$0xff] }
 0x112   : > { %3347 = vmatprep.subr.mxu1 %v807_v18  ;;  %3313 = vmatpush3.msra.mxu0 %v759_v19  ;;  %v858_v15 = vld [vmem:[%s3644_s12 + $0x1160] sm:$0xff]  ;;  %v873_v17 = vld [vmem:[%s3644_s12 + $0x11d8] sm:$0xff] }
 0x113   : > { %3348 = vmatpush3.msra.mxu1 %v791_v20  ;;  %3314 = vmatprep.subr.mxu0 %v774_v21  ;;  %v825_v18 = vld [vmem:[%s3644_s12 + $0x1058] sm:$0xff]  ;;  %v840_v20 = vld [vmem:[%s3644_s12 + $0x10d0] sm:$0xff] }
 0x114   : > { %3349 = vmatprep.subr.mxu1 %v806_v22  ;;  %3315 = vmatpush3.msra.mxu0 %v758_v23  ;;  %v857_v19 = vld [vmem:[%s3644_s12 + $0x1158] sm:$0xff]  ;;  %v872_v21 = vld [vmem:[%s3644_s12 + $0x11d0] sm:$0xff] }
 0x115   : > { %3350 = vmatpush3.msra.mxu1 %v790_v24  ;;  %3316 = vmatprep.subr.mxu0 %v773_v25  ;;  %v824_v22 = vld [vmem:[%s3644_s12 + $0x1050] sm:$0xff]  ;;  %v839_v24 = vld [vmem:[%s3644_s12 + $0x10c8] sm:$0xff] }
 0x116   : > { %3351 = vmatprep.subr.mxu1 %v805_v26  ;;  %3317 = vmatpush3.msra.mxu0 %v757_v27  ;;  %v856_v23 = vld [vmem:[%s3644_s12 + $0x1150] sm:$0xff]  ;;  %v871_v25 = vld [vmem:[%s3644_s12 + $0x11c8] sm:$0xff] }
 0x117   : > { %3352 = vmatpush3.msra.mxu1 %v789_v28  ;;  %3318 = vmatprep.subr.mxu0 %v772_v29  ;;  %v823_v26 = vld [vmem:[%s3644_s12 + $0x1048] sm:$0xff]  ;;  %v838_v28 = vld [vmem:[%s3644_s12 + $0x10c0] sm:$0xff] }
 0x118   : > { %3353 = vmatprep.subr.mxu1 %v804_v30  ;;  %3319 = vmatpush3.msra.mxu0 %v756_v31  ;;  %v855_v27 = vld [vmem:[%s3644_s12 + $0x1148] sm:$0xff]  ;;  %v870_v29 = vld [vmem:[%s3644_s12 + $0x11c0] sm:$0xff] }
 0x119   : > { %3354 = vmatpush3.msra.mxu1 %v788_v32  ;;  %3320 = vmatprep.subr.mxu0 %v771_v33  ;;  %v822_v30 = vld [vmem:[%s3644_s12 + $0x1040] sm:$0xff]  ;;  %v837_v32 = vld [vmem:[%s3644_s12 + $0x10b8] sm:$0xff] }
 0x11a   : > { %3355 = vmatprep.subr.mxu1 %v803_v34  ;;  %3321 = vmatpush3.msra.mxu0 %v755_v36  ;;  %v854_v31 = vld [vmem:[%s3644_s12 + $0x1140] sm:$0xff]  ;;  %v869_v33 = vld [vmem:[%s3644_s12 + $0x11b8] sm:$0xff]  ;;  %v836_v36 = vld [vmem:[%s3644_s12 + $0x10b0] sm:$0xff] }
 0x11b   : > { %3356 = vmatpush3.msra.mxu1 %v787_v37  ;;  %3322 = vmatprep.subr.mxu0 %v770_v38  ;;  %v821_v34 = vld [vmem:[%s3644_s12 + $0x1038] sm:$0xff]  ;;  %v868_v37 = vld [vmem:[%s3644_s12 + $0x11b0] sm:$0xff] }
 0x11c   : > { %3357 = vmatprep.subr.mxu1 %v802_v39  ;;  %3323 = vmatpush3.msra.mxu0 %v754_v40  ;;  %v820_v38 = vld [vmem:[%s3644_s12 + $0x1030] sm:$0xff]  ;;  %v835_v40 = vld [vmem:[%s3644_s12 + $0x10a8] sm:$0xff] }
 0x11d   : > { %3358 = vmatpush3.msra.mxu1 %v786_v41  ;;  %3324 = vmatprep.subr.mxu0 %v769_v43  ;;  %v852_v39 = vld [vmem:[%s3644_s12 + $0x1130] sm:$0xff]  ;;  %v867_v41 = vld [vmem:[%s3644_s12 + $0x11a8] sm:$0xff] }
 0x11e   : > { %3359 = vmatprep.subr.mxu1 %v801_v44  ;;  %3325 = vmatpush3.msra.mxu0 %v753_v45  ;;  %v819_v43 = vld [vmem:[%s3644_s12 + $0x1028] sm:$0xff]  ;;  %v834_v45 = vld [vmem:[%s3644_s12 + $0x10a0] sm:$0xff] }
 0x11f   : > { %3360 = vmatpush3.msra.mxu1 %v785_v46  ;;  %3326 = vmatprep.subr.mxu0 %v768_v47  ;;  %v851_v44 = vld [vmem:[%s3644_s12 + $0x1128] sm:$0xff]  ;;  %v866_v46 = vld [vmem:[%s3644_s12 + $0x11a0] sm:$0xff] }
 0x120   : > { %3361 = vmatprep.subr.mxu1 %v800_v48  ;;  %3327 = vmatpush3.msra.mxu0 %v752_v50  ;;  %v818_v47 = vld [vmem:[%s3644_s12 + $0x1020] sm:$0xff]  ;;  %v833_v50 = vld [vmem:[%s3644_s12 + $0x1098] sm:$0xff] }
 0x121   : > { %3362 = vmatpush3.msra.mxu1 %v784_v51  ;;  %3328 = vmatprep.subr.mxu0 %v767_v54  ;;  %v850_v48 = vld [vmem:[%s3644_s12 + $0x1120] sm:$0xff]  ;;  %v865_v51 = vld [vmem:[%s3644_s12 + $0x1198] sm:$0xff] }
 0x122   : > { %3363 = vmatprep.subr.mxu1 %v799_v55  ;;  %3329 = vmatpush3.msra.mxu0 %v751_v56  ;;  %v849_v54 = vld [vmem:[%s3644_s12 + $0x1118] sm:$0xff]  ;;  %v832_v55 = vld [vmem:[%s3644_s12 + $0x1090] sm:$0xff] }
 0x123   : > { %3364 = vmatpush3.msra.mxu1 %v783_v57  ;;  %3330 = vmatprep.subr.mxu0 %v766_v58  ;;  %v864_v56 = vld [vmem:[%s3644_s12 + $0x1190] sm:$0xff]  ;;  %v1090_v57 = vrot.slane %v300_v42, %v3693_v53 }
 0x124   : > { %3365 = vmatprep.subr.mxu1 %v798_v59  ;;  %3331 = vmatpush3.msra.mxu0 %v750_v61  ;;  %v816_v58 = vld [vmem:[%s3644_s12 + $0x1010] sm:$0xff]  ;;  %v831_v61 = vld [vmem:[%s3644_s12 + $0x1088] sm:$0xff] }
 0x125   : > { %2203 = vmatprep.mubr.f32.mxu0 %v1081_v60  ;;  %3366 = vmatpush3.msra.mxu1 %v782_v63  ;;  %v848_v59 = vld [vmem:[%s3644_s12 + $0x1110] sm:$0xff]  ;;  %v815_v63 = vld [vmem:[%s3644_s12 + $0x1008] sm:$0xff] }
 0x126   : > { %2273 = vmatprep.mubr.f32.mxu1 %v1082_v62  ;;  %2204 = vmatmul.mubr.f32.vlgmr.msra.gmra.mxu0 %v1073_v49  ;;  %v1083_v49 = vcombine.high %v300_v42, %v300_v42  ;;  %v863_v62 = vld [vmem:[%s3644_s12 + $0x1188] sm:$0xff]  ;;  %v882_v42 = vld [vmem:[%s3644_s12 + $0x1220] sm:$0xff] }
 0x127   : > { %2274 = vmatmul.mubr.f32.vlgmr.msra.gmra.mxu1 %v1080_v52  ;;  %3370 = vmatprep.subr.mxu0 %v845_v0  ;;  %v817_v52 = vld [vmem:[%s3644_s12 + $0x1018] sm:$0xff]  ;;  %v847_v0 = vld [vmem:[%s3644_s12 + $0x1108] sm:$0xff] }
 0x128   : > { %3405 = vmatprep.subr.mxu1 %v877_v1  ;;  %3371 = vmatpush3.msra.mxu0 %v829_v2  ;;  %v1097_v60 = vrot.slane %v1083_v49, %v3693_v53  ;;  %v830_v1 = vld [vmem:[%s3644_s12 + $0x1080] sm:$0xff]  ;;  %v896_v49 = vld [vmem:[%s3644_s12 + $0x1290] sm:$0xff] }
 0x129   : > { %3406 = vmatpush3.msra.mxu1 %v861_v3  ;;  %3372 = vmatprep.subr.mxu0 %v844_v4  ;;  %v862_v2 = vld [vmem:[%s3644_s12 + $0x1180] sm:$0xff]  ;;  %v1098_v3 = vcombine.high %v1090_v57, %v1090_v57 }
 0x12a   : > { %3407 = vmatprep.subr.mxu1 %v876_v5  ;;  %3373 = vmatpush3.msra.mxu0 %v828_v6  ;;  %v814_v4 = vld [vmem:[%s3644_s12 + $0x1000] sm:$0xff]  ;;  %v1099_v5 = vcombine.high %v1097_v60, %v1097_v60 }
 0x12b   : > { %3408 = vmatpush3.msra.mxu1 %v860_v7  ;;  %3374 = vmatprep.subr.mxu0 %v843_v8  ;;  %v846_v6 = vld [vmem:[%s3644_s12 + $0x1100] sm:$0xff]  ;;  %v909_v7 = vld [vmem:[%s3644_s12 + $0x12f8] sm:$0xff] }
 0x12c   : > { %3409 = vmatprep.subr.mxu1 %v875_v9  ;;  %3375 = vmatpush3.msra.mxu0 %v827_v10  ;;  %v893_v8 = vld [vmem:[%s3644_s12 + $0x1278] sm:$0xff]  ;;  %v908_v10 = vld [vmem:[%s3644_s12 + $0x12f0] sm:$0xff] }
 0x12d   : > { %3410 = vmatpush3.msra.mxu1 %v859_v11  ;;  %3376 = vmatprep.subr.mxu0 %v842_v12  ;;  %v925_v9 = vld [vmem:[%s3644_s12 + $0x1378] sm:$0xff]  ;;  %v3578_v11 = vmov 0.0   ;;  %v892_v12 = vld [vmem:[%s3644_s12 + $0x1270] sm:$0xff] }
 0x12e   : > { %3411 = vmatprep.subr.mxu1 %v874_v13  ;;  %3377 = vmatpush3.msra.mxu0 %v826_v14  ;;  %v924_v13 = vld [vmem:[%s3644_s12 + $0x1370] sm:$0xff]  ;;  %v907_v14 = vld [vmem:[%s3644_s12 + $0x12e8] sm:$0xff] }
 0x12f   : > { %3412 = vmatpush3.msra.mxu1 %v858_v15  ;;  %3378 = vmatprep.subr.mxu0 %v841_v16  ;;  %v891_v15 = vld [vmem:[%s3644_s12 + $0x1268] sm:$0xff] }
 0x130   : > { %3413 = vmatprep.subr.mxu1 %v873_v17  ;;  %3379 = vmatpush3.msra.mxu0 %v825_v18  ;;  %v923_v16 = vld [vmem:[%s3644_s12 + $0x1368] sm:$0xff]  ;;  %v906_v17 = vld [vmem:[%s3644_s12 + $0x12e0] sm:$0xff] }
 0x131   : > { %3414 = vmatpush3.msra.mxu1 %v857_v19  ;;  %3380 = vmatprep.subr.mxu0 %v840_v20  ;;  %v890_v18 = vld [vmem:[%s3644_s12 + $0x1260] sm:$0xff]  ;;  %v905_v20 = vld [vmem:[%s3644_s12 + $0x12d8] sm:$0xff] }
 0x132   : > { %3415 = vmatprep.subr.mxu1 %v872_v21  ;;  %3381 = vmatpush3.msra.mxu0 %v824_v22  ;;  %v922_v19 = vld [vmem:[%s3644_s12 + $0x1360] sm:$0xff]  ;;  %v889_v21 = vld [vmem:[%s3644_s12 + $0x1258] sm:$0xff] }
 0x133   : > { %3416 = vmatpush3.msra.mxu1 %v856_v23  ;;  %3382 = vmatprep.subr.mxu0 %v839_v24  ;;  %v921_v22 = vld [vmem:[%s3644_s12 + $0x1358] sm:$0xff]  ;;  %v904_v23 = vld [vmem:[%s3644_s12 + $0x12d0] sm:$0xff] }
 0x134   : > { %3417 = vmatprep.subr.mxu1 %v871_v25  ;;  %3383 = vmatpush3.msra.mxu0 %v823_v26  ;;  %v888_v24 = vld [vmem:[%s3644_s12 + $0x1250] sm:$0xff]  ;;  %v903_v26 = vld [vmem:[%s3644_s12 + $0x12c8] sm:$0xff] }
 0x135   : > { %3418 = vmatpush3.msra.mxu1 %v855_v27  ;;  %3384 = vmatprep.subr.mxu0 %v838_v28  ;;  %v920_v25 = vld [vmem:[%s3644_s12 + $0x1350] sm:$0xff]  ;;  %v887_v27 = vld [vmem:[%s3644_s12 + $0x1248] sm:$0xff] }
 0x136   : > { %3419 = vmatprep.subr.mxu1 %v870_v29  ;;  %3385 = vmatpush3.msra.mxu0 %v822_v30  ;;  %v919_v28 = vld [vmem:[%s3644_s12 + $0x1348] sm:$0xff]  ;;  %v902_v29 = vld [vmem:[%s3644_s12 + $0x12c0] sm:$0xff] }
 0x137   : > { %3420 = vmatpush3.msra.mxu1 %v854_v31  ;;  %3386 = vmatprep.subr.mxu0 %v837_v32  ;;  %v886_v30 = vld [vmem:[%s3644_s12 + $0x1240] sm:$0xff]  ;;  %v901_v32 = vld [vmem:[%s3644_s12 + $0x12b8] sm:$0xff] }
 0x138   : > { %3421 = vmatprep.subr.mxu1 %v869_v33  ;;  %3387 = vmatpush3.msra.mxu0 %v821_v34  ;;  %v918_v31 = vld [vmem:[%s3644_s12 + $0x1340] sm:$0xff]  ;;  %v885_v33 = vld [vmem:[%s3644_s12 + $0x1238] sm:$0xff] }
 0x139   : > { %3422 = vmatpush3.msra.mxu1 %v853_v35  ;;  %3388 = vmatprep.subr.mxu0 %v836_v36  ;;  %v917_v34 = vld [vmem:[%s3644_s12 + $0x1338] sm:$0xff]  ;;  %v900_v35 = vld [vmem:[%s3644_s12 + $0x12b0] sm:$0xff] }
 0x13a   : > { %3423 = vmatprep.subr.mxu1 %v868_v37  ;;  %3389 = vmatpush3.msra.mxu0 %v820_v38  ;;  %v884_v36 = vld [vmem:[%s3644_s12 + $0x1230] sm:$0xff]  ;;  %v899_v38 = vld [vmem:[%s3644_s12 + $0x12a8] sm:$0xff] }
 0x13b   : > { %3424 = vmatpush3.msra.mxu1 %v852_v39  ;;  %3390 = vmatprep.subr.mxu0 %v835_v40  ;;  %v916_v37 = vld [vmem:[%s3644_s12 + $0x1330] sm:$0xff]  ;;  %v883_v39 = vld [vmem:[%s3644_s12 + $0x1228] sm:$0xff] }
 0x13c   : > { %3425 = vmatprep.subr.mxu1 %v867_v41  ;;  %3391 = vmatpush3.msra.mxu0 %v819_v43  ;;  %v915_v40 = vld [vmem:[%s3644_s12 + $0x1328] sm:$0xff]  ;;  %v898_v41 = vld [vmem:[%s3644_s12 + $0x12a0] sm:$0xff] }
 0x13d   : > { %3426 = vmatpush3.msra.mxu1 %v851_v44  ;;  %3392 = vmatprep.subr.mxu0 %v834_v45  ;;  %v914_v43 = vld [vmem:[%s3644_s12 + $0x1320] sm:$0xff]  ;;  %v301_v44 = vld [vmem:[%s3639_s9 + $0x48] sm:$0xff]  ;;  %v897_v45 = vld [vmem:[%s3644_s12 + $0x1298] sm:$0xff] }
 0x13e   : > { %3427 = vmatprep.subr.mxu1 %v866_v46  ;;  %3393 = vmatpush3.msra.mxu0 %v818_v47  ;;  %v1100_v46 = vcombine.high %v301_v44, %v301_v44  ;;  %v881_v47 = vld [vmem:[%s3644_s12 + $0x1218] sm:$0xff] }
 0x13f   : > { %3428 = vmatpush3.msra.mxu1 %v850_v48  ;;  %3394 = vmatprep.subr.mxu0 %v833_v50  ;;  %v913_v48 = vld [vmem:[%s3644_s12 + $0x1318] sm:$0xff]  ;;  %v1107_v50 = vrot.slane %v301_v44, %v3693_v53 }
 0x140   : > { %3429 = vmatprep.subr.mxu1 %v865_v51  ;;  %3395 = vmatpush3.msra.mxu0 %v817_v52  ;;  %v880_v51 = vld [vmem:[%s3644_s12 + $0x1210] sm:$0xff] }
 0x141   : > { %3430 = vmatpush3.msra.mxu1 %v849_v54  ;;  %3396 = vmatprep.subr.mxu0 %v832_v55  ;;  %v912_v52 = vld [vmem:[%s3644_s12 + $0x1310] sm:$0xff]  ;;  %v895_v54 = vld [vmem:[%s3644_s12 + $0x1288] sm:$0xff]  ;;  %v1114_v55 = vrot.slane %v1100_v46, %v3693_v53 }
 0x142   : > { %3431 = vmatprep.subr.mxu1 %v864_v56  ;;  %3397 = vmatpush3.msra.mxu0 %v816_v58  ;;  %v879_v56 = vld [vmem:[%s3644_s12 + $0x1208] sm:$0xff]  ;;  %v894_v58 = vld [vmem:[%s3644_s12 + $0x1280] sm:$0xff] }
 0x143   : > { %3432 = vmatpush3.msra.mxu1 %v848_v59  ;;  %3398 = vmatprep.subr.mxu0 %v831_v61  ;;  %v1115_v59 = vcombine.high %v1107_v50, %v1107_v50  ;;  %v910_v61 = vld [vmem:[%s3644_s12 + $0x1300] sm:$0xff]  ;;  %v1116_v53 = vcombine.high %v1114_v55, %v1114_v55 }
 0x144   : > { %3433 = vmatprep.subr.mxu1 %v863_v62  ;;  %3399 = vmatpush3.msra.mxu0 %v815_v63  ;;  %v936_v62 = vld [vmem:[%s3644_s12 + $0x13d0] sm:$0xff]  ;;  %v935_v63 = vld [vmem:[%s3644_s12 + $0x13c8] sm:$0xff] }
 0x145   : > { %3434 = vmatpush3.msra.mxu1 %v847_v0  ;;  %3400 = vmatprep.subr.mxu0 %v830_v1  ;;  %v934_v0 = vld [vmem:[%s3644_s12 + $0x13c0] sm:$0xff]  ;;  %v933_v1 = vld [vmem:[%s3644_s12 + $0x13b8] sm:$0xff] }
 0x146   : > { %3435 = vmatprep.subr.mxu1 %v862_v2  ;;  %3401 = vmatpush3.msra.mxu0 %v814_v4  ;;  %v932_v2 = vld [vmem:[%s3644_s12 + $0x13b0] sm:$0xff]  ;;  %v930_v4 = vld [vmem:[%s3644_s12 + $0x13a0] sm:$0xff] }
 0x147   : > { %2343 = vmatprep.mubr.f32.mxu0 %v1098_v3  ;;  %3436 = vmatpush3.msra.mxu1 %v846_v6  ;;  %v931_v3 = vld [vmem:[%s3644_s12 + $0x13a8] sm:$0xff]  ;;  %v928_v6 = vld [vmem:[%s3644_s12 + $0x1390] sm:$0xff] }
 0x148   : > { %2413 = vmatprep.mubr.f32.mxu1 %v1099_v5  ;;  %2344 = vmatmul.mubr.f32.vlgmr.msra.gmra.mxu0 %v1090_v57  ;;  %v911_v57 = vld [vmem:[%s3644_s12 + $0x1308] sm:$0xff]  ;;  %v929_v5 = vld [vmem:[%s3644_s12 + $0x1398] sm:$0xff] }
 0x149   : > { %2414 = vmatmul.mubr.f32.vlgmr.msra.gmra.mxu1 %v1097_v60  ;;  %3440 = vmatprep.subr.mxu0 %v909_v7  ;;  %v878_v60 = vld [vmem:[%s3644_s12 + $0x1200] sm:$0xff]  ;;  %v927_v7 = vld [vmem:[%s3644_s12 + $0x1388] sm:$0xff] }
 0x14a   : > { %2489 = vmatprep.subr.mxu1 %v3578_v11  ;;  %3441 = vmatpush3.msra.mxu0 %v893_v8  ;;  %v926_v8 = vld [vmem:[%s3644_s12 + $0x1380] sm:$0xff] }
 0x14b   : > { %2490 = vmatpush1.msra.mxu1 %v925_v9  ;;  %3442 = vmatprep.subr.mxu0 %v908_v10  ;;  %v2842_v9 = vpop.f32.mrf.mxu0  ;;  %v2877_v10 = vpop.f32.mrf.mxu1 }
 0x14c   : > { %2491 = vmatprep.subr.mxu1 %v3578_v11  ;;  %3443 = vmatpush3.msra.mxu0 %v892_v12 }
 0x14d   : > { %2492 = vmatpush1.msra.mxu1 %v924_v13  ;;  %3444 = vmatprep.subr.mxu0 %v907_v14  ;;  %v2843_v12 = vpop.f32.mrf.mxu0  ;;  %v2878_v14 = vpop.f32.mrf.mxu1 }
 0x14e   : > { %2493 = vmatprep.subr.mxu1 %v3578_v11  ;;  %3445 = vmatpush3.msra.mxu0 %v891_v15 }
 0x14f   : > { %2494 = vmatpush1.msra.mxu1 %v923_v16  ;;  %3446 = vmatprep.subr.mxu0 %v906_v17  ;;  %v2912_v13 = vpop.f32.mrf.mxu0  ;;  %v2844_v16 = vadd.f32 %v2843_v12, %v2842_v9  ;;  %v2879_v17 = vadd.f32 %v2878_v14, %v2877_v10 }
 0x150   : > { %2495 = vmatprep.subr.mxu1 %v3578_v11  ;;  %3447 = vmatpush3.msra.mxu0 %v890_v18  ;;  %v2947_v18 = vpop.f32.mrf.mxu1 }
 0x151   : > { %2496 = vmatpush1.msra.mxu1 %v922_v19  ;;  %3448 = vmatprep.subr.mxu0 %v905_v20  ;;  %v2913_v15 = vpop.f32.mrf.mxu0 }
 0x152   : > { %2497 = vmatprep.subr.mxu1 %v3578_v11  ;;  %3449 = vmatpush3.msra.mxu0 %v889_v21  ;;  %v2914_v20 = vadd.f32 %v2913_v15, %v2912_v13  ;;  %v1296_v21 = vadd.f32 %v2879_v17, %v2844_v16 }
 0x153   : > { %2498 = vmatpush1.msra.mxu1 %v921_v22  ;;  %3450 = vmatprep.subr.mxu0 %v904_v23  ;;  %v2982_v19 = vpop.f32.mrf.mxu0  ;;  %v2948_v22 = vpop.f32.mrf.mxu1 }
 0x154   : > { %2499 = vmatprep.subr.mxu1 %v3578_v11  ;;  %3451 = vmatpush3.msra.mxu0 %v888_v24  ;;  %v1366_v24 = vadd.f32 %v2914_v20, %v1296_v21  ;;  %v291_v21 = vld [vmem:[#allocation2] sm:$0x3] }
 0x155   : > { %2500 = vmatpush1.msra.mxu1 %v920_v25  ;;  %3452 = vmatprep.subr.mxu0 %v903_v26  ;;  %v2983_v23 = vpop.f32.mrf.mxu0  ;;  %v3017_v25 = vpop.f32.mrf.mxu1 }
 0x156   : > { %2501 = vmatprep.subr.mxu1 %v3578_v11  ;;  %3453 = vmatpush3.msra.mxu0 %v887_v27  ;;  %v2984_v27 = vadd.f32 %v2983_v23, %v2982_v19 }
 0x157   : > { %2502 = vmatpush1.msra.mxu1 %v919_v28  ;;  %3454 = vmatprep.subr.mxu0 %v902_v29  ;;  %v3018_v29 = vpop.f32.mrf.mxu1 }
 0x158   : > { %2503 = vmatprep.subr.mxu1 %v3578_v11  ;;  %3455 = vmatpush3.msra.mxu0 %v886_v30 }
 0x159   : > { %2504 = vmatpush1.msra.mxu1 %v918_v31  ;;  %3456 = vmatprep.subr.mxu0 %v901_v32 }
 0x15a   : > { %2505 = vmatprep.subr.mxu1 %v3578_v11  ;;  %3457 = vmatpush3.msra.mxu0 %v885_v33 }
 0x15b   : > { %2506 = vmatpush1.msra.mxu1 %v917_v34  ;;  %3458 = vmatprep.subr.mxu0 %v900_v35  ;;  %v3019_v34 = vadd.f32 %v3018_v29, %v3017_v25 }
 0x15c   : > { %2507 = vmatprep.subr.mxu1 %v3578_v11  ;;  %3459 = vmatpush3.msra.mxu0 %v884_v36 }
 0x15d   : > { %2508 = vmatpush1.msra.mxu1 %v916_v37  ;;  %3460 = vmatprep.subr.mxu0 %v899_v38 }
 0x15e   : > { %2509 = vmatprep.subr.mxu1 %v3578_v11  ;;  %3461 = vmatpush3.msra.mxu0 %v883_v39  ;;  %v3052_v26 = vpop.f32.mrf.mxu0 }
 0x15f   : > { %2510 = vmatpush1.msra.mxu1 %v915_v40  ;;  %3462 = vmatprep.subr.mxu0 %v898_v41  ;;  %v3087_v32 = vpop.f32.mrf.mxu1 }
 0x160   : > { %2511 = vmatprep.subr.mxu1 %v3578_v11  ;;  %3463 = vmatpush3.msra.mxu0 %v882_v42  ;;  %v3053_v30 = vpop.f32.mrf.mxu0 }
 0x161   : > { %2512 = vmatpush1.msra.mxu1 %v914_v43  ;;  %3464 = vmatprep.subr.mxu0 %v897_v45  ;;  %v3054_v35 = vadd.f32 %v3053_v30, %v3052_v26  ;;  %v3088_v37 = vpop.f32.mrf.mxu1 }
 0x162   : > { %2513 = vmatprep.subr.mxu1 %v3578_v11  ;;  %3465 = vmatpush3.msra.mxu0 %v881_v47  ;;  %v3089_v42 = vadd.f32 %v3088_v37, %v3087_v32 }
 0x163   : > { %2514 = vmatpush1.msra.mxu1 %v913_v48  ;;  %3466 = vmatprep.subr.mxu0 %v896_v49 }
 0x164   : > { %2515 = vmatprep.subr.mxu1 %v3578_v11  ;;  %3467 = vmatpush3.msra.mxu0 %v880_v51 }
 0x165   : > { %2516 = vmatpush1.msra.mxu1 %v912_v52  ;;  %3468 = vmatprep.subr.mxu0 %v895_v54 }
 0x166   : > { %2517 = vmatprep.subr.mxu1 %v3578_v11  ;;  %3469 = vmatpush3.msra.mxu0 %v879_v56 }
 0x167   : > { %2518 = vmatpush1.msra.mxu1 %v911_v57  ;;  %3470 = vmatprep.subr.mxu0 %v894_v58 }
 0x168   : > { %2519 = vmatprep.subr.mxu1 %v3578_v11  ;;  %3471 = vmatpush3.msra.mxu0 %v878_v60 }
 0x169   : > { %2483 = vmatprep.mubr.f32.mxu0 %v1115_v59  ;;  %2520 = vmatpush1.msra.mxu1 %v910_v61 }
 0x16a   : > { %2484 = vmatmul.mubr.f32.vlgmr.msra.gmra.mxu0 %v1107_v50  ;;  %2531 = vmatprep.subr.mxu1 %v3578_v11 }
 0x16b   : > { %2802 = vmatprep.mubr.msk.f32.mxu1 %vm1156_vm0, %v1116_v53  ;;  %2532 = vmatpush2.msra.mxu1 %v936_v62 }
 0x16c   : > { %2533 = vmatprep.subr.mxu1 %v3578_v11 }
 0x16d   : > { %2534 = vmatpush2.msra.mxu1 %v935_v63 }
 0x16e   : > { %2535 = vmatprep.subr.mxu1 %v3578_v11 }
 0x16f   : > { %2536 = vmatpush2.msra.mxu1 %v934_v0 }
 0x170   : > { %2537 = vmatprep.subr.mxu1 %v3578_v11 }
 0x171   : > { %2538 = vmatpush2.msra.mxu1 %v933_v1 }
 0x172   : > { %2539 = vmatprep.subr.mxu1 %v3578_v11 }
 0x173   : > { %2540 = vmatpush2.msra.mxu1 %v932_v2 }
 0x174   : > { %2541 = vmatprep.subr.mxu1 %v3578_v11 }
 0x175   : > { %2542 = vmatpush2.msra.mxu1 %v931_v3 }
 0x176   : > { %2543 = vmatprep.subr.mxu1 %v3578_v11 }
 0x177   : > { %2544 = vmatpush2.msra.mxu1 %v930_v4 }
 0x178   : > { %2545 = vmatprep.subr.mxu1 %v3578_v11 }
 0x179   : > { %2546 = vmatpush2.msra.mxu1 %v929_v5 }
 0x17a   : > { %2547 = vmatprep.subr.mxu1 %v3578_v11 }
 0x17b   : > { %2548 = vmatpush2.msra.mxu1 %v928_v6 }
 0x17c   : > { %2549 = vmatprep.subr.mxu1 %v3578_v11 }
 0x17d   : > { %2550 = vmatpush2.msra.mxu1 %v927_v7 }
 0x17e   : > { %2551 = vmatprep.subr.mxu1 %v3578_v11  ;;  %v2949_v11 = vadd.f32 %v2948_v22, %v2947_v18 }
 0x17f   : > { %2552 = vmatpush2.msra.mxu1 %v926_v8 }
 0x180   : > { %2554 = vmatmul.mubr.f32.vlgmr.msra.gmra.mxu1 %v1114_v55  ;;  %v1436_v28 = vadd.f32 %v2949_v11, %v1366_v24  ;;  %v3122_v33 = vpop.f32.mrf.mxu0 }
 0x181   : > { %v3157_v40 = vpop.f32.mrf.mxu1 }
 0x182   : > { %v1506_v31 = vadd.f32 %v2984_v27, %v1436_v28  ;;  %v3123_v38 = vpop.f32.mrf.mxu0 }
 0x183   : > { %v3124_v43 = vadd.f32 %v3123_v38, %v3122_v33  ;;  %v3158_v45 = vpop.f32.mrf.mxu1 }
 0x184   : > { %v1576_v36 = vadd.f32 %v3019_v34, %v1506_v31  ;;  %v3159_v50 = vadd.f32 %v3158_v45, %v3157_v40 }
 0x186   : > { %v1646_v39 = vadd.f32 %v3054_v35, %v1576_v36 }
 0x188   : > { %v1716_v44 = vadd.f32 %v3089_v42, %v1646_v39 }
 0x18a   : > { %v1786_v47 = vadd.f32 %v3124_v43, %v1716_v44 }
 0x18c   : > { %v1856_v52 = vadd.f32 %v3159_v50, %v1786_v47 }
 0x1a2   : > { %v3192_v41 = vpop.f32.mrf.mxu0 }
 0x1a3   : > { %v3227_v48 = vpop.f32.mrf.mxu1 }
 0x1a4   : > { %v3193_v46 = vpop.f32.mrf.mxu0 }
 0x1a5   : > { %v3194_v51 = vadd.f32 %v3193_v46, %v3192_v41  ;;  %v3228_v54 = vpop.f32.mrf.mxu1 }
 0x1a6   : > { %v3229_v59 = vadd.f32 %v3228_v54, %v3227_v48 }
 0x1a7   : > { %v1926_v56 = vadd.f32 %v3194_v51, %v1856_v52 }
 0x1a9   : > { %v1996_v61 = vadd.f32 %v3229_v59, %v1926_v56 }
 0x1c4   : > { %v3262_v49 = vpop.f32.mrf.mxu0 }
 0x1c5   : > { %v3297_v57 = vpop.f32.mrf.mxu1 }
 0x1c6   : > { %v3263_v55 = vpop.f32.mrf.mxu0 }
 0x1c7   : > { %v3264_v60 = vadd.f32 %v3263_v55, %v3262_v49  ;;  %v3298_v53 = vpop.f32.mrf.mxu1 }
 0x1c8   : > { %v3299_v2 = vadd.f32 %v3298_v53, %v3297_v57 }
 0x1c9   : > { %v2066_v63 = vadd.f32 %v3264_v60, %v1996_v61 }
 0x1cb   : > { %v2136_v4 = vadd.f32 %v3299_v2, %v2066_v63 }
 0x1e6   : > { %v3332_v58 = vpop.f32.mrf.mxu0 }
 0x1e7   : > { %v3367_v0 = vpop.f32.mrf.mxu1 }
 0x1e8   : > { %v3333_v62 = vpop.f32.mrf.mxu0 }
 0x1e9   : > { %v3334_v3 = vadd.f32 %v3333_v62, %v3332_v58  ;;  %v3368_v5 = vpop.f32.mrf.mxu1 }
 0x1ea   : > { %v3369_v10 = vadd.f32 %v3368_v5, %v3367_v0 }
 0x1eb   : > { %v2206_v7 = vadd.f32 %v3334_v3, %v2136_v4 }
 0x1ed   : > { %v2276_v13 = vadd.f32 %v3369_v10, %v2206_v7 }
 0x208   : > { %v3402_v1 = vpop.f32.mrf.mxu0 }
 0x209   : > { %v3437_v8 = vpop.f32.mrf.mxu1 }
 0x20a   : > { %v3403_v6 = vpop.f32.mrf.mxu0 }
 0x20b   : > { %v3404_v12 = vadd.f32 %v3403_v6, %v3402_v1  ;;  %v3438_v14 = vpop.f32.mrf.mxu1 }
 0x20c   : > { %v3439_v17 = vadd.f32 %v3438_v14, %v3437_v8 }
 0x20d   : > { %v2346_v16 = vadd.f32 %v3404_v12, %v2276_v13 }
 0x20f   : > { %v2416_v19 = vadd.f32 %v3439_v17, %v2346_v16 }
 0x22a   : > { %v3472_v9 = vpop.f32.mrf.mxu0 }
 0x22c   : > { %v3473_v15 = vpop.f32.mrf.mxu0 }
 0x22d   : > { %v3474_v18 = vadd.f32 %v3473_v15, %v3472_v9 }
 0x22f   : > { %v2486_v20 = vadd.f32 %v3474_v18, %v2416_v19 }
 0x240   : > { %v2555_v22 = vpop.f32.mrf.mxu1 }
 0x241   : > { %v2556_v23 = vadd.f32 %v2555_v22, %v2486_v20  ;;  %2564 = sbr.rel (%p2803_p5) target bundleno = 1006 (0x3ee), region = 56 }
 0x242   : > { %v2557_v24 = vpop.f32.mrf.mxu1 }
 0x243   : > { %v2559_v25 = vadd.f32 %v2556_v23, %v291_v21 }
 0x245   : > { %2560 = vst [vmem:[#allocation2] sm:$0x3] %v2559_v25 }
 0x246   : > { %v2590_v26 = vld [vmem:[%s4439_s3 + $0x78] sm:$0xff]  ;;  %v3579_v11 = vmov 0.0   ;;  %v2589_v27 = vld [vmem:[%s4439_s3 + $0x70] sm:$0xff]  ;;  %vm3580_vm1 = vmmov 0   ;;  %v2588_v28 = vld [vmem:[%s4439_s3 + $0x68] sm:$0xff]  ;;  %vm2679_vm2 = vcmask 261120  }
 0x247   : > { %3497 = vmatprep.subr.mxu0 %v3579_v11  ;;  %3529 = vmatprep.mubr.msk.f32.mxu0 %vm3580_vm1, %v3579_v11  ;;  %v2587_v29 = vld [vmem:[%s4439_s3 + $0x60] sm:$0xff]  ;;  %v2671_v30 = vld [vmem:[%s4441_s5 + $0x18] sm:$0xff]  ;;  %v2670_v31 = vld [vmem:[%s4441_s5 + $0x10] sm:$0xff]  ;;  %vm2753_vm3 = vcmask 1024  }
 0x248   : > { %3498 = vmatpush3.msra.mxu0 %v2590_v26  ;;  %3532 = vmatprep.subr.mxu1 %v3579_v11  ;;  %v2586_v32 = vld [vmem:[%s4439_s3 + $0x58] sm:$0xff]  ;;  %v2585_v33 = vld [vmem:[%s4439_s3 + $0x50] sm:$0xff]  ;;  %v2584_v34 = vld [vmem:[%s4439_s3 + $0x48] sm:$0xff] }
 0x249   : > { %3499 = vmatprep.subr.mxu0 %v3579_v11  ;;  %3540 = vmatprep.mubr.msk.f32.mxu1 %vm3580_vm1, %v3579_v11  ;;  %v2583_v35 = vld [vmem:[%s4439_s3 + $0x40] sm:$0xff]  ;;  %v2582_v36 = vld [vmem:[%s4439_s3 + $0x38] sm:$0xff]  ;;  %v2581_v37 = vld [vmem:[%s4439_s3 + $0x30] sm:$0xff] }
 0x24a   : > { %3500 = vmatpush3.msra.mxu0 %v2589_v27  ;;  %3533 = vmatpush3.msra.mxu1 %v2671_v30  ;;  %v2580_v38 = vld [vmem:[%s4439_s3 + $0x28] sm:$0xff]  ;;  %v2579_v39 = vld [vmem:[%s4439_s3 + $0x20] sm:$0xff]  ;;  %v2578_v42 = vld [vmem:[%s4439_s3 + $0x18] sm:$0xff] }
 0x24b   : > { %3501 = vmatprep.subr.mxu0 %v3579_v11  ;;  %3534 = vmatprep.subr.mxu1 %v3579_v11  ;;  %v2804_v41 = vld [vmem:[%s4438_s2] ss:$0 sm:$0xff]  ;;  %v2577_v43 = vld [vmem:[%s4439_s3 + $0x10] sm:$0xff]  ;;  %v2576_v45 = vld [vmem:[%s4439_s3 + $0x8] sm:$0xff] }
 0x24c   : > { %3502 = vmatpush3.msra.mxu0 %v2588_v28  ;;  %3535 = vmatpush3.msra.mxu1 %v2670_v31  ;;  %v2565_v40 = vld [vmem:[#allocation2] sm:$0x3]  ;;  %v2669_v48 = vld [vmem:[%s4441_s5 + $0x8] sm:$0xff]  ;;  %v2806_v55 = vld [vmem:[#allocation3] ss:$0 sm:$0xff] }
 0x24d   : > { %3503 = vmatprep.subr.mxu0 %v3579_v11  ;;  %3536 = vmatprep.subr.mxu1 %v3579_v11  ;;  %v2573_v44 = vadd.f32 %v2804_v41, %v2565_v40  ;;  %v2575_v46 = vld [vmem:[%s4439_s3] sm:$0xff] }
 0x24e   : > { %3504 = vmatpush3.msra.mxu0 %v2587_v29  ;;  %3537 = vmatpush3.msra.mxu1 %v2669_v48  ;;  %v2668_v49 = vld [vmem:[%s4441_s5] sm:$0xff] }
 0x24f   : > { %3505 = vmatprep.subr.mxu0 %v3579_v11  ;;  %v2574_v47 = vmax.f32 %v2573_v44, 0.0  ;;  %3538 = vmatprep.subr.mxu1 %v3579_v11  ;;  %v2805_v50 = vld [vmem:[%s4440_s4] ss:$0 sm:$0xff] }
 0x250   : > { %3506 = vmatpush3.msra.mxu0 %v2586_v32  ;;  %3539 = vmatpush3.msra.mxu1 %v2668_v49 }
 0x251   : > { %3507 = vmatprep.subr.mxu0 %v3579_v11 }
 0x252   : > { %3508 = vmatpush3.msra.mxu0 %v2585_v33 }
 0x253   : > { %3509 = vmatprep.subr.mxu0 %v3579_v11 }
 0x254   : > { %3510 = vmatpush3.msra.mxu0 %v2584_v34 }
 0x255   : > { %3511 = vmatprep.subr.mxu0 %v3579_v11 }
 0x256   : > { %3512 = vmatpush3.msra.mxu0 %v2583_v35 }
 0x257   : > { %3513 = vmatprep.subr.mxu0 %v3579_v11 }
 0x258   : > { %3514 = vmatpush3.msra.mxu0 %v2582_v36 }
 0x259   : > { %3515 = vmatprep.subr.mxu0 %v3579_v11 }
 0x25a   : > { %3516 = vmatpush3.msra.mxu0 %v2581_v37 }
 0x25b   : > { %3517 = vmatprep.subr.mxu0 %v3579_v11 }
 0x25c   : > { %3518 = vmatpush3.msra.mxu0 %v2580_v38 }
 0x25d   : > { %3519 = vmatprep.subr.mxu0 %v3579_v11 }
 0x25e   : > { %3520 = vmatpush3.msra.mxu0 %v2579_v39 }
 0x25f   : > { %3521 = vmatprep.subr.mxu0 %v3579_v11 }
 0x260   : > { %3522 = vmatpush3.msra.mxu0 %v2578_v42 }
 0x261   : > { %3523 = vmatprep.subr.mxu0 %v3579_v11 }
 0x262   : > { %3524 = vmatpush3.msra.mxu0 %v2577_v43 }
 0x263   : > { %3525 = vmatprep.subr.mxu0 %v3579_v11 }
 0x264   : > { %3526 = vmatpush3.msra.mxu0 %v2576_v45 }
 0x265   : > { %3527 = vmatprep.subr.mxu0 %v3579_v11 }
 0x266   : > { %3528 = vmatpush3.msra.mxu0 %v2575_v46 }
 0x267   : > { %3530 = vmatmul.mubr.f32.vlgmr.msra.gmra.mxu0 %v2574_v47 }
 0x327   : > { %v2664_v51 = vpop.f32.mrf.mxu0 }
 0x328   : > { %v2665_v52 = vadd.f32 %v2805_v50, %v2664_v51 }
 0x329   : > { %v3531_v54 = vpop.f32.mrf.mxu0 }
 0x32a   : > { %3541 = vmatmul.mubr.msk.f32.vlgmr.msra.gmra.mxu1 %vm2679_vm2, %v2665_v52 }
 0x3ea   : > { %v2749_v56 = vpop.f32.mrf.mxu1 }
 0x3eb   : > { %v2750_v57 = vadd.f32 %v2806_v55, %v2749_v56 }
 0x3ec   : > { %v3542_v58 = vpop.f32.mrf.mxu1 }
 0x3ed   : > { %2754 = vst.msk [vmem:[%s4443_s7] sm:$0x3] %vm2753_vm3, %v2750_v57 }
 0x3ee PF: > { %s19_s26 = sadd.s32 1, %s3574_s26  }
 0x3ef   : > { %p16_p6 = scmp.ge.s32.totalorder %s19_s26, 7  }
 0x3f1   :  { %18 = sbr.rel (!%p16_p6) target bundleno = 3 (0x3), region = 85 }

</bundles_post_ra>
